<compile_context>
chip_gen: v5e
topology: v5e:2x2
jax: 0.10.0
libtpu: 0.0.40
codegen_flags: <defaults>
</compile_context>

<pallas_src>
import functools

import jax
import jax.numpy as jnp
import numpy as np
from jax.experimental import pallas as pl
from jax.experimental.pallas import tpu as pltpu

_K = 5  # conv kernel size (fixed by the module)


def _ru(x, m):
    return ((x + m - 1) // m) * m


def _pool_selector(oh, ow, row_w):
    """0/1 matrix compacting 2x2-max sources: [oh*row_w - 1 - row_w, (oh//2)*(ow//2)]."""
    ph, pw = oh // 2, ow // 2
    rows = oh * row_w - 1 - row_w
    sel = np.zeros((rows, ph * pw), np.float32)
    for a in range(ph):
        for b in range(pw):
            sel[2 * a * row_w + 2 * b, a * pw + b] = 1.0
    return jnp.asarray(sel)


# -----------------------------------------------------------------------------
# The fused kernel (one grid step == one sample)
# -----------------------------------------------------------------------------
def _cnn_embed_kernel(x_ref, w1_ref, b1_ref, s1_ref, w2_ref, b2_ref, s2_ref,
                      f1w_ref, f1b_ref, f2w_ref, f2b_ref, f3w_ref, f3b_ref,
                      out_ref, a2_ref, flat_ref, *,
                      w1_row, l1_acc, c1_out,
                      row2, l2_in, l2_acc, c2_out,
                      p1, p2, denom, embed_dim):
    n = pl.program_id(0)

    @pl.when(n == 0)
    def _init():
        out_ref[...] = jnp.zeros_like(out_ref)

    # ---------------- conv1 (+bias, ReLU): 25 shifted-tap matmuls ------------
    acc1 = jnp.zeros((c1_out, l1_acc), jnp.float32)
    for i in range(_K):
        for j in range(_K):
            t = i * _K + j
            off = i * w1_row + j
            sl = x_ref[0, :, off:off + l1_acc]            # [Cin, OH1*W1]
            acc1 = acc1 + jnp.dot(w1_ref[t], sl,
                                  preferred_element_type=jnp.float32)
    act1 = jnp.maximum(acc1 + b1_ref[...], 0.0)           # [C1out, OH1*W1]

    # ---------------- 2x2 max-pool: shifted maxima + selection matmul --------
    cmax = jnp.maximum(act1[:, :l1_acc - 1], act1[:, 1:])
    rmax = jnp.maximum(cmax[:, :l1_acc - 1 - w1_row], cmax[:, w1_row:])
    pool1 = jnp.dot(rmax, s1_ref[...],
                    preferred_element_type=jnp.float32)   # [C1out, PH1*PW1]

    # ---------------- conv2 input: zero-lane-padded copy in VMEM -------------
    a2_ref[...] = jnp.zeros((c1_out, l2_in), jnp.float32)
    a2_ref[:, :p1] = pool1

    # ---------------- conv2 (+bias, ReLU) ------------------------------------
    acc2 = jnp.zeros((c2_out, l2_acc), jnp.float32)
    for i in range(_K):
        for j in range(_K):
            t = i * _K + j
            off = i * row2 + j
            sl = a2_ref[:, off:off + l2_acc]              # [C2in, OH2*ROW2]
            acc2 = acc2 + jnp.dot(w2_ref[t], sl,
                                  preferred_element_type=jnp.float32)
    act2 = jnp.maximum(acc2 + b2_ref[...], 0.0)           # [C2out, OH2*ROW2]

    cmax2 = jnp.maximum(act2[:, :l2_acc - 1], act2[:, 1:])
    rmax2 = jnp.maximum(cmax2[:, :l2_acc - 1 - row2], cmax2[:, row2:])
    pool2 = jnp.dot(rmax2, s2_ref[...],
                    preferred_element_type=jnp.float32)   # [C2out, PH2*PW2]

    # ---------------- flatten in PyTorch (C, H, W) order ---------------------
    for c in range(c2_out):
        flat_ref[:, c * p2:(c + 1) * p2] = pool2[c:c + 1, :]
    flat = flat_ref[...]                                   # [1, C2out*PH2*PW2]

    # ---------------- fc head ------------------------------------------------
    h = jnp.dot(flat, f1w_ref[...], preferred_element_type=jnp.float32) + f1b_ref[...]
    h = jnp.maximum(h, 0.0)
    h = jnp.dot(h, f2w_ref[...], preferred_element_type=jnp.float32) + f2b_ref[...]
    h = jnp.maximum(h, 0.0)
    h = jnp.dot(h, f3w_ref[...], preferred_element_type=jnp.float32) + f3b_ref[...]

    out_ref[...] += h                                      # running sum over samples

    # ---------------- epilogue: /l, then (x - mean) / std (unbiased) ---------
    @pl.when(n == pl.num_programs(0) - 1)
    def _finalize():
        e = out_ref[...] / denom
        m = jnp.sum(e, axis=1, keepdims=True) / embed_dim
        var = jnp.sum((e - m) ** 2, axis=1, keepdims=True) / (embed_dim - 1)
        out_ref[...] = (e - m) / jnp.sqrt(var)


# -----------------------------------------------------------------------------
# Wrapper
# -----------------------------------------------------------------------------
@functools.partial(jax.jit, static_argnames=("denom", "embed_dim", "n_kernels", "hw"))
def _fused_forward(params, inp, *, denom, embed_dim, n_kernels, hw):
    n_samp, c1_in, l1_in = inp.shape
    c1_out = n_kernels
    c2_out = 2 * n_kernels

    w1_row = hw
    oh1 = hw - _K + 1                        # 28
    l1_acc = oh1 * w1_row                    # 896
    ph1 = oh1 // 2                           # 14
    p1 = ph1 * ph1                           # 196
    row2 = ph1                               # 14
    oh2 = ph1 - _K + 1                       # 10
    l2_acc = oh2 * row2                      # 140
    l2_in = _ru((_K - 1) * row2 + (_K - 1) + l2_acc, 128)   # 256
    p2 = (oh2 // 2) ** 2                     # 25
    flat_dim = c2_out * p2                   # 400
    assert flat_dim == params["fc1_w"].shape[0]

    # Parameter re-layout (constant-folded under jit).
    w1 = jnp.transpose(params["conv1_w"], (2, 3, 0, 1)).reshape(_K * _K, c1_out, c1_in)
    b1 = params["conv1_b"].reshape(c1_out, 1)
    w2 = jnp.transpose(params["conv2_w"], (2, 3, 0, 1)).reshape(_K * _K, c2_out, c1_out)
    b2 = params["conv2_b"].reshape(c2_out, 1)
    f1w, f1b = params["fc1_w"], params["fc1_b"].reshape(1, -1)
    f2w, f2b = params["fc2_w"], params["fc2_b"].reshape(1, -1)
    f3w, f3b = params["fc3_w"], params["fc3_b"].reshape(1, -1)

    s1 = _pool_selector(oh1, oh1, w1_row)    # [863, 196]
    s2 = _pool_selector(oh2, oh2, row2)      # [125,  25]

    kernel = functools.partial(
        _cnn_embed_kernel,
        w1_row=w1_row, l1_acc=l1_acc, c1_out=c1_out,
        row2=row2, l2_in=l2_in, l2_acc=l2_acc, c2_out=c2_out,
        p1=p1, p2=p2, denom=denom, embed_dim=embed_dim)

    def _full_spec(shape):
        return pl.BlockSpec(shape, lambda n, _r=len(shape): (0,) * _r)

    out = pl.pallas_call(
        kernel,
        out_shape=jax.ShapeDtypeStruct((1, embed_dim), jnp.float32),
        grid_spec=pltpu.PrefetchScalarGridSpec(
            num_scalar_prefetch=0,
            grid=(n_samp,),
            in_specs=[
                pl.BlockSpec((1, c1_in, l1_in), lambda n: (n, 0, 0)),
                _full_spec(w1.shape), _full_spec(b1.shape), _full_spec(s1.shape),
                _full_spec(w2.shape), _full_spec(b2.shape), _full_spec(s2.shape),
                _full_spec(f1w.shape), _full_spec(f1b.shape),
                _full_spec(f2w.shape), _full_spec(f2b.shape),
                _full_spec(f3w.shape), _full_spec(f3b.shape),
            ],
            out_specs=pl.BlockSpec((1, embed_dim), lambda n: (0, 0)),
            scratch_shapes=[
                pltpu.VMEM((c1_out, l2_in), jnp.float32),    # padded conv2 input
                pltpu.VMEM((1, flat_dim), jnp.float32),      # flattened features
            ],
        ),
        compiler_params=pltpu.CompilerParams(
            dimension_semantics=("arbitrary",)),             # grid carries accumulator
    )(inp, w1, b1, s1, w2, b2, s2, f1w, f1b, f2w, f2b, f3w, f3b)
    return out


def _prep_input(x_nchw, y, embed_y):
    # TODO(synk): y-channel concat + NCHW -> [N, C, H*W] (+ lane padding) stays as
    # tiny host-side jnp layout plumbing; all math runs in the fused Pallas kernel.
    n, c, h, w = x_nchw.shape
    if embed_y:
        dy = y.shape[1]
        ych = jnp.broadcast_to(y.reshape(n, dy, 1, 1).astype(x_nchw.dtype), (n, dy, h, w))
        x_nchw = jnp.concatenate([x_nchw, ych], axis=1)
    flat = x_nchw.reshape(n, x_nchw.shape[1], h * w)
    l1_acc = (h - _K + 1) * w
    l1_in = _ru(l1_acc + (_K - 1) * w + (_K - 1), 128)
    return jnp.pad(flat, ((0, 0), (0, 0), (0, l1_in - h * w))).astype(jnp.float32)


def cnn_embed_forward(params, batches, *, embed_y, embed_dim, n_kernels, hw):
    """Mirrors CNNEmbed.forward over an iterable of (x_nchw, y) batches.

    Note: the reference does `l += len(B)` where B is the (x, y) tuple, so l
    increments by 2 per batch; reproduced faithfully here.
    """
    l = 0
    prepped = []
    for (x_nchw, y) in batches:
        l += 2
        prepped.append(_prep_input(x_nchw, y, embed_y))
    inp = prepped[0] if len(prepped) == 1 else jnp.concatenate(prepped, axis=0)
    emb = _fused_forward(params, inp, denom=float(l), embed_dim=embed_dim,
                         n_kernels=n_kernels, hw=hw)
    return emb[0]


def init_params(key, in_channels, embed_y, dim_y, n_kernels, embed_dim):
    cin = in_channels + embed_y * dim_y
    ks = jax.random.split(key, 10)
    s = 0.1
    return {
        "conv1_w": s * jax.random.normal(ks[0], (n_kernels, cin, 5, 5), jnp.float32),
        "conv1_b": s * jax.random.normal(ks[1], (n_kernels,), jnp.float32),
        "conv2_w": s * jax.random.normal(ks[2], (2 * n_kernels, n_kernels, 5, 5), jnp.float32),
        "conv2_b": s * jax.random.normal(ks[3], (2 * n_kernels,), jnp.float32),
        "fc1_w": s * jax.random.normal(ks[4], (2 * n_kernels * 5 * 5, 120), jnp.float32),
        "fc1_b": s * jax.random.normal(ks[5], (120,), jnp.float32),
        "fc2_w": s * jax.random.normal(ks[6], (120, 84), jnp.float32),
        "fc2_b": s * jax.random.normal(ks[7], (84,), jnp.float32),
        "fc3_w": s * jax.random.normal(ks[8], (84, embed_dim), jnp.float32),
        "fc3_b": s * jax.random.normal(ks[9], (embed_dim,), jnp.float32),
    }


if __name__ == "__main__":
    # Module hyperparameters (spatial must be 32x32 so fc1 sees 2*n_kernels*5*5).
    embed_y, dim_y, embed_dim = 1, 4, 16
    in_channels, n_kernels = 3, 8
    batch, hw = 2, 32

    key = jax.random.PRNGKey(0)
    kp, kx, ky = jax.random.split(key, 3)
    params = init_params(kp, in_channels, embed_y, dim_y, n_kernels, embed_dim)

    # PyTorch-style NCHW input (as the DataLoader would yield).
    x = jax.random.normal(kx, (batch, in_channels, hw, hw), jnp.float32)
    y = jax.random.normal(ky, (batch, dim_y), jnp.float32)
    batches = [(x, y)]  # stands in for the torch DataLoader (single batch)

    emb = cnn_embed_forward(params, batches, embed_y=embed_y, embed_dim=embed_dim,
                            n_kernels=n_kernels, hw=hw)
    emb = jax.block_until_ready(emb)
    assert emb.shape == (embed_dim,) and emb.dtype == jnp.float32
    assert bool(jnp.all(jnp.isfinite(emb)))
    print("KERNEL_OK")
</pallas_src>

<mosaic_0001>
module attributes {stable_mosaic.version = 11 : i64} {
  func.func @_cnn_embed_kernel(%arg0: i32, %arg1: memref<1x7x1152xf32, #tpu.memory_space<vmem>>, %arg2: memref<25x8x7xf32, #tpu.memory_space<vmem>>, %arg3: memref<8x1xf32, #tpu.memory_space<vmem>>, %arg4: memref<863x196xf32, #tpu.memory_space<vmem>>, %arg5: memref<25x16x8xf32, #tpu.memory_space<vmem>>, %arg6: memref<16x1xf32, #tpu.memory_space<vmem>>, %arg7: memref<125x25xf32, #tpu.memory_space<vmem>>, %arg8: memref<400x120xf32, #tpu.memory_space<vmem>>, %arg9: memref<1x120xf32, #tpu.memory_space<vmem>>, %arg10: memref<120x84xf32, #tpu.memory_space<vmem>>, %arg11: memref<1x84xf32, #tpu.memory_space<vmem>>, %arg12: memref<84x16xf32, #tpu.memory_space<vmem>>, %arg13: memref<1x16xf32, #tpu.memory_space<vmem>>, %arg14: memref<1x16xf32, #tpu.memory_space<vmem>>, %arg15: memref<8x256xf32, #tpu.memory_space<vmem>>, %arg16: memref<1x400xf32, #tpu.memory_space<vmem>>) attributes {dimension_semantics = [#tpu.dimension_semantics<arbitrary>], iteration_bounds = array<i64: 2>, scalar_prefetch = 0 : i64, scratch_operands = 2 : i64, tpu.core_type = #tpu.core_type<tc>, window_params = [{transform_indices = @transform_0, window_bounds = array<i64: 1, 7, 1152>}, {pipeline_mode = #tpu.pipeline_mode<synchronous>, transform_indices = @transform_1, window_bounds = array<i64: 25, 8, 7>}, {pipeline_mode = #tpu.pipeline_mode<synchronous>, transform_indices = @transform_2, window_bounds = array<i64: 8, 1>}, {pipeline_mode = #tpu.pipeline_mode<synchronous>, transform_indices = @transform_3, window_bounds = array<i64: 863, 196>}, {pipeline_mode = #tpu.pipeline_mode<synchronous>, transform_indices = @transform_4, window_bounds = array<i64: 25, 16, 8>}, {pipeline_mode = #tpu.pipeline_mode<synchronous>, transform_indices = @transform_5, window_bounds = array<i64: 16, 1>}, {pipeline_mode = #tpu.pipeline_mode<synchronous>, transform_indices = @transform_6, window_bounds = array<i64: 125, 25>}, {pipeline_mode = #tpu.pipeline_mode<synchronous>, transform_indices = @transform_7, window_bounds = array<i64: 400, 120>}, {pipeline_mode = #tpu.pipeline_mode<synchronous>, transform_indices = @transform_8, window_bounds = array<i64: 1, 120>}, {pipeline_mode = #tpu.pipeline_mode<synchronous>, transform_indices = @transform_9, window_bounds = array<i64: 120, 84>}, {pipeline_mode = #tpu.pipeline_mode<synchronous>, transform_indices = @transform_10, window_bounds = array<i64: 1, 84>}, {pipeline_mode = #tpu.pipeline_mode<synchronous>, transform_indices = @transform_11, window_bounds = array<i64: 84, 16>}, {pipeline_mode = #tpu.pipeline_mode<synchronous>, transform_indices = @transform_12, window_bounds = array<i64: 1, 16>}, {pipeline_mode = #tpu.pipeline_mode<synchronous>, transform_indices = @transform_13, window_bounds = array<i64: 1, 16>}]} {
    %c0_i32 = arith.constant 0 : i32
    %0 = arith.cmpi eq, %arg0, %c0_i32 : i32
    %1 = arith.extui %0 : i1 to i32
    %c0_i32_0 = arith.constant 0 : i32
    %2 = arith.cmpi ne, %1, %c0_i32_0 : i32
    scf.if %2 {
      %cst_327 = arith.constant 0.000000e+00 : f32
      %364 = vector.broadcast %cst_327 : f32 to vector<1x16xf32>
      %c0_328 = arith.constant 0 : index
      %c0_329 = arith.constant 0 : index
      %365 = vector.load %arg14[%c0_328, %c0_329] : memref<1x16xf32, #tpu.memory_space<vmem>>, vector<1x16xf32>
      tpu.vector_store %arg14[%c0_328, %c0_329], %364 {strides = array<i32>} : memref<1x16xf32, #tpu.memory_space<vmem>>, vector<1x16xf32>,
    } else {
    }
    %cst = arith.constant 0.000000e+00 : f32
    %3 = vector.broadcast %cst : f32 to vector<8x896xf32>
    %c0 = arith.constant 0 : index
    %c0_1 = arith.constant 0 : index
    %c0_2 = arith.constant 0 : index
    %4 = vector.load %arg1[%c0, %c0_1, %c0_2] : memref<1x7x1152xf32, #tpu.memory_space<vmem>>, vector<1x7x896xf32>
    %5 = vector.shape_cast %4 : vector<1x7x896xf32> to vector<7x896xf32>
    %c0_3 = arith.constant 0 : index
    %c0_4 = arith.constant 0 : index
    %c0_5 = arith.constant 0 : index
    %6 = vector.load %arg2[%c0_3, %c0_4, %c0_5] : memref<25x8x7xf32, #tpu.memory_space<vmem>>, vector<1x8x7xf32>
    %7 = vector.shape_cast %6 : vector<1x8x7xf32> to vector<8x7xf32>
    %cst_6 = arith.constant dense<0.000000e+00> : vector<8x896xf32>
    %8 = tpu.matmul %7, %5, %cst_6 {dimension_numbers = #tpu.dot_dimension_numbers<[1], [0], [0], [1], [0, 0, 1, 1], [], []>} : vector<8x7xf32>, vector<7x896xf32>, vector<8x896xf32> -> vector<8x896xf32>
    %9 = arith.addf %3, %8 : vector<8x896xf32>
    %c0_7 = arith.constant 0 : index
    %c0_8 = arith.constant 0 : index
    %c1 = arith.constant 1 : index
    %10 = vector.load %arg1[%c0_7, %c0_8, %c1] : memref<1x7x1152xf32, #tpu.memory_space<vmem>>, vector<1x7x896xf32>
    %11 = vector.shape_cast %10 : vector<1x7x896xf32> to vector<7x896xf32>
    %c1_9 = arith.constant 1 : index
    %c0_10 = arith.constant 0 : index
    %c0_11 = arith.constant 0 : index
    %12 = vector.load %arg2[%c1_9, %c0_10, %c0_11] : memref<25x8x7xf32, #tpu.memory_space<vmem>>, vector<1x8x7xf32>
    %13 = vector.shape_cast %12 : vector<1x8x7xf32> to vector<8x7xf32>
    %cst_12 = arith.constant dense<0.000000e+00> : vector<8x896xf32>
    %14 = tpu.matmul %13, %11, %cst_12 {dimension_numbers = #tpu.dot_dimension_numbers<[1], [0], [0], [1], [0, 0, 1, 1], [], []>} : vector<8x7xf32>, vector<7x896xf32>, vector<8x896xf32> -> vector<8x896xf32>
    %15 = arith.addf %9, %14 : vector<8x896xf32>
    %c0_13 = arith.constant 0 : index
    %c0_14 = arith.constant 0 : index
    %c2 = arith.constant 2 : index
    %16 = vector.load %arg1[%c0_13, %c0_14, %c2] : memref<1x7x1152xf32, #tpu.memory_space<vmem>>, vector<1x7x896xf32>
    %17 = vector.shape_cast %16 : vector<1x7x896xf32> to vector<7x896xf32>
    %c2_15 = arith.constant 2 : index
    %c0_16 = arith.constant 0 : index
    %c0_17 = arith.constant 0 : index
    %18 = vector.load %arg2[%c2_15, %c0_16, %c0_17] : memref<25x8x7xf32, #tpu.memory_space<vmem>>, vector<1x8x7xf32>
    %19 = vector.shape_cast %18 : vector<1x8x7xf32> to vector<8x7xf32>
    %cst_18 = arith.constant dense<0.000000e+00> : vector<8x896xf32>
    %20 = tpu.matmul %19, %17, %cst_18 {dimension_numbers = #tpu.dot_dimension_numbers<[1], [0], [0], [1], [0, 0, 1, 1], [], []>} : vector<8x7xf32>, vector<7x896xf32>, vector<8x896xf32> -> vector<8x896xf32>
    %21 = arith.addf %15, %20 : vector<8x896xf32>
    %c0_19 = arith.constant 0 : index
    %c0_20 = arith.constant 0 : index
    %c3 = arith.constant 3 : index
    %22 = vector.load %arg1[%c0_19, %c0_20, %c3] : memref<1x7x1152xf32, #tpu.memory_space<vmem>>, vector<1x7x896xf32>
    %23 = vector.shape_cast %22 : vector<1x7x896xf32> to vector<7x896xf32>
    %c3_21 = arith.constant 3 : index
    %c0_22 = arith.constant 0 : index
    %c0_23 = arith.constant 0 : index
    %24 = vector.load %arg2[%c3_21, %c0_22, %c0_23] : memref<25x8x7xf32, #tpu.memory_space<vmem>>, vector<1x8x7xf32>
    %25 = vector.shape_cast %24 : vector<1x8x7xf32> to vector<8x7xf32>
    %cst_24 = arith.constant dense<0.000000e+00> : vector<8x896xf32>
    %26 = tpu.matmul %25, %23, %cst_24 {dimension_numbers = #tpu.dot_dimension_numbers<[1], [0], [0], [1], [0, 0, 1, 1], [], []>} : vector<8x7xf32>, vector<7x896xf32>, vector<8x896xf32> -> vector<8x896xf32>
    %27 = arith.addf %21, %26 : vector<8x896xf32>
    %c0_25 = arith.constant 0 : index
    %c0_26 = arith.constant 0 : index
    %c4 = arith.constant 4 : index
    %28 = vector.load %arg1[%c0_25, %c0_26, %c4] : memref<1x7x1152xf32, #tpu.memory_space<vmem>>, vector<1x7x896xf32>
    %29 = vector.shape_cast %28 : vector<1x7x896xf32> to vector<7x896xf32>
    %c4_27 = arith.constant 4 : index
    %c0_28 = arith.constant 0 : index
    %c0_29 = arith.constant 0 : index
    %30 = vector.load %arg2[%c4_27, %c0_28, %c0_29] : memref<25x8x7xf32, #tpu.memory_space<vmem>>, vector<1x8x7xf32>
    %31 = vector.shape_cast %30 : vector<1x8x7xf32> to vector<8x7xf32>
    %cst_30 = arith.constant dense<0.000000e+00> : vector<8x896xf32>
    %32 = tpu.matmul %31, %29, %cst_30 {dimension_numbers = #tpu.dot_dimension_numbers<[1], [0], [0], [1], [0, 0, 1, 1], [], []>} : vector<8x7xf32>, vector<7x896xf32>, vector<8x896xf32> -> vector<8x896xf32>
    %33 = arith.addf %27, %32 : vector<8x896xf32>
    %c0_31 = arith.constant 0 : index
    %c0_32 = arith.constant 0 : index
    %c32 = arith.constant 32 : index
    %34 = vector.load %arg1[%c0_31, %c0_32, %c32] : memref<1x7x1152xf32, #tpu.memory_space<vmem>>, vector<1x7x896xf32>
    %35 = vector.shape_cast %34 : vector<1x7x896xf32> to vector<7x896xf32>
    %c5 = arith.constant 5 : index
    %c0_33 = arith.constant 0 : index
    %c0_34 = arith.constant 0 : index
    %36 = vector.load %arg2[%c5, %c0_33, %c0_34] : memref<25x8x7xf32, #tpu.memory_space<vmem>>, vector<1x8x7xf32>
    %37 = vector.shape_cast %36 : vector<1x8x7xf32> to vector<8x7xf32>
    %cst_35 = arith.constant dense<0.000000e+00> : vector<8x896xf32>
    %38 = tpu.matmul %37, %35, %cst_35 {dimension_numbers = #tpu.dot_dimension_numbers<[1], [0], [0], [1], [0, 0, 1, 1], [], []>} : vector<8x7xf32>, vector<7x896xf32>, vector<8x896xf32> -> vector<8x896xf32>
    %39 = arith.addf %33, %38 : vector<8x896xf32>
    %c0_36 = arith.constant 0 : index
    %c0_37 = arith.constant 0 : index
    %c33 = arith.constant 33 : index
    %40 = vector.load %arg1[%c0_36, %c0_37, %c33] : memref<1x7x1152xf32, #tpu.memory_space<vmem>>, vector<1x7x896xf32>
    %41 = vector.shape_cast %40 : vector<1x7x896xf32> to vector<7x896xf32>
    %c6 = arith.constant 6 : index
    %c0_38 = arith.constant 0 : index
    %c0_39 = arith.constant 0 : index
    %42 = vector.load %arg2[%c6, %c0_38, %c0_39] : memref<25x8x7xf32, #tpu.memory_space<vmem>>, vector<1x8x7xf32>
    %43 = vector.shape_cast %42 : vector<1x8x7xf32> to vector<8x7xf32>
    %cst_40 = arith.constant dense<0.000000e+00> : vector<8x896xf32>
    %44 = tpu.matmul %43, %41, %cst_40 {dimension_numbers = #tpu.dot_dimension_numbers<[1], [0], [0], [1], [0, 0, 1, 1], [], []>} : vector<8x7xf32>, vector<7x896xf32>, vector<8x896xf32> -> vector<8x896xf32>
    %45 = arith.addf %39, %44 : vector<8x896xf32>
    %c0_41 = arith.constant 0 : index
    %c0_42 = arith.constant 0 : index
    %c34 = arith.constant 34 : index
    %46 = vector.load %arg1[%c0_41, %c0_42, %c34] : memref<1x7x1152xf32, #tpu.memory_space<vmem>>, vector<1x7x896xf32>
    %47 = vector.shape_cast %46 : vector<1x7x896xf32> to vector<7x896xf32>
    %c7 = arith.constant 7 : index
    %c0_43 = arith.constant 0 : index
    %c0_44 = arith.constant 0 : index
    %48 = vector.load %arg2[%c7, %c0_43, %c0_44] : memref<25x8x7xf32, #tpu.memory_space<vmem>>, vector<1x8x7xf32>
    %49 = vector.shape_cast %48 : vector<1x8x7xf32> to vector<8x7xf32>
    %cst_45 = arith.constant dense<0.000000e+00> : vector<8x896xf32>
    %50 = tpu.matmul %49, %47, %cst_45 {dimension_numbers = #tpu.dot_dimension_numbers<[1], [0], [0], [1], [0, 0, 1, 1], [], []>} : vector<8x7xf32>, vector<7x896xf32>, vector<8x896xf32> -> vector<8x896xf32>
    %51 = arith.addf %45, %50 : vector<8x896xf32>
    %c0_46 = arith.constant 0 : index
    %c0_47 = arith.constant 0 : index
    %c35 = arith.constant 35 : index
    %52 = vector.load %arg1[%c0_46, %c0_47, %c35] : memref<1x7x1152xf32, #tpu.memory_space<vmem>>, vector<1x7x896xf32>
    %53 = vector.shape_cast %52 : vector<1x7x896xf32> to vector<7x896xf32>
    %c8 = arith.constant 8 : index
    %c0_48 = arith.constant 0 : index
    %c0_49 = arith.constant 0 : index
    %54 = vector.load %arg2[%c8, %c0_48, %c0_49] : memref<25x8x7xf32, #tpu.memory_space<vmem>>, vector<1x8x7xf32>
    %55 = vector.shape_cast %54 : vector<1x8x7xf32> to vector<8x7xf32>
    %cst_50 = arith.constant dense<0.000000e+00> : vector<8x896xf32>
    %56 = tpu.matmul %55, %53, %cst_50 {dimension_numbers = #tpu.dot_dimension_numbers<[1], [0], [0], [1], [0, 0, 1, 1], [], []>} : vector<8x7xf32>, vector<7x896xf32>, vector<8x896xf32> -> vector<8x896xf32>
    %57 = arith.addf %51, %56 : vector<8x896xf32>
    %c0_51 = arith.constant 0 : index
    %c0_52 = arith.constant 0 : index
    %c36 = arith.constant 36 : index
    %58 = vector.load %arg1[%c0_51, %c0_52, %c36] : memref<1x7x1152xf32, #tpu.memory_space<vmem>>, vector<1x7x896xf32>
    %59 = vector.shape_cast %58 : vector<1x7x896xf32> to vector<7x896xf32>
    %c9 = arith.constant 9 : index
    %c0_53 = arith.constant 0 : index
    %c0_54 = arith.constant 0 : index
    %60 = vector.load %arg2[%c9, %c0_53, %c0_54] : memref<25x8x7xf32, #tpu.memory_space<vmem>>, vector<1x8x7xf32>
    %61 = vector.shape_cast %60 : vector<1x8x7xf32> to vector<8x7xf32>
    %cst_55 = arith.constant dense<0.000000e+00> : vector<8x896xf32>
    %62 = tpu.matmul %61, %59, %cst_55 {dimension_numbers = #tpu.dot_dimension_numbers<[1], [0], [0], [1], [0, 0, 1, 1], [], []>} : vector<8x7xf32>, vector<7x896xf32>, vector<8x896xf32> -> vector<8x896xf32>
    %63 = arith.addf %57, %62 : vector<8x896xf32>
    %c0_56 = arith.constant 0 : index
    %c0_57 = arith.constant 0 : index
    %c64 = arith.constant 64 : index
    %64 = vector.load %arg1[%c0_56, %c0_57, %c64] : memref<1x7x1152xf32, #tpu.memory_space<vmem>>, vector<1x7x896xf32>
    %65 = vector.shape_cast %64 : vector<1x7x896xf32> to vector<7x896xf32>
    %c10 = arith.constant 10 : index
    %c0_58 = arith.constant 0 : index
    %c0_59 = arith.constant 0 : index
    %66 = vector.load %arg2[%c10, %c0_58, %c0_59] : memref<25x8x7xf32, #tpu.memory_space<vmem>>, vector<1x8x7xf32>
    %67 = vector.shape_cast %66 : vector<1x8x7xf32> to vector<8x7xf32>
    %cst_60 = arith.constant dense<0.000000e+00> : vector<8x896xf32>
    %68 = tpu.matmul %67, %65, %cst_60 {dimension_numbers = #tpu.dot_dimension_numbers<[1], [0], [0], [1], [0, 0, 1, 1], [], []>} : vector<8x7xf32>, vector<7x896xf32>, vector<8x896xf32> -> vector<8x896xf32>
    %69 = arith.addf %63, %68 : vector<8x896xf32>
    %c0_61 = arith.constant 0 : index
    %c0_62 = arith.constant 0 : index
    %c65 = arith.constant 65 : index
    %70 = vector.load %arg1[%c0_61, %c0_62, %c65] : memref<1x7x1152xf32, #tpu.memory_space<vmem>>, vector<1x7x896xf32>
    %71 = vector.shape_cast %70 : vector<1x7x896xf32> to vector<7x896xf32>
    %c11 = arith.constant 11 : index
    %c0_63 = arith.constant 0 : index
    %c0_64 = arith.constant 0 : index
    %72 = vector.load %arg2[%c11, %c0_63, %c0_64] : memref<25x8x7xf32, #tpu.memory_space<vmem>>, vector<1x8x7xf32>
    %73 = vector.shape_cast %72 : vector<1x8x7xf32> to vector<8x7xf32>
    %cst_65 = arith.constant dense<0.000000e+00> : vector<8x896xf32>
    %74 = tpu.matmul %73, %71, %cst_65 {dimension_numbers = #tpu.dot_dimension_numbers<[1], [0], [0], [1], [0, 0, 1, 1], [], []>} : vector<8x7xf32>, vector<7x896xf32>, vector<8x896xf32> -> vector<8x896xf32>
    %75 = arith.addf %69, %74 : vector<8x896xf32>
    %c0_66 = arith.constant 0 : index
    %c0_67 = arith.constant 0 : index
    %c66 = arith.constant 66 : index
    %76 = vector.load %arg1[%c0_66, %c0_67, %c66] : memref<1x7x1152xf32, #tpu.memory_space<vmem>>, vector<1x7x896xf32>
    %77 = vector.shape_cast %76 : vector<1x7x896xf32> to vector<7x896xf32>
    %c12 = arith.constant 12 : index
    %c0_68 = arith.constant 0 : index
    %c0_69 = arith.constant 0 : index
    %78 = vector.load %arg2[%c12, %c0_68, %c0_69] : memref<25x8x7xf32, #tpu.memory_space<vmem>>, vector<1x8x7xf32>
    %79 = vector.shape_cast %78 : vector<1x8x7xf32> to vector<8x7xf32>
    %cst_70 = arith.constant dense<0.000000e+00> : vector<8x896xf32>
    %80 = tpu.matmul %79, %77, %cst_70 {dimension_numbers = #tpu.dot_dimension_numbers<[1], [0], [0], [1], [0, 0, 1, 1], [], []>} : vector<8x7xf32>, vector<7x896xf32>, vector<8x896xf32> -> vector<8x896xf32>
    %81 = arith.addf %75, %80 : vector<8x896xf32>
    %c0_71 = arith.constant 0 : index
    %c0_72 = arith.constant 0 : index
    %c67 = arith.constant 67 : index
    %82 = vector.load %arg1[%c0_71, %c0_72, %c67] : memref<1x7x1152xf32, #tpu.memory_space<vmem>>, vector<1x7x896xf32>
    %83 = vector.shape_cast %82 : vector<1x7x896xf32> to vector<7x896xf32>
    %c13 = arith.constant 13 : index
    %c0_73 = arith.constant 0 : index
    %c0_74 = arith.constant 0 : index
    %84 = vector.load %arg2[%c13, %c0_73, %c0_74] : memref<25x8x7xf32, #tpu.memory_space<vmem>>, vector<1x8x7xf32>
    %85 = vector.shape_cast %84 : vector<1x8x7xf32> to vector<8x7xf32>
    %cst_75 = arith.constant dense<0.000000e+00> : vector<8x896xf32>
    %86 = tpu.matmul %85, %83, %cst_75 {dimension_numbers = #tpu.dot_dimension_numbers<[1], [0], [0], [1], [0, 0, 1, 1], [], []>} : vector<8x7xf32>, vector<7x896xf32>, vector<8x896xf32> -> vector<8x896xf32>
    %87 = arith.addf %81, %86 : vector<8x896xf32>
    %c0_76 = arith.constant 0 : index
    %c0_77 = arith.constant 0 : index
    %c68 = arith.constant 68 : index
    %88 = vector.load %arg1[%c0_76, %c0_77, %c68] : memref<1x7x1152xf32, #tpu.memory_space<vmem>>, vector<1x7x896xf32>
    %89 = vector.shape_cast %88 : vector<1x7x896xf32> to vector<7x896xf32>
    %c14 = arith.constant 14 : index
    %c0_78 = arith.constant 0 : index
    %c0_79 = arith.constant 0 : index
    %90 = vector.load %arg2[%c14, %c0_78, %c0_79] : memref<25x8x7xf32, #tpu.memory_space<vmem>>, vector<1x8x7xf32>
    %91 = vector.shape_cast %90 : vector<1x8x7xf32> to vector<8x7xf32>
    %cst_80 = arith.constant dense<0.000000e+00> : vector<8x896xf32>
    %92 = tpu.matmul %91, %89, %cst_80 {dimension_numbers = #tpu.dot_dimension_numbers<[1], [0], [0], [1], [0, 0, 1, 1], [], []>} : vector<8x7xf32>, vector<7x896xf32>, vector<8x896xf32> -> vector<8x896xf32>
    %93 = arith.addf %87, %92 : vector<8x896xf32>
    %c0_81 = arith.constant 0 : index
    %c0_82 = arith.constant 0 : index
    %c96 = arith.constant 96 : index
    %94 = vector.load %arg1[%c0_81, %c0_82, %c96] : memref<1x7x1152xf32, #tpu.memory_space<vmem>>, vector<1x7x896xf32>
    %95 = vector.shape_cast %94 : vector<1x7x896xf32> to vector<7x896xf32>
    %c15 = arith.constant 15 : index
    %c0_83 = arith.constant 0 : index
    %c0_84 = arith.constant 0 : index
    %96 = vector.load %arg2[%c15, %c0_83, %c0_84] : memref<25x8x7xf32, #tpu.memory_space<vmem>>, vector<1x8x7xf32>
    %97 = vector.shape_cast %96 : vector<1x8x7xf32> to vector<8x7xf32>
    %cst_85 = arith.constant dense<0.000000e+00> : vector<8x896xf32>
    %98 = tpu.matmul %97, %95, %cst_85 {dimension_numbers = #tpu.dot_dimension_numbers<[1], [0], [0], [1], [0, 0, 1, 1], [], []>} : vector<8x7xf32>, vector<7x896xf32>, vector<8x896xf32> -> vector<8x896xf32>
    %99 = arith.addf %93, %98 : vector<8x896xf32>
    %c0_86 = arith.constant 0 : index
    %c0_87 = arith.constant 0 : index
    %c97 = arith.constant 97 : index
    %100 = vector.load %arg1[%c0_86, %c0_87, %c97] : memref<1x7x1152xf32, #tpu.memory_space<vmem>>, vector<1x7x896xf32>
    %101 = vector.shape_cast %100 : vector<1x7x896xf32> to vector<7x896xf32>
    %c16 = arith.constant 16 : index
    %c0_88 = arith.constant 0 : index
    %c0_89 = arith.constant 0 : index
    %102 = vector.load %arg2[%c16, %c0_88, %c0_89] : memref<25x8x7xf32, #tpu.memory_space<vmem>>, vector<1x8x7xf32>
    %103 = vector.shape_cast %102 : vector<1x8x7xf32> to vector<8x7xf32>
    %cst_90 = arith.constant dense<0.000000e+00> : vector<8x896xf32>
    %104 = tpu.matmul %103, %101, %cst_90 {dimension_numbers = #tpu.dot_dimension_numbers<[1], [0], [0], [1], [0, 0, 1, 1], [], []>} : vector<8x7xf32>, vector<7x896xf32>, vector<8x896xf32> -> vector<8x896xf32>
    %105 = arith.addf %99, %104 : vector<8x896xf32>
    %c0_91 = arith.constant 0 : index
    %c0_92 = arith.constant 0 : index
    %c98 = arith.constant 98 : index
    %106 = vector.load %arg1[%c0_91, %c0_92, %c98] : memref<1x7x1152xf32, #tpu.memory_space<vmem>>, vector<1x7x896xf32>
    %107 = vector.shape_cast %106 : vector<1x7x896xf32> to vector<7x896xf32>
    %c17 = arith.constant 17 : index
    %c0_93 = arith.constant 0 : index
    %c0_94 = arith.constant 0 : index
    %108 = vector.load %arg2[%c17, %c0_93, %c0_94] : memref<25x8x7xf32, #tpu.memory_space<vmem>>, vector<1x8x7xf32>
    %109 = vector.shape_cast %108 : vector<1x8x7xf32> to vector<8x7xf32>
    %cst_95 = arith.constant dense<0.000000e+00> : vector<8x896xf32>
    %110 = tpu.matmul %109, %107, %cst_95 {dimension_numbers = #tpu.dot_dimension_numbers<[1], [0], [0], [1], [0, 0, 1, 1], [], []>} : vector<8x7xf32>, vector<7x896xf32>, vector<8x896xf32> -> vector<8x896xf32>
    %111 = arith.addf %105, %110 : vector<8x896xf32>
    %c0_96 = arith.constant 0 : index
    %c0_97 = arith.constant 0 : index
    %c99 = arith.constant 99 : index
    %112 = vector.load %arg1[%c0_96, %c0_97, %c99] : memref<1x7x1152xf32, #tpu.memory_space<vmem>>, vector<1x7x896xf32>
    %113 = vector.shape_cast %112 : vector<1x7x896xf32> to vector<7x896xf32>
    %c18 = arith.constant 18 : index
    %c0_98 = arith.constant 0 : index
    %c0_99 = arith.constant 0 : index
    %114 = vector.load %arg2[%c18, %c0_98, %c0_99] : memref<25x8x7xf32, #tpu.memory_space<vmem>>, vector<1x8x7xf32>
    %115 = vector.shape_cast %114 : vector<1x8x7xf32> to vector<8x7xf32>
    %cst_100 = arith.constant dense<0.000000e+00> : vector<8x896xf32>
    %116 = tpu.matmul %115, %113, %cst_100 {dimension_numbers = #tpu.dot_dimension_numbers<[1], [0], [0], [1], [0, 0, 1, 1], [], []>} : vector<8x7xf32>, vector<7x896xf32>, vector<8x896xf32> -> vector<8x896xf32>
    %117 = arith.addf %111, %116 : vector<8x896xf32>
    %c0_101 = arith.constant 0 : index
    %c0_102 = arith.constant 0 : index
    %c100 = arith.constant 100 : index
    %118 = vector.load %arg1[%c0_101, %c0_102, %c100] : memref<1x7x1152xf32, #tpu.memory_space<vmem>>, vector<1x7x896xf32>
    %119 = vector.shape_cast %118 : vector<1x7x896xf32> to vector<7x896xf32>
    %c19 = arith.constant 19 : index
    %c0_103 = arith.constant 0 : index
    %c0_104 = arith.constant 0 : index
    %120 = vector.load %arg2[%c19, %c0_103, %c0_104] : memref<25x8x7xf32, #tpu.memory_space<vmem>>, vector<1x8x7xf32>
    %121 = vector.shape_cast %120 : vector<1x8x7xf32> to vector<8x7xf32>
    %cst_105 = arith.constant dense<0.000000e+00> : vector<8x896xf32>
    %122 = tpu.matmul %121, %119, %cst_105 {dimension_numbers = #tpu.dot_dimension_numbers<[1], [0], [0], [1], [0, 0, 1, 1], [], []>} : vector<8x7xf32>, vector<7x896xf32>, vector<8x896xf32> -> vector<8x896xf32>
    %123 = arith.addf %117, %122 : vector<8x896xf32>
    %c0_106 = arith.constant 0 : index
    %c0_107 = arith.constant 0 : index
    %c128 = arith.constant 128 : index
    %124 = vector.load %arg1[%c0_106, %c0_107, %c128] : memref<1x7x1152xf32, #tpu.memory_space<vmem>>, vector<1x7x896xf32>
    %125 = vector.shape_cast %124 : vector<1x7x896xf32> to vector<7x896xf32>
    %c20 = arith.constant 20 : index
    %c0_108 = arith.constant 0 : index
    %c0_109 = arith.constant 0 : index
    %126 = vector.load %arg2[%c20, %c0_108, %c0_109] : memref<25x8x7xf32, #tpu.memory_space<vmem>>, vector<1x8x7xf32>
    %127 = vector.shape_cast %126 : vector<1x8x7xf32> to vector<8x7xf32>
    %cst_110 = arith.constant dense<0.000000e+00> : vector<8x896xf32>
    %128 = tpu.matmul %127, %125, %cst_110 {dimension_numbers = #tpu.dot_dimension_numbers<[1], [0], [0], [1], [0, 0, 1, 1], [], []>} : vector<8x7xf32>, vector<7x896xf32>, vector<8x896xf32> -> vector<8x896xf32>
    %129 = arith.addf %123, %128 : vector<8x896xf32>
    %c0_111 = arith.constant 0 : index
    %c0_112 = arith.constant 0 : index
    %c129 = arith.constant 129 : index
    %130 = vector.load %arg1[%c0_111, %c0_112, %c129] : memref<1x7x1152xf32, #tpu.memory_space<vmem>>, vector<1x7x896xf32>
    %131 = vector.shape_cast %130 : vector<1x7x896xf32> to vector<7x896xf32>
    %c21 = arith.constant 21 : index
    %c0_113 = arith.constant 0 : index
    %c0_114 = arith.constant 0 : index
    %132 = vector.load %arg2[%c21, %c0_113, %c0_114] : memref<25x8x7xf32, #tpu.memory_space<vmem>>, vector<1x8x7xf32>
    %133 = vector.shape_cast %132 : vector<1x8x7xf32> to vector<8x7xf32>
    %cst_115 = arith.constant dense<0.000000e+00> : vector<8x896xf32>
    %134 = tpu.matmul %133, %131, %cst_115 {dimension_numbers = #tpu.dot_dimension_numbers<[1], [0], [0], [1], [0, 0, 1, 1], [], []>} : vector<8x7xf32>, vector<7x896xf32>, vector<8x896xf32> -> vector<8x896xf32>
    %135 = arith.addf %129, %134 : vector<8x896xf32>
    %c0_116 = arith.constant 0 : index
    %c0_117 = arith.constant 0 : index
    %c130 = arith.constant 130 : index
    %136 = vector.load %arg1[%c0_116, %c0_117, %c130] : memref<1x7x1152xf32, #tpu.memory_space<vmem>>, vector<1x7x896xf32>
    %137 = vector.shape_cast %136 : vector<1x7x896xf32> to vector<7x896xf32>
    %c22 = arith.constant 22 : index
    %c0_118 = arith.constant 0 : index
    %c0_119 = arith.constant 0 : index
    %138 = vector.load %arg2[%c22, %c0_118, %c0_119] : memref<25x8x7xf32, #tpu.memory_space<vmem>>, vector<1x8x7xf32>
    %139 = vector.shape_cast %138 : vector<1x8x7xf32> to vector<8x7xf32>
    %cst_120 = arith.constant dense<0.000000e+00> : vector<8x896xf32>
    %140 = tpu.matmul %139, %137, %cst_120 {dimension_numbers = #tpu.dot_dimension_numbers<[1], [0], [0], [1], [0, 0, 1, 1], [], []>} : vector<8x7xf32>, vector<7x896xf32>, vector<8x896xf32> -> vector<8x896xf32>
    %141 = arith.addf %135, %140 : vector<8x896xf32>
    %c0_121 = arith.constant 0 : index
    %c0_122 = arith.constant 0 : index
    %c131 = arith.constant 131 : index
    %142 = vector.load %arg1[%c0_121, %c0_122, %c131] : memref<1x7x1152xf32, #tpu.memory_space<vmem>>, vector<1x7x896xf32>
    %143 = vector.shape_cast %142 : vector<1x7x896xf32> to vector<7x896xf32>
    %c23 = arith.constant 23 : index
    %c0_123 = arith.constant 0 : index
    %c0_124 = arith.constant 0 : index
    %144 = vector.load %arg2[%c23, %c0_123, %c0_124] : memref<25x8x7xf32, #tpu.memory_space<vmem>>, vector<1x8x7xf32>
    %145 = vector.shape_cast %144 : vector<1x8x7xf32> to vector<8x7xf32>
    %cst_125 = arith.constant dense<0.000000e+00> : vector<8x896xf32>
    %146 = tpu.matmul %145, %143, %cst_125 {dimension_numbers = #tpu.dot_dimension_numbers<[1], [0], [0], [1], [0, 0, 1, 1], [], []>} : vector<8x7xf32>, vector<7x896xf32>, vector<8x896xf32> -> vector<8x896xf32>
    %147 = arith.addf %141, %146 : vector<8x896xf32>
    %c0_126 = arith.constant 0 : index
    %c0_127 = arith.constant 0 : index
    %c132 = arith.constant 132 : index
    %148 = vector.load %arg1[%c0_126, %c0_127, %c132] : memref<1x7x1152xf32, #tpu.memory_space<vmem>>, vector<1x7x896xf32>
    %149 = vector.shape_cast %148 : vector<1x7x896xf32> to vector<7x896xf32>
    %c24 = arith.constant 24 : index
    %c0_128 = arith.constant 0 : index
    %c0_129 = arith.constant 0 : index
    %150 = vector.load %arg2[%c24, %c0_128, %c0_129] : memref<25x8x7xf32, #tpu.memory_space<vmem>>, vector<1x8x7xf32>
    %151 = vector.shape_cast %150 : vector<1x8x7xf32> to vector<8x7xf32>
    %cst_130 = arith.constant dense<0.000000e+00> : vector<8x896xf32>
    %152 = tpu.matmul %151, %149, %cst_130 {dimension_numbers = #tpu.dot_dimension_numbers<[1], [0], [0], [1], [0, 0, 1, 1], [], []>} : vector<8x7xf32>, vector<7x896xf32>, vector<8x896xf32> -> vector<8x896xf32>
    %153 = arith.addf %147, %152 : vector<8x896xf32>
    %c0_131 = arith.constant 0 : index
    %c0_132 = arith.constant 0 : index
    %154 = vector.load %arg3[%c0_131, %c0_132] : memref<8x1xf32, #tpu.memory_space<vmem>>, vector<8x1xf32>
    %155 = vector.broadcast %154 : vector<8x1xf32> to vector<8x896xf32>
    %156 = arith.addf %153, %155 : vector<8x896xf32>
    %cst_133 = arith.constant 0.000000e+00 : f32
    %157 = vector.broadcast %cst_133 : f32 to vector<8x896xf32>
    %158 = arith.maximumf %156, %157 : vector<8x896xf32>
    %159 = vector.extract_strided_slice %158 {offsets = [0, 0], sizes = [8, 895], strides = [1, 1]} : vector<8x896xf32> to vector<8x895xf32>
    %160 = vector.extract_strided_slice %158 {offsets = [0, 1], sizes = [8, 895], strides = [1, 1]} : vector<8x896xf32> to vector<8x895xf32>
    %161 = arith.maximumf %159, %160 : vector<8x895xf32>
    %162 = vector.extract_strided_slice %161 {offsets = [0, 0], sizes = [8, 863], strides = [1, 1]} : vector<8x895xf32> to vector<8x863xf32>
    %163 = vector.extract_strided_slice %161 {offsets = [0, 32], sizes = [8, 863], strides = [1, 1]} : vector<8x895xf32> to vector<8x863xf32>
    %164 = arith.maximumf %162, %163 : vector<8x863xf32>
    %c0_134 = arith.constant 0 : index
    %c0_135 = arith.constant 0 : index
    %165 = vector.load %arg4[%c0_134, %c0_135] : memref<863x196xf32, #tpu.memory_space<vmem>>, vector<863x196xf32>
    %cst_136 = arith.constant dense<0.000000e+00> : vector<8x196xf32>
    %166 = tpu.matmul %164, %165, %cst_136 {dimension_numbers = #tpu.dot_dimension_numbers<[1], [0], [0], [1], [0, 0, 1, 1], [], []>} : vector<8x863xf32>, vector<863x196xf32>, vector<8x196xf32> -> vector<8x196xf32>
    %cst_137 = arith.constant 0.000000e+00 : f32
    %167 = vector.broadcast %cst_137 : f32 to vector<8x256xf32>
    %c0_138 = arith.constant 0 : index
    %c0_139 = arith.constant 0 : index
    %168 = vector.load %arg15[%c0_138, %c0_139] : memref<8x256xf32, #tpu.memory_space<vmem>>, vector<8x256xf32>
    tpu.vector_store %arg15[%c0_138, %c0_139], %167 {strides = array<i32>} : memref<8x256xf32, #tpu.memory_space<vmem>>, vector<8x256xf32>,
    %c0_140 = arith.constant 0 : index
    %c0_141 = arith.constant 0 : index
    %169 = vector.load %arg15[%c0_140, %c0_141] : memref<8x256xf32, #tpu.memory_space<vmem>>, vector<8x196xf32>
    tpu.vector_store %arg15[%c0_140, %c0_141], %166 {strides = array<i32>} : memref<8x256xf32, #tpu.memory_space<vmem>>, vector<8x196xf32>,
    %cst_142 = arith.constant 0.000000e+00 : f32
    %170 = vector.broadcast %cst_142 : f32 to vector<16x140xf32>
    %c0_143 = arith.constant 0 : index
    %c0_144 = arith.constant 0 : index
    %171 = vector.load %arg15[%c0_143, %c0_144] : memref<8x256xf32, #tpu.memory_space<vmem>>, vector<8x140xf32>
    %c0_145 = arith.constant 0 : index
    %c0_146 = arith.constant 0 : index
    %c0_147 = arith.constant 0 : index
    %172 = vector.load %arg5[%c0_145, %c0_146, %c0_147] : memref<25x16x8xf32, #tpu.memory_space<vmem>>, vector<1x16x8xf32>
    %173 = vector.shape_cast %172 : vector<1x16x8xf32> to vector<16x8xf32>
    %cst_148 = arith.constant dense<0.000000e+00> : vector<16x140xf32>
    %174 = tpu.matmul %173, %171, %cst_148 {dimension_numbers = #tpu.dot_dimension_numbers<[1], [0], [0], [1], [0, 0, 1, 1], [], []>} : vector<16x8xf32>, vector<8x140xf32>, vector<16x140xf32> -> vector<16x140xf32>
    %175 = arith.addf %170, %174 : vector<16x140xf32>
    %c0_149 = arith.constant 0 : index
    %c1_150 = arith.constant 1 : index
    %176 = vector.load %arg15[%c0_149, %c1_150] : memref<8x256xf32, #tpu.memory_space<vmem>>, vector<8x140xf32>
    %c1_151 = arith.constant 1 : index
    %c0_152 = arith.constant 0 : index
    %c0_153 = arith.constant 0 : index
    %177 = vector.load %arg5[%c1_151, %c0_152, %c0_153] : memref<25x16x8xf32, #tpu.memory_space<vmem>>, vector<1x16x8xf32>
    %178 = vector.shape_cast %177 : vector<1x16x8xf32> to vector<16x8xf32>
    %cst_154 = arith.constant dense<0.000000e+00> : vector<16x140xf32>
    %179 = tpu.matmul %178, %176, %cst_154 {dimension_numbers = #tpu.dot_dimension_numbers<[1], [0], [0], [1], [0, 0, 1, 1], [], []>} : vector<16x8xf32>, vector<8x140xf32>, vector<16x140xf32> -> vector<16x140xf32>
    %180 = arith.addf %175, %179 : vector<16x140xf32>
    %c0_155 = arith.constant 0 : index
    %c2_156 = arith.constant 2 : index
    %181 = vector.load %arg15[%c0_155, %c2_156] : memref<8x256xf32, #tpu.memory_space<vmem>>, vector<8x140xf32>
    %c2_157 = arith.constant 2 : index
    %c0_158 = arith.constant 0 : index
    %c0_159 = arith.constant 0 : index
    %182 = vector.load %arg5[%c2_157, %c0_158, %c0_159] : memref<25x16x8xf32, #tpu.memory_space<vmem>>, vector<1x16x8xf32>
    %183 = vector.shape_cast %182 : vector<1x16x8xf32> to vector<16x8xf32>
    %cst_160 = arith.constant dense<0.000000e+00> : vector<16x140xf32>
    %184 = tpu.matmul %183, %181, %cst_160 {dimension_numbers = #tpu.dot_dimension_numbers<[1], [0], [0], [1], [0, 0, 1, 1], [], []>} : vector<16x8xf32>, vector<8x140xf32>, vector<16x140xf32> -> vector<16x140xf32>
    %185 = arith.addf %180, %184 : vector<16x140xf32>
    %c0_161 = arith.constant 0 : index
    %c3_162 = arith.constant 3 : index
    %186 = vector.load %arg15[%c0_161, %c3_162] : memref<8x256xf32, #tpu.memory_space<vmem>>, vector<8x140xf32>
    %c3_163 = arith.constant 3 : index
    %c0_164 = arith.constant 0 : index
    %c0_165 = arith.constant 0 : index
    %187 = vector.load %arg5[%c3_163, %c0_164, %c0_165] : memref<25x16x8xf32, #tpu.memory_space<vmem>>, vector<1x16x8xf32>
    %188 = vector.shape_cast %187 : vector<1x16x8xf32> to vector<16x8xf32>
    %cst_166 = arith.constant dense<0.000000e+00> : vector<16x140xf32>
    %189 = tpu.matmul %188, %186, %cst_166 {dimension_numbers = #tpu.dot_dimension_numbers<[1], [0], [0], [1], [0, 0, 1, 1], [], []>} : vector<16x8xf32>, vector<8x140xf32>, vector<16x140xf32> -> vector<16x140xf32>
    %190 = arith.addf %185, %189 : vector<16x140xf32>
    %c0_167 = arith.constant 0 : index
    %c4_168 = arith.constant 4 : index
    %191 = vector.load %arg15[%c0_167, %c4_168] : memref<8x256xf32, #tpu.memory_space<vmem>>, vector<8x140xf32>
    %c4_169 = arith.constant 4 : index
    %c0_170 = arith.constant 0 : index
    %c0_171 = arith.constant 0 : index
    %192 = vector.load %arg5[%c4_169, %c0_170, %c0_171] : memref<25x16x8xf32, #tpu.memory_space<vmem>>, vector<1x16x8xf32>
    %193 = vector.shape_cast %192 : vector<1x16x8xf32> to vector<16x8xf32>
    %cst_172 = arith.constant dense<0.000000e+00> : vector<16x140xf32>
    %194 = tpu.matmul %193, %191, %cst_172 {dimension_numbers = #tpu.dot_dimension_numbers<[1], [0], [0], [1], [0, 0, 1, 1], [], []>} : vector<16x8xf32>, vector<8x140xf32>, vector<16x140xf32> -> vector<16x140xf32>
    %195 = arith.addf %190, %194 : vector<16x140xf32>
    %c0_173 = arith.constant 0 : index
    %c14_174 = arith.constant 14 : index
    %196 = vector.load %arg15[%c0_173, %c14_174] : memref<8x256xf32, #tpu.memory_space<vmem>>, vector<8x140xf32>
    %c5_175 = arith.constant 5 : index
    %c0_176 = arith.constant 0 : index
    %c0_177 = arith.constant 0 : index
    %197 = vector.load %arg5[%c5_175, %c0_176, %c0_177] : memref<25x16x8xf32, #tpu.memory_space<vmem>>, vector<1x16x8xf32>
    %198 = vector.shape_cast %197 : vector<1x16x8xf32> to vector<16x8xf32>
    %cst_178 = arith.constant dense<0.000000e+00> : vector<16x140xf32>
    %199 = tpu.matmul %198, %196, %cst_178 {dimension_numbers = #tpu.dot_dimension_numbers<[1], [0], [0], [1], [0, 0, 1, 1], [], []>} : vector<16x8xf32>, vector<8x140xf32>, vector<16x140xf32> -> vector<16x140xf32>
    %200 = arith.addf %195, %199 : vector<16x140xf32>
    %c0_179 = arith.constant 0 : index
    %c15_180 = arith.constant 15 : index
    %201 = vector.load %arg15[%c0_179, %c15_180] : memref<8x256xf32, #tpu.memory_space<vmem>>, vector<8x140xf32>
    %c6_181 = arith.constant 6 : index
    %c0_182 = arith.constant 0 : index
    %c0_183 = arith.constant 0 : index
    %202 = vector.load %arg5[%c6_181, %c0_182, %c0_183] : memref<25x16x8xf32, #tpu.memory_space<vmem>>, vector<1x16x8xf32>
    %203 = vector.shape_cast %202 : vector<1x16x8xf32> to vector<16x8xf32>
    %cst_184 = arith.constant dense<0.000000e+00> : vector<16x140xf32>
    %204 = tpu.matmul %203, %201, %cst_184 {dimension_numbers = #tpu.dot_dimension_numbers<[1], [0], [0], [1], [0, 0, 1, 1], [], []>} : vector<16x8xf32>, vector<8x140xf32>, vector<16x140xf32> -> vector<16x140xf32>
    %205 = arith.addf %200, %204 : vector<16x140xf32>
    %c0_185 = arith.constant 0 : index
    %c16_186 = arith.constant 16 : index
    %206 = vector.load %arg15[%c0_185, %c16_186] : memref<8x256xf32, #tpu.memory_space<vmem>>, vector<8x140xf32>
    %c7_187 = arith.constant 7 : index
    %c0_188 = arith.constant 0 : index
    %c0_189 = arith.constant 0 : index
    %207 = vector.load %arg5[%c7_187, %c0_188, %c0_189] : memref<25x16x8xf32, #tpu.memory_space<vmem>>, vector<1x16x8xf32>
    %208 = vector.shape_cast %207 : vector<1x16x8xf32> to vector<16x8xf32>
    %cst_190 = arith.constant dense<0.000000e+00> : vector<16x140xf32>
    %209 = tpu.matmul %208, %206, %cst_190 {dimension_numbers = #tpu.dot_dimension_numbers<[1], [0], [0], [1], [0, 0, 1, 1], [], []>} : vector<16x8xf32>, vector<8x140xf32>, vector<16x140xf32> -> vector<16x140xf32>
    %210 = arith.addf %205, %209 : vector<16x140xf32>
    %c0_191 = arith.constant 0 : index
    %c17_192 = arith.constant 17 : index
    %211 = vector.load %arg15[%c0_191, %c17_192] : memref<8x256xf32, #tpu.memory_space<vmem>>, vector<8x140xf32>
    %c8_193 = arith.constant 8 : index
    %c0_194 = arith.constant 0 : index
    %c0_195 = arith.constant 0 : index
    %212 = vector.load %arg5[%c8_193, %c0_194, %c0_195] : memref<25x16x8xf32, #tpu.memory_space<vmem>>, vector<1x16x8xf32>
    %213 = vector.shape_cast %212 : vector<1x16x8xf32> to vector<16x8xf32>
    %cst_196 = arith.constant dense<0.000000e+00> : vector<16x140xf32>
    %214 = tpu.matmul %213, %211, %cst_196 {dimension_numbers = #tpu.dot_dimension_numbers<[1], [0], [0], [1], [0, 0, 1, 1], [], []>} : vector<16x8xf32>, vector<8x140xf32>, vector<16x140xf32> -> vector<16x140xf32>
    %215 = arith.addf %210, %214 : vector<16x140xf32>
    %c0_197 = arith.constant 0 : index
    %c18_198 = arith.constant 18 : index
    %216 = vector.load %arg15[%c0_197, %c18_198] : memref<8x256xf32, #tpu.memory_space<vmem>>, vector<8x140xf32>
    %c9_199 = arith.constant 9 : index
    %c0_200 = arith.constant 0 : index
    %c0_201 = arith.constant 0 : index
    %217 = vector.load %arg5[%c9_199, %c0_200, %c0_201] : memref<25x16x8xf32, #tpu.memory_space<vmem>>, vector<1x16x8xf32>
    %218 = vector.shape_cast %217 : vector<1x16x8xf32> to vector<16x8xf32>
    %cst_202 = arith.constant dense<0.000000e+00> : vector<16x140xf32>
    %219 = tpu.matmul %218, %216, %cst_202 {dimension_numbers = #tpu.dot_dimension_numbers<[1], [0], [0], [1], [0, 0, 1, 1], [], []>} : vector<16x8xf32>, vector<8x140xf32>, vector<16x140xf32> -> vector<16x140xf32>
    %220 = arith.addf %215, %219 : vector<16x140xf32>
    %c0_203 = arith.constant 0 : index
    %c28 = arith.constant 28 : index
    %221 = vector.load %arg15[%c0_203, %c28] : memref<8x256xf32, #tpu.memory_space<vmem>>, vector<8x140xf32>
    %c10_204 = arith.constant 10 : index
    %c0_205 = arith.constant 0 : index
    %c0_206 = arith.constant 0 : index
    %222 = vector.load %arg5[%c10_204, %c0_205, %c0_206] : memref<25x16x8xf32, #tpu.memory_space<vmem>>, vector<1x16x8xf32>
    %223 = vector.shape_cast %222 : vector<1x16x8xf32> to vector<16x8xf32>
    %cst_207 = arith.constant dense<0.000000e+00> : vector<16x140xf32>
    %224 = tpu.matmul %223, %221, %cst_207 {dimension_numbers = #tpu.dot_dimension_numbers<[1], [0], [0], [1], [0, 0, 1, 1], [], []>} : vector<16x8xf32>, vector<8x140xf32>, vector<16x140xf32> -> vector<16x140xf32>
    %225 = arith.addf %220, %224 : vector<16x140xf32>
    %c0_208 = arith.constant 0 : index
    %c29 = arith.constant 29 : index
    %226 = vector.load %arg15[%c0_208, %c29] : memref<8x256xf32, #tpu.memory_space<vmem>>, vector<8x140xf32>
    %c11_209 = arith.constant 11 : index
    %c0_210 = arith.constant 0 : index
    %c0_211 = arith.constant 0 : index
    %227 = vector.load %arg5[%c11_209, %c0_210, %c0_211] : memref<25x16x8xf32, #tpu.memory_space<vmem>>, vector<1x16x8xf32>
    %228 = vector.shape_cast %227 : vector<1x16x8xf32> to vector<16x8xf32>
    %cst_212 = arith.constant dense<0.000000e+00> : vector<16x140xf32>
    %229 = tpu.matmul %228, %226, %cst_212 {dimension_numbers = #tpu.dot_dimension_numbers<[1], [0], [0], [1], [0, 0, 1, 1], [], []>} : vector<16x8xf32>, vector<8x140xf32>, vector<16x140xf32> -> vector<16x140xf32>
    %230 = arith.addf %225, %229 : vector<16x140xf32>
    %c0_213 = arith.constant 0 : index
    %c30 = arith.constant 30 : index
    %231 = vector.load %arg15[%c0_213, %c30] : memref<8x256xf32, #tpu.memory_space<vmem>>, vector<8x140xf32>
    %c12_214 = arith.constant 12 : index
    %c0_215 = arith.constant 0 : index
    %c0_216 = arith.constant 0 : index
    %232 = vector.load %arg5[%c12_214, %c0_215, %c0_216] : memref<25x16x8xf32, #tpu.memory_space<vmem>>, vector<1x16x8xf32>
    %233 = vector.shape_cast %232 : vector<1x16x8xf32> to vector<16x8xf32>
    %cst_217 = arith.constant dense<0.000000e+00> : vector<16x140xf32>
    %234 = tpu.matmul %233, %231, %cst_217 {dimension_numbers = #tpu.dot_dimension_numbers<[1], [0], [0], [1], [0, 0, 1, 1], [], []>} : vector<16x8xf32>, vector<8x140xf32>, vector<16x140xf32> -> vector<16x140xf32>
    %235 = arith.addf %230, %234 : vector<16x140xf32>
    %c0_218 = arith.constant 0 : index
    %c31 = arith.constant 31 : index
    %236 = vector.load %arg15[%c0_218, %c31] : memref<8x256xf32, #tpu.memory_space<vmem>>, vector<8x140xf32>
    %c13_219 = arith.constant 13 : index
    %c0_220 = arith.constant 0 : index
    %c0_221 = arith.constant 0 : index
    %237 = vector.load %arg5[%c13_219, %c0_220, %c0_221] : memref<25x16x8xf32, #tpu.memory_space<vmem>>, vector<1x16x8xf32>
    %238 = vector.shape_cast %237 : vector<1x16x8xf32> to vector<16x8xf32>
    %cst_222 = arith.constant dense<0.000000e+00> : vector<16x140xf32>
    %239 = tpu.matmul %238, %236, %cst_222 {dimension_numbers = #tpu.dot_dimension_numbers<[1], [0], [0], [1], [0, 0, 1, 1], [], []>} : vector<16x8xf32>, vector<8x140xf32>, vector<16x140xf32> -> vector<16x140xf32>
    %240 = arith.addf %235, %239 : vector<16x140xf32>
    %c0_223 = arith.constant 0 : index
    %c32_224 = arith.constant 32 : index
    %241 = vector.load %arg15[%c0_223, %c32_224] : memref<8x256xf32, #tpu.memory_space<vmem>>, vector<8x140xf32>
    %c14_225 = arith.constant 14 : index
    %c0_226 = arith.constant 0 : index
    %c0_227 = arith.constant 0 : index
    %242 = vector.load %arg5[%c14_225, %c0_226, %c0_227] : memref<25x16x8xf32, #tpu.memory_space<vmem>>, vector<1x16x8xf32>
    %243 = vector.shape_cast %242 : vector<1x16x8xf32> to vector<16x8xf32>
    %cst_228 = arith.constant dense<0.000000e+00> : vector<16x140xf32>
    %244 = tpu.matmul %243, %241, %cst_228 {dimension_numbers = #tpu.dot_dimension_numbers<[1], [0], [0], [1], [0, 0, 1, 1], [], []>} : vector<16x8xf32>, vector<8x140xf32>, vector<16x140xf32> -> vector<16x140xf32>
    %245 = arith.addf %240, %244 : vector<16x140xf32>
    %c0_229 = arith.constant 0 : index
    %c42 = arith.constant 42 : index
    %246 = vector.load %arg15[%c0_229, %c42] : memref<8x256xf32, #tpu.memory_space<vmem>>, vector<8x140xf32>
    %c15_230 = arith.constant 15 : index
    %c0_231 = arith.constant 0 : index
    %c0_232 = arith.constant 0 : index
    %247 = vector.load %arg5[%c15_230, %c0_231, %c0_232] : memref<25x16x8xf32, #tpu.memory_space<vmem>>, vector<1x16x8xf32>
    %248 = vector.shape_cast %247 : vector<1x16x8xf32> to vector<16x8xf32>
    %cst_233 = arith.constant dense<0.000000e+00> : vector<16x140xf32>
    %249 = tpu.matmul %248, %246, %cst_233 {dimension_numbers = #tpu.dot_dimension_numbers<[1], [0], [0], [1], [0, 0, 1, 1], [], []>} : vector<16x8xf32>, vector<8x140xf32>, vector<16x140xf32> -> vector<16x140xf32>
    %250 = arith.addf %245, %249 : vector<16x140xf32>
    %c0_234 = arith.constant 0 : index
    %c43 = arith.constant 43 : index
    %251 = vector.load %arg15[%c0_234, %c43] : memref<8x256xf32, #tpu.memory_space<vmem>>, vector<8x140xf32>
    %c16_235 = arith.constant 16 : index
    %c0_236 = arith.constant 0 : index
    %c0_237 = arith.constant 0 : index
    %252 = vector.load %arg5[%c16_235, %c0_236, %c0_237] : memref<25x16x8xf32, #tpu.memory_space<vmem>>, vector<1x16x8xf32>
    %253 = vector.shape_cast %252 : vector<1x16x8xf32> to vector<16x8xf32>
    %cst_238 = arith.constant dense<0.000000e+00> : vector<16x140xf32>
    %254 = tpu.matmul %253, %251, %cst_238 {dimension_numbers = #tpu.dot_dimension_numbers<[1], [0], [0], [1], [0, 0, 1, 1], [], []>} : vector<16x8xf32>, vector<8x140xf32>, vector<16x140xf32> -> vector<16x140xf32>
    %255 = arith.addf %250, %254 : vector<16x140xf32>
    %c0_239 = arith.constant 0 : index
    %c44 = arith.constant 44 : index
    %256 = vector.load %arg15[%c0_239, %c44] : memref<8x256xf32, #tpu.memory_space<vmem>>, vector<8x140xf32>
    %c17_240 = arith.constant 17 : index
    %c0_241 = arith.constant 0 : index
    %c0_242 = arith.constant 0 : index
    %257 = vector.load %arg5[%c17_240, %c0_241, %c0_242] : memref<25x16x8xf32, #tpu.memory_space<vmem>>, vector<1x16x8xf32>
    %258 = vector.shape_cast %257 : vector<1x16x8xf32> to vector<16x8xf32>
    %cst_243 = arith.constant dense<0.000000e+00> : vector<16x140xf32>
    %259 = tpu.matmul %258, %256, %cst_243 {dimension_numbers = #tpu.dot_dimension_numbers<[1], [0], [0], [1], [0, 0, 1, 1], [], []>} : vector<16x8xf32>, vector<8x140xf32>, vector<16x140xf32> -> vector<16x140xf32>
    %260 = arith.addf %255, %259 : vector<16x140xf32>
    %c0_244 = arith.constant 0 : index
    %c45 = arith.constant 45 : index
    %261 = vector.load %arg15[%c0_244, %c45] : memref<8x256xf32, #tpu.memory_space<vmem>>, vector<8x140xf32>
    %c18_245 = arith.constant 18 : index
    %c0_246 = arith.constant 0 : index
    %c0_247 = arith.constant 0 : index
    %262 = vector.load %arg5[%c18_245, %c0_246, %c0_247] : memref<25x16x8xf32, #tpu.memory_space<vmem>>, vector<1x16x8xf32>
    %263 = vector.shape_cast %262 : vector<1x16x8xf32> to vector<16x8xf32>
    %cst_248 = arith.constant dense<0.000000e+00> : vector<16x140xf32>
    %264 = tpu.matmul %263, %261, %cst_248 {dimension_numbers = #tpu.dot_dimension_numbers<[1], [0], [0], [1], [0, 0, 1, 1], [], []>} : vector<16x8xf32>, vector<8x140xf32>, vector<16x140xf32> -> vector<16x140xf32>
    %265 = arith.addf %260, %264 : vector<16x140xf32>
    %c0_249 = arith.constant 0 : index
    %c46 = arith.constant 46 : index
    %266 = vector.load %arg15[%c0_249, %c46] : memref<8x256xf32, #tpu.memory_space<vmem>>, vector<8x140xf32>
    %c19_250 = arith.constant 19 : index
    %c0_251 = arith.constant 0 : index
    %c0_252 = arith.constant 0 : index
    %267 = vector.load %arg5[%c19_250, %c0_251, %c0_252] : memref<25x16x8xf32, #tpu.memory_space<vmem>>, vector<1x16x8xf32>
    %268 = vector.shape_cast %267 : vector<1x16x8xf32> to vector<16x8xf32>
    %cst_253 = arith.constant dense<0.000000e+00> : vector<16x140xf32>
    %269 = tpu.matmul %268, %266, %cst_253 {dimension_numbers = #tpu.dot_dimension_numbers<[1], [0], [0], [1], [0, 0, 1, 1], [], []>} : vector<16x8xf32>, vector<8x140xf32>, vector<16x140xf32> -> vector<16x140xf32>
    %270 = arith.addf %265, %269 : vector<16x140xf32>
    %c0_254 = arith.constant 0 : index
    %c56 = arith.constant 56 : index
    %271 = vector.load %arg15[%c0_254, %c56] : memref<8x256xf32, #tpu.memory_space<vmem>>, vector<8x140xf32>
    %c20_255 = arith.constant 20 : index
    %c0_256 = arith.constant 0 : index
    %c0_257 = arith.constant 0 : index
    %272 = vector.load %arg5[%c20_255, %c0_256, %c0_257] : memref<25x16x8xf32, #tpu.memory_space<vmem>>, vector<1x16x8xf32>
    %273 = vector.shape_cast %272 : vector<1x16x8xf32> to vector<16x8xf32>
    %cst_258 = arith.constant dense<0.000000e+00> : vector<16x140xf32>
    %274 = tpu.matmul %273, %271, %cst_258 {dimension_numbers = #tpu.dot_dimension_numbers<[1], [0], [0], [1], [0, 0, 1, 1], [], []>} : vector<16x8xf32>, vector<8x140xf32>, vector<16x140xf32> -> vector<16x140xf32>
    %275 = arith.addf %270, %274 : vector<16x140xf32>
    %c0_259 = arith.constant 0 : index
    %c57 = arith.constant 57 : index
    %276 = vector.load %arg15[%c0_259, %c57] : memref<8x256xf32, #tpu.memory_space<vmem>>, vector<8x140xf32>
    %c21_260 = arith.constant 21 : index
    %c0_261 = arith.constant 0 : index
    %c0_262 = arith.constant 0 : index
    %277 = vector.load %arg5[%c21_260, %c0_261, %c0_262] : memref<25x16x8xf32, #tpu.memory_space<vmem>>, vector<1x16x8xf32>
    %278 = vector.shape_cast %277 : vector<1x16x8xf32> to vector<16x8xf32>
    %cst_263 = arith.constant dense<0.000000e+00> : vector<16x140xf32>
    %279 = tpu.matmul %278, %276, %cst_263 {dimension_numbers = #tpu.dot_dimension_numbers<[1], [0], [0], [1], [0, 0, 1, 1], [], []>} : vector<16x8xf32>, vector<8x140xf32>, vector<16x140xf32> -> vector<16x140xf32>
    %280 = arith.addf %275, %279 : vector<16x140xf32>
    %c0_264 = arith.constant 0 : index
    %c58 = arith.constant 58 : index
    %281 = vector.load %arg15[%c0_264, %c58] : memref<8x256xf32, #tpu.memory_space<vmem>>, vector<8x140xf32>
    %c22_265 = arith.constant 22 : index
    %c0_266 = arith.constant 0 : index
    %c0_267 = arith.constant 0 : index
    %282 = vector.load %arg5[%c22_265, %c0_266, %c0_267] : memref<25x16x8xf32, #tpu.memory_space<vmem>>, vector<1x16x8xf32>
    %283 = vector.shape_cast %282 : vector<1x16x8xf32> to vector<16x8xf32>
    %cst_268 = arith.constant dense<0.000000e+00> : vector<16x140xf32>
    %284 = tpu.matmul %283, %281, %cst_268 {dimension_numbers = #tpu.dot_dimension_numbers<[1], [0], [0], [1], [0, 0, 1, 1], [], []>} : vector<16x8xf32>, vector<8x140xf32>, vector<16x140xf32> -> vector<16x140xf32>
    %285 = arith.addf %280, %284 : vector<16x140xf32>
    %c0_269 = arith.constant 0 : index
    %c59 = arith.constant 59 : index
    %286 = vector.load %arg15[%c0_269, %c59] : memref<8x256xf32, #tpu.memory_space<vmem>>, vector<8x140xf32>
    %c23_270 = arith.constant 23 : index
    %c0_271 = arith.constant 0 : index
    %c0_272 = arith.constant 0 : index
    %287 = vector.load %arg5[%c23_270, %c0_271, %c0_272] : memref<25x16x8xf32, #tpu.memory_space<vmem>>, vector<1x16x8xf32>
    %288 = vector.shape_cast %287 : vector<1x16x8xf32> to vector<16x8xf32>
    %cst_273 = arith.constant dense<0.000000e+00> : vector<16x140xf32>
    %289 = tpu.matmul %288, %286, %cst_273 {dimension_numbers = #tpu.dot_dimension_numbers<[1], [0], [0], [1], [0, 0, 1, 1], [], []>} : vector<16x8xf32>, vector<8x140xf32>, vector<16x140xf32> -> vector<16x140xf32>
    %290 = arith.addf %285, %289 : vector<16x140xf32>
    %c0_274 = arith.constant 0 : index
    %c60 = arith.constant 60 : index
    %291 = vector.load %arg15[%c0_274, %c60] : memref<8x256xf32, #tpu.memory_space<vmem>>, vector<8x140xf32>
    %c24_275 = arith.constant 24 : index
    %c0_276 = arith.constant 0 : index
    %c0_277 = arith.constant 0 : index
    %292 = vector.load %arg5[%c24_275, %c0_276, %c0_277] : memref<25x16x8xf32, #tpu.memory_space<vmem>>, vector<1x16x8xf32>
    %293 = vector.shape_cast %292 : vector<1x16x8xf32> to vector<16x8xf32>
    %cst_278 = arith.constant dense<0.000000e+00> : vector<16x140xf32>
    %294 = tpu.matmul %293, %291, %cst_278 {dimension_numbers = #tpu.dot_dimension_numbers<[1], [0], [0], [1], [0, 0, 1, 1], [], []>} : vector<16x8xf32>, vector<8x140xf32>, vector<16x140xf32> -> vector<16x140xf32>
    %295 = arith.addf %290, %294 : vector<16x140xf32>
    %c0_279 = arith.constant 0 : index
    %c0_280 = arith.constant 0 : index
    %296 = vector.load %arg6[%c0_279, %c0_280] : memref<16x1xf32, #tpu.memory_space<vmem>>, vector<16x1xf32>
    %297 = vector.broadcast %296 : vector<16x1xf32> to vector<16x140xf32>
    %298 = arith.addf %295, %297 : vector<16x140xf32>
    %cst_281 = arith.constant 0.000000e+00 : f32
    %299 = vector.broadcast %cst_281 : f32 to vector<16x140xf32>
    %300 = arith.maximumf %298, %299 : vector<16x140xf32>
    %301 = vector.extract_strided_slice %300 {offsets = [0, 0], sizes = [16, 139], strides = [1, 1]} : vector<16x140xf32> to vector<16x139xf32>
    %302 = vector.extract_strided_slice %300 {offsets = [0, 1], sizes = [16, 139], strides = [1, 1]} : vector<16x140xf32> to vector<16x139xf32>
    %303 = arith.maximumf %301, %302 : vector<16x139xf32>
    %304 = vector.extract_strided_slice %303 {offsets = [0, 0], sizes = [16, 125], strides = [1, 1]} : vector<16x139xf32> to vector<16x125xf32>
    %305 = vector.extract_strided_slice %303 {offsets = [0, 14], sizes = [16, 125], strides = [1, 1]} : vector<16x139xf32> to vector<16x125xf32>
    %306 = arith.maximumf %304, %305 : vector<16x125xf32>
    %c0_282 = arith.constant 0 : index
    %c0_283 = arith.constant 0 : index
    %307 = vector.load %arg7[%c0_282, %c0_283] : memref<125x25xf32, #tpu.memory_space<vmem>>, vector<125x25xf32>
    %cst_284 = arith.constant dense<0.000000e+00> : vector<16x25xf32>
    %308 = tpu.matmul %306, %307, %cst_284 {dimension_numbers = #tpu.dot_dimension_numbers<[1], [0], [0], [1], [0, 0, 1, 1], [], []>} : vector<16x125xf32>, vector<125x25xf32>, vector<16x25xf32> -> vector<16x25xf32>
    %309 = vector.extract_strided_slice %308 {offsets = [0, 0], sizes = [1, 25], strides = [1, 1]} : vector<16x25xf32> to vector<1x25xf32>
    %c0_285 = arith.constant 0 : index
    %c0_286 = arith.constant 0 : index
    %310 = vector.load %arg16[%c0_285, %c0_286] : memref<1x400xf32, #tpu.memory_space<vmem>>, vector<1x25xf32>
    tpu.vector_store %arg16[%c0_285, %c0_286], %309 {strides = array<i32>} : memref<1x400xf32, #tpu.memory_space<vmem>>, vector<1x25xf32>,
    %311 = vector.extract_strided_slice %308 {offsets = [1, 0], sizes = [1, 25], strides = [1, 1]} : vector<16x25xf32> to vector<1x25xf32>
    %c0_287 = arith.constant 0 : index
    %c25 = arith.constant 25 : index
    %312 = vector.load %arg16[%c0_287, %c25] : memref<1x400xf32, #tpu.memory_space<vmem>>, vector<1x25xf32>
    tpu.vector_store %arg16[%c0_287, %c25], %311 {strides = array<i32>} : memref<1x400xf32, #tpu.memory_space<vmem>>, vector<1x25xf32>,
    %313 = vector.extract_strided_slice %308 {offsets = [2, 0], sizes = [1, 25], strides = [1, 1]} : vector<16x25xf32> to vector<1x25xf32>
    %c0_288 = arith.constant 0 : index
    %c50 = arith.constant 50 : index
    %314 = vector.load %arg16[%c0_288, %c50] : memref<1x400xf32, #tpu.memory_space<vmem>>, vector<1x25xf32>
    tpu.vector_store %arg16[%c0_288, %c50], %313 {strides = array<i32>} : memref<1x400xf32, #tpu.memory_space<vmem>>, vector<1x25xf32>,
    %315 = vector.extract_strided_slice %308 {offsets = [3, 0], sizes = [1, 25], strides = [1, 1]} : vector<16x25xf32> to vector<1x25xf32>
    %c0_289 = arith.constant 0 : index
    %c75 = arith.constant 75 : index
    %316 = vector.load %arg16[%c0_289, %c75] : memref<1x400xf32, #tpu.memory_space<vmem>>, vector<1x25xf32>
    tpu.vector_store %arg16[%c0_289, %c75], %315 {strides = array<i32>} : memref<1x400xf32, #tpu.memory_space<vmem>>, vector<1x25xf32>,
    %317 = vector.extract_strided_slice %308 {offsets = [4, 0], sizes = [1, 25], strides = [1, 1]} : vector<16x25xf32> to vector<1x25xf32>
    %c0_290 = arith.constant 0 : index
    %c100_291 = arith.constant 100 : index
    %318 = vector.load %arg16[%c0_290, %c100_291] : memref<1x400xf32, #tpu.memory_space<vmem>>, vector<1x25xf32>
    tpu.vector_store %arg16[%c0_290, %c100_291], %317 {strides = array<i32>} : memref<1x400xf32, #tpu.memory_space<vmem>>, vector<1x25xf32>,
    %319 = vector.extract_strided_slice %308 {offsets = [5, 0], sizes = [1, 25], strides = [1, 1]} : vector<16x25xf32> to vector<1x25xf32>
    %c0_292 = arith.constant 0 : index
    %c125 = arith.constant 125 : index
    %320 = vector.load %arg16[%c0_292, %c125] : memref<1x400xf32, #tpu.memory_space<vmem>>, vector<1x25xf32>
    tpu.vector_store %arg16[%c0_292, %c125], %319 {strides = array<i32>} : memref<1x400xf32, #tpu.memory_space<vmem>>, vector<1x25xf32>,
    %321 = vector.extract_strided_slice %308 {offsets = [6, 0], sizes = [1, 25], strides = [1, 1]} : vector<16x25xf32> to vector<1x25xf32>
    %c0_293 = arith.constant 0 : index
    %c150 = arith.constant 150 : index
    %322 = vector.load %arg16[%c0_293, %c150] : memref<1x400xf32, #tpu.memory_space<vmem>>, vector<1x25xf32>
    tpu.vector_store %arg16[%c0_293, %c150], %321 {strides = array<i32>} : memref<1x400xf32, #tpu.memory_space<vmem>>, vector<1x25xf32>,
    %323 = vector.extract_strided_slice %308 {offsets = [7, 0], sizes = [1, 25], strides = [1, 1]} : vector<16x25xf32> to vector<1x25xf32>
    %c0_294 = arith.constant 0 : index
    %c175 = arith.constant 175 : index
    %324 = vector.load %arg16[%c0_294, %c175] : memref<1x400xf32, #tpu.memory_space<vmem>>, vector<1x25xf32>
    tpu.vector_store %arg16[%c0_294, %c175], %323 {strides = array<i32>} : memref<1x400xf32, #tpu.memory_space<vmem>>, vector<1x25xf32>,
    %325 = vector.extract_strided_slice %308 {offsets = [8, 0], sizes = [1, 25], strides = [1, 1]} : vector<16x25xf32> to vector<1x25xf32>
    %c0_295 = arith.constant 0 : index
    %c200 = arith.constant 200 : index
    %326 = vector.load %arg16[%c0_295, %c200] : memref<1x400xf32, #tpu.memory_space<vmem>>, vector<1x25xf32>
    tpu.vector_store %arg16[%c0_295, %c200], %325 {strides = array<i32>} : memref<1x400xf32, #tpu.memory_space<vmem>>, vector<1x25xf32>,
    %327 = vector.extract_strided_slice %308 {offsets = [9, 0], sizes = [1, 25], strides = [1, 1]} : vector<16x25xf32> to vector<1x25xf32>
    %c0_296 = arith.constant 0 : index
    %c225 = arith.constant 225 : index
    %328 = vector.load %arg16[%c0_296, %c225] : memref<1x400xf32, #tpu.memory_space<vmem>>, vector<1x25xf32>
    tpu.vector_store %arg16[%c0_296, %c225], %327 {strides = array<i32>} : memref<1x400xf32, #tpu.memory_space<vmem>>, vector<1x25xf32>,
    %329 = vector.extract_strided_slice %308 {offsets = [10, 0], sizes = [1, 25], strides = [1, 1]} : vector<16x25xf32> to vector<1x25xf32>
    %c0_297 = arith.constant 0 : index
    %c250 = arith.constant 250 : index
    %330 = vector.load %arg16[%c0_297, %c250] : memref<1x400xf32, #tpu.memory_space<vmem>>, vector<1x25xf32>
    tpu.vector_store %arg16[%c0_297, %c250], %329 {strides = array<i32>} : memref<1x400xf32, #tpu.memory_space<vmem>>, vector<1x25xf32>,
    %331 = vector.extract_strided_slice %308 {offsets = [11, 0], sizes = [1, 25], strides = [1, 1]} : vector<16x25xf32> to vector<1x25xf32>
    %c0_298 = arith.constant 0 : index
    %c275 = arith.constant 275 : index
    %332 = vector.load %arg16[%c0_298, %c275] : memref<1x400xf32, #tpu.memory_space<vmem>>, vector<1x25xf32>
    tpu.vector_store %arg16[%c0_298, %c275], %331 {strides = array<i32>} : memref<1x400xf32, #tpu.memory_space<vmem>>, vector<1x25xf32>,
    %333 = vector.extract_strided_slice %308 {offsets = [12, 0], sizes = [1, 25], strides = [1, 1]} : vector<16x25xf32> to vector<1x25xf32>
    %c0_299 = arith.constant 0 : index
    %c300 = arith.constant 300 : index
    %334 = vector.load %arg16[%c0_299, %c300] : memref<1x400xf32, #tpu.memory_space<vmem>>, vector<1x25xf32>
    tpu.vector_store %arg16[%c0_299, %c300], %333 {strides = array<i32>} : memref<1x400xf32, #tpu.memory_space<vmem>>, vector<1x25xf32>,
    %335 = vector.extract_strided_slice %308 {offsets = [13, 0], sizes = [1, 25], strides = [1, 1]} : vector<16x25xf32> to vector<1x25xf32>
    %c0_300 = arith.constant 0 : index
    %c325 = arith.constant 325 : index
    %336 = vector.load %arg16[%c0_300, %c325] : memref<1x400xf32, #tpu.memory_space<vmem>>, vector<1x25xf32>
    tpu.vector_store %arg16[%c0_300, %c325], %335 {strides = array<i32>} : memref<1x400xf32, #tpu.memory_space<vmem>>, vector<1x25xf32>,
    %337 = vector.extract_strided_slice %308 {offsets = [14, 0], sizes = [1, 25], strides = [1, 1]} : vector<16x25xf32> to vector<1x25xf32>
    %c0_301 = arith.constant 0 : index
    %c350 = arith.constant 350 : index
    %338 = vector.load %arg16[%c0_301, %c350] : memref<1x400xf32, #tpu.memory_space<vmem>>, vector<1x25xf32>
    tpu.vector_store %arg16[%c0_301, %c350], %337 {strides = array<i32>} : memref<1x400xf32, #tpu.memory_space<vmem>>, vector<1x25xf32>,
    %339 = vector.extract_strided_slice %308 {offsets = [15, 0], sizes = [1, 25], strides = [1, 1]} : vector<16x25xf32> to vector<1x25xf32>
    %c0_302 = arith.constant 0 : index
    %c375 = arith.constant 375 : index
    %340 = vector.load %arg16[%c0_302, %c375] : memref<1x400xf32, #tpu.memory_space<vmem>>, vector<1x25xf32>
    tpu.vector_store %arg16[%c0_302, %c375], %339 {strides = array<i32>} : memref<1x400xf32, #tpu.memory_space<vmem>>, vector<1x25xf32>,
    %c0_303 = arith.constant 0 : index
    %c0_304 = arith.constant 0 : index
    %341 = vector.load %arg16[%c0_303, %c0_304] : memref<1x400xf32, #tpu.memory_space<vmem>>, vector<1x400xf32>
    %c0_305 = arith.constant 0 : index
    %c0_306 = arith.constant 0 : index
    %342 = vector.load %arg8[%c0_305, %c0_306] : memref<400x120xf32, #tpu.memory_space<vmem>>, vector<400x120xf32>
    %cst_307 = arith.constant dense<0.000000e+00> : vector<1x120xf32>
    %343 = tpu.matmul %341, %342, %cst_307 {dimension_numbers = #tpu.dot_dimension_numbers<[1], [0], [0], [1], [0, 0, 1, 1], [], []>} : vector<1x400xf32>, vector<400x120xf32>, vector<1x120xf32> -> vector<1x120xf32>
    %c0_308 = arith.constant 0 : index
    %c0_309 = arith.constant 0 : index
    %344 = vector.load %arg9[%c0_308, %c0_309] : memref<1x120xf32, #tpu.memory_space<vmem>>, vector<1x120xf32>
    %345 = arith.addf %343, %344 : vector<1x120xf32>
    %cst_310 = arith.constant 0.000000e+00 : f32
    %346 = vector.broadcast %cst_310 : f32 to vector<1x120xf32>
    %347 = arith.maximumf %345, %346 : vector<1x120xf32>
    %c0_311 = arith.constant 0 : index
    %c0_312 = arith.constant 0 : index
    %348 = vector.load %arg10[%c0_311, %c0_312] : memref<120x84xf32, #tpu.memory_space<vmem>>, vector<120x84xf32>
    %cst_313 = arith.constant dense<0.000000e+00> : vector<1x84xf32>
    %349 = tpu.matmul %347, %348, %cst_313 {dimension_numbers = #tpu.dot_dimension_numbers<[1], [0], [0], [1], [0, 0, 1, 1], [], []>} : vector<1x120xf32>, vector<120x84xf32>, vector<1x84xf32> -> vector<1x84xf32>
    %c0_314 = arith.constant 0 : index
    %c0_315 = arith.constant 0 : index
    %350 = vector.load %arg11[%c0_314, %c0_315] : memref<1x84xf32, #tpu.memory_space<vmem>>, vector<1x84xf32>
    %351 = arith.addf %349, %350 : vector<1x84xf32>
    %cst_316 = arith.constant 0.000000e+00 : f32
    %352 = vector.broadcast %cst_316 : f32 to vector<1x84xf32>
    %353 = arith.maximumf %351, %352 : vector<1x84xf32>
    %c0_317 = arith.constant 0 : index
    %c0_318 = arith.constant 0 : index
    %354 = vector.load %arg12[%c0_317, %c0_318] : memref<84x16xf32, #tpu.memory_space<vmem>>, vector<84x16xf32>
    %cst_319 = arith.constant dense<0.000000e+00> : vector<1x16xf32>
    %355 = tpu.matmul %353, %354, %cst_319 {dimension_numbers = #tpu.dot_dimension_numbers<[1], [0], [0], [1], [0, 0, 1, 1], [], []>} : vector<1x84xf32>, vector<84x16xf32>, vector<1x16xf32> -> vector<1x16xf32>
    %c0_320 = arith.constant 0 : index
    %c0_321 = arith.constant 0 : index
    %356 = vector.load %arg13[%c0_320, %c0_321] : memref<1x16xf32, #tpu.memory_space<vmem>>, vector<1x16xf32>
    %357 = arith.addf %355, %356 : vector<1x16xf32>
    %c0_322 = arith.constant 0 : index
    %c0_323 = arith.constant 0 : index
    %358 = vector.load %arg14[%c0_322, %c0_323] : memref<1x16xf32, #tpu.memory_space<vmem>>, vector<1x16xf32>
    %359 = arith.addf %358, %357 : vector<1x16xf32>
    %c0_324 = arith.constant 0 : index
    %c0_325 = arith.constant 0 : index
    %360 = vector.load %arg14[%c0_324, %c0_325] : memref<1x16xf32, #tpu.memory_space<vmem>>, vector<1x16xf32>
    tpu.vector_store %arg14[%c0_324, %c0_325], %359 {strides = array<i32>} : memref<1x16xf32, #tpu.memory_space<vmem>>, vector<1x16xf32>,
    %c1_i32 = arith.constant 1 : i32
    %361 = arith.cmpi eq, %arg0, %c1_i32 : i32
    %362 = arith.extui %361 : i1 to i32
    %c0_i32_326 = arith.constant 0 : i32
    %363 = arith.cmpi ne, %362, %c0_i32_326 : i32
    scf.if %363 {
      %c0_327 = arith.constant 0 : index
      %c0_328 = arith.constant 0 : index
      %364 = vector.load %arg14[%c0_327, %c0_328] : memref<1x16xf32, #tpu.memory_space<vmem>>, vector<1x16xf32>
      %cst_329 = arith.constant 2.000000e+00 : f32
      %365 = vector.broadcast %cst_329 : f32 to vector<1x16xf32>
      %366 = arith.divf %364, %365 : vector<1x16xf32>
      %cst_330 = arith.constant dense<0.000000e+00> : vector<1xf32>
      %367 = vector.multi_reduction <add>, %366, %cst_330 [1] : vector<1x16xf32> to vector<1xf32>
      %368 = vector.shape_cast %367 : vector<1xf32> to vector<1x1xf32>
      %cst_331 = arith.constant 1.600000e+01 : f32
      %369 = vector.broadcast %cst_331 : f32 to vector<1x1xf32>
      %370 = arith.divf %368, %369 : vector<1x1xf32>
      %371 = vector.broadcast %370 : vector<1x1xf32> to vector<1x16xf32>
      %372 = arith.subf %366, %371 : vector<1x16xf32>
      %373 = arith.mulf %372, %372 : vector<1x16xf32>
      %cst_332 = arith.constant dense<0.000000e+00> : vector<1xf32>
      %374 = vector.multi_reduction <add>, %373, %cst_332 [1] : vector<1x16xf32> to vector<1xf32>
      %375 = vector.shape_cast %374 : vector<1xf32> to vector<1x1xf32>
      %cst_333 = arith.constant 1.500000e+01 : f32
      %376 = vector.broadcast %cst_333 : f32 to vector<1x1xf32>
      %377 = arith.divf %375, %376 : vector<1x1xf32>
      %378 = vector.broadcast %370 : vector<1x1xf32> to vector<1x16xf32>
      %379 = arith.subf %366, %378 : vector<1x16xf32>
      %380 = math.sqrt %377 : vector<1x1xf32>
      %381 = vector.broadcast %380 : vector<1x1xf32> to vector<1x16xf32>
      %382 = arith.divf %379, %381 : vector<1x16xf32>
      %c0_334 = arith.constant 0 : index
      %c0_335 = arith.constant 0 : index
      %383 = vector.load %arg14[%c0_334, %c0_335] : memref<1x16xf32, #tpu.memory_space<vmem>>, vector<1x16xf32>
      tpu.vector_store %arg14[%c0_334, %c0_335], %382 {strides = array<i32>} : memref<1x16xf32, #tpu.memory_space<vmem>>, vector<1x16xf32>,
    } else {
    }
    return
  }
  func.func @transform_0(%arg0: i32) -> (i32, i32, i32) {
    %c0_i32 = arith.constant 0 : i32
    %c0_i32_0 = arith.constant 0 : i32
    %c0_i32_1 = arith.constant 0 : i32
    return %arg0, %c0_i32, %c0_i32_0 : i32, i32, i32
  }
  func.func @transform_1(%arg0: i32) -> (i32, i32, i32) {
    %c0_i32 = arith.constant 0 : i32
    %c0_i32_0 = arith.constant 0 : i32
    %c0_i32_1 = arith.constant 0 : i32
    %c0_i32_2 = arith.constant 0 : i32
    return %c0_i32, %c0_i32_0, %c0_i32_1 : i32, i32, i32
  }
  func.func @transform_2(%arg0: i32) -> (i32, i32) {
    %c0_i32 = arith.constant 0 : i32
    %c0_i32_0 = arith.constant 0 : i32
    %c0_i32_1 = arith.constant 0 : i32
    return %c0_i32, %c0_i32_0 : i32, i32
  }
  func.func @transform_3(%arg0: i32) -> (i32, i32) {
    %c0_i32 = arith.constant 0 : i32
    %c0_i32_0 = arith.constant 0 : i32
    %c0_i32_1 = arith.constant 0 : i32
    return %c0_i32, %c0_i32_0 : i32, i32
  }
  func.func @transform_4(%arg0: i32) -> (i32, i32, i32) {
    %c0_i32 = arith.constant 0 : i32
    %c0_i32_0 = arith.constant 0 : i32
    %c0_i32_1 = arith.constant 0 : i32
    %c0_i32_2 = arith.constant 0 : i32
    return %c0_i32, %c0_i32_0, %c0_i32_1 : i32, i32, i32
  }
  func.func @transform_5(%arg0: i32) -> (i32, i32) {
    %c0_i32 = arith.constant 0 : i32
    %c0_i32_0 = arith.constant 0 : i32
    %c0_i32_1 = arith.constant 0 : i32
    return %c0_i32, %c0_i32_0 : i32, i32
  }
  func.func @transform_6(%arg0: i32) -> (i32, i32) {
    %c0_i32 = arith.constant 0 : i32
    %c0_i32_0 = arith.constant 0 : i32
    %c0_i32_1 = arith.constant 0 : i32
    return %c0_i32, %c0_i32_0 : i32, i32
  }
  func.func @transform_7(%arg0: i32) -> (i32, i32) {
    %c0_i32 = arith.constant 0 : i32
    %c0_i32_0 = arith.constant 0 : i32
    %c0_i32_1 = arith.constant 0 : i32
    return %c0_i32, %c0_i32_0 : i32, i32
  }
  func.func @transform_8(%arg0: i32) -> (i32, i32) {
    %c0_i32 = arith.constant 0 : i32
    %c0_i32_0 = arith.constant 0 : i32
    %c0_i32_1 = arith.constant 0 : i32
    return %c0_i32, %c0_i32_0 : i32, i32
  }
  func.func @transform_9(%arg0: i32) -> (i32, i32) {
    %c0_i32 = arith.constant 0 : i32
    %c0_i32_0 = arith.constant 0 : i32
    %c0_i32_1 = arith.constant 0 : i32
    return %c0_i32, %c0_i32_0 : i32, i32
  }
  func.func @transform_10(%arg0: i32) -> (i32, i32) {
    %c0_i32 = arith.constant 0 : i32
    %c0_i32_0 = arith.constant 0 : i32
    %c0_i32_1 = arith.constant 0 : i32
    return %c0_i32, %c0_i32_0 : i32, i32
  }
  func.func @transform_11(%arg0: i32) -> (i32, i32) {
    %c0_i32 = arith.constant 0 : i32
    %c0_i32_0 = arith.constant 0 : i32
    %c0_i32_1 = arith.constant 0 : i32
    return %c0_i32, %c0_i32_0 : i32, i32
  }
  func.func @transform_12(%arg0: i32) -> (i32, i32) {
    %c0_i32 = arith.constant 0 : i32
    %c0_i32_0 = arith.constant 0 : i32
    %c0_i32_1 = arith.constant 0 : i32
    return %c0_i32, %c0_i32_0 : i32, i32
  }
  func.func @transform_13(%arg0: i32) -> (i32, i32) {
    %c0_i32 = arith.constant 0 : i32
    %c0_i32_0 = arith.constant 0 : i32
    %c0_i32_1 = arith.constant 0 : i32
    return %c0_i32, %c0_i32_0 : i32, i32
  }
}

</mosaic_0001>

<bundles_post_ra>
// kernel: _fused_forward.1
= control target key start
LH: loop header
LB: loop body
LE: loop exit
PB: predicated region body
PF: predicated region fallthrough
CT: control target
= control target key end

     0   :  { %18 = vsyncpa [#allocation5], 0  ;;  %s11497_s0 = inlined_call_operand.vmem [shape: f32[2,7,1152], index: 0, kind: input, shape index: {}]   ;;  %s11498_s1 = inlined_call_operand.vmem [shape: f32[25,8,7], index: 1, kind: input, shape index: {}]   ;;  %s11499_s2 = inlined_call_operand.vmem [shape: f32[8,1], index: 2, kind: input, shape index: {}]   ;;  %s11500_s3 = inlined_call_operand.hbm [shape: f32[863,196], index: 3, kind: input, shape index: {}]   ;;  %s11501_s4 = inlined_call_operand.vmem [shape: f32[25,16,8], index: 4, kind: input, shape index: {}]   ;;  %s11502_s5 = inlined_call_operand.vmem [shape: f32[16,1], index: 5, kind: input, shape index: {}]   ;;  %s11503_s6 = inlined_call_operand.vmem [shape: f32[125,25], index: 6, kind: input, shape index: {}]   ;;  %s11504_s7 = inlined_call_operand.vmem [shape: f32[400,120], index: 7, kind: input, shape index: {}]   ;;  %s11505_s8 = inlined_call_operand.vmem [shape: f32[1,120], index: 8, kind: input, shape index: {}]   ;;  %s11506_s9 = inlined_call_operand.vmem [shape: f32[120,84], index: 9, kind: input, shape index: {}]   ;;  %s11507_s10 = inlined_call_operand.vmem [shape: f32[1,84], index: 10, kind: input, shape index: {}]   ;;  %s11508_s11 = inlined_call_operand.vmem [shape: f32[84,16], index: 11, kind: input, shape index: {}]   ;;  %s11509_s12 = inlined_call_operand.vmem [shape: f32[1,16], index: 12, kind: input, shape index: {}]   ;;  %s11510_s13 = inlined_call_operand.hbm [shape: f32[1,16], index: 13, kind: output, shape index: {}]  }
   0x1   :  { %19 = vsyncpa [#allocation6], 0  ;;  %s8983_s25 = smov 0  }
   0x2 LB: > { %s346_s28 = sshll.u32 %s11500_s3, 4  ;;  %s8992_s29 = sadd.s32 4294967295, %s8854_s25   ;;  %s8854_s25 = sphi %s8983_s25, %s25_s25   ;;  %s347_s28 = int_to_ptr.hbm [resolvable:$true] %s346_s28 }
   0x3   : > { %p8049_p0 = scmp.ge.s32.totalorder %s8854_s25, 1  ;;  %p329_p1 = scmp.lt.s32.totalorder %s8854_s25, 3 }
   0x4   : > { %p8050_p2 = scmp.ne.s32.totalorder %s8992_s29, 0  ;;  %p8607_p3 = scmp.eq.s32.totalorder %s8992_s29, 0 }
   0x5   : > { %p330_p4 = pnand %p8049_p0, %p329_p1  ;;  %s8856_s30 = smov [#allocation4]  }
   0x6   : > { %s348_s14 = sshll.u32 %s8856_s30, 4  ;;  %s8857_s15 = smov 256   ;;  %s349_s14 = int_to_ptr.vmem [resolvable:$true] %s348_s14 }
   0x7   : > { %p8603_p5 = pneg %p330_p4  ;;  %s8858_s16 = smov 16  }
   0x8   : > { %399 = sbr.rel (%p330_p4) target bundleno = 3037 (0xbdd), region = 72 }
   0x9   : > { %p8604_p6 = pnand %p8607_p3, %p8603_p5 }
   0xb   : > { %8606 = dma.hbm_to_vmem [thread:$0]  (!%p8604_p6), %s347_s28, 27648, %s349_s14, [#allocation5], %s8857_s15, %s8857_s15, %s8858_s16  }
   0xd   : > { %8845 = dma.done.wait (%p8607_p3), [#allocation5], 27648  }
   0xe   : > { %8847 = vsyncadd (%p8607_p3), [#allocation5], 4294939648  ;;  %p439_p7 = scmp.lt.s32.totalorder %s8992_s29, 1 }
  0x10   : > { %s440_s17 = scalar_select %p439_p7, %s8992_s29, 1 }
  0x11   : > { %447 = sbr.rel (%p8050_p2) target bundleno = 24 (0x18), region = 80 }
  0x12   : > { %s8594_s18 = smul.u32 72, %s440_s17 }
  0x14   : > { %s9003_s21 = scalar_lea.vmem %s11497_s0, %s8594_s18 }
  0x16   : > { %vm448_vm0 = vcmask 122880   ;;  %v8859_v0 = vmov 0.0  }
  0x17   : > { %449 = vst.msk [vmem:[#allocation7] sm:$0x1] %vm448_vm0, %v8859_v0 }
  0x18 PF: > { %v9008_v1 = vld [vmem:[%s9003_s21 + $0x10] sm:$0x7f]  ;;  %v9011_v2 = vld [vmem:[%s9003_s21] sm:$0x7f]  ;;  %s8860_s22 = smov 127   ;;  %s8861_s23 = smov 126  }
  0x19   : > { %473 = vrot.lane.b32.xlu0 %v9008_v1, %s8860_s22  ;;  %469 = vrot.lane.b32.xlu1 %v9011_v2, %s8860_s22  ;;  %v9018_v3 = vld [vmem:[%s9003_s21 + $0x20] sm:$0x7f]  ;;  %v9023_v4 = vld [vmem:[%s9003_s21 + $0x18] sm:$0x7f]  ;;  %s8862_s24 = smov 125   ;;  %s8863_s26 = smov 124  }
  0x1a   : > { %477 = vrot.lane.b32.xlu2 %v9018_v3, %s8860_s22  ;;  %v9026_v5 = vld [vmem:[%s9003_s21 + $0x8] sm:$0x7f]  ;;  %v9038_v7 = vld [vmem:[%s9003_s21 + $0x30] sm:$0x7f]  ;;  %v9041_v8 = vld [vmem:[%s9003_s21 + $0x38] sm:$0x7f] }
  0x1b   : > { %v9029_v6 = vld [vmem:[%s9003_s21 + $0x28] sm:$0x7f]  ;;  %s8864_s27 = smov 96   ;;  %vm497_vm1 = vcmask 1046528   ;;  %s8865_s28 = smov 95   ;;  %vm493_vm2 = vcmask 56320  }
  0x1c   : > { %8073 = vmatpush.msk.msra.mxu0 %vm497_vm1, %v9026_v5  ;;  %v9122_v11 = vld [vmem:[%s11498_s1] sm:$0xff]  ;;  %vm485_vm3 = vcmask 1039360   ;;  %v8056_v18 = vld [vmem:[%s11498_s1 + $0x8] sm:$0xff]  ;;  %s11511_s17 = smov 94   ;;  %vm827_vm4 = vcmask 1031168   ;;  %s8867_s18 = smov 93  }
  0x1d   : > { %8074 = vmatmul.msk.f32.vlgmr.msra.gmra.mxu0 %vm493_vm2, %v9122_v11  ;;  %v8085_v43 = vld [vmem:[%s11498_s1 + $0x10] sm:$0xff]  ;;  %vm1017_vm5 = vcmask 1022976   ;;  %v8100_v53 = vld [vmem:[%s11498_s1 + $0x18] sm:$0xff]  ;;  %s8868_s14 = smov 92   ;;  %vm1207_vm6 = vcmask 1014784   ;;  %s8869_s15 = smov 64  }
  0x1e   : > { %8081 = vmatpush.msk.msrb.mxu0 %vm497_vm1, %v9029_v6  ;;  %vm1397_vm7 = vcmask 785408   ;;  %vm1587_vm8 = vcmask 777216   ;;  %vm1777_vm9 = vcmask 769024   ;;  %s8872_s19 = smov 61   ;;  %vm1967_vm10 = vcmask 760832   ;;  %s8873_s30 = smov 60  }
  0x1f   : > { %vm2157_vm11 = vcmask 752640   ;;  %s8874_s16 = smov 32   ;;  %vm2347_vm12 = vcmask 523264   ;;  %s8875_s20 = smov 31   ;;  %vm2537_vm13 = vcmask 515072   ;;  %vm2727_vm14 = vcmask 506880  }
  0x20   : > { %vm2917_vm15 = vcmask 498688   ;;  %vm3107_vm0 = vcmask 490496   ;;  %p8589_p8 = scmp.ne.s32.totalorder %s8992_s29, 1 }
  0x21   : > { %475 = vrot.lane.b32.xlu0 %v9023_v4, %s8860_s22  ;;  %471 = vrot.lane.b32.xlu1 %v9026_v5, %s8860_s22 }
  0x22   : > { %479 = vrot.lane.b32.xlu2 %v9029_v6, %s8860_s22 }
  0x25   : > { %8082 = vmatmul.msk.f32.vlgmr.msrb.gmra.mxu0 %vm493_vm2, %v9122_v11 }
  0x29   : > { %481 = vrot.lane.b32.xlu0 %v9038_v7, %s8860_s22  ;;  %483 = vrot.lane.b32.xlu1 %v9041_v8, %s8860_s22 }
  0x2a   : > { %811 = vrot.lane.b32.xlu2 %v9011_v2, %s8861_s23 }
  0x31   : > { %813 = vrot.lane.b32.xlu0 %v9026_v5, %s8861_s23  ;;  %815 = vrot.lane.b32.xlu1 %v9008_v1, %s8861_s23 }
  0x32   : > { %819 = vrot.lane.b32.xlu2 %v9018_v3, %s8861_s23 }
  0x39   : > { %821 = vrot.lane.b32.xlu0 %v9029_v6, %s8861_s23  ;;  %817 = vrot.lane.b32.xlu1 %v9023_v4, %s8861_s23 }
  0x3a   : > { %823 = vrot.lane.b32.xlu2 %v9038_v7, %s8861_s23 }
  0x41   : > { %1003 = vrot.lane.b32.xlu0 %v9026_v5, %s8862_s24  ;;  %1005 = vrot.lane.b32.xlu1 %v9008_v1, %s8862_s24 }
  0x42   : > { %825 = vrot.lane.b32.xlu2 %v9041_v8, %s8861_s23 }
  0x49   : > { %1001 = vrot.lane.b32.xlu0 %v9011_v2, %s8862_s24  ;;  %1007 = vrot.lane.b32.xlu1 %v9023_v4, %s8862_s24 }
  0x4a   : > { %1011 = vrot.lane.b32.xlu2 %v9029_v6, %s8862_s24 }
  0x51   : > { %1013 = vrot.lane.b32.xlu0 %v9038_v7, %s8862_s24  ;;  %1009 = vrot.lane.b32.xlu1 %v9018_v3, %s8862_s24 }
  0x52   : > { %1015 = vrot.lane.b32.xlu2 %v9041_v8, %s8862_s24 }
  0x59   : > { %1195 = vrot.lane.b32.xlu0 %v9008_v1, %s8863_s26  ;;  %1197 = vrot.lane.b32.xlu1 %v9023_v4, %s8863_s26 }
  0x5a   : > { %1191 = vrot.lane.b32.xlu2 %v9011_v2, %s8863_s26 }
  0x61   : > { %1193 = vrot.lane.b32.xlu0 %v9026_v5, %s8863_s26  ;;  %1199 = vrot.lane.b32.xlu1 %v9018_v3, %s8863_s26 }
  0x62   : > { %1203 = vrot.lane.b32.xlu2 %v9038_v7, %s8863_s26 }
  0x69   : > { %1205 = vrot.lane.b32.xlu0 %v9041_v8, %s8863_s26  ;;  %1201 = vrot.lane.b32.xlu1 %v9029_v6, %s8863_s26 }
  0x6a   : > { %1381 = vrot.lane.b32.xlu2 %v9011_v2, %s8864_s27 }
  0x71   : > { %1383 = vrot.lane.b32.xlu0 %v9026_v5, %s8864_s27  ;;  %1387 = vrot.lane.b32.xlu1 %v9023_v4, %s8864_s27 }
  0x72   : > { %1389 = vrot.lane.b32.xlu2 %v9018_v3, %s8864_s27 }
  0x74   : > { %v478_v9 = vpop.permute.xlu2 %477 }
  0x79   : > { %1385 = vrot.lane.b32.xlu0 %v9008_v1, %s8864_s27  ;;  %1391 = vrot.lane.b32.xlu1 %v9029_v6, %s8864_s27 }
  0x7a   : > { %1571 = vrot.lane.b32.xlu2 %v9011_v2, %s8865_s28 }
  0x7c   : > { %v480_v10 = vpop.permute.xlu2 %479 }
  0x7d   : > { %v490_v24 = vsel %vm485_vm3, %v478_v9, %v480_v10 }
  0x81   : > { %1573 = vrot.lane.b32.xlu0 %v9026_v5, %s8865_s28  ;;  %1393 = vrot.lane.b32.xlu1 %v9038_v7, %s8864_s27 }
  0x82   : > { %1395 = vrot.lane.b32.xlu2 %v9041_v8, %s8864_s27 }
  0x84   : > { %v812_v12 = vpop.permute.xlu2 %811 }
  0x89   : > { %1575 = vrot.lane.b32.xlu0 %v9008_v1, %s8865_s28  ;;  %1579 = vrot.lane.b32.xlu1 %v9018_v3, %s8865_s28 }
  0x8a   : > { %1581 = vrot.lane.b32.xlu2 %v9029_v6, %s8865_s28 }
  0x8b   : > { %v474_v13 = vpop.permute.xlu0 %473  ;;  %v470_v14 = vpop.permute.xlu1 %469 }
  0x8c   : > { %v9132_v15 = vpop.permute.xlu2 %819 }
  0x91   : > { %1577 = vrot.lane.b32.xlu0 %v9023_v4, %s8865_s28  ;;  %1583 = vrot.lane.b32.xlu1 %v9038_v7, %s8865_s28 }
  0x92   : > { %1763 = vrot.lane.b32.xlu2 %v9026_v5, %s11511_s17 }
  0x93   : > { %v476_v16 = vpop.permute.xlu0 %475  ;;  %v472_v17 = vpop.permute.xlu1 %471 }
  0x94   : > { %v486_v19 = vsel %vm485_vm3, %v470_v14, %v472_v17  ;;  %v488_v20 = vsel %vm485_vm3, %v474_v13, %v476_v16  ;;  %v489_v21 = vsel %vm485_vm3, %v476_v16, %v478_v9  ;;  %v487_v22 = vsel %vm485_vm3, %v472_v17, %v474_v13  ;;  %v824_v23 = vpop.permute.xlu2 %823  ;;  %v8115_v14 = vld [vmem:[%s11498_s1 + $0x20] sm:$0xff] }
  0x95   : > { %8057 = vmatpush.msk.msra.mxu1 %vm497_vm1, %v486_v19  ;;  %8061 = vmatpush.msk.msra.mxu2 %vm497_vm1, %v488_v20 }
  0x96   : > { %8063 = vmatpush.msk.msra.mxu3 %vm497_vm1, %v489_v21  ;;  %8058 = vmatmul.msk.f32.vlgmr.msra.gmra.mxu1 %vm493_vm2, %v8056_v18 }
  0x97   : > { %8059 = vmatpush.msk.msrb.mxu1 %vm497_vm1, %v487_v22  ;;  %8062 = vmatmul.msk.f32.vlgmr.msra.gmra.mxu2 %vm493_vm2, %v8056_v18 }
  0x98   : > { %8065 = vmatpush.msk.msrb.mxu2 %vm497_vm1, %v490_v24  ;;  %8064 = vmatmul.msk.f32.vlgmr.msra.gmra.mxu3 %vm493_vm2, %v8056_v18  ;;  %v8130_v24 = vld [vmem:[%s11498_s1 + $0x28] sm:$0xff] }
  0x99   : > { %1765 = vrot.lane.b32.xlu0 %v9008_v1, %s11511_s17  ;;  %1585 = vrot.lane.b32.xlu1 %v9041_v8, %s8865_s28  ;;  %s8870_s28 = smov 63  }
  0x9a   : > { %8071 = vmatpush.msk.msrb.mxu3 %vm497_vm1, %v9011_v2  ;;  %1761 = vrot.lane.b32.xlu2 %v9011_v2, %s11511_s17 }
  0x9b   : > { %v482_v25 = vpop.permute.xlu0 %481  ;;  %v484_v26 = vpop.permute.xlu1 %483 }
  0x9c   : > { %8079 = vmatpush.msk.msra.mxu3 %vm497_vm1, %v9018_v3  ;;  %v491_v27 = vsel %vm485_vm3, %v480_v10, %v482_v25  ;;  %v492_v28 = vsel %vm485_vm3, %v482_v25, %v484_v26  ;;  %v826_v29 = vpop.permute.xlu2 %825 }
  0x9d   : > { %8067 = vmatpush.msk.msra.mxu1 %vm497_vm1, %v491_v27  ;;  %8069 = vmatpush.msk.msra.mxu2 %vm497_vm1, %v492_v28  ;;  %v834_v37 = vsel %vm827_vm4, %v824_v23, %v826_v29 }
  0x9e   : > { %8060 = vmatmul.msk.f32.vlgmr.msrb.gmra.mxu1 %vm493_vm2, %v8056_v18 }
  0x9f   : > { %8066 = vmatmul.msk.f32.vlgmr.msrb.gmra.mxu2 %vm493_vm2, %v8056_v18  ;;  %8075 = vmatpush.msk.msrb.mxu1 %vm497_vm1, %v9008_v1 }
  0xa0   : > { %8072 = vmatmul.msk.f32.vlgmr.msrb.gmra.mxu3 %vm493_vm2, %v9122_v11  ;;  %8077 = vmatpush.msk.msrb.mxu2 %vm497_vm1, %v9023_v4 }
  0xa1   : > { %1767 = vrot.lane.b32.xlu0 %v9023_v4, %s11511_s17  ;;  %1771 = vrot.lane.b32.xlu1 %v9029_v6, %s11511_s17 }
  0xa2   : > { %1773 = vrot.lane.b32.xlu2 %v9038_v7, %s11511_s17 }
  0xa3   : > { %v814_v30 = vpop.permute.xlu0 %813  ;;  %v816_v31 = vpop.permute.xlu1 %815 }
  0xa4   : > { %v829_v32 = vsel %vm827_vm4, %v814_v30, %v816_v31  ;;  %v828_v33 = vsel %vm827_vm4, %v812_v12, %v814_v30  ;;  %v9189_v34 = vpop.permute.xlu2 %1011 }
  0xa5   : > { %8088 = vmatpush.msk.msrb.mxu3 %vm497_vm1, %v829_v32 }
  0xa6   : > { %8068 = vmatmul.msk.f32.vlgmr.msra.gmra.mxu1 %vm493_vm2, %v8056_v18 }
  0xa7   : > { %8070 = vmatmul.msk.f32.vlgmr.msra.gmra.mxu2 %vm493_vm2, %v8056_v18  ;;  %8083 = vmatpush.msk.msra.mxu1 %vm497_vm1, %v9038_v7 }
  0xa8   : > { %8086 = vmatpush.msk.msra.mxu2 %vm497_vm1, %v828_v33  ;;  %8080 = vmatmul.msk.f32.vlgmr.msra.gmra.mxu3 %vm493_vm2, %v9122_v11 }
  0xa9   : > { %1769 = vrot.lane.b32.xlu0 %v9018_v3, %s11511_s17  ;;  %1775 = vrot.lane.b32.xlu1 %v9041_v8, %s11511_s17  ;;  %s11691_s17 = smov 69  }
  0xaa   : > { %1955 = vrot.lane.b32.xlu2 %v9008_v1, %s8867_s18 }
  0xab   : > { %v822_v35 = vpop.permute.xlu0 %821  ;;  %v818_v36 = vpop.permute.xlu1 %817 }
  0xac   : > { %v833_v38 = vsel %vm827_vm4, %v822_v35, %v824_v23  ;;  %v830_v39 = vsel %vm827_vm4, %v816_v31, %v818_v36  ;;  %v831_v40 = vsel %vm827_vm4, %v818_v36, %v9132_v15  ;;  %v832_v41 = vsel %vm827_vm4, %v9132_v15, %v822_v35  ;;  %v1016_v42 = vpop.permute.xlu2 %1015 }
  0xad   : > { %8090 = vmatpush.msk.msra.mxu0 %vm497_vm1, %v830_v39  ;;  %8096 = vmatpush.msk.msra.mxu3 %vm497_vm1, %v833_v38  ;;  %v8145_v39 = vld [vmem:[%s11498_s1 + $0x30] sm:$0xff] }
  0xae   : > { %8076 = vmatmul.msk.f32.vlgmr.msrb.gmra.mxu1 %vm493_vm2, %v9122_v11  ;;  %8091 = vmatmul.msk.f32.vlgmr.msra.gmra.mxu0 %vm493_vm2, %v8085_v43 }
  0xaf   : > { %8098 = vmatpush.msk.msrb.mxu0 %vm497_vm1, %v834_v37  ;;  %8078 = vmatmul.msk.f32.vlgmr.msrb.gmra.mxu2 %vm493_vm2, %v9122_v11 }
  0xb0   : > { %8092 = vmatpush.msk.msrb.mxu1 %vm497_vm1, %v831_v40  ;;  %8094 = vmatpush.msk.msrb.mxu2 %vm497_vm1, %v832_v41 }
  0xb1   : > { %8089 = vmatmul.msk.f32.vlgmr.msrb.gmra.mxu3 %vm493_vm2, %v8085_v43  ;;  %1957 = vrot.lane.b32.xlu0 %v9023_v4, %s8867_s18 }
  0xb2   : > { %1951 = vrot.lane.b32.xlu1 %v9011_v2, %s8867_s18  ;;  %1953 = vrot.lane.b32.xlu2 %v9026_v5, %s8867_s18 }
  0xb3   : > { %v1004_v44 = vpop.permute.xlu0 %1003  ;;  %v1006_v45 = vpop.permute.xlu1 %1005 }
  0xb4   : > { %v1019_v46 = vsel %vm1017_vm5, %v1004_v44, %v1006_v45  ;;  %v1192_v47 = vpop.permute.xlu2 %1191 }
  0xb6   : > { %8084 = vmatmul.msk.f32.vlgmr.msra.gmra.mxu1 %vm493_vm2, %v9122_v11  ;;  %8099 = vmatmul.msk.f32.vlgmr.msrb.gmra.mxu0 %vm493_vm2, %v8085_v43 }
  0xb7   : > { %8087 = vmatmul.msk.f32.vlgmr.msra.gmra.mxu2 %vm493_vm2, %v8085_v43 }
  0xb8   : > { %8103 = vmatpush.msk.msra.mxu2 %vm497_vm1, %v1019_v46 }
  0xb9   : > { %8097 = vmatmul.msk.f32.vlgmr.msra.gmra.mxu3 %vm493_vm2, %v8085_v43  ;;  %1959 = vrot.lane.b32.xlu0 %v9018_v3, %s8867_s18 }
  0xba   : > { %1963 = vrot.lane.b32.xlu1 %v9038_v7, %s8867_s18  ;;  %1965 = vrot.lane.b32.xlu2 %v9041_v8, %s8867_s18 }
  0xbb   : > { %v1002_v48 = vpop.permute.xlu0 %1001  ;;  %v1008_v49 = vpop.permute.xlu1 %1007 }
  0xbc   : > { %v1018_v50 = vsel %vm1017_vm5, %v1002_v48, %v1004_v44  ;;  %v1020_v51 = vsel %vm1017_vm5, %v1006_v45, %v1008_v49  ;;  %v1204_v52 = vpop.permute.xlu2 %1203 }
  0xbd   : > { %8101 = vmatpush.msk.msra.mxu1 %vm497_vm1, %v1018_v50  ;;  %8105 = vmatpush.msk.msrb.mxu3 %vm497_vm1, %v1020_v51 }
  0xbe   : > { %8093 = vmatmul.msk.f32.vlgmr.msrb.gmra.mxu1 %vm493_vm2, %v8085_v43 }
  0xbf   : > { %8095 = vmatmul.msk.f32.vlgmr.msrb.gmra.mxu2 %vm493_vm2, %v8085_v43 }
  0xc1   : > { %8106 = vmatmul.msk.f32.vlgmr.msrb.gmra.mxu3 %vm493_vm2, %v8100_v53  ;;  %1961 = vrot.lane.b32.xlu0 %v9029_v6, %s8867_s18  ;;  %s8877_s18 = smov 29  }
  0xc2   : > { %2141 = vrot.lane.b32.xlu1 %v9011_v2, %s8868_s14  ;;  %2143 = vrot.lane.b32.xlu2 %v9026_v5, %s8868_s14 }
  0xc3   : > { %v1014_v54 = vpop.permute.xlu0 %1013  ;;  %v1010_v55 = vpop.permute.xlu1 %1009 }
  0xc4   : > { %v1023_v56 = vsel %vm1017_vm5, %v9189_v34, %v1014_v54  ;;  %v1024_v57 = vsel %vm1017_vm5, %v1014_v54, %v1016_v42  ;;  %v1021_v58 = vsel %vm1017_vm5, %v1008_v49, %v1010_v55  ;;  %v1022_v59 = vsel %vm1017_vm5, %v1010_v55, %v9189_v34  ;;  %v1382_v60 = vpop.permute.xlu2 %1381  ;;  %v8160_v55 = vld [vmem:[%s11498_s1 + $0x38] sm:$0xff] }
  0xc5   : > { %8107 = vmatpush.msk.msra.mxu0 %vm497_vm1, %v1021_v58  ;;  %8109 = vmatpush.msk.msrb.mxu1 %vm497_vm1, %v1022_v59 }
  0xc6   : > { %8111 = vmatpush.msk.msrb.mxu2 %vm497_vm1, %v1023_v56  ;;  %8113 = vmatpush.msk.msra.mxu3 %vm497_vm1, %v1024_v57 }
  0xc7   : > { %8104 = vmatmul.msk.f32.vlgmr.msra.gmra.mxu2 %vm493_vm2, %v8100_v53  ;;  %8102 = vmatmul.msk.f32.vlgmr.msra.gmra.mxu1 %vm493_vm2, %v8100_v53 }
  0xc8   : > { %8108 = vmatmul.msk.f32.vlgmr.msra.gmra.mxu0 %vm493_vm2, %v8100_v53 }
  0xc9   : > { %8114 = vmatmul.msk.f32.vlgmr.msra.gmra.mxu3 %vm493_vm2, %v8100_v53  ;;  %2147 = vrot.lane.b32.xlu0 %v9023_v4, %s8868_s14 }
  0xca   : > { %2149 = vrot.lane.b32.xlu1 %v9018_v3, %s8868_s14  ;;  %2145 = vrot.lane.b32.xlu2 %v9008_v1, %s8868_s14 }
  0xcb   : > { %v1196_v61 = vpop.permute.xlu0 %1195  ;;  %v1198_v62 = vpop.permute.xlu1 %1197 }
  0xcc   : > { %v1210_v63 = vsel %vm1207_vm6, %v1196_v61, %v1198_v62  ;;  %v1390_v0 = vpop.permute.xlu2 %1389 }
  0xcd   : > { %8120 = vmatpush.msk.msra.mxu2 %vm497_vm1, %v1210_v63 }
  0xcf   : > { %8110 = vmatmul.msk.f32.vlgmr.msrb.gmra.mxu1 %vm493_vm2, %v8100_v53  ;;  %8112 = vmatmul.msk.f32.vlgmr.msrb.gmra.mxu2 %vm493_vm2, %v8100_v53 }
  0xd1   : > { %2151 = vrot.lane.b32.xlu0 %v9029_v6, %s8868_s14 }
  0xd2   : > { %2331 = vrot.lane.b32.xlu1 %v9011_v2, %s8869_s15  ;;  %2333 = vrot.lane.b32.xlu2 %v9026_v5, %s8869_s15 }
  0xd3   : > { %v1194_v9 = vpop.permute.xlu0 %1193  ;;  %v1200_v10 = vpop.permute.xlu1 %1199 }
  0xd4   : > { %v1208_v11 = vsel %vm1207_vm6, %v1192_v47, %v1194_v9  ;;  %v1209_v12 = vsel %vm1207_vm6, %v1194_v9, %v1196_v61  ;;  %v1211_v13 = vsel %vm1207_vm6, %v1198_v62, %v1200_v10  ;;  %v1572_v15 = vpop.permute.xlu2 %1571 }
  0xd5   : > { %8116 = vmatpush.msk.msrb.mxu0 %vm497_vm1, %v1208_v11  ;;  %8118 = vmatpush.msk.msra.mxu1 %vm497_vm1, %v1209_v12 }
  0xd6   : > { %8122 = vmatpush.msk.msrb.mxu3 %vm497_vm1, %v1211_v13  ;;  %8117 = vmatmul.msk.f32.vlgmr.msrb.gmra.mxu0 %vm493_vm2, %v8115_v14 }
  0xd7   : > { %8121 = vmatmul.msk.f32.vlgmr.msra.gmra.mxu2 %vm493_vm2, %v8115_v14  ;;  %8119 = vmatmul.msk.f32.vlgmr.msra.gmra.mxu1 %vm493_vm2, %v8115_v14 }
  0xd8   : > { %8123 = vmatmul.msk.f32.vlgmr.msrb.gmra.mxu3 %vm493_vm2, %v8115_v14 }
  0xd9   : > { %2153 = vrot.lane.b32.xlu0 %v9038_v7, %s8868_s14 }
  0xda   : > { %2155 = vrot.lane.b32.xlu1 %v9041_v8, %s8868_s14  ;;  %2335 = vrot.lane.b32.xlu2 %v9008_v1, %s8869_s15  ;;  %s8876_s14 = smov 30  }
  0xdb   : > { %v1206_v16 = vpop.permute.xlu0 %1205  ;;  %v1202_v17 = vpop.permute.xlu1 %1201 }
  0xdc   : > { %v1214_v18 = vsel %vm1207_vm6, %v1204_v52, %v1206_v16  ;;  %v1212_v19 = vsel %vm1207_vm6, %v1200_v10, %v1202_v17  ;;  %v1213_v20 = vsel %vm1207_vm6, %v1202_v17, %v1204_v52  ;;  %v1396_v21 = vpop.permute.xlu2 %1395  ;;  %v8175_v17 = vld [vmem:[%s11498_s1 + $0x40] sm:$0xff] }
  0xdd   : > { %8124 = vmatpush.msk.msra.mxu0 %vm497_vm1, %v1212_v19  ;;  %8126 = vmatpush.msk.msrb.mxu1 %vm497_vm1, %v1213_v20 }
  0xde   : > { %8128 = vmatpush.msk.msrb.mxu2 %vm497_vm1, %v1214_v18  ;;  %8125 = vmatmul.msk.f32.vlgmr.msra.gmra.mxu0 %vm493_vm2, %v8115_v14 }
  0xdf   : > { %8129 = vmatmul.msk.f32.vlgmr.msrb.gmra.mxu2 %vm493_vm2, %v8115_v14  ;;  %8127 = vmatmul.msk.f32.vlgmr.msrb.gmra.mxu1 %vm493_vm2, %v8115_v14 }
  0xe1   : > { %2339 = vrot.lane.b32.xlu0 %v9018_v3, %s8869_s15 }
  0xe2   : > { %2341 = vrot.lane.b32.xlu1 %v9029_v6, %s8869_s15  ;;  %2337 = vrot.lane.b32.xlu2 %v9023_v4, %s8869_s15 }
  0xe3   : > { %v1384_v22 = vpop.permute.xlu0 %1383  ;;  %v1388_v23 = vpop.permute.xlu1 %1387 }
  0xe4   : > { %v1398_v25 = vsel %vm1397_vm7, %v1382_v60, %v1384_v22  ;;  %v1401_v26 = vsel %vm1397_vm7, %v1388_v23, %v1390_v0  ;;  %v1582_v27 = vpop.permute.xlu2 %1581 }
  0xe5   : > { %8131 = vmatpush.msk.msra.mxu3 %vm497_vm1, %v1398_v25  ;;  %8137 = vmatpush.msk.msra.mxu2 %vm497_vm1, %v1401_v26 }
  0xe6   : > { %8132 = vmatmul.msk.f32.vlgmr.msra.gmra.mxu3 %vm493_vm2, %v8130_v24 }
  0xe7   : > { %8138 = vmatmul.msk.f32.vlgmr.msra.gmra.mxu2 %vm493_vm2, %v8130_v24 }
  0xe9   : > { %2343 = vrot.lane.b32.xlu0 %v9038_v7, %s8869_s15 }
  0xea   : > { %2523 = vrot.lane.b32.xlu1 %v9026_v5, %s8870_s28  ;;  %2525 = vrot.lane.b32.xlu2 %v9008_v1, %s8870_s28 }
  0xeb   : > { %v1386_v28 = vpop.permute.xlu0 %1385  ;;  %v1392_v29 = vpop.permute.xlu1 %1391 }
  0xec   : > { %v1399_v30 = vsel %vm1397_vm7, %v1384_v22, %v1386_v28  ;;  %v1400_v31 = vsel %vm1397_vm7, %v1386_v28, %v1388_v23  ;;  %v1402_v32 = vsel %vm1397_vm7, %v1390_v0, %v1392_v29  ;;  %v1764_v33 = vpop.permute.xlu2 %1763 }
  0xed   : > { %8133 = vmatpush.msk.msrb.mxu0 %vm497_vm1, %v1399_v30  ;;  %8135 = vmatpush.msk.msra.mxu1 %vm497_vm1, %v1400_v31  ;;  %v8190_v31 = vld [vmem:[%s11498_s1 + $0x48] sm:$0xff] }
  0xee   : > { %8139 = vmatpush.msk.msrb.mxu3 %vm497_vm1, %v1402_v32  ;;  %8134 = vmatmul.msk.f32.vlgmr.msrb.gmra.mxu0 %vm493_vm2, %v8130_v24 }
  0xef   : > { %8136 = vmatmul.msk.f32.vlgmr.msra.gmra.mxu1 %vm493_vm2, %v8130_v24  ;;  %8140 = vmatmul.msk.f32.vlgmr.msrb.gmra.mxu3 %vm493_vm2, %v8130_v24 }
  0xf1   : > { %2345 = vrot.lane.b32.xlu0 %v9041_v8, %s8869_s15  ;;  %s8871_s15 = smov 62  }
  0xf2   : > { %2521 = vrot.lane.b32.xlu1 %v9011_v2, %s8870_s28  ;;  %2527 = vrot.lane.b32.xlu2 %v9023_v4, %s8870_s28 }
  0xf3   : > { %v1574_v34 = vpop.permute.xlu0 %1573  ;;  %v1394_v35 = vpop.permute.xlu1 %1393 }
  0xf4   : > { %v1588_v36 = vsel %vm1587_vm8, %v1572_v15, %v1574_v34  ;;  %v1403_v37 = vsel %vm1397_vm7, %v1392_v29, %v1394_v35  ;;  %v1404_v38 = vsel %vm1397_vm7, %v1394_v35, %v1396_v21  ;;  %v1762_v40 = vpop.permute.xlu2 %1761 }
  0xf5   : > { %8141 = vmatpush.msk.msra.mxu0 %vm497_vm1, %v1403_v37  ;;  %8146 = vmatpush.msk.msrb.mxu2 %vm497_vm1, %v1588_v36  ;;  %v1778_v48 = vsel %vm1777_vm9, %v1762_v40, %v1764_v33 }
  0xf6   : > { %8143 = vmatpush.msk.msrb.mxu1 %vm497_vm1, %v1404_v38  ;;  %8142 = vmatmul.msk.f32.vlgmr.msra.gmra.mxu0 %vm493_vm2, %v8130_v24 }
  0xf7   : > { %8147 = vmatmul.msk.f32.vlgmr.msrb.gmra.mxu2 %vm493_vm2, %v8145_v39  ;;  %8144 = vmatmul.msk.f32.vlgmr.msrb.gmra.mxu1 %vm493_vm2, %v8130_v24 }
  0xf9   : > { %2531 = vrot.lane.b32.xlu0 %v9029_v6, %s8870_s28 }
  0xfa   : > { %2533 = vrot.lane.b32.xlu1 %v9038_v7, %s8870_s28  ;;  %2529 = vrot.lane.b32.xlu2 %v9018_v3, %s8870_s28 }
  0xfb   : > { %v1576_v41 = vpop.permute.xlu0 %1575  ;;  %v1580_v42 = vpop.permute.xlu1 %1579 }
  0xfc   : > { %v1589_v43 = vsel %vm1587_vm8, %v1574_v34, %v1576_v41  ;;  %v1592_v44 = vsel %vm1587_vm8, %v1580_v42, %v1582_v27  ;;  %v1774_v45 = vpop.permute.xlu2 %1773 }
  0xfd   : > { %8148 = vmatpush.msk.msra.mxu3 %vm497_vm1, %v1589_v43  ;;  %8154 = vmatpush.msk.msra.mxu2 %vm497_vm1, %v1592_v44 }
  0xfe   : > { %8149 = vmatmul.msk.f32.vlgmr.msra.gmra.mxu3 %vm493_vm2, %v8145_v39 }
  0xff   : > { %8155 = vmatmul.msk.f32.vlgmr.msra.gmra.mxu2 %vm493_vm2, %v8145_v39 }
 0x101   : > { %2535 = vrot.lane.b32.xlu0 %v9041_v8, %s8870_s28  ;;  %s8878_s28 = smov 28  }
 0x102   : > { %2715 = vrot.lane.b32.xlu1 %v9008_v1, %s8871_s15  ;;  %2717 = vrot.lane.b32.xlu2 %v9023_v4, %s8871_s15 }
 0x103   : > { %v1578_v46 = vpop.permute.xlu0 %1577  ;;  %v1584_v47 = vpop.permute.xlu1 %1583 }
 0x104   : > { %v1590_v49 = vsel %vm1587_vm8, %v1576_v41, %v1578_v46  ;;  %v1591_v50 = vsel %vm1587_vm8, %v1578_v46, %v1580_v42  ;;  %v1593_v51 = vsel %vm1587_vm8, %v1582_v27, %v1584_v47  ;;  %v1956_v52 = vpop.permute.xlu2 %1955  ;;  %v9508_v41 = vld [vmem:[%s11498_s1 + $0x50] sm:$0xff] }
 0x105   : > { %8150 = vmatpush.msk.msrb.mxu0 %vm497_vm1, %v1590_v49  ;;  %8152 = vmatpush.msk.msra.mxu1 %vm497_vm1, %v1591_v50 }
 0x106   : > { %8156 = vmatpush.msk.msrb.mxu3 %vm497_vm1, %v1593_v51  ;;  %8151 = vmatmul.msk.f32.vlgmr.msrb.gmra.mxu0 %vm493_vm2, %v8145_v39 }
 0x107   : > { %8161 = vmatpush.msk.msrb.mxu1 %vm497_vm1, %v1778_v48  ;;  %8157 = vmatmul.msk.f32.vlgmr.msrb.gmra.mxu3 %vm493_vm2, %v8145_v39 }
 0x108   : > { %8153 = vmatmul.msk.f32.vlgmr.msra.gmra.mxu1 %vm493_vm2, %v8145_v39 }
 0x109   : > { %2711 = vrot.lane.b32.xlu0 %v9011_v2, %s8871_s15 }
 0x10a   : > { %2713 = vrot.lane.b32.xlu1 %v9026_v5, %s8871_s15  ;;  %2719 = vrot.lane.b32.xlu2 %v9018_v3, %s8871_s15 }
 0x10b   : > { %v1766_v53 = vpop.permute.xlu0 %1765  ;;  %v1586_v54 = vpop.permute.xlu1 %1585 }
 0x10c   : > { %v1779_v56 = vsel %vm1777_vm9, %v1764_v33, %v1766_v53  ;;  %v1594_v57 = vsel %vm1587_vm8, %v1584_v47, %v1586_v54  ;;  %v1954_v58 = vpop.permute.xlu2 %1953 }
 0x10d   : > { %8158 = vmatpush.msk.msra.mxu0 %vm497_vm1, %v1594_v57  ;;  %8163 = vmatpush.msk.msrb.mxu2 %vm497_vm1, %v1779_v56  ;;  %v1969_v13 = vsel %vm1967_vm10, %v1954_v58, %v1956_v52 }
 0x10e   : > { %8164 = vmatmul.msk.f32.vlgmr.msrb.gmra.mxu2 %vm493_vm2, %v8160_v55  ;;  %8159 = vmatmul.msk.f32.vlgmr.msra.gmra.mxu0 %vm493_vm2, %v8145_v39 }
 0x110   : > { %8162 = vmatmul.msk.f32.vlgmr.msrb.gmra.mxu1 %vm493_vm2, %v8160_v55 }
 0x111   : > { %2723 = vrot.lane.b32.xlu0 %v9038_v7, %s8871_s15 }
 0x112   : > { %2725 = vrot.lane.b32.xlu1 %v9041_v8, %s8871_s15  ;;  %2721 = vrot.lane.b32.xlu2 %v9029_v6, %s8871_s15  ;;  %s8888_s15 = smov 99  }
 0x113   : > { %v1768_v59 = vpop.permute.xlu0 %1767  ;;  %v1772_v60 = vpop.permute.xlu1 %1771 }
 0x114   : > { %v1780_v61 = vsel %vm1777_vm9, %v1766_v53, %v1768_v59  ;;  %v1783_v62 = vsel %vm1777_vm9, %v1772_v60, %v1774_v45  ;;  %v1966_v63 = vpop.permute.xlu2 %1965  ;;  %v9543_v54 = vpop.f32.mrf.mxu1 }
 0x115   : > { %8165 = vmatpush.msk.msra.mxu3 %vm497_vm1, %v1780_v61  ;;  %8171 = vmatpush.msk.msra.mxu2 %vm497_vm1, %v1783_v62 }
 0x116   : > { %8166 = vmatmul.msk.f32.vlgmr.msra.gmra.mxu3 %vm493_vm2, %v8160_v55  ;;  %8172 = vmatmul.msk.f32.vlgmr.msra.gmra.mxu2 %vm493_vm2, %v8160_v55 }
 0x119   : > { %2901 = vrot.lane.b32.xlu0 %v9011_v2, %s8872_s19 }
 0x11a   : > { %2903 = vrot.lane.b32.xlu1 %v9026_v5, %s8872_s19  ;;  %2907 = vrot.lane.b32.xlu2 %v9023_v4, %s8872_s19 }
 0x11b   : > { %v1770_v0 = vpop.permute.xlu0 %1769  ;;  %v1776_v9 = vpop.permute.xlu1 %1775 }
 0x11c   : > { %v1781_v10 = vsel %vm1777_vm9, %v1768_v59, %v1770_v0  ;;  %v1782_v11 = vsel %vm1777_vm9, %v1770_v0, %v1772_v60  ;;  %v1784_v12 = vsel %vm1777_vm9, %v1774_v45, %v1776_v9  ;;  %v2144_v14 = vpop.permute.xlu2 %2143  ;;  %vm3297_vm9 = vcmask 261120  }
 0x11d   : > { %8167 = vmatpush.msk.msrb.mxu0 %vm497_vm1, %v1781_v10  ;;  %8169 = vmatpush.msk.msra.mxu1 %vm497_vm1, %v1782_v11 }
 0x11e   : > { %8173 = vmatpush.msk.msrb.mxu3 %vm497_vm1, %v1784_v12  ;;  %8168 = vmatmul.msk.f32.vlgmr.msrb.gmra.mxu0 %vm493_vm2, %v8160_v55  ;;  %v9585_v12 = vpop.f32.mrf.mxu3 }
 0x11f   : > { %8170 = vmatmul.msk.f32.vlgmr.msra.gmra.mxu1 %vm493_vm2, %v8160_v55  ;;  %8174 = vmatmul.msk.f32.vlgmr.msrb.gmra.mxu3 %vm493_vm2, %v8160_v55 }
 0x120   : > { %8178 = vmatpush.msk.msrb.mxu1 %vm497_vm1, %v1969_v13 }
 0x121   : > { %2909 = vrot.lane.b32.xlu0 %v9018_v3, %s8872_s19 }
 0x122   : > { %2905 = vrot.lane.b32.xlu1 %v9008_v1, %s8872_s19  ;;  %2911 = vrot.lane.b32.xlu2 %v9029_v6, %s8872_s19 }
 0x123   : > { %v1958_v15 = vpop.permute.xlu0 %1957 }
 0x124   : > { %v1952_v16 = vpop.permute.xlu1 %1951  ;;  %v1970_v18 = vsel %vm1967_vm10, %v1956_v52, %v1958_v15  ;;  %v2146_v20 = vpop.permute.xlu2 %2145 }
 0x125   : > { %v1968_v19 = vsel %vm1967_vm10, %v1952_v16, %v1954_v58  ;;  %8180 = vmatpush.msk.msrb.mxu2 %vm497_vm1, %v1970_v18  ;;  %v2159_v32 = vsel %vm2157_vm11, %v2144_v14, %v2146_v20  ;;  %v9555_v58 = vpop.f32.mrf.mxu2 }
 0x126   : > { %8176 = vmatpush.msk.msra.mxu0 %vm497_vm1, %v1968_v19  ;;  %8181 = vmatmul.msk.f32.vlgmr.msrb.gmra.mxu2 %vm493_vm2, %v8175_v17 }
 0x127   : > { %8177 = vmatmul.msk.f32.vlgmr.msra.gmra.mxu0 %vm493_vm2, %v8175_v17  ;;  %8179 = vmatmul.msk.f32.vlgmr.msrb.gmra.mxu1 %vm493_vm2, %v8175_v17 }
 0x129   : > { %3091 = vrot.lane.b32.xlu0 %v9011_v2, %s8873_s30 }
 0x12a   : > { %3093 = vrot.lane.b32.xlu1 %v9026_v5, %s8873_s30  ;;  %2913 = vrot.lane.b32.xlu2 %v9038_v7, %s8872_s19 }
 0x12b   : > { %v1960_v21 = vpop.permute.xlu0 %1959 }
 0x12c   : > { %v1964_v22 = vpop.permute.xlu1 %1963  ;;  %v1971_v23 = vsel %vm1967_vm10, %v1958_v15, %v1960_v21  ;;  %v2334_v25 = vpop.permute.xlu2 %2333 }
 0x12d   : > { %v1974_v24 = vsel %vm1967_vm10, %v1964_v22, %v1966_v63  ;;  %8182 = vmatpush.msk.msra.mxu3 %vm497_vm1, %v1971_v23  ;;  %v8220_v63 = vld [vmem:[%s11498_s1 + $0x58] sm:$0xff]  ;;  %v9581_v9 = vpop.f32.mrf.mxu2 }
 0x12e   : > { %8188 = vmatpush.msk.msra.mxu2 %vm497_vm1, %v1974_v24  ;;  %8183 = vmatmul.msk.f32.vlgmr.msra.gmra.mxu3 %vm493_vm2, %v8175_v17 }
 0x12f   : > { %8189 = vmatmul.msk.f32.vlgmr.msra.gmra.mxu2 %vm493_vm2, %v8175_v17 }
 0x131   : > { %2915 = vrot.lane.b32.xlu0 %v9041_v8, %s8872_s19  ;;  %s8881_s19 = smov 113  }
 0x132   : > { %3095 = vrot.lane.b32.xlu1 %v9008_v1, %s8873_s30  ;;  %3099 = vrot.lane.b32.xlu2 %v9018_v3, %s8873_s30 }
 0x133   : > { %v1962_v26 = vpop.permute.xlu0 %1961 }
 0x134   : > { %v2142_v27 = vpop.permute.xlu1 %2141  ;;  %v1972_v28 = vsel %vm1967_vm10, %v1960_v21, %v1962_v26  ;;  %v1973_v29 = vsel %vm1967_vm10, %v1962_v26, %v1964_v22  ;;  %v2336_v33 = vpop.permute.xlu2 %2335  ;;  %vm3487_vm10 = vcmask 252928  }
 0x135   : > { %v2158_v30 = vsel %vm2157_vm11, %v2142_v27, %v2144_v14  ;;  %8184 = vmatpush.msk.msrb.mxu0 %vm497_vm1, %v1972_v28  ;;  %8186 = vmatpush.msk.msra.mxu1 %vm497_vm1, %v1973_v29  ;;  %v2349_v44 = vsel %vm2347_vm12, %v2334_v25, %v2336_v33  ;;  %v9605_v18 = vpop.f32.mrf.mxu2  ;;  %v9623_v21 = vpop.f32.mrf.mxu0  ;;  %v8235_v27 = vld [vmem:[%s11498_s1 + $0x60] sm:$0xff] }
 0x136   : > { %8191 = vmatpush.msk.msrb.mxu3 %vm497_vm1, %v2158_v30  ;;  %8185 = vmatmul.msk.f32.vlgmr.msrb.gmra.mxu0 %vm493_vm2, %v8175_v17 }
 0x137   : > { %8187 = vmatmul.msk.f32.vlgmr.msra.gmra.mxu1 %vm493_vm2, %v8175_v17  ;;  %8192 = vmatmul.msk.f32.vlgmr.msrb.gmra.mxu3 %vm493_vm2, %v8190_v31 }
 0x138   : > { %8193 = vmatpush.msk.msra.mxu0 %vm497_vm1, %v2159_v32  ;;  %v9650_v32 = vld [vmem:[%s9003_s21 + $0x10] sm:$0x7f] }
 0x139   : > { %3101 = vrot.lane.b32.xlu0 %v9029_v6, %s8873_s30 }
 0x13a   : > { %3097 = vrot.lane.b32.xlu1 %v9023_v4, %s8873_s30  ;;  %3103 = vrot.lane.b32.xlu2 %v9038_v7, %s8873_s30 }
 0x13b   : > { %v2148_v34 = vpop.permute.xlu0 %2147 }
 0x13c   : > { %v2150_v35 = vpop.permute.xlu1 %2149  ;;  %v2160_v36 = vsel %vm2157_vm11, %v2146_v20, %v2148_v34  ;;  %v2338_v38 = vpop.permute.xlu2 %2337 }
 0x13d   : > { %v2161_v37 = vsel %vm2157_vm11, %v2148_v34, %v2150_v35  ;;  %8195 = vmatpush.msk.msrb.mxu1 %vm497_vm1, %v2160_v36  ;;  %v2350_v50 = vsel %vm2347_vm12, %v2336_v33, %v2338_v38  ;;  %v9642_v30 = vpop.f32.mrf.mxu2  ;;  %v9655_v33 = vld [vmem:[%s9003_s21 + $0x28] sm:$0x7f]  ;;  %v9660_v36 = vld [vmem:[%s9003_s21] sm:$0x7f] }
 0x13e   : > { %8197 = vmatpush.msk.msrb.mxu2 %vm497_vm1, %v2161_v37  ;;  %8194 = vmatmul.msk.f32.vlgmr.msra.gmra.mxu0 %vm493_vm2, %v8190_v31  ;;  %v9664_v37 = vpop.f32.mrf.mxu0 }
 0x13f   : > { %8198 = vmatmul.msk.f32.vlgmr.msrb.gmra.mxu2 %vm493_vm2, %v8190_v31  ;;  %8196 = vmatmul.msk.f32.vlgmr.msrb.gmra.mxu1 %vm493_vm2, %v8190_v31 }
 0x141   : > { %3283 = vrot.lane.b32.xlu0 %v9026_v5, %s8874_s16 }
 0x142   : > { %3285 = vrot.lane.b32.xlu1 %v9008_v1, %s8874_s16  ;;  %3105 = vrot.lane.b32.xlu2 %v9041_v8, %s8873_s30  ;;  %s8886_s30 = smov 110  }
 0x143   : > { %v2152_v39 = vpop.permute.xlu0 %2151 }
 0x144   : > { %v2332_v40 = vpop.permute.xlu1 %2331  ;;  %v2162_v42 = vsel %vm2157_vm11, %v2150_v35, %v2152_v39  ;;  %v2526_v45 = vpop.permute.xlu2 %2525 }
 0x145   : > { %v2348_v43 = vsel %vm2347_vm12, %v2332_v40, %v2334_v25  ;;  %8199 = vmatpush.msk.msra.mxu3 %vm497_vm1, %v2162_v42  ;;  %v9628_v25 = vld [vmem:[%s9003_s21 + $0x20] sm:$0x7f] }
 0x146   : > { %8206 = vmatpush.msk.msra.mxu2 %vm497_vm1, %v2348_v43  ;;  %8200 = vmatmul.msk.f32.vlgmr.msra.gmra.mxu3 %vm493_vm2, %v8190_v31  ;;  %v9677_v43 = vpop.f32.mrf.mxu2 }
 0x147   : > { %8207 = vmatmul.msk.f32.vlgmr.msra.gmra.mxu2 %vm493_vm2, %v9508_v41  ;;  %8208 = vmatpush.msk.msrb.mxu3 %vm497_vm1, %v2349_v44  ;;  %v9680_v44 = vld [vmem:[%s9003_s21 + $0x8] sm:$0x7f] }
 0x149   : > { %3281 = vrot.lane.b32.xlu0 %v9011_v2, %s8874_s16 }
 0x14a   : > { %3287 = vrot.lane.b32.xlu1 %v9023_v4, %s8874_s16  ;;  %3291 = vrot.lane.b32.xlu2 %v9029_v6, %s8874_s16 }
 0x14b   : > { %v2154_v46 = vpop.permute.xlu0 %2153 }
 0x14c   : > { %v2156_v47 = vpop.permute.xlu1 %2155  ;;  %v2163_v48 = vsel %vm2157_vm11, %v2152_v39, %v2154_v46  ;;  %v2528_v51 = vpop.permute.xlu2 %2527 }
 0x14d   : > { %v2164_v49 = vsel %vm2157_vm11, %v2154_v46, %v2156_v47  ;;  %8201 = vmatpush.msk.msrb.mxu0 %vm497_vm1, %v2163_v48  ;;  %v2540_v0 = vsel %vm2537_vm13, %v2526_v45, %v2528_v51  ;;  %vm3677_vm11 = vcmask 244736  }
 0x14e   : > { %8203 = vmatpush.msk.msra.mxu1 %vm497_vm1, %v2164_v49  ;;  %8202 = vmatmul.msk.f32.vlgmr.msrb.gmra.mxu0 %vm493_vm2, %v8190_v31  ;;  %v9692_v49 = vld [vmem:[%s9003_s21 + $0x38] sm:$0x7f] }
 0x14f   : > { %8204 = vmatmul.msk.f32.vlgmr.msra.gmra.mxu1 %vm493_vm2, %v8190_v31  ;;  %8209 = vmatmul.msk.f32.vlgmr.msrb.gmra.mxu3 %vm493_vm2, %v9508_v41 }
 0x150   : > { %8210 = vmatpush.msk.msra.mxu0 %vm497_vm1, %v2350_v50 }
 0x151   : > { %3293 = vrot.lane.b32.xlu0 %v9038_v7, %s8874_s16 }
 0x152   : > { %3289 = vrot.lane.b32.xlu1 %v9018_v3, %s8874_s16  ;;  %3295 = vrot.lane.b32.xlu2 %v9041_v8, %s8874_s16  ;;  %s11513_s16 = smov 97  }
 0x153   : > { %v2340_v52 = vpop.permute.xlu0 %2339 }
 0x154   : > { %v2342_v53 = vpop.permute.xlu1 %2341  ;;  %v2351_v55 = vsel %vm2347_vm12, %v2338_v38, %v2340_v52  ;;  %v2530_v57 = vpop.permute.xlu2 %2529 }
 0x155   : > { %v2352_v56 = vsel %vm2347_vm12, %v2340_v52, %v2342_v53  ;;  %8212 = vmatpush.msk.msrb.mxu1 %vm497_vm1, %v2351_v55  ;;  %v2541_v15 = vsel %vm2537_vm13, %v2528_v51, %v2530_v57 }
 0x156   : > { %8214 = vmatpush.msk.msrb.mxu2 %vm497_vm1, %v2352_v56  ;;  %8211 = vmatmul.msk.f32.vlgmr.msra.gmra.mxu0 %vm493_vm2, %v9508_v41  ;;  %v9713_v56 = vpop.f32.mrf.mxu2 }
 0x157   : > { %8213 = vmatmul.msk.f32.vlgmr.msrb.gmra.mxu1 %vm493_vm2, %v9508_v41  ;;  %8215 = vmatmul.msk.f32.vlgmr.msrb.gmra.mxu2 %vm493_vm2, %v9508_v41 }
 0x159   : > { %3475 = vrot.lane.b32.xlu0 %v9008_v1, %s8875_s20 }
 0x15a   : > { %3477 = vrot.lane.b32.xlu1 %v9023_v4, %s8875_s20  ;;  %3471 = vrot.lane.b32.xlu2 %v9011_v2, %s8875_s20  ;;  %v9571_v4 = vpop.f32.mrf.mxu1 }
 0x15b   : > { %v2344_v59 = vpop.permute.xlu0 %2343 }
 0x15c   : > { %v2524_v60 = vpop.permute.xlu1 %2523  ;;  %v2353_v61 = vsel %vm2347_vm12, %v2342_v53, %v2344_v59  ;;  %v2718_v1 = vpop.permute.xlu2 %2717 }
 0x15d   : > { %v2539_v62 = vsel %vm2537_vm13, %v2524_v60, %v2526_v45  ;;  %8216 = vmatpush.msk.msra.mxu3 %vm497_vm1, %v2353_v61  ;;  %v9685_v45 = vld [vmem:[%s9003_s21 + $0x30] sm:$0x7f]  ;;  %v9702_v53 = vpop.f32.mrf.mxu0 }
 0x15e   : > { %8223 = vmatpush.msk.msra.mxu2 %vm497_vm1, %v2539_v62  ;;  %8217 = vmatmul.msk.f32.vlgmr.msra.gmra.mxu3 %vm493_vm2, %v9508_v41 }
 0x15f   : > { %8224 = vmatmul.msk.f32.vlgmr.msra.gmra.mxu2 %vm493_vm2, %v8220_v63  ;;  %8225 = vmatpush.msk.msrb.mxu3 %vm497_vm1, %v2540_v0 }
 0x161   : > { %3473 = vrot.lane.b32.xlu0 %v9026_v5, %s8875_s20 }
 0x162   : > { %3479 = vrot.lane.b32.xlu1 %v9018_v3, %s8875_s20  ;;  %3483 = vrot.lane.b32.xlu2 %v9038_v7, %s8875_s20  ;;  %v9597_v7 = vpop.f32.mrf.mxu1 }
 0x163   : > { %v2346_v10 = vpop.permute.xlu0 %2345 }
 0x164   : > { %v2522_v11 = vpop.permute.xlu1 %2521  ;;  %v2354_v13 = vsel %vm2347_vm12, %v2344_v59, %v2346_v10  ;;  %v2720_v3 = vpop.permute.xlu2 %2719  ;;  %vm3867_vm12 = vcmask 236544  }
 0x165   : > { %v2538_v14 = vsel %vm2537_vm13, %v2522_v11, %v2524_v60  ;;  %8218 = vmatpush.msk.msrb.mxu0 %vm497_vm1, %v2354_v13  ;;  %v2731_v28 = vsel %vm2727_vm14, %v2718_v1, %v2720_v3  ;;  %v8250_v60 = vld [vmem:[%s11498_s1 + $0x68] sm:$0xff]  ;;  %v9727_v0 = vpop.f32.mrf.mxu0  ;;  %v9737_v13 = vpop.f32.mrf.mxu2 }
 0x166   : > { %8221 = vmatpush.msk.msra.mxu1 %vm497_vm1, %v2538_v14  ;;  %8219 = vmatmul.msk.f32.vlgmr.msrb.gmra.mxu0 %vm493_vm2, %v9508_v41  ;;  %11514 = vst [vmem:[#allocation10_spill] sm:$0xff] %v9727_v0 }
 0x167   : > { %8222 = vmatmul.msk.f32.vlgmr.msra.gmra.mxu1 %vm493_vm2, %v8220_v63  ;;  %8226 = vmatmul.msk.f32.vlgmr.msrb.gmra.mxu3 %vm493_vm2, %v8220_v63 }
 0x168   : > { %8227 = vmatpush.msk.msra.mxu0 %vm497_vm1, %v2541_v15 }
 0x169   : > { %3485 = vrot.lane.b32.xlu0 %v9041_v8, %s8875_s20 }
 0x16a   : > { %3481 = vrot.lane.b32.xlu1 %v9029_v6, %s8875_s20  ;;  %3661 = vrot.lane.b32.xlu2 %v9011_v2, %s8876_s14  ;;  %v9611_v6 = vpop.f32.mrf.mxu3  ;;  %v9619_v2 = vld [vmem:[%s9003_s21 + $0x18] sm:$0x7f]  ;;  %v9625_v22 = vpop.f32.mrf.mxu1  ;;  %s8882_s20 = smov 114  }
 0x16b   : > { %v2532_v16 = vpop.permute.xlu0 %2531 }
 0x16c   : > { %v2534_v17 = vpop.permute.xlu1 %2533  ;;  %v2542_v19 = vsel %vm2537_vm13, %v2530_v57, %v2532_v16  ;;  %v2722_v8 = vpop.permute.xlu2 %2721 }
 0x16d   : > { %v2543_v20 = vsel %vm2537_vm13, %v2532_v16, %v2534_v17  ;;  %8229 = vmatpush.msk.msrb.mxu1 %vm497_vm1, %v2542_v19  ;;  %v2732_v40 = vsel %vm2727_vm14, %v2720_v3, %v2722_v8 }
 0x16e   : > { %8231 = vmatpush.msk.msrb.mxu2 %vm497_vm1, %v2543_v20  ;;  %8228 = vmatmul.msk.f32.vlgmr.msra.gmra.mxu0 %vm493_vm2, %v8220_v63 }
 0x16f   : > { %8230 = vmatmul.msk.f32.vlgmr.msrb.gmra.mxu1 %vm493_vm2, %v8220_v63  ;;  %8232 = vmatmul.msk.f32.vlgmr.msrb.gmra.mxu2 %vm493_vm2, %v8220_v63 }
 0x171   : > { %3663 = vrot.lane.b32.xlu0 %v9026_v5, %s8876_s14 }
 0x172   : > { %3667 = vrot.lane.b32.xlu1 %v9619_v2, %s8876_s14  ;;  %3669 = vrot.lane.b32.xlu2 %v9628_v25, %s8876_s14  ;;  %v9647_v31 = vpop.f32.mrf.mxu3  ;;  %v9669_v41 = vpop.f32.mrf.mxu1 }
 0x173   : > { %v2536_v23 = vpop.permute.xlu0 %2535 }
 0x174   : > { %v2716_v24 = vpop.permute.xlu1 %2715  ;;  %v2544_v5 = vsel %vm2537_vm13, %v2534_v17, %v2536_v23  ;;  %v9640_v29 = vpop.permute.xlu2 %2907  ;;  %vm4057_vm13 = vcmask 228352  }
 0x175   : > { %v2730_v26 = vsel %vm2727_vm14, %v2716_v24, %v2718_v1  ;;  %8233 = vmatpush.msk.msra.mxu3 %vm497_vm1, %v2544_v5 }
 0x176   : > { %8240 = vmatpush.msk.msra.mxu2 %vm497_vm1, %v2730_v26  ;;  %8234 = vmatmul.msk.f32.vlgmr.msra.gmra.mxu3 %vm493_vm2, %v8220_v63 }
 0x177   : > { %8241 = vmatmul.msk.f32.vlgmr.msra.gmra.mxu2 %vm493_vm2, %v8235_v27  ;;  %8242 = vmatpush.msk.msrb.mxu3 %vm497_vm1, %v2731_v28 }
 0x179   : > { %3665 = vrot.lane.b32.xlu0 %v9650_v32, %s8876_s14 }
 0x17a   : > { %3671 = vrot.lane.b32.xlu1 %v9655_v33, %s8876_s14  ;;  %3851 = vrot.lane.b32.xlu2 %v9660_v36, %s8877_s18  ;;  %v9689_v46 = vpop.f32.mrf.mxu3  ;;  %v9706_v55 = vpop.f32.mrf.mxu1 }
 0x17b   : > { %v2712_v34 = vpop.permute.xlu0 %2711 }
 0x17c   : > { %v2714_v35 = vpop.permute.xlu1 %2713  ;;  %v2912_v42 = vpop.permute.xlu2 %2911 }
 0x17d   : > { %v2728_v38 = vsel %vm2727_vm14, %v2712_v34, %v2714_v35  ;;  %v2729_v39 = vsel %vm2727_vm14, %v2714_v35, %v2716_v24 }
 0x17e   : > { %8236 = vmatpush.msk.msrb.mxu0 %vm497_vm1, %v2728_v38  ;;  %8238 = vmatpush.msk.msra.mxu1 %vm497_vm1, %v2729_v39 }
 0x17f   : > { %8237 = vmatmul.msk.f32.vlgmr.msrb.gmra.mxu0 %vm493_vm2, %v8235_v27  ;;  %8239 = vmatmul.msk.f32.vlgmr.msra.gmra.mxu1 %vm493_vm2, %v8235_v27 }
 0x180   : > { %8243 = vmatmul.msk.f32.vlgmr.msrb.gmra.mxu3 %vm493_vm2, %v8235_v27  ;;  %8244 = vmatpush.msk.msra.mxu0 %vm497_vm1, %v2732_v40 }
 0x181   : > { %3853 = vrot.lane.b32.xlu0 %v9680_v44, %s8877_s18 }
 0x182   : > { %3673 = vrot.lane.b32.xlu1 %v9685_v45, %s8876_s14  ;;  %3675 = vrot.lane.b32.xlu2 %v9692_v49, %s8876_s14  ;;  %v9720_v61 = vpop.f32.mrf.mxu3  ;;  %v9729_v1 = vpop.f32.mrf.mxu1  ;;  %s8887_s14 = smov 98  }
 0x183   : > { %v2724_v47 = vpop.permute.xlu0 %2723 }
 0x184   : > { %v2726_v48 = vpop.permute.xlu1 %2725  ;;  %v2733_v50 = vsel %vm2727_vm14, %v2722_v8, %v2724_v47  ;;  %v9700_v52 = vpop.permute.xlu2 %2913 }
 0x185   : > { %v2734_v51 = vsel %vm2727_vm14, %v2724_v47, %v2726_v48  ;;  %8246 = vmatpush.msk.msrb.mxu1 %vm497_vm1, %v2733_v50  ;;  %v2923_v20 = vsel %vm2917_vm15, %v2912_v42, %v9700_v52  ;;  %v9763_v8 = vpop.f32.mrf.mxu0  ;;  %v9807_v50 = vld [vmem:[%s9003_s21 + $0x8] sm:$0x7f]  ;;  %vm6227_vm14 = vcmask 916480  }
 0x186   : > { %8248 = vmatpush.msk.msrb.mxu2 %vm497_vm1, %v2734_v51 }
 0x187   : > { %8245 = vmatmul.msk.f32.vlgmr.msra.gmra.mxu0 %vm493_vm2, %v8235_v27  ;;  %8247 = vmatmul.msk.f32.vlgmr.msrb.gmra.mxu1 %vm493_vm2, %v8235_v27 }
 0x188   : > { %8249 = vmatmul.msk.f32.vlgmr.msrb.gmra.mxu2 %vm493_vm2, %v8235_v27  ;;  %v9774_v27 = vld [vmem:[%s11498_s1 + $0x70] sm:$0xff] }
 0x189   : > { %3855 = vrot.lane.b32.xlu0 %v9650_v32, %s8877_s18 }
 0x18a   : > { %3859 = vrot.lane.b32.xlu1 %v9628_v25, %s8877_s18  ;;  %3861 = vrot.lane.b32.xlu2 %v9655_v33, %s8877_s18  ;;  %v9749_v19 = vpop.f32.mrf.mxu3  ;;  %v9766_v23 = vpop.f32.mrf.mxu1 }
 0x18b   : > { %v2902_v57 = vpop.permute.xlu0 %2901 }
 0x18c   : > { %v2904_v59 = vpop.permute.xlu1 %2903  ;;  %v9724_v63 = vpop.permute.xlu2 %3099 }
 0x18d   : > { %v2918_v62 = vsel %vm2917_vm15, %v2902_v57, %v2904_v59 }
 0x18e   : > { %8251 = vmatpush.msk.msra.mxu3 %vm497_vm1, %v2918_v62 }
 0x18f   : > { %8252 = vmatmul.msk.f32.vlgmr.msra.gmra.mxu3 %vm493_vm2, %v8250_v60 }
 0x191   : > { %3857 = vrot.lane.b32.xlu0 %v9619_v2, %s8877_s18 }
 0x192   : > { %3863 = vrot.lane.b32.xlu1 %v9685_v45, %s8877_s18  ;;  %4043 = vrot.lane.b32.xlu2 %v9680_v44, %s8878_s28  ;;  %v9780_v34 = vpop.f32.mrf.mxu3  ;;  %v9794_v40 = vpop.f32.mrf.mxu1 }
 0x193   : > { %v2910_v10 = vpop.permute.xlu0 %2909  ;;  %11515 = vst [vmem:[#allocation11_spill] sm:$0xff] %v9780_v34 }
 0x194   : > { %v2906_v11 = vpop.permute.xlu1 %2905  ;;  %v2921_v14 = vsel %vm2917_vm15, %v9640_v29, %v2910_v10  ;;  %v2922_v15 = vsel %vm2917_vm15, %v2910_v10, %v2912_v42  ;;  %v9747_v17 = vpop.permute.xlu2 %3103 }
 0x195   : > { %v2919_v3 = vsel %vm2917_vm15, %v2904_v59, %v2906_v11  ;;  %v2920_v16 = vsel %vm2917_vm15, %v2906_v11, %v9640_v29  ;;  %8257 = vmatpush.msk.msra.mxu2 %vm497_vm1, %v2921_v14  ;;  %8259 = vmatpush.msk.msrb.mxu3 %vm497_vm1, %v2922_v15  ;;  %v9776_v29 = vpop.f32.mrf.mxu2  ;;  %v9831_v15 = vld [vmem:[%s9003_s21 + $0x10] sm:$0x7f] }
 0x196   : > { %8253 = vmatpush.msk.msrb.mxu0 %vm497_vm1, %v2919_v3  ;;  %8255 = vmatpush.msk.msra.mxu1 %vm497_vm1, %v2920_v16  ;;  %v9834_v3 = vld [vmem:[%s9003_s21 + $0x20] sm:$0x7f] }
 0x197   : > { %8254 = vmatmul.msk.f32.vlgmr.msrb.gmra.mxu0 %vm493_vm2, %v8250_v60  ;;  %8256 = vmatmul.msk.f32.vlgmr.msra.gmra.mxu1 %vm493_vm2, %v8250_v60 }
 0x198   : > { %8258 = vmatmul.msk.f32.vlgmr.msra.gmra.mxu2 %vm493_vm2, %v8250_v60  ;;  %8260 = vmatmul.msk.f32.vlgmr.msrb.gmra.mxu3 %vm493_vm2, %v8250_v60 }
 0x199   : > { %4045 = vrot.lane.b32.xlu0 %v9650_v32, %s8878_s28  ;;  %8261 = vmatpush.msk.msra.mxu0 %vm497_vm1, %v2923_v20  ;;  %v9849_v20 = vld [vmem:[%s9003_s21 + $0x28] sm:$0x7f] }
 0x19a   : > { %3865 = vrot.lane.b32.xlu1 %v9692_v49, %s8877_s18  ;;  %4041 = vrot.lane.b32.xlu2 %v9660_v36, %s8878_s28  ;;  %v9790_v36 = vpop.f32.mrf.mxu0  ;;  %v9813_v51 = vpop.f32.mrf.mxu3  ;;  %s8891_s18 = smov 86  }
 0x19b   : > { %v3092_v24 = vpop.permute.xlu0 %3091  ;;  %11517 = vst [vmem:[#allocation13_spill] sm:$0xff] %v9813_v51  ;;  %v9836_v16 = vpop.f32.mrf.mxu1 }
 0x19c   : > { %v3094_v5 = vpop.permute.xlu1 %3093  ;;  %v3106_v28 = vpop.permute.xlu2 %3105 }
 0x19d   : > { %v3108_v26 = vsel %vm3107_vm0, %v3092_v24, %v3094_v5  ;;  %v9804_v48 = vpop.f32.mrf.mxu2 }
 0x19e   : > { %8266 = vmatpush.msk.msrb.mxu2 %vm497_vm1, %v3108_v26  ;;  %11516 = vst [vmem:[#allocation12_spill] sm:$0xff] %v9804_v48 }
 0x19f   : > { %8262 = vmatmul.msk.f32.vlgmr.msra.gmra.mxu0 %vm493_vm2, %v8250_v60 }
 0x1a0   : > { %8267 = vmatmul.msk.f32.vlgmr.msrb.gmra.mxu2 %vm493_vm2, %v9774_v27 }
 0x1a1   : > { %4047 = vrot.lane.b32.xlu0 %v9619_v2, %s8878_s28 }
 0x1a2   : > { %4051 = vrot.lane.b32.xlu1 %v9655_v33, %s8878_s28  ;;  %4053 = vrot.lane.b32.xlu2 %v9685_v45, %s8878_s28  ;;  %v9826_v14 = vpop.f32.mrf.mxu0 }
 0x1a3   : > { %v2916_v35 = vpop.permute.xlu0 %2915 }
 0x1a4   : > { %v2924_v38 = vsel %vm2917_vm15, %v9700_v52, %v2916_v35  ;;  %v3096_v39 = vpop.permute.xlu1 %3095  ;;  %v9798_v47 = vpop.permute.xlu2 %3291  ;;  %v8280_v35 = vld [vmem:[%s11498_s1 + $0x78] sm:$0xff]  ;;  %vm6361_vm15 = vcmask 900096  }
 0x1a5   : > { %v3109_v42 = vsel %vm3107_vm0, %v3094_v5, %v3096_v39  ;;  %8263 = vmatpush.msk.msrb.mxu1 %vm497_vm1, %v2924_v38  ;;  %v9855_v24 = vpop.f32.mrf.mxu2  ;;  %v9860_v5 = vpop.f32.mrf.mxu3 }
 0x1a6   : > { %8268 = vmatpush.msk.msra.mxu3 %vm497_vm1, %v3109_v42  ;;  %8264 = vmatmul.msk.f32.vlgmr.msrb.gmra.mxu1 %vm493_vm2, %v8250_v60  ;;  %11518 = vst [vmem:[#allocation14_spill] sm:$0xff] %v9855_v24  ;;  %v9873_v42 = vld [vmem:[%s9003_s21 + $0x30] sm:$0x7f]  ;;  %v9900_v24 = vld [vmem:[%s9003_s21 + $0x38] sm:$0x7f] }
 0x1a7   : > { %8269 = vmatmul.msk.f32.vlgmr.msra.gmra.mxu3 %vm493_vm2, %v9774_v27 }
 0x1a9   : > { %4049 = vrot.lane.b32.xlu0 %v9628_v25, %s8878_s28 }
 0x1aa   : > { %4055 = vrot.lane.b32.xlu1 %v9692_v49, %s8878_s28  ;;  %4401 = vrot.lane.b32.xlu2 %v9807_v50, %s8860_s22  ;;  %s8883_s28 = smov 111  }
 0x1ab   : > { %v3102_v52 = vpop.permute.xlu0 %3101 }
 0x1ac   : > { %v3112_v57 = vsel %vm3107_vm0, %v9724_v63, %v3102_v52  ;;  %v3113_v59 = vsel %vm3107_vm0, %v3102_v52, %v9747_v17  ;;  %v3098_v60 = vpop.permute.xlu1 %3097  ;;  %v3296_v11 = vpop.permute.xlu2 %3295 }
 0x1ad   : > { %v3110_v62 = vsel %vm3107_vm0, %v3096_v39, %v3098_v60  ;;  %v3111_v10 = vsel %vm3107_vm0, %v3098_v60, %v9724_v63  ;;  %8274 = vmatpush.msk.msra.mxu2 %vm497_vm1, %v3112_v57  ;;  %8276 = vmatpush.msk.msrb.mxu3 %vm497_vm1, %v3113_v59  ;;  %v3114_v63 = vsel %vm3107_vm0, %v9747_v17, %v3106_v28  ;;  %v9870_v39 = vld [vmem:[%s9003_s21 + $0x18] sm:$0x7f]  ;;  %v9877_v52 = vpop.f32.mrf.mxu0  ;;  %v9880_v57 = vpop.f32.mrf.mxu1  ;;  %vm6428_vm0 = vcmask 818176  }
 0x1ae   : > { %8270 = vmatpush.msk.msrb.mxu0 %vm497_vm1, %v3110_v62  ;;  %8272 = vmatpush.msk.msra.mxu1 %vm497_vm1, %v3111_v10  ;;  %11519 = vst [vmem:[#allocation15_spill] sm:$0xff] %v9880_v57  ;;  %v9888_v60 = vpop.f32.mrf.mxu2 }
 0x1af   : > { %8271 = vmatmul.msk.f32.vlgmr.msrb.gmra.mxu0 %vm493_vm2, %v9774_v27  ;;  %8273 = vmatmul.msk.f32.vlgmr.msra.gmra.mxu1 %vm493_vm2, %v9774_v27  ;;  %11520 = vst [vmem:[#allocation16_spill] sm:$0xff] %v9888_v60  ;;  %v9904_v60 = vld [vmem:[%s9003_s21 + $0x40] sm:$0x7f]  ;;  %s8890_s21 = smov 85  }
 0x1b0   : > { %8275 = vmatmul.msk.f32.vlgmr.msra.gmra.mxu2 %vm493_vm2, %v9774_v27  ;;  %8277 = vmatmul.msk.f32.vlgmr.msrb.gmra.mxu3 %vm493_vm2, %v9774_v27 }
 0x1b1   : > { %4403 = vrot.lane.b32.xlu0 %v9831_v15, %s8860_s22  ;;  %8278 = vmatpush.msk.msra.mxu0 %vm497_vm1, %v3114_v63 }
 0x1b2   : > { %4407 = vrot.lane.b32.xlu1 %v9834_v3, %s8860_s22  ;;  %4409 = vrot.lane.b32.xlu2 %v9849_v20, %s8860_s22 }
 0x1b3   : > { %v3284_v17 = vpop.permute.xlu0 %3283 }
 0x1b4   : > { %v3286_v26 = vpop.permute.xlu1 %3285  ;;  %v9866_v38 = vpop.permute.xlu2 %3471 }
 0x1b5   : > { %v3299_v28 = vsel %vm3297_vm9, %v3284_v17, %v3286_v26 }
 0x1b6   : > { %8283 = vmatpush.msk.msrb.mxu2 %vm497_vm1, %v3299_v28  ;;  %v9895_v28 = vpop.f32.mrf.mxu3 }
 0x1b7   : > { %8279 = vmatmul.msk.f32.vlgmr.msra.gmra.mxu0 %vm493_vm2, %v9774_v27  ;;  %11521 = vst [vmem:[#allocation17_spill] sm:$0xff] %v9895_v28 }
 0x1b8   : > { %8284 = vmatmul.msk.f32.vlgmr.msrb.gmra.mxu2 %vm493_vm2, %v8280_v35 }
 0x1b9   : > { %4405 = vrot.lane.b32.xlu0 %v9870_v39, %s8860_s22 }
 0x1ba   : > { %4411 = vrot.lane.b32.xlu1 %v9873_v42, %s8860_s22  ;;  %4590 = vrot.lane.b32.xlu2 %v9807_v50, %s8861_s23 }
 0x1bb   : > { %v3282_v59 = vpop.permute.xlu0 %3281 }
 0x1bc   : > { %v3298_v27 = vsel %vm3297_vm9, %v3282_v59, %v3284_v17  ;;  %v3288_v62 = vpop.permute.xlu1 %3287  ;;  %v9893_v63 = vpop.permute.xlu2 %3483 }
 0x1bd   : > { %v3300_v10 = vsel %vm3297_vm9, %v3286_v26, %v3288_v62  ;;  %8281 = vmatpush.msk.msrb.mxu1 %vm497_vm1, %v3298_v27  ;;  %v9910_v17 = vpop.f32.mrf.mxu0  ;;  %v9912_v26 = vpop.f32.mrf.mxu1 }
 0x1be   : > { %8285 = vmatpush.msk.msra.mxu3 %vm497_vm1, %v3300_v10  ;;  %8282 = vmatmul.msk.f32.vlgmr.msrb.gmra.mxu1 %vm493_vm2, %v8280_v35  ;;  %11522 = vst [vmem:[#allocation18_spill] sm:$0xff] %v9910_v17  ;;  %v9926_v17 = vpop.f32.mrf.mxu2 }
 0x1bf   : > { %8286 = vmatmul.msk.f32.vlgmr.msra.gmra.mxu3 %vm493_vm2, %v8280_v35  ;;  %11523 = vst [vmem:[#allocation19_spill] sm:$0xff] %v9912_v26 }
 0x1c1   : > { %4592 = vrot.lane.b32.xlu0 %v9831_v15, %s8861_s23 }
 0x1c2   : > { %4413 = vrot.lane.b32.xlu1 %v9900_v24, %s8860_s22  ;;  %4415 = vrot.lane.b32.xlu2 %v9904_v60, %s8860_s22 }
 0x1c3   : > { %v3294_v59 = vpop.permute.xlu0 %3293 }
 0x1c4   : > { %v3303_v27 = vsel %vm3297_vm9, %v9798_v47, %v3294_v59  ;;  %v3304_v10 = vsel %vm3297_vm9, %v3294_v59, %v3296_v11  ;;  %v3290_v34 = vpop.permute.xlu1 %3289  ;;  %v9924_v26 = vpop.permute.xlu2 %3661 }
 0x1c5   : > { %v3301_v57 = vsel %vm3297_vm9, %v3288_v62, %v3290_v34  ;;  %v3302_v51 = vsel %vm3297_vm9, %v3290_v34, %v9798_v47  ;;  %8291 = vmatpush.msk.msra.mxu2 %vm497_vm1, %v3303_v27  ;;  %8293 = vmatpush.msk.msrb.mxu3 %vm497_vm1, %v3304_v10  ;;  %v9932_v11 = vpop.f32.mrf.mxu3  ;;  %v9942_v47 = vpop.f32.mrf.mxu0  ;;  %vm6495_vm9 = vcmask 809984  }
 0x1c6   : > { %8287 = vmatpush.msk.msrb.mxu0 %vm497_vm1, %v3301_v57  ;;  %8289 = vmatpush.msk.msra.mxu1 %vm497_vm1, %v3302_v51  ;;  %11524 = vst [vmem:[#allocation20_spill] sm:$0xff] %v9942_v47  ;;  %v9944_v57 = vpop.f32.mrf.mxu1  ;;  %v9953_v27 = vpop.f32.mrf.mxu2 }
 0x1c7   : > { %8288 = vmatmul.msk.f32.vlgmr.msrb.gmra.mxu0 %vm493_vm2, %v8280_v35  ;;  %8290 = vmatmul.msk.f32.vlgmr.msra.gmra.mxu1 %vm493_vm2, %v8280_v35  ;;  %11525 = vst [vmem:[#allocation21_spill] sm:$0xff] %v9944_v57 }
 0x1c8   : > { %8292 = vmatmul.msk.f32.vlgmr.msra.gmra.mxu2 %vm493_vm2, %v8280_v35  ;;  %8294 = vmatmul.msk.f32.vlgmr.msrb.gmra.mxu3 %vm493_vm2, %v8280_v35  ;;  %v8295_v35 = vld [vmem:[%s11498_s1 + $0x80] sm:$0xff]  ;;  %11526 = vst [vmem:[#allocation22_spill] sm:$0xff] %v9953_v27 }
 0x1c9   : > { %4594 = vrot.lane.b32.xlu0 %v9870_v39, %s8861_s23 }
 0x1ca   : > { %4598 = vrot.lane.b32.xlu1 %v9849_v20, %s8861_s23  ;;  %4600 = vrot.lane.b32.xlu2 %v9873_v42, %s8861_s23 }
 0x1cb   : > { %v3476_v34 = vpop.permute.xlu0 %3475 }
 0x1cc   : > { %v3478_v51 = vpop.permute.xlu1 %3477  ;;  %v9950_v59 = vpop.permute.xlu2 %3669 }
 0x1cd   : > { %v3490_v62 = vsel %vm3487_vm10, %v3476_v34, %v3478_v51  ;;  %v9960_v10 = vpop.f32.mrf.mxu3  ;;  %v9972_v48 = vpop.f32.mrf.mxu0 }
 0x1ce   : > { %8300 = vmatpush.msk.msrb.mxu2 %vm497_vm1, %v3490_v62  ;;  %11527 = vst [vmem:[#allocation23_spill] sm:$0xff] %v9960_v10  ;;  %v9976_v10 = vpop.f32.mrf.mxu1 }
 0x1cf   : > { %11528 = vst [vmem:[#allocation24_spill] sm:$0xff] %v9972_v48 }
 0x1d0   : > { %8301 = vmatmul.msk.f32.vlgmr.msrb.gmra.mxu2 %vm493_vm2, %v8295_v35  ;;  %11529 = vst [vmem:[#allocation25_spill] sm:$0xff] %v9976_v10 }
 0x1d1   : > { %4596 = vrot.lane.b32.xlu0 %v9834_v3, %s8861_s23 }
 0x1d2   : > { %4602 = vrot.lane.b32.xlu1 %v9900_v24, %s8861_s23  ;;  %4781 = vrot.lane.b32.xlu2 %v9831_v15, %s8862_s24 }
 0x1d3   : > { %v3474_v57 = vpop.permute.xlu0 %3473 }
 0x1d4   : > { %v3488_v47 = vsel %vm3487_vm10, %v9866_v38, %v3474_v57  ;;  %v3489_v62 = vsel %vm3487_vm10, %v3474_v57, %v3476_v34  ;;  %v3480_v27 = vpop.permute.xlu1 %3479  ;;  %v9970_v0 = vpop.permute.xlu2 %3851 }
 0x1d5   : > { %v3491_v28 = vsel %vm3487_vm10, %v3478_v51, %v3480_v27  ;;  %8296 = vmatpush.msk.msra.mxu0 %vm497_vm1, %v3488_v47  ;;  %8298 = vmatpush.msk.msrb.mxu1 %vm497_vm1, %v3489_v62  ;;  %v9984_v38 = vpop.f32.mrf.mxu2 }
 0x1d6   : > { %8302 = vmatpush.msk.msra.mxu3 %vm497_vm1, %v3491_v28  ;;  %8297 = vmatmul.msk.f32.vlgmr.msra.gmra.mxu0 %vm493_vm2, %v8295_v35  ;;  %11530 = vst [vmem:[#allocation26_spill] sm:$0xff] %v9984_v38  ;;  %v9988_v28 = vpop.f32.mrf.mxu3 }
 0x1d7   : > { %8299 = vmatmul.msk.f32.vlgmr.msrb.gmra.mxu1 %vm493_vm2, %v8295_v35  ;;  %8303 = vmatmul.msk.f32.vlgmr.msra.gmra.mxu3 %vm493_vm2, %v8295_v35  ;;  %11531 = vst [vmem:[#allocation27_spill] sm:$0xff] %v9988_v28  ;;  %v10000_v28 = vpop.f32.mrf.mxu0 }
 0x1d8   : > { %11532 = vst [vmem:[#allocation28_spill] sm:$0xff] %v10000_v28 }
 0x1d9   : > { %4783 = vrot.lane.b32.xlu0 %v9870_v39, %s8862_s24 }
 0x1da   : > { %4604 = vrot.lane.b32.xlu1 %v9904_v60, %s8861_s23  ;;  %4779 = vrot.lane.b32.xlu2 %v9807_v50, %s8862_s24 }
 0x1db   : > { %v3486_v34 = vpop.permute.xlu0 %3485 }
 0x1dc   : > { %v3494_v47 = vsel %vm3487_vm10, %v9893_v63, %v3486_v34  ;;  %v3482_v51 = vpop.permute.xlu1 %3481  ;;  %v3676_v48 = vpop.permute.xlu2 %3675 }
 0x1dd   : > { %v3492_v57 = vsel %vm3487_vm10, %v3480_v27, %v3482_v51  ;;  %v3493_v62 = vsel %vm3487_vm10, %v3482_v51, %v9893_v63  ;;  %8308 = vmatpush.msk.msra.mxu2 %vm497_vm1, %v3494_v47  ;;  %v10003_v34 = vpop.f32.mrf.mxu1  ;;  %v8310_v27 = vld [vmem:[%s11498_s1 + $0x88] sm:$0xff]  ;;  %v10014_v47 = vpop.f32.mrf.mxu2  ;;  %vm6562_vm10 = vcmask 801792  }
 0x1de   : > { %8304 = vmatpush.msk.msrb.mxu0 %vm497_vm1, %v3492_v57  ;;  %8306 = vmatpush.msk.msra.mxu1 %vm497_vm1, %v3493_v62  ;;  %11533 = vst [vmem:[#allocation29_spill] sm:$0xff] %v10003_v34  ;;  %v10023_v28 = vpop.f32.mrf.mxu3 }
 0x1df   : > { %8305 = vmatmul.msk.f32.vlgmr.msrb.gmra.mxu0 %vm493_vm2, %v8295_v35  ;;  %8307 = vmatmul.msk.f32.vlgmr.msra.gmra.mxu1 %vm493_vm2, %v8295_v35  ;;  %11534 = vst [vmem:[#allocation30_spill] sm:$0xff] %v10014_v47 }
 0x1e0   : > { %8309 = vmatmul.msk.f32.vlgmr.msra.gmra.mxu2 %vm493_vm2, %v8295_v35  ;;  %11535 = vst [vmem:[#allocation31_spill] sm:$0xff] %v10023_v28 }
 0x1e1   : > { %4785 = vrot.lane.b32.xlu0 %v9834_v3, %s8862_s24 }
 0x1e2   : > { %4789 = vrot.lane.b32.xlu1 %v9873_v42, %s8862_s24  ;;  %4791 = vrot.lane.b32.xlu2 %v9900_v24, %s8862_s24 }
 0x1e3   : > { %v3664_v63 = vpop.permute.xlu0 %3663 }
 0x1e4   : > { %v3678_v35 = vsel %vm3677_vm11, %v9924_v26, %v3664_v63  ;;  %v3668_v51 = vpop.permute.xlu1 %3667  ;;  %v10021_v62 = vpop.permute.xlu2 %3861 }
 0x1e5   : > { %v3681_v57 = vsel %vm3677_vm11, %v3668_v51, %v9950_v59  ;;  %8311 = vmatpush.msk.msrb.mxu3 %vm497_vm1, %v3678_v35  ;;  %v10032_v26 = vpop.f32.mrf.mxu0  ;;  %v10034_v47 = vpop.f32.mrf.mxu1 }
 0x1e6   : > { %8317 = vmatpush.msk.msrb.mxu2 %vm497_vm1, %v3681_v57  ;;  %8312 = vmatmul.msk.f32.vlgmr.msrb.gmra.mxu3 %vm493_vm2, %v8310_v27  ;;  %11536 = vst [vmem:[#allocation32_spill] sm:$0xff] %v10032_v26  ;;  %v10046_v26 = vpop.f32.mrf.mxu2 }
 0x1e8   : > { %8318 = vmatmul.msk.f32.vlgmr.msrb.gmra.mxu2 %vm493_vm2, %v8310_v27 }
 0x1e9   : > { %4787 = vrot.lane.b32.xlu0 %v9849_v20, %s8862_s24 }
 0x1ea   : > { %4793 = vrot.lane.b32.xlu1 %v9904_v60, %s8862_s24  ;;  %4972 = vrot.lane.b32.xlu2 %v9870_v39, %s8863_s26  ;;  %v10052_v39 = vpop.f32.mrf.mxu3 }
 0x1eb   : > { %v3666_v35 = vpop.permute.xlu0 %3665  ;;  %11537 = vst [vmem:[#allocation33_spill] sm:$0xff] %v10052_v39 }
 0x1ec   : > { %v3679_v57 = vsel %vm3677_vm11, %v3664_v63, %v3666_v35  ;;  %v3680_v28 = vsel %vm3677_vm11, %v3666_v35, %v3668_v51  ;;  %v3672_v34 = vpop.permute.xlu1 %3671  ;;  %v10044_v38 = vpop.permute.xlu2 %4043 }
 0x1ed   : > { %v3682_v10 = vsel %vm3677_vm11, %v9950_v59, %v3672_v34  ;;  %8313 = vmatpush.msk.msra.mxu0 %vm497_vm1, %v3679_v57  ;;  %8315 = vmatpush.msk.msrb.mxu1 %vm497_vm1, %v3680_v28  ;;  %v10058_v59 = vpop.f32.mrf.mxu0  ;;  %v10060_v28 = vpop.f32.mrf.mxu1 }
 0x1ee   : > { %8319 = vmatpush.msk.msra.mxu3 %vm497_vm1, %v3682_v10  ;;  %8314 = vmatmul.msk.f32.vlgmr.msra.gmra.mxu0 %vm493_vm2, %v8310_v27  ;;  %v10072_v39 = vpop.f32.mrf.mxu2 }
 0x1ef   : > { %8316 = vmatmul.msk.f32.vlgmr.msrb.gmra.mxu1 %vm493_vm2, %v8310_v27  ;;  %8320 = vmatmul.msk.f32.vlgmr.msra.gmra.mxu3 %vm493_vm2, %v8310_v27  ;;  %11538 = vst [vmem:[#allocation34_spill] sm:$0xff] %v10072_v39 }
 0x1f1   : > { %4974 = vrot.lane.b32.xlu0 %v9834_v3, %s8863_s26 }
 0x1f2   : > { %4968 = vrot.lane.b32.xlu1 %v9807_v50, %s8863_s26  ;;  %4970 = vrot.lane.b32.xlu2 %v9831_v15, %s8863_s26  ;;  %v8325_v50 = vld [vmem:[%s11498_s1 + $0x90] sm:$0xff] }
 0x1f3   : > { %v3854_v10 = vpop.permute.xlu0 %3853 }
 0x1f4   : > { %v3868_v63 = vsel %vm3867_vm12, %v9970_v0, %v3854_v10  ;;  %v3674_v51 = vpop.permute.xlu1 %3673  ;;  %v4042_v57 = vpop.permute.xlu2 %4041 }
 0x1f5   : > { %v3683_v35 = vsel %vm3677_vm11, %v3672_v34, %v3674_v51  ;;  %v3684_v3 = vsel %vm3677_vm11, %v3674_v51, %v3676_v48  ;;  %8326 = vmatpush.msk.msra.mxu2 %vm497_vm1, %v3868_v63  ;;  %v10083_v0 = vpop.f32.mrf.mxu3  ;;  %v10087_v15 = vpop.f32.mrf.mxu0  ;;  %vm6629_vm11 = vcmask 793600  }
 0x1f6   : > { %8321 = vmatpush.msk.msrb.mxu0 %vm497_vm1, %v3683_v35  ;;  %8323 = vmatpush.msk.msra.mxu1 %vm497_vm1, %v3684_v3 }
 0x1f7   : > { %8322 = vmatmul.msk.f32.vlgmr.msrb.gmra.mxu0 %vm493_vm2, %v8310_v27  ;;  %8324 = vmatmul.msk.f32.vlgmr.msra.gmra.mxu1 %vm493_vm2, %v8310_v27  ;;  %v10090_v27 = vpop.f32.mrf.mxu1 }
 0x1f8   : > { %8327 = vmatmul.msk.f32.vlgmr.msra.gmra.mxu2 %vm493_vm2, %v8325_v50  ;;  %11539 = vst [vmem:[#allocation35_spill] sm:$0xff] %v10090_v27 }
 0x1f9   : > { %4976 = vrot.lane.b32.xlu0 %v9849_v20, %s8863_s26 }
 0x1fa   : > { %4978 = vrot.lane.b32.xlu1 %v9873_v42, %s8863_s26  ;;  %4980 = vrot.lane.b32.xlu2 %v9900_v24, %s8863_s26  ;;  %v10095_v42 = vpop.f32.mrf.mxu2 }
 0x1fb   : > { %v3856_v48 = vpop.permute.xlu0 %3855  ;;  %11540 = vst [vmem:[#allocation36_spill] sm:$0xff] %v10095_v42 }
 0x1fc   : > { %v3869_v34 = vsel %vm3867_vm12, %v3854_v10, %v3856_v48  ;;  %v3860_v63 = vpop.permute.xlu1 %3859  ;;  %v4054_v20 = vpop.permute.xlu2 %4053 }
 0x1fd   : > { %v3872_v51 = vsel %vm3867_vm12, %v3860_v63, %v10021_v62  ;;  %8328 = vmatpush.msk.msrb.mxu3 %vm497_vm1, %v3869_v34  ;;  %v10102_v24 = vpop.f32.mrf.mxu3  ;;  %v10104_v35 = vpop.f32.mrf.mxu0 }
 0x1fe   : > { %8334 = vmatpush.msk.msrb.mxu2 %vm497_vm1, %v3872_v51  ;;  %8329 = vmatmul.msk.f32.vlgmr.msrb.gmra.mxu3 %vm493_vm2, %v8325_v50  ;;  %11541 = vst [vmem:[#allocation37_spill] sm:$0xff] %v10102_v24 }
 0x1ff   : > { %11542 = vst [vmem:[#allocation38_spill] sm:$0xff] %v10104_v35  ;;  %v10108_v42 = vpop.f32.mrf.mxu1 }
 0x200   : > { %8335 = vmatmul.msk.f32.vlgmr.msrb.gmra.mxu2 %vm493_vm2, %v8325_v50  ;;  %11543 = vst [vmem:[#allocation39_spill] sm:$0xff] %v10108_v42 }
 0x201   : > { %4982 = vrot.lane.b32.xlu0 %v9904_v60, %s8863_s26  ;;  %v4058_v60 = vsel %vm4057_vm13, %v4042_v57, %v10044_v38 }
 0x203   : > { %v3858_v10 = vpop.permute.xlu0 %3857 }
 0x204   : > { %v3870_v3 = vsel %vm3867_vm12, %v3856_v48, %v3858_v10  ;;  %v3871_v34 = vsel %vm3867_vm12, %v3858_v10, %v3860_v63  ;;  %v3864_v39 = vpop.permute.xlu1 %3863  ;;  %v4402_v27 = vpop.permute.xlu2 %4401  ;;  %v8340_v63 = vld [vmem:[%s11498_s1 + $0x98] sm:$0xff] }
 0x205   : > { %v3873_v51 = vsel %vm3867_vm12, %v10021_v62, %v3864_v39  ;;  %8330 = vmatpush.msk.msra.mxu0 %vm497_vm1, %v3870_v3  ;;  %8332 = vmatpush.msk.msrb.mxu1 %vm497_vm1, %v3871_v34  ;;  %v10120_v48 = vpop.f32.mrf.mxu2  ;;  %v10126_v10 = vpop.f32.mrf.mxu3 }
 0x206   : > { %8336 = vmatpush.msk.msra.mxu3 %vm497_vm1, %v3873_v51  ;;  %8331 = vmatmul.msk.f32.vlgmr.msra.gmra.mxu0 %vm493_vm2, %v8325_v50  ;;  %v10134_v42 = vpop.f32.mrf.mxu0 }
 0x207   : > { %8333 = vmatmul.msk.f32.vlgmr.msrb.gmra.mxu1 %vm493_vm2, %v8325_v50  ;;  %8337 = vmatmul.msk.f32.vlgmr.msra.gmra.mxu3 %vm493_vm2, %v8325_v50  ;;  %11544 = vst [vmem:[#allocation40_spill] sm:$0xff] %v10134_v42 }
 0x208   : > { %8341 = vmatpush.msk.msra.mxu1 %vm497_vm1, %v4058_v60  ;;  %v10138_v60 = vpop.f32.mrf.mxu1 }
 0x209   : > { %11545 = vst [vmem:[#allocation41_spill] sm:$0xff] %v10138_v60 }
 0x20b   : > { %v4046_v62 = vpop.permute.xlu0 %4045 }
 0x20c   : > { %v4059_v57 = vsel %vm4057_vm13, %v10044_v38, %v4046_v62  ;;  %v3866_v3 = vpop.permute.xlu1 %3865  ;;  %v10132_v51 = vpop.permute.xlu2 %4409 }
 0x20d   : > { %v3874_v34 = vsel %vm3867_vm12, %v3864_v39, %v3866_v3  ;;  %8343 = vmatpush.msk.msra.mxu2 %vm497_vm1, %v4059_v57  ;;  %v10142_v38 = vpop.f32.mrf.mxu2  ;;  %v10144_v39 = vpop.f32.mrf.mxu3  ;;  %vm6762_vm12 = vcmask 703488  }
 0x20e   : > { %8338 = vmatpush.msk.msrb.mxu0 %vm497_vm1, %v3874_v34  ;;  %8344 = vmatmul.msk.f32.vlgmr.msra.gmra.mxu2 %vm493_vm2, %v8340_v63  ;;  %11546 = vst [vmem:[#allocation42_spill] sm:$0xff] %v10142_v38  ;;  %v10150_v34 = vpop.f32.mrf.mxu0 }
 0x20f   : > { %8339 = vmatmul.msk.f32.vlgmr.msrb.gmra.mxu0 %vm493_vm2, %v8325_v50  ;;  %8342 = vmatmul.msk.f32.vlgmr.msra.gmra.mxu1 %vm493_vm2, %v8340_v63  ;;  %11547 = vst [vmem:[#allocation43_spill] sm:$0xff] %v10144_v39 }
 0x210   : > { %11548 = vst [vmem:[#allocation44_spill] sm:$0xff] %v10150_v34  ;;  %v10154_v50 = vpop.f32.mrf.mxu1 }
 0x213   : > { %v4048_v35 = vpop.permute.xlu0 %4047 }
 0x214   : > { %v4060_v57 = vsel %vm4057_vm13, %v4046_v62, %v4048_v35  ;;  %v4052_v3 = vpop.permute.xlu1 %4051  ;;  %v10148_v42 = vpop.permute.xlu2 %4590 }
 0x215   : > { %8345 = vmatpush.msk.msrb.mxu3 %vm497_vm1, %v4060_v57  ;;  %v4063_v60 = vsel %vm4057_vm13, %v4052_v3, %v4054_v20  ;;  %v10160_v62 = vpop.f32.mrf.mxu2 }
 0x216   : > { %8346 = vmatmul.msk.f32.vlgmr.msrb.gmra.mxu3 %vm493_vm2, %v8340_v63  ;;  %8351 = vmatpush.msk.msrb.mxu2 %vm497_vm1, %v4063_v60  ;;  %v10172_v60 = vpop.f32.mrf.mxu3 }
 0x217   : > { %8352 = vmatmul.msk.f32.vlgmr.msrb.gmra.mxu2 %vm493_vm2, %v8340_v63  ;;  %11549 = vst [vmem:[#allocation45_spill] sm:$0xff] %v10172_v60 }
 0x218   : > { %8360 = vmatpush.msk.msra.mxu2 %vm497_vm1, %v9619_v2  ;;  %v8355_v2 = vld [vmem:[%s11498_s1 + $0xa0] sm:$0xff] }
 0x21a   : > { %8368 = vmatpush.msk.msrb.mxu2 %vm497_vm1, %v9692_v49 }
 0x21b   : > { %v4050_v57 = vpop.permute.xlu0 %4049 }
 0x21c   : > { %v4061_v34 = vsel %vm4057_vm13, %v4048_v35, %v4050_v57  ;;  %v4062_v39 = vsel %vm4057_vm13, %v4050_v57, %v4052_v3  ;;  %v4056_v38 = vpop.permute.xlu1 %4055  ;;  %v4416_v49 = vpop.permute.xlu2 %4415 }
 0x21d   : > { %v4064_v24 = vsel %vm4057_vm13, %v4054_v20, %v4056_v38  ;;  %8347 = vmatpush.msk.msra.mxu0 %vm497_vm1, %v4061_v34  ;;  %8349 = vmatpush.msk.msrb.mxu1 %vm497_vm1, %v4062_v39  ;;  %v10176_v35 = vpop.f32.mrf.mxu0  ;;  %v10180_v20 = vpop.f32.mrf.mxu1  ;;  %vm6896_vm13 = vcmask 687104  }
 0x21e   : > { %8353 = vmatpush.msk.msra.mxu3 %vm497_vm1, %v4064_v24  ;;  %8348 = vmatmul.msk.f32.vlgmr.msra.gmra.mxu0 %vm493_vm2, %v8340_v63  ;;  %11550 = vst [vmem:[#allocation46_spill] sm:$0xff] %v10176_v35  ;;  %v10185_v38 = vpop.f32.mrf.mxu2  ;;  %v10199_v3 = vpop.f32.mrf.mxu3 }
 0x21f   : > { %8350 = vmatmul.msk.f32.vlgmr.msrb.gmra.mxu1 %vm493_vm2, %v8340_v63  ;;  %8354 = vmatmul.msk.f32.vlgmr.msra.gmra.mxu3 %vm493_vm2, %v8340_v63  ;;  %11551 = vst [vmem:[#allocation47_spill] sm:$0xff] %v10180_v20 }
 0x220   : > { %8361 = vmatmul.msk.f32.vlgmr.msra.gmra.mxu2 %vm493_vm2, %v8355_v2  ;;  %8362 = vmatpush.msk.msrb.mxu3 %vm497_vm1, %v9628_v25  ;;  %11552 = vst [vmem:[#allocation48_spill] sm:$0xff] %v10185_v38 }
 0x221   : > { %8356 = vmatpush.msk.msrb.mxu0 %vm497_vm1, %v9680_v44  ;;  %8358 = vmatpush.msk.msra.mxu1 %vm497_vm1, %v9650_v32  ;;  %11553 = vst [vmem:[#allocation49_spill] sm:$0xff] %v10199_v3 }
 0x223   : > { %8364 = vmatpush.msk.msra.mxu0 %vm497_vm1, %v9655_v33  ;;  %8366 = vmatpush.msk.msrb.mxu1 %vm497_vm1, %v9685_v45  ;;  %v4404_v24 = vpop.permute.xlu0 %4403 }
 0x224   : > { %v4417_v63 = vsel %vm485_vm3, %v4402_v27, %v4404_v24  ;;  %v4408_v39 = vpop.permute.xlu1 %4407  ;;  %v4601_v44 = vpop.permute.xlu2 %4600 }
 0x225   : > { %v4420_v25 = vsel %vm485_vm3, %v4408_v39, %v10132_v51  ;;  %8371 = vmatpush.msk.msra.mxu3 %vm497_vm1, %v4417_v63  ;;  %v10203_v32 = vpop.f32.mrf.mxu0  ;;  %v10207_v33 = vpop.f32.mrf.mxu1 }
 0x226   : > { %8357 = vmatmul.msk.f32.vlgmr.msrb.gmra.mxu0 %vm493_vm2, %v8355_v2  ;;  %8377 = vmatpush.msk.msra.mxu2 %vm497_vm1, %v4420_v25  ;;  %v10210_v45 = vpop.f32.mrf.mxu2  ;;  %v8370_v25 = vld [vmem:[%s11498_s1 + $0xa8] sm:$0xff] }
 0x227   : > { %8359 = vmatmul.msk.f32.vlgmr.msra.gmra.mxu1 %vm493_vm2, %v8355_v2  ;;  %8363 = vmatmul.msk.f32.vlgmr.msrb.gmra.mxu3 %vm493_vm2, %v8355_v2  ;;  %11554 = vst [vmem:[#allocation50_spill] sm:$0xff] %v10210_v45 }
 0x228   : > { %8369 = vmatmul.msk.f32.vlgmr.msrb.gmra.mxu2 %vm493_vm2, %v8355_v2 }
 0x22b   : > { %v4406_v27 = vpop.permute.xlu0 %4405 }
 0x22c   : > { %v4418_v34 = vsel %vm485_vm3, %v4404_v24, %v4406_v27  ;;  %v4419_v57 = vsel %vm485_vm3, %v4406_v27, %v4408_v39  ;;  %v4412_v63 = vpop.permute.xlu1 %4411  ;;  %v10225_v24 = vpop.f32.mrf.mxu3 }
 0x22d   : > { %v4421_v3 = vsel %vm485_vm3, %v10132_v51, %v4412_v63  ;;  %8373 = vmatpush.msk.msrb.mxu0 %vm497_vm1, %v4418_v34  ;;  %8375 = vmatpush.msk.msra.mxu1 %vm497_vm1, %v4419_v57  ;;  %11555 = vst [vmem:[#allocation51_spill] sm:$0xff] %v10225_v24  ;;  %v10228_v39 = vpop.f32.mrf.mxu0  ;;  %v10230_v27 = vpop.f32.mrf.mxu1  ;;  %v8385_v24 = vld [vmem:[%s11498_s1 + $0xb0] sm:$0xff] }
 0x22e   : > { %8379 = vmatpush.msk.msrb.mxu3 %vm497_vm1, %v4421_v3  ;;  %8365 = vmatmul.msk.f32.vlgmr.msra.gmra.mxu0 %vm493_vm2, %v8355_v2  ;;  %11556 = vst [vmem:[#allocation52_spill] sm:$0xff] %v10228_v39  ;;  %v4782_v51 = vpop.permute.xlu2 %4781  ;;  %v10232_v34 = vpop.f32.mrf.mxu2 }
 0x22f   : > { %8367 = vmatmul.msk.f32.vlgmr.msrb.gmra.mxu1 %vm493_vm2, %v8355_v2  ;;  %8372 = vmatmul.msk.f32.vlgmr.msra.gmra.mxu3 %vm493_vm2, %v8370_v25  ;;  %11557 = vst [vmem:[#allocation53_spill] sm:$0xff] %v10230_v27 }
 0x230   : > { %8378 = vmatmul.msk.f32.vlgmr.msra.gmra.mxu2 %vm493_vm2, %v8370_v25  ;;  %11558 = vst [vmem:[#allocation54_spill] sm:$0xff] %v10232_v34 }
 0x233   : > { %v4593_v57 = vpop.permute.xlu0 %4592 }
 0x234   : > { %v4606_v3 = vsel %vm827_vm4, %v10148_v42, %v4593_v57  ;;  %v4414_v35 = vpop.permute.xlu1 %4413  ;;  %v10246_v42 = vpop.f32.mrf.mxu3 }
 0x235   : > { %v4422_v2 = vsel %vm485_vm3, %v4412_v63, %v4414_v35  ;;  %v4423_v45 = vsel %vm485_vm3, %v4414_v35, %v4416_v49  ;;  %8386 = vmatpush.msk.msrb.mxu2 %vm497_vm1, %v4606_v3  ;;  %v10250_v49 = vpop.f32.mrf.mxu0  ;;  %v10252_v35 = vpop.f32.mrf.mxu1 }
 0x236   : > { %8381 = vmatpush.msk.msra.mxu0 %vm497_vm1, %v4422_v2  ;;  %8383 = vmatpush.msk.msrb.mxu1 %vm497_vm1, %v4423_v45  ;;  %11559 = vst [vmem:[#allocation55_spill] sm:$0xff] %v10252_v35  ;;  %v10254_v63 = vpop.f32.mrf.mxu2  ;;  %v4780_v34 = vpop.permute.xlu2 %4779 }
 0x237   : > { %8374 = vmatmul.msk.f32.vlgmr.msrb.gmra.mxu0 %vm493_vm2, %v8370_v25  ;;  %8376 = vmatmul.msk.f32.vlgmr.msra.gmra.mxu1 %vm493_vm2, %v8370_v25  ;;  %11560 = vst [vmem:[#allocation56_spill] sm:$0xff] %v10254_v63  ;;  %v4795_v60 = vsel %vm1017_vm5, %v4780_v34, %v4782_v51 }
 0x238   : > { %8380 = vmatmul.msk.f32.vlgmr.msrb.gmra.mxu3 %vm493_vm2, %v8370_v25  ;;  %8387 = vmatmul.msk.f32.vlgmr.msrb.gmra.mxu2 %vm493_vm2, %v8385_v24 }
 0x23b   : > { %v4595_v3 = vpop.permute.xlu0 %4594 }
 0x23c   : > { %v4607_v2 = vsel %vm827_vm4, %v4593_v57, %v4595_v3  ;;  %v4599_v45 = vpop.permute.xlu1 %4598  ;;  %v10264_v63 = vpop.f32.mrf.mxu3 }
 0x23d   : > { %v4610_v27 = vsel %vm827_vm4, %v4599_v45, %v4601_v44  ;;  %8388 = vmatpush.msk.msra.mxu3 %vm497_vm1, %v4607_v2  ;;  %11561 = vst [vmem:[#allocation57_spill] sm:$0xff] %v10264_v63  ;;  %v10266_v35 = vpop.f32.mrf.mxu1  ;;  %v10268_v57 = vpop.f32.mrf.mxu0 }
 0x23e   : > { %8394 = vmatpush.msk.msra.mxu2 %vm497_vm1, %v4610_v27  ;;  %11562 = vst [vmem:[#allocation58_spill] sm:$0xff] %v10266_v35  ;;  %v10273_v20 = vpop.f32.mrf.mxu2  ;;  %v4792_v35 = vpop.permute.xlu2 %4791 }
 0x23f   : > { %8382 = vmatmul.msk.f32.vlgmr.msra.gmra.mxu0 %vm493_vm2, %v8370_v25  ;;  %8384 = vmatmul.msk.f32.vlgmr.msrb.gmra.mxu1 %vm493_vm2, %v8370_v25  ;;  %11563 = vst [vmem:[#allocation59_spill] sm:$0xff] %v10268_v57 }
 0x240   : > { %8389 = vmatmul.msk.f32.vlgmr.msra.gmra.mxu3 %vm493_vm2, %v8385_v24  ;;  %8395 = vmatmul.msk.f32.vlgmr.msra.gmra.mxu2 %vm493_vm2, %v8385_v24  ;;  %11564 = vst [vmem:[#allocation60_spill] sm:$0xff] %v10273_v20 }
 0x243   : > { %v4597_v39 = vpop.permute.xlu0 %4596 }
 0x244   : > { %v4608_v2 = vsel %vm827_vm4, %v4595_v3, %v4597_v39  ;;  %v4609_v27 = vsel %vm827_vm4, %v4597_v39, %v4599_v45  ;;  %v4603_v38 = vpop.permute.xlu1 %4602  ;;  %v10283_v39 = vpop.f32.mrf.mxu3  ;;  %v8400_v3 = vld [vmem:[%s11498_s1 + $0xb8] sm:$0xff] }
 0x245   : > { %v4611_v25 = vsel %vm827_vm4, %v4601_v44, %v4603_v38  ;;  %8390 = vmatpush.msk.msrb.mxu0 %vm497_vm1, %v4608_v2  ;;  %8392 = vmatpush.msk.msra.mxu1 %vm497_vm1, %v4609_v27  ;;  %11565 = vst [vmem:[#allocation61_spill] sm:$0xff] %v10283_v39  ;;  %v10285_v34 = vpop.f32.mrf.mxu0  ;;  %v10290_v45 = vpop.f32.mrf.mxu1 }
 0x246   : > { %8396 = vmatpush.msk.msrb.mxu3 %vm497_vm1, %v4611_v25  ;;  %11566 = vst [vmem:[#allocation62_spill] sm:$0xff] %v10285_v34  ;;  %v10293_v27 = vpop.f32.mrf.mxu2  ;;  %v4973_v34 = vpop.permute.xlu2 %4972 }
 0x247   : > { %8401 = vmatpush.msk.msrb.mxu1 %vm497_vm1, %v4795_v60  ;;  %8391 = vmatmul.msk.f32.vlgmr.msrb.gmra.mxu0 %vm493_vm2, %v8385_v24  ;;  %11567 = vst [vmem:[#allocation63_spill] sm:$0xff] %v10290_v45  ;;  %v8879_v45 = vmov 0  }
 0x248   : > { %8393 = vmatmul.msk.f32.vlgmr.msra.gmra.mxu1 %vm493_vm2, %v8385_v24  ;;  %8397 = vmatmul.msk.f32.vlgmr.msrb.gmra.mxu3 %vm493_vm2, %v8385_v24  ;;  %11568 = vst [vmem:[#allocation64_spill] sm:$0xff] %v10293_v27 }
 0x249   : > { %8676 = vset.pattern.permute.xlu1 %v8879_v45  ;;  %8762 = vset.pattern.permute.xlu2 %v8879_v45 }
 0x24a   : > { %8763 = vset.pattern.permute.xlu0 %v8879_v45 }
 0x24b   : > { %v4784_v44 = vpop.permute.xlu0 %4783 }
 0x24c   : > { %v4796_v60 = vsel %vm1017_vm5, %v4782_v51, %v4784_v44  ;;  %v4605_v2 = vpop.permute.xlu1 %4604 }
 0x24d   : > { %v4612_v25 = vsel %vm827_vm4, %v4603_v38, %v4605_v2  ;;  %8403 = vmatpush.msk.msrb.mxu2 %vm497_vm1, %v4796_v60  ;;  %v10301_v51 = vpop.f32.mrf.mxu1  ;;  %v5155_v60 = vld [vmem:[%s11499_s2] sm:$0xff]  ;;  %v10307_v2 = vpop.f32.mrf.mxu0 }
 0x24e   : > { %8398 = vmatpush.msk.msra.mxu0 %vm497_vm1, %v4612_v25  ;;  %8404 = vmatmul.msk.f32.vlgmr.msrb.gmra.mxu2 %vm493_vm2, %v8400_v3  ;;  %11569 = vst [vmem:[#allocation65_spill] sm:$0xff] %v10301_v51  ;;  %v10311_v25 = vpop.f32.mrf.mxu3  ;;  %v4971_v63 = vpop.permute.xlu2 %4970 }
 0x24f   : > { %8399 = vmatmul.msk.f32.vlgmr.msra.gmra.mxu0 %vm493_vm2, %v8385_v24  ;;  %11570 = vst [vmem:[#allocation66_spill] sm:$0xff] %v10307_v2  ;;  %5158 = vperm.xlu1 %8676, %v5155_v60   ;;  %v4985_v60 = vsel %vm1207_vm6, %v4971_v63, %v4973_v34 }
 0x250   : > { %8402 = vmatmul.msk.f32.vlgmr.msrb.gmra.mxu1 %vm493_vm2, %v8400_v3  ;;  %11571 = vst [vmem:[#allocation67_spill] sm:$0xff] %v10311_v25 }
 0x253   : > { %v4786_v57 = vpop.permute.xlu0 %4785 }
 0x254   : > { %v4797_v27 = vsel %vm1017_vm5, %v4784_v44, %v4786_v57  ;;  %v4790_v38 = vpop.permute.xlu1 %4789  ;;  %v10315_v44 = vpop.f32.mrf.mxu2 }
 0x255   : > { %v4800_v24 = vsel %vm1017_vm5, %v4790_v38, %v4792_v35  ;;  %8405 = vmatpush.msk.msra.mxu3 %vm497_vm1, %v4797_v27  ;;  %v10320_v20 = vpop.f32.mrf.mxu0  ;;  %v10328_v25 = vpop.f32.mrf.mxu1 }
 0x256   : > { %8411 = vmatpush.msk.msra.mxu2 %vm497_vm1, %v4800_v24  ;;  %8406 = vmatmul.msk.f32.vlgmr.msra.gmra.mxu3 %vm493_vm2, %v8400_v3  ;;  %11572 = vst [vmem:[#allocation68_spill] sm:$0xff] %v10320_v20  ;;  %v10326_v24 = vpop.f32.mrf.mxu3 }
 0x257   : > { %8412 = vmatmul.msk.f32.vlgmr.msra.gmra.mxu2 %vm493_vm2, %v8400_v3  ;;  %11573 = vst [vmem:[#allocation69_spill] sm:$0xff] %v10326_v24 }
 0x258   : > { %11574 = vst [vmem:[#allocation70_spill] sm:$0xff] %v10328_v25 }
 0x25b   : > { %v4788_v51 = vpop.permute.xlu0 %4787 }
 0x25c   : > { %v4798_v45 = vsel %vm1017_vm5, %v4786_v57, %v4788_v51  ;;  %v4799_v2 = vsel %vm1017_vm5, %v4788_v51, %v4790_v38  ;;  %v4794_v39 = vpop.permute.xlu1 %4793  ;;  %v10332_v57 = vpop.f32.mrf.mxu2 }
 0x25d   : > { %v4801_v27 = vsel %vm1017_vm5, %v4792_v35, %v4794_v39  ;;  %8407 = vmatpush.msk.msrb.mxu0 %vm497_vm1, %v4798_v45  ;;  %8409 = vmatpush.msk.msra.mxu1 %vm497_vm1, %v4799_v2  ;;  %11575 = vst [vmem:[#allocation71_spill] sm:$0xff] %v10332_v57  ;;  %v8415_v39 = vld [vmem:[%s11498_s1 + $0xc0] sm:$0xff]  ;;  %v10341_v2 = vpop.f32.mrf.mxu0 }
 0x25e   : > { %8413 = vmatpush.msk.msrb.mxu3 %vm497_vm1, %v4801_v27  ;;  %8408 = vmatmul.msk.f32.vlgmr.msrb.gmra.mxu0 %vm493_vm2, %v8400_v3  ;;  %v10345_v27 = vpop.f32.mrf.mxu1 }
 0x25f   : > { %8410 = vmatmul.msk.f32.vlgmr.msra.gmra.mxu1 %vm493_vm2, %v8400_v3  ;;  %8414 = vmatmul.msk.f32.vlgmr.msrb.gmra.mxu3 %vm493_vm2, %v8400_v3  ;;  %v10351_v3 = vpop.f32.mrf.mxu3 }
 0x260   : > { %8418 = vmatpush.msk.msrb.mxu1 %vm497_vm1, %v4985_v60  ;;  %11576 = vst [vmem:[#allocation72_spill] sm:$0xff] %v10351_v3  ;;  %v4981_v60 = vpop.permute.xlu2 %4980 }
 0x263   : > { %v4975_v35 = vpop.permute.xlu0 %4974 }
 0x264   : > { %v4986_v51 = vsel %vm1207_vm6, %v4973_v34, %v4975_v35  ;;  %v4969_v38 = vpop.permute.xlu1 %4968  ;;  %v10353_v34 = vpop.f32.mrf.mxu2 }
 0x265   : > { %v4984_v45 = vsel %vm1207_vm6, %v4969_v38, %v4971_v63  ;;  %8420 = vmatpush.msk.msrb.mxu2 %vm497_vm1, %v4986_v51  ;;  %11577 = vst [vmem:[#allocation73_spill] sm:$0xff] %v10353_v34 }
 0x266   : > { %8416 = vmatpush.msk.msra.mxu0 %vm497_vm1, %v4984_v45  ;;  %8421 = vmatmul.msk.f32.vlgmr.msrb.gmra.mxu2 %vm493_vm2, %v8415_v39  ;;  %v10361_v45 = vpop.f32.mrf.mxu0 }
 0x267   : > { %8417 = vmatmul.msk.f32.vlgmr.msra.gmra.mxu0 %vm493_vm2, %v8415_v39  ;;  %8419 = vmatmul.msk.f32.vlgmr.msrb.gmra.mxu1 %vm493_vm2, %v8415_v39  ;;  %11578 = vst [vmem:[#allocation74_spill] sm:$0xff] %v10361_v45  ;;  %v10365_v3 = vpop.f32.mrf.mxu3 }
 0x268   : > { %11579 = vst [vmem:[#allocation75_spill] sm:$0xff] %v10365_v3 }
 0x26b   : > { %v4977_v20 = vpop.permute.xlu0 %4976 }
 0x26c   : > { %v4987_v63 = vsel %vm1207_vm6, %v4975_v35, %v4977_v20  ;;  %v4979_v38 = vpop.permute.xlu1 %4978  ;;  %v10367_v35 = vpop.f32.mrf.mxu1 }
 0x26d   : > { %v4988_v51 = vsel %vm1207_vm6, %v4977_v20, %v4979_v38  ;;  %v4989_v24 = vsel %vm1207_vm6, %v4979_v38, %v4981_v60  ;;  %8422 = vmatpush.msk.msra.mxu3 %vm497_vm1, %v4987_v63  ;;  %11580 = vst [vmem:[#allocation76_spill] sm:$0xff] %v10367_v35  ;;  %v10370_v20 = vpop.f32.mrf.mxu2 }
 0x26e   : > { %8424 = vmatpush.msk.msrb.mxu0 %vm497_vm1, %v4988_v51  ;;  %8426 = vmatpush.msk.msra.mxu1 %vm497_vm1, %v4989_v24  ;;  %11581 = vst [vmem:[#allocation77_spill] sm:$0xff] %v10370_v20  ;;  %v10375_v24 = vpop.f32.mrf.mxu0 }
 0x26f   : > { %8423 = vmatmul.msk.f32.vlgmr.msra.gmra.mxu3 %vm493_vm2, %v8415_v39  ;;  %8425 = vmatmul.msk.f32.vlgmr.msrb.gmra.mxu0 %vm493_vm2, %v8415_v39  ;;  %v10377_v51 = vpop.f32.mrf.mxu3 }
 0x270   : > { %8427 = vmatmul.msk.f32.vlgmr.msra.gmra.mxu1 %vm493_vm2, %v8415_v39 }
 0x273   : > { %v4983_v38 = vpop.permute.xlu0 %4982 }
 0x274   : > { %v4990_v63 = vsel %vm1207_vm6, %v4981_v60, %v4983_v38  ;;  %v10379_v34 = vpop.f32.mrf.mxu1 }
 0x275   : > { %8428 = vmatpush.msk.msra.mxu2 %vm497_vm1, %v4990_v63  ;;  %11582 = vst [vmem:[#allocation78_spill] sm:$0xff] %v10379_v34  ;;  %v10381_v3 = vpop.f32.mrf.mxu2 }
 0x276   : > { %8429 = vmatmul.msk.f32.vlgmr.msra.gmra.mxu2 %vm493_vm2, %v8415_v39  ;;  %11583 = vst [vmem:[#allocation79_spill] sm:$0xff] %v10381_v3  ;;  %v10383_v35 = vpop.f32.mrf.mxu0  ;;  %vm5783_vm2 = vcmask 64512  }
 0x277   : > { %11584 = vst [vmem:[#allocation80_spill] sm:$0xff] %v10383_v35  ;;  %v10385_v45 = vpop.f32.mrf.mxu3 }
 0x278   : > { %11585 = vst [vmem:[#allocation81_spill] sm:$0xff] %v10385_v45 }
 0x27c   : > { %v10387_v20 = vpop.f32.mrf.mxu1 }
 0x27d   : > { %11586 = vst [vmem:[#allocation82_spill] sm:$0xff] %v10387_v20  ;;  %v10389_v57 = vpop.f32.mrf.mxu2 }
 0x27e   : > { %11587 = vst [vmem:[#allocation83_spill] sm:$0xff] %v10389_v57 }
 0x281   : > { %v10393_v38 = vpop.f32.mrf.mxu3 }
 0x282   : > { %11589 = vst [vmem:[#allocation85_spill] sm:$0xff] %v10393_v38 }
 0x283   : > { %v10391_v60 = vpop.f32.mrf.mxu0 }
 0x284   : > { %11588 = vst [vmem:[#allocation84_spill] sm:$0xff] %v10391_v60  ;;  %v10395_v39 = vpop.f32.mrf.mxu1 }
 0x285   : > { %11590 = vst [vmem:[#allocation86_spill] sm:$0xff] %v10395_v39  ;;  %v10397_v63 = vpop.f32.mrf.mxu2 }
 0x286   : > { %11591 = vst [vmem:[#allocation87_spill] sm:$0xff] %v10397_v63 }
 0x28a   : > { %v10401_v34 = vpop.f32.mrf.mxu3 }
 0x28b   : > { %11593 = vst [vmem:[#allocation89_spill] sm:$0xff] %v10401_v34 }
 0x28c   : > { %v10399_v25 = vpop.f32.mrf.mxu0  ;;  %v10403_v3 = vpop.f32.mrf.mxu1 }
 0x28d   : > { %11592 = vst [vmem:[#allocation88_spill] sm:$0xff] %v10399_v25  ;;  %v707_v25 = vadd.f32 %v9623_v21, %v9571_v4  ;;  %v767_v4 = vadd.f32 %v9647_v31, %v9581_v9  ;;  %v747_v31 = vadd.f32 %v9642_v30, %v9585_v12 }
 0x291   : > { %v10405_v35 = vpop.f32.mrf.mxu2 }
 0x292   : > { %11594 = vst [vmem:[#allocation90_spill] sm:$0xff] %v10405_v35 }
 0x299   : > { %v10409_v20 = vpop.f32.mrf.mxu3 }
 0x29a   : > { %11596 = vst [vmem:[#allocation92_spill] sm:$0xff] %v10409_v20  ;;  %v10413_v60 = vpop.f32.mrf.mxu2 }
 0x29b   : > { %v10407_v45 = vpop.f32.mrf.mxu0  ;;  %11598 = vst [vmem:[#allocation94_spill] sm:$0xff] %v10413_v60  ;;  %v993_v60 = vadd.f32 %v9689_v46, %v707_v25 }
 0x29c   : > { %11595 = vst [vmem:[#allocation91_spill] sm:$0xff] %v10407_v45  ;;  %v10411_v57 = vpop.f32.mrf.mxu1  ;;  %v687_v45 = vadd.f32 %v9611_v6, %v9543_v54  ;;  %v787_v54 = vadd.f32 %v9664_v37, %v9597_v7  ;;  %v727_v6 = vadd.f32 %v9625_v22, %v9555_v58 }
 0x29d   : > { %11597 = vst [vmem:[#allocation93_spill] sm:$0xff] %v10411_v57 }
 0x29e   : > { %v992_v57 = vadd.f32 %v9677_v43, %v687_v45  ;;  %v994_v7 = vadd.f32 %v9702_v53, %v727_v6  ;;  %v807_v53 = vadd.f32 %v9669_v41, %v9605_v18  ;;  %v11606_v41 = vld [vmem:[#allocation25_spill] sm:$0xff]  ;;  %v11608_v6 = vld [vmem:[#allocation18_spill] sm:$0xff] }
 0x2a0   : > { %v1182_v21 = vadd.f32 %v9729_v1, %v992_v57  ;;  %v997_v1 = vadd.f32 %v9720_v61, %v787_v54  ;;  %v995_v57 = vadd.f32 %v9706_v55, %v747_v31  ;;  %v11607_v54 = vld [vmem:[#allocation13_spill] sm:$0xff] }
 0x2a2   : > { %v10419_v63 = vpop.f32.mrf.mxu3  ;;  %v1372_v9 = vadd.f32 %v9790_v36, %v1182_v21  ;;  %v1184_v36 = vadd.f32 %v9749_v19, %v994_v7  ;;  %v11602_v19 = vld [vmem:[#allocation12_spill] sm:$0xff]  ;;  %v11605_v21 = vld [vmem:[#allocation17_spill] sm:$0xff]  ;;  %v11611_v7 = vld [vmem:[#allocation11_spill] sm:$0xff] }
 0x2a3   : > { %v10415_v38 = vpop.f32.mrf.mxu0  ;;  %11600 = vst [vmem:[#allocation96_spill] sm:$0xff] %v10419_v63  ;;  %v10423_v34 = vpop.f32.mrf.mxu2  ;;  %v1183_v63 = vadd.f32 %v9737_v13, %v993_v60  ;;  %v996_v13 = vadd.f32 %v9713_v56, %v767_v4  ;;  %v1187_v56 = vadd.f32 %v9776_v29, %v997_v1 }
 0x2a4   : > { %11599 = vst [vmem:[#allocation95_spill] sm:$0xff] %v10415_v38  ;;  %v10417_v39 = vpop.f32.mrf.mxu1  ;;  %v1374_v45 = vadd.f32 %v11602_v19, %v1184_v36 }
 0x2a5   : > { %11601 = vst [vmem:[#allocation97_spill] sm:$0xff] %v10423_v34  ;;  %v1373_v46 = vadd.f32 %v9794_v40, %v1183_v63  ;;  %v1186_v22 = vadd.f32 %v9766_v23, %v996_v13  ;;  %v1562_v40 = vadd.f32 %v9860_v5, %v1372_v9  ;;  %v1185_v5 = vadd.f32 %v9763_v8, %v995_v57  ;;  %v11604_v63 = vld [vmem:[#allocation10_spill] sm:$0xff]  ;;  %v11609_v8 = vld [vmem:[#allocation15_spill] sm:$0xff]  ;;  %v11610_v9 = vld [vmem:[#allocation32_spill] sm:$0xff] }
 0x2a6   : > { %v1377_v55 = vadd.f32 %v9836_v16, %v1187_v56  ;;  %v998_v4 = vadd.f32 %v11604_v63, %v807_v53  ;;  %v1564_v16 = vadd.f32 %v11609_v8, %v1374_v45  ;;  %v11621_v8 = vld [vmem:[#allocation19_spill] sm:$0xff] }
 0x2a7   : > { %v1563_v37 = vadd.f32 %v9877_v52, %v1373_v46  ;;  %v1376_v61 = vadd.f32 %v9826_v14, %v1186_v22  ;;  %v1752_v52 = vadd.f32 %v9926_v17, %v1562_v40  ;;  %v1375_v17 = vadd.f32 %v11607_v54, %v1185_v5  ;;  %v11612_v22 = vld [vmem:[#allocation22_spill] sm:$0xff]  ;;  %v11615_v5 = vld [vmem:[#allocation20_spill] sm:$0xff] }
 0x2a8   : > { %v1567_v46 = vadd.f32 %v11608_v6, %v1377_v55  ;;  %v1754_v55 = vadd.f32 %v11615_v5, %v1564_v16 }
 0x2a9   : > { %v1753_v12 = vadd.f32 %v9932_v11, %v1563_v37  ;;  %v11603_v11 = vld [vmem:[#allocation26_spill] sm:$0xff]  ;;  %v1566_v18 = vadd.f32 %v11605_v21, %v1376_v61  ;;  %v1942_v14 = vadd.f32 %v11606_v41, %v1752_v52  ;;  %v1188_v37 = vadd.f32 %v11611_v7, %v998_v4  ;;  %v11614_v61 = vld [vmem:[#allocation23_spill] sm:$0xff] }
 0x2aa   : > { %v10433_v38 = vpop.f32.mrf.mxu3  ;;  %v1757_v52 = vadd.f32 %v11614_v61, %v1567_v46  ;;  %v11628_v61 = vld [vmem:[#allocation61_spill] sm:$0xff] }
 0x2ab   : > { %v10427_v35 = vpop.f32.mrf.mxu0  ;;  %v10439_v34 = vpop.f32.mrf.mxu2  ;;  %v1943_v60 = vadd.f32 %v11603_v11, %v1753_v12  ;;  %v2132_v31 = vadd.f32 %v11610_v9, %v1942_v14  ;;  %v1756_v40 = vadd.f32 %v11612_v22, %v1566_v18  ;;  %v11613_v12 = vld [vmem:[#allocation16_spill] sm:$0xff]  ;;  %v11616_v11 = vld [vmem:[#allocation14_spill] sm:$0xff]  ;;  %v11618_v18 = vld [vmem:[#allocation21_spill] sm:$0xff] }
 0x2ac   : > { %v10429_v20 = vpop.f32.mrf.mxu1  ;;  %v1565_v53 = vadd.f32 %v11613_v12, %v1375_v17  ;;  %v11619_v14 = vld [vmem:[#allocation30_spill] sm:$0xff]  ;;  %v11620_v17 = vld [vmem:[#allocation27_spill] sm:$0xff]  ;;  %v11623_v22 = vld [vmem:[#allocation28_spill] sm:$0xff] }
 0x2ad   : > { %v2133_v1 = vadd.f32 %v10034_v47, %v1943_v60  ;;  %v2322_v57 = vadd.f32 %v10083_v0, %v2132_v31  ;;  %v1378_v60 = vadd.f32 %v11616_v11, %v1188_v37  ;;  %v11617_v0 = vld [vmem:[#allocation29_spill] sm:$0xff]  ;;  %v1947_v54 = vadd.f32 %v11619_v14, %v1757_v52  ;;  %v11632_v11 = vld [vmem:[#allocation40_spill] sm:$0xff] }
 0x2ae   : > { %v1755_v41 = vadd.f32 %v11618_v18, %v1565_v53  ;;  %v11627_v53 = vld [vmem:[#allocation60_spill] sm:$0xff] }
 0x2af   : > { %v2323_v56 = vadd.f32 %v10087_v15, %v2133_v1  ;;  %v2512_v19 = vadd.f32 %v10120_v48, %v2322_v57  ;;  %v1946_v15 = vadd.f32 %v11617_v0, %v1756_v40  ;;  %v1944_v48 = vadd.f32 %v11620_v17, %v1754_v55  ;;  %v11624_v40 = vld [vmem:[#allocation38_spill] sm:$0xff]  ;;  %v11625_v57 = vld [vmem:[#allocation35_spill] sm:$0xff]  ;;  %v11635_v14 = vld [vmem:[#allocation36_spill] sm:$0xff] }
 0x2b0   : > { %v1568_v16 = vadd.f32 %v11621_v8, %v1378_v60  ;;  %v2137_v9 = vadd.f32 %v10060_v28, %v1947_v54  ;;  %v11633_v0 = vld [vmem:[#allocation47_spill] sm:$0xff]  ;;  %v11636_v17 = vld [vmem:[#allocation48_spill] sm:$0xff] }
 0x2b1   : > { %v2513_v47 = vadd.f32 %v10126_v10, %v2323_v56  ;;  %v2702_v21 = vadd.f32 %v10154_v50, %v2512_v19  ;;  %v2136_v10 = vadd.f32 %v10058_v59, %v1946_v15  ;;  %v2134_v50 = vadd.f32 %v10046_v26, %v1944_v48  ;;  %v11626_v56 = vld [vmem:[#allocation42_spill] sm:$0xff]  ;;  %v11629_v26 = vld [vmem:[#allocation24_spill] sm:$0xff]  ;;  %v11630_v19 = vld [vmem:[#allocation33_spill] sm:$0xff] }
 0x2b2   : > { %v10457_v58 = vpop.f32.mrf.mxu3  ;;  %v1945_v59 = vadd.f32 %v11623_v22, %v1755_v41  ;;  %v1758_v55 = vadd.f32 %v11629_v26, %v1568_v16  ;;  %v11638_v8 = vld [vmem:[#allocation52_spill] sm:$0xff] }
 0x2b3   : > { %v10465_v30 = vpop.f32.mrf.mxu2  ;;  %v2703_v4 = vadd.f32 %v10160_v62, %v2513_v47  ;;  %v2892_v6 = vadd.f32 %v10203_v32, %v2702_v21  ;;  %v11622_v62 = vld [vmem:[#allocation37_spill] sm:$0xff]  ;;  %v2327_v32 = vadd.f32 %v11624_v40, %v2137_v9  ;;  %v11631_v47 = vld [vmem:[#allocation43_spill] sm:$0xff]  ;;  %v11647_v26 = vld [vmem:[#allocation64_spill] sm:$0xff] }
 0x2b4   : > { %v10446_v43 = vpop.f32.mrf.mxu0  ;;  %v10448_v25 = vpop.f32.mrf.mxu1  ;;  %v2326_v1 = vadd.f32 %v11622_v62, %v2136_v10  ;;  %v11634_v21 = vld [vmem:[#allocation65_spill] sm:$0xff]  ;;  %v11639_v62 = vld [vmem:[#allocation31_spill] sm:$0xff] }
 0x2b5   : > { %v2893_v46 = vadd.f32 %v10207_v33, %v2703_v4  ;;  %v3082_v7 = vadd.f32 %v10246_v42, %v2892_v6  ;;  %v2324_v33 = vadd.f32 %v11625_v57, %v2134_v50  ;;  %v2135_v42 = vadd.f32 %v11630_v19, %v1945_v59  ;;  %v11637_v6 = vld [vmem:[#allocation45_spill] sm:$0xff]  ;;  %v11642_v59 = vld [vmem:[#allocation50_spill] sm:$0xff]  ;;  %v11648_v19 = vld [vmem:[#allocation83_spill] sm:$0xff] }
 0x2b6   : > { %v2516_v12 = vadd.f32 %v11626_v56, %v2326_v1  ;;  %v1948_v1 = vadd.f32 %v11639_v62, %v1758_v55  ;;  %v11658_v62 = vld [vmem:[#allocation71_spill] sm:$0xff] }
 0x2b7   : > { %v3083_v37 = vadd.f32 %v10250_v49, %v2893_v46  ;;  %v3272_v28 = vadd.f32 %v11627_v53, %v3082_v7  ;;  %v2517_v49 = vadd.f32 %v11631_v47, %v2327_v32  ;;  %v2514_v60 = vadd.f32 %v11632_v11, %v2324_v33  ;;  %v11643_v32 = vld [vmem:[#allocation57_spill] sm:$0xff] }
 0x2b8   : > { %v2706_v15 = vadd.f32 %v11633_v0, %v2516_v12  ;;  %v2325_v54 = vadd.f32 %v11635_v14, %v2135_v42  ;;  %v11644_v12 = vld [vmem:[#allocation46_spill] sm:$0xff]  ;;  %v11649_v47 = vld [vmem:[#allocation85_spill] sm:$0xff] }
 0x2b9   : > { %v3273_v52 = vadd.f32 %v11628_v61, %v3083_v37  ;;  %v3462_v18 = vadd.f32 %v11634_v21, %v3272_v28  ;;  %v2707_v48 = vadd.f32 %v11636_v17, %v2517_v49  ;;  %v2704_v46 = vadd.f32 %v11637_v6, %v2514_v60  ;;  %v11641_v37 = vld [vmem:[#allocation53_spill] sm:$0xff]  ;;  %v11645_v28 = vld [vmem:[#allocation59_spill] sm:$0xff]  ;;  %v11650_v60 = vld [vmem:[#allocation34_spill] sm:$0xff] }
 0x2ba   : > { %v2896_v16 = vadd.f32 %v11638_v8, %v2706_v15  ;;  %v2138_v0 = vadd.f32 %v11650_v60, %v1948_v1  ;;  %v11653_v21 = vld [vmem:[#allocation62_spill] sm:$0xff]  ;;  %v11656_v8 = vld [vmem:[#allocation39_spill] sm:$0xff] }
 0x2bb   : > { %v10484_v13 = vpop.f32.mrf.mxu3  ;;  %v10493_v36 = vpop.f32.mrf.mxu2  ;;  %v3463_v4 = vadd.f32 %v10315_v44, %v3273_v52  ;;  %v3652_v9 = vadd.f32 %v10341_v2, %v3462_v18  ;;  %v11640_v44 = vld [vmem:[#allocation41_spill] sm:$0xff]  ;;  %v2897_v22 = vadd.f32 %v11641_v37, %v2707_v48  ;;  %v2894_v40 = vadd.f32 %v11642_v59, %v2704_v46  ;;  %v11654_v14 = vld [vmem:[#allocation70_spill] sm:$0xff] }
 0x2bc   : > { %v10471_v23 = vpop.f32.mrf.mxu0  ;;  %v10475_v29 = vpop.f32.mrf.mxu1  ;;  %v2515_v7 = vadd.f32 %v11640_v44, %v2325_v54  ;;  %v3086_v57 = vadd.f32 %v11643_v32, %v2896_v16  ;;  %v11655_v48 = vld [vmem:[#allocation90_spill] sm:$0xff]  ;;  %v2328_v16 = vadd.f32 %v11656_v8, %v2138_v0  ;;  %v11669_v0 = vld [vmem:[#allocation80_spill] sm:$0xff] }
 0x2bd   : > { %v3653_v50 = vadd.f32 %v10345_v27, %v3463_v4  ;;  %v3842_v33 = vadd.f32 %v10377_v51, %v3652_v9  ;;  %v3087_v2 = vadd.f32 %v11645_v28, %v2897_v22  ;;  %v11646_v27 = vld [vmem:[#allocation55_spill] sm:$0xff]  ;;  %v11657_v9 = vld [vmem:[#allocation56_spill] sm:$0xff]  ;;  %v11660_v22 = vld [vmem:[#allocation74_spill] sm:$0xff] }
 0x2be   : > { %v2705_v53 = vadd.f32 %v11644_v12, %v2515_v7  ;;  %v3084_v52 = vadd.f32 %v11646_v27, %v2894_v40  ;;  %v3276_v55 = vadd.f32 %v11647_v26, %v3086_v57  ;;  %v11651_v51 = vld [vmem:[#allocation51_spill] sm:$0xff]  ;;  %v11659_v7 = vld [vmem:[#allocation69_spill] sm:$0xff]  ;;  %v11675_v8 = vld [vmem:[#allocation84_spill] sm:$0xff] }
 0x2bf   : > { %v3843_v56 = vadd.f32 %v10375_v24, %v3653_v50  ;;  %v4032_v42 = vadd.f32 %v11648_v19, %v3842_v33  ;;  %v11652_v24 = vld [vmem:[#allocation67_spill] sm:$0xff] }
 0x2c0   : > { %v2895_v15 = vadd.f32 %v11651_v51, %v2705_v53  ;;  %v3277_v4 = vadd.f32 %v11652_v24, %v3087_v2  ;;  %v3274_v18 = vadd.f32 %v11653_v21, %v3084_v52  ;;  %v3466_v54 = vadd.f32 %v11654_v14, %v3276_v55  ;;  %v11661_v40 = vld [vmem:[#allocation95_spill] sm:$0xff]  ;;  %v11664_v53 = vld [vmem:[#allocation76_spill] sm:$0xff]  ;;  %v11665_v2 = vld [vmem:[#allocation73_spill] sm:$0xff] }
 0x2c1   : > { %v4033_v49 = vadd.f32 %v11649_v47, %v3843_v56  ;;  %v4222_v17 = vadd.f32 %v10403_v3, %v4032_v42  ;;  %v11662_v3 = vld [vmem:[#allocation44_spill] sm:$0xff]  ;;  %v11663_v56 = vld [vmem:[#allocation63_spill] sm:$0xff]  ;;  %v11666_v52 = vld [vmem:[#allocation81_spill] sm:$0xff] }
 0x2c2   : > { %v3085_v50 = vadd.f32 %v11657_v9, %v2895_v15  ;;  %v3467_v1 = vadd.f32 %v11658_v62, %v3277_v4  ;;  %v3464_v37 = vadd.f32 %v11659_v7, %v3274_v18  ;;  %v3656_v59 = vadd.f32 %v11660_v22, %v3466_v54  ;;  %v11667_v42 = vld [vmem:[#allocation49_spill] sm:$0xff]  ;;  %v11670_v15 = vld [vmem:[#allocation78_spill] sm:$0xff]  ;;  %v11671_v4 = vld [vmem:[#allocation87_spill] sm:$0xff] }
 0x2c3   : > { %v10516_v31 = vpop.f32.mrf.mxu3  ;;  %v10528_v5 = vpop.f32.mrf.mxu2  ;;  %v4223_v6 = vadd.f32 %v11655_v48, %v4033_v49  ;;  %v4376_v32 = vadd.f32 %v11661_v40, %v4222_v17  ;;  %v2518_v33 = vadd.f32 %v11662_v3, %v2328_v16  ;;  %v11668_v49 = vld [vmem:[#allocation68_spill] sm:$0xff]  ;;  %v11672_v54 = vld [vmem:[#allocation54_spill] sm:$0xff]  ;;  %v11676_v9 = vld [vmem:[#allocation93_spill] sm:$0xff] }
 0x2c4   : > { %v10500_v45 = vpop.f32.mrf.mxu0  ;;  %v3275_v12 = vadd.f32 %v11663_v56, %v3085_v50  ;;  %v3657_v28 = vadd.f32 %v11664_v53, %v3467_v1  ;;  %v3654_v27 = vadd.f32 %v11665_v2, %v3464_v37  ;;  %v3846_v26 = vadd.f32 %v11666_v52, %v3656_v59  ;;  %v10595_v37 = vpop.permute.xlu1 %5158  ;;  %v11677_v22 = vld [vmem:[#allocation58_spill] sm:$0xff] }
 0x2c5   : > { %v10503_v63 = vpop.f32.mrf.mxu1  ;;  %v4377_v57 = vadd.f32 %v10417_v39, %v4223_v6  ;;  %v4581_v55 = vadd.f32 %v10457_v58, %v4376_v32  ;;  %v2708_v47 = vadd.f32 %v11667_v42, %v2518_v33  ;;  %v11673_v58 = vld [vmem:[#allocation75_spill] sm:$0xff]  ;;  %v11680_v33 = vld [vmem:[#allocation92_spill] sm:$0xff]  ;;  %v11681_v2 = vld [vmem:[#allocation66_spill] sm:$0xff] }
 0x2c6   : > { %v3465_v60 = vadd.f32 %v11668_v49, %v3275_v12  ;;  %v3847_v39 = vadd.f32 %v11669_v0, %v3657_v28  ;;  %v3844_v24 = vadd.f32 %v11670_v15, %v3654_v27  ;;  %v4036_v21 = vadd.f32 %v11671_v4, %v3846_v26  ;;  %v11683_v26 = vld [vmem:[#allocation97_spill] sm:$0xff]  ;;  %v11684_v49 = vld [vmem:[#allocation72_spill] sm:$0xff] }
 0x2c7   : > { %v4582_v19 = vadd.f32 %v10446_v43, %v4377_v57  ;;  %v4770_v18 = vadd.f32 %v10493_v36, %v4581_v55  ;;  %v2898_v17 = vadd.f32 %v11672_v54, %v2708_v47  ;;  %v11674_v43 = vld [vmem:[#allocation89_spill] sm:$0xff]  ;;  %v11678_v36 = vld [vmem:[#allocation79_spill] sm:$0xff] }
 0x2c8   : > { %v3655_v48 = vadd.f32 %v11673_v58, %v3465_v60  ;;  %v4037_v6 = vadd.f32 %v11674_v43, %v3847_v39  ;;  %v4034_v16 = vadd.f32 %v11675_v8, %v3844_v24  ;;  %v4226_v50 = vadd.f32 %v11676_v9, %v4036_v21  ;;  %v11685_v60 = vld [vmem:[#allocation91_spill] sm:$0xff]  ;;  %v11686_v4 = vld [vmem:[#allocation77_spill] sm:$0xff] }
 0x2c9   : > { %v4771_v14 = vadd.f32 %v10516_v31, %v4582_v19  ;;  %v3088_v59 = vadd.f32 %v11677_v22, %v2898_v17  ;;  %v11679_v31 = vld [vmem:[#allocation94_spill] sm:$0xff]  ;;  %v11689_v22 = vld [vmem:[#allocation96_spill] sm:$0xff] }
 0x2ca   : > { %v3845_v40 = vadd.f32 %v11678_v36, %v3655_v48  ;;  %v4227_v32 = vadd.f32 %v11679_v31, %v4037_v6  ;;  %v4224_v56 = vadd.f32 %v11680_v33, %v4034_v16  ;;  %v4380_v12 = vadd.f32 %v10427_v35, %v4226_v50 }
 0x2cb   : > { %v10554_v61 = vpop.f32.mrf.mxu3 }
 0x2cc   : > { %v10537_v41 = vpop.f32.mrf.mxu0  ;;  %v4381_v52 = vadd.f32 %v10429_v20, %v4227_v32  ;;  %v4378_v55 = vadd.f32 %v11683_v26, %v4224_v56  ;;  %v4585_v19 = vadd.f32 %v10484_v13, %v4380_v12  ;;  %v5317_v26 = vld [vmem:[#allocation4 + $0x1e0] sm:$0xff] }
 0x2cd   : > { %v4836_v10 = vpop.f32.mrf.mxu1 }
 0x2ce   : > { %v4959_v62 = vadd.f32 %v4836_v10, %v4770_v18  ;;  %v3278_v10 = vadd.f32 %v11681_v2, %v3088_v59  ;;  %v4586_v39 = vadd.f32 %v10471_v23, %v4381_v52  ;;  %v4583_v15 = vadd.f32 %v10448_v25, %v4378_v55  ;;  %v11687_v23 = vld [vmem:[#allocation82_spill] sm:$0xff] }
 0x2cf   : > { %v4774_v20 = vadd.f32 %v10528_v5, %v4585_v19  ;;  %v5285_v52 = vld [vmem:[#allocation4 + $0xe0] sm:$0xff]  ;;  %v5283_v19 = vld [vmem:[#allocation4 + $0xd0] sm:$0xff] }
 0x2d0   : > { %v3468_v35 = vadd.f32 %v11684_v49, %v3278_v10  ;;  %v4775_v18 = vadd.f32 %v10554_v61, %v4586_v39  ;;  %v4772_v17 = vadd.f32 %v10500_v45, %v4583_v15  ;;  %v5287_v10 = vld [vmem:[#allocation4 + $0xf0] sm:$0xff]  ;;  %v5381_v55 = vld [vmem:[#allocation4 + $0x3e0] sm:$0xff] }
 0x2d1   : > { %v4856_v11 = vpop.f32.mrf.mxu2  ;;  %5482 = vmatpush.msrb.mxu3 %v5287_v10  ;;  %v5315_v49 = vld [vmem:[#allocation4 + $0x1d0] sm:$0xff]  ;;  %v5377_v39 = vld [vmem:[#allocation4 + $0x3c0] sm:$0xff] }
 0x2d2   : > { %v4960_v1 = vadd.f32 %v4856_v11, %v4771_v14  ;;  %v11682_v11 = vld [vmem:[#allocation86_spill] sm:$0xff]  ;;  %v3658_v21 = vadd.f32 %v11686_v4, %v3468_v35  ;;  %v5279_v15 = vld [vmem:[#allocation4 + $0xb0] sm:$0xff] }
 0x2d3   : > { %v4035_v27 = vadd.f32 %v11682_v11, %v3845_v40  ;;  %v5319_v11 = vld [vmem:[#allocation4 + $0x1f0] sm:$0xff]  ;;  %5483 = vmatpush.msrb.mxu3 %v5285_v52  ;;  %v5281_v35 = vld [vmem:[#allocation4 + $0xc0] sm:$0xff] }
 0x2d4   : > { %v3848_v5 = vadd.f32 %v11687_v23, %v3658_v21  ;;  %5502 = vmatpush.msra.mxu0 %v5319_v11  ;;  %v5349_v4 = vld [vmem:[#allocation4 + $0x2e0] sm:$0xff]  ;;  %v5375_v21 = vld [vmem:[#allocation4 + $0x3b0] sm:$0xff] }
 0x2d5   : > { %v4225_v0 = vadd.f32 %v11685_v60, %v4035_v27  ;;  %v5383_v27 = vld [vmem:[#allocation4 + $0x3f0] sm:$0xff]  ;;  %v5313_v60 = vld [vmem:[#allocation4 + $0x1c0] sm:$0xff]  ;;  %5484 = vmatpush.msrb.mxu3 %v5283_v19 }
 0x2d6   : > { %5542 = vmatpush.msrb.mxu2 %v5383_v27  ;;  %5503 = vmatpush.msra.mxu0 %v5317_v26  ;;  %v5275_v23 = vld [vmem:[#allocation4 + $0x90] sm:$0xff]  ;;  %v5265_v19 = vld [vmem:[#allocation4 + $0x40] sm:$0xff] }
 0x2d7   : > { %v4379_v54 = vadd.f32 %v10433_v38, %v4225_v0  ;;  %v11688_v38 = vld [vmem:[#allocation88_spill] sm:$0xff]  ;;  %5485 = vmatpush.msrb.mxu3 %v5281_v35 }
 0x2d8   : > { %v4038_v45 = vadd.f32 %v11688_v38, %v3848_v5  ;;  %5543 = vmatpush.msrb.mxu2 %v5381_v55  ;;  %v5351_v0 = vld [vmem:[#allocation4 + $0x2f0] sm:$0xff]  ;;  %5504 = vmatpush.msra.mxu0 %v5315_v49  ;;  %v5273_v38 = vld [vmem:[#allocation4 + $0x80] sm:$0xff] }
 0x2d9   : > { %v4876_v51 = vpop.f32.mrf.mxu3  ;;  %v4584_v8 = vadd.f32 %v10465_v30, %v4379_v54  ;;  %5522 = vmatpush.msrb.mxu1 %v5351_v0  ;;  %v5277_v54 = vld [vmem:[#allocation4 + $0xa0] sm:$0xff]  ;;  %5486 = vmatpush.msrb.mxu3 %v5279_v15  ;;  %v5307_v5 = vld [vmem:[#allocation4 + $0x190] sm:$0xff] }
 0x2da   : > { %v4936_v7 = vpop.f32.mrf.mxu2  ;;  %v4961_v16 = vadd.f32 %v4876_v51, %v4772_v17  ;;  %5505 = vmatpush.msra.mxu0 %v5313_v60  ;;  %v5309_v17 = vld [vmem:[#allocation4 + $0x1a0] sm:$0xff]  ;;  %v5299_v52 = vld [vmem:[#allocation4 + $0x150] sm:$0xff] }
 0x2db   : > { %v10567_v46 = vpop.f32.mrf.mxu0  ;;  %v4964_v48 = vadd.f32 %v4936_v7, %v4775_v18  ;;  %v4773_v50 = vadd.f32 %v10503_v63, %v4584_v8  ;;  %v4228_v7 = vadd.f32 %v11689_v22, %v4038_v45  ;;  %v5347_v18 = vld [vmem:[#allocation4 + $0x2d0] sm:$0xff]  ;;  %5523 = vmatpush.msrb.mxu1 %v5349_v4  ;;  %5487 = vmatpush.msrb.mxu3 %v5277_v54  ;;  %v5305_v45 = vld [vmem:[#allocation4 + $0x180] sm:$0xff] }
 0x2dc   : > { %v4916_v44 = vpop.f32.mrf.mxu1  ;;  %v5371_v8 = vld [vmem:[#allocation4 + $0x390] sm:$0xff]  ;;  %v5261_v15 = vld [vmem:[#allocation4 + $0x20] sm:$0xff] }
 0x2dd   : > { %v4963_v58 = vadd.f32 %v4916_v44, %v4774_v20  ;;  %v4962_v30 = vadd.f32 %v10567_v46, %v4773_v50  ;;  %v4382_v36 = vadd.f32 %v10439_v34, %v4228_v7  ;;  %v5311_v20 = vld [vmem:[#allocation4 + $0x1b0] sm:$0xff]  ;;  %5524 = vmatpush.msrb.mxu1 %v5347_v18  ;;  %5488 = vmatpush.msrb.mxu3 %v5275_v23  ;;  %v5341_v50 = vld [vmem:[#allocation4 + $0x2a0] sm:$0xff]  ;;  %v5288_v23 = vld [vmem:[#allocation4 + $0xf8] sm:$0xff] }
 0x2de   : > { %5506 = vmatpush.msra.mxu0 %v5311_v20  ;;  %v5271_v22 = vld [vmem:[#allocation4 + $0x70] sm:$0xff]  ;;  %v5293_v20 = vld [vmem:[#allocation4 + $0x120] sm:$0xff] }
 0x2df   : > { %5489 = vmatpush.msrb.mxu3 %v5273_v38  ;;  %v5363_v26 = vld [vmem:[#allocation4 + $0x350] sm:$0xff]  ;;  %v5333_v4 = vld [vmem:[#allocation4 + $0x260] sm:$0xff] }
 0x2e0   : > { %5507 = vmatpush.msra.mxu0 %v5309_v17  ;;  %v5335_v49 = vld [vmem:[#allocation4 + $0x270] sm:$0xff]  ;;  %v5329_v54 = vld [vmem:[#allocation4 + $0x240] sm:$0xff] }
 0x2e1   : > { %5490 = vmatpush.msrb.mxu3 %v5271_v22  ;;  %v5259_v18 = vld [vmem:[#allocation4 + $0x10] sm:$0xff]  ;;  %v5353_v17 = vld [vmem:[#allocation4 + $0x300] sm:$0xff] }
 0x2e2   : > { %v4956_v14 = vpop.f32.mrf.mxu3  ;;  %5508 = vmatpush.msra.mxu0 %v5307_v5  ;;  %v5327_v5 = vld [vmem:[#allocation4 + $0x230] sm:$0xff] }
 0x2e3   : > { %v5323_v38 = vld [vmem:[#allocation4 + $0x210] sm:$0xff] }
 0x2e4   : > { %v5025_v57 = vpop.f32.mrf.mxu0  ;;  %v5045_v3 = vpop.f32.mrf.mxu1  ;;  %5509 = vmatpush.msra.mxu0 %v5305_v45  ;;  %v5409_v45 = vld [vmem:[#allocation4 + $0x4c0] sm:$0xff]  ;;  %v5407_v22 = vld [vmem:[#allocation4 + $0x4b0] sm:$0xff] }
 0x2e5   : > { %v5148_v53 = vadd.f32 %v5025_v57, %v4959_v62  ;;  %v5149_v28 = vadd.f32 %v5045_v3, %v4960_v1  ;;  %v4587_v57 = vadd.f32 %v10475_v29, %v4382_v36  ;;  %v5303_v36 = vld [vmem:[#allocation4 + $0x170] sm:$0xff] }
 0x2e6   : > { %5510 = vmatpush.msra.mxu0 %v5303_v36  ;;  %v5471_v36 = vld [vmem:[#allocation4 + $0x6b0] sm:$0x7f] }
 0x2e7   : > { %v10608_v42 = vadd.f32 %v10595_v37, %v5148_v53  ;;  %v10611_v47 = vadd.f32 %v10595_v37, %v5149_v28  ;;  %v4776_v33 = vadd.f32 %v10537_v41, %v4587_v57  ;;  %v5269_v57 = vld [vmem:[#allocation4 + $0x60] sm:$0xff] }
 0x2e8   : > { %5491 = vmatpush.msrb.mxu3 %v5269_v57  ;;  %v5437_v57 = vld [vmem:[#allocation4 + $0x5a0] sm:$0xff] }
 0x2e9   : > { %v5168_v24 = vmax.f32 %v10608_v42, 0.0  ;;  %v5169_v13 = vmax.f32 %v10611_v47, 0.0  ;;  %v5065_v43 = vpop.f32.mrf.mxu2  ;;  %v4965_v12 = vadd.f32 %v4956_v14, %v4776_v33 }
 0x2ea   : > { %v5150_v62 = vadd.f32 %v5065_v43, %v4961_v16  ;;  %v5343_v16 = vld [vmem:[#allocation4 + $0x2b0] sm:$0xff] }
 0x2eb   : > { %v8677_v25 = vpack.i.bf16 %v5169_v13, %v5168_v24 }
 0x2ec   : > { %v5105_v6 = vpop.f32.mrf.mxu0  ;;  %v10645_v63 = vadd.f32 %v10595_v37, %v5150_v62 }
 0x2ed   : > { %v5152_v61 = vadd.f32 %v5105_v6, %v4963_v58  ;;  %v5125_v9 = vpop.f32.mrf.mxu1  ;;  %8678 = vrot.lane.b32.xlu2 %v8677_v25, %s8860_s22  ;;  %v5373_v58 = vld [vmem:[#allocation4 + $0x3a0] sm:$0xff] }
 0x2ee   : > { %v5153_v44 = vadd.f32 %v5125_v9, %v4964_v48  ;;  %v5170_v34 = vmax.f32 %v10645_v63, 0.0  ;;  %v5345_v25 = vld [vmem:[#allocation4 + $0x2c0] sm:$0xff] }
 0x2ef   : > { %v10634_v1 = vadd.f32 %v10595_v37, %v5152_v61  ;;  %5525 = vmatpush.msrb.mxu1 %v5345_v25  ;;  %v5361_v63 = vld [vmem:[#allocation4 + $0x340] sm:$0xff]  ;;  %v5447_v25 = vld [vmem:[#allocation4 + $0x5f0] sm:$0xff] }
 0x2f0   : > { %v10638_v59 = vadd.f32 %v10595_v37, %v5153_v44  ;;  %v5369_v44 = vld [vmem:[#allocation4 + $0x380] sm:$0xff] }
 0x2f1   : > { %v5172_v51 = vmax.f32 %v10634_v1, 0.0  ;;  %5526 = vmatpush.msrb.mxu1 %v5343_v16  ;;  %v5411_v16 = vld [vmem:[#allocation4 + $0x4d0] sm:$0xff] }
 0x2f2   : > { %v5173_v40 = vmax.f32 %v10638_v59, 0.0  ;;  %v5085_v31 = vpop.f32.mrf.mxu3  ;;  %v5355_v59 = vld [vmem:[#allocation4 + $0x310] sm:$0xff] }
 0x2f3   : > { %v5151_v32 = vadd.f32 %v5085_v31, %v4962_v30  ;;  %v5367_v31 = vld [vmem:[#allocation4 + $0x370] sm:$0xff]  ;;  %5527 = vmatpush.msrb.mxu1 %v5341_v50  ;;  %v5282_v50 = vld [vmem:[#allocation4 + $0xc8] sm:$0xff] }
 0x2f4   : > { %v8687_v3 = vpack.i.bf16 %v5173_v40, %v5172_v51 }
 0x2f5   : > { %v10653_v46 = vadd.f32 %v10595_v37, %v5151_v32 }
 0x2f6   : > { %8688 = vrot.lane.b32.xlu1 %v8687_v3, %s8860_s22  ;;  %v5339_v3 = vld [vmem:[#allocation4 + $0x290] sm:$0xff] }
 0x2f7   : > { %v5171_v56 = vmax.f32 %v10653_v46, 0.0  ;;  %5528 = vmatpush.msrb.mxu1 %v5339_v3  ;;  %v5263_v46 = vld [vmem:[#allocation4 + $0x30] sm:$0xff]  ;;  %v5469_v3 = vld [vmem:[#allocation4 + $0x6a0] sm:$0xff] }
 0x2f9   : > { %v8682_v29 = vpack.i.bf16 %v5171_v56, %v5170_v34  ;;  %v5145_v53 = vpop.f32.mrf.mxu2 }
 0x2fa   : > { %v5154_v28 = vadd.f32 %v5145_v53, %v4965_v12  ;;  %v5365_v53 = vld [vmem:[#allocation4 + $0x360] sm:$0xff] }
 0x2fb   : > { %8683 = vrot.lane.b32.xlu0 %v8682_v29, %s8860_s22  ;;  %v5301_v29 = vld [vmem:[#allocation4 + $0x160] sm:$0xff] }
 0x2fc   : > { %v10665_v2 = vadd.f32 %v10595_v37, %v5154_v28  ;;  %v5379_v37 = vld [vmem:[#allocation4 + $0x3d0] sm:$0xff]  ;;  %v5337_v28 = vld [vmem:[#allocation4 + $0x280] sm:$0xff]  ;;  %5511 = vmatpush.msra.mxu0 %v5301_v29 }
 0x2fd   : > { %5544 = vmatpush.msrb.mxu2 %v5379_v37  ;;  %5529 = vmatpush.msrb.mxu1 %v5337_v28  ;;  %v5435_v29 = vld [vmem:[#allocation4 + $0x590] sm:$0xff]  ;;  %v5401_v28 = vld [vmem:[#allocation4 + $0x480] sm:$0xff] }
 0x2fe   : > { %v5174_v41 = vmax.f32 %v10665_v2, 0.0  ;;  %5512 = vmatpush.msra.mxu0 %v5299_v52  ;;  %v5291_v2 = vld [vmem:[#allocation4 + $0x110] sm:$0xff] }
 0x2ff   : > { %5545 = vmatpush.msrb.mxu2 %v5377_v39  ;;  %5530 = vmatpush.msrb.mxu1 %v5335_v49  ;;  %v5399_v52 = vld [vmem:[#allocation4 + $0x470] sm:$0xff]  ;;  %v5272_v49 = vld [vmem:[#allocation4 + $0x78] sm:$0xff] }
 0x300   : > { %5194 = vrot.lane.b32.xlu2 %v5174_v41, %s8860_s22 }
 0x301   : > { %5546 = vmatpush.msrb.mxu2 %v5375_v21  ;;  %v5357_v21 = vld [vmem:[#allocation4 + $0x320] sm:$0xff]  ;;  %5531 = vmatpush.msrb.mxu1 %v5333_v4  ;;  %v5266_v4 = vld [vmem:[#allocation4 + $0x48] sm:$0xff] }
 0x303   : > { %5547 = vmatpush.msrb.mxu2 %v5373_v58  ;;  %v5415_v58 = vld [vmem:[#allocation4 + $0x4f0] sm:$0xff] }
 0x305   : > { %5548 = vmatpush.msrb.mxu2 %v5371_v8  ;;  %v5325_v8 = vld [vmem:[#allocation4 + $0x220] sm:$0xff] }
 0x307   : > { %5549 = vmatpush.msrb.mxu2 %v5369_v44  ;;  %v5441_v44 = vld [vmem:[#allocation4 + $0x5c0] sm:$0xff] }
 0x309   : > { %5550 = vmatpush.msrb.mxu2 %v5367_v31  ;;  %v5280_v31 = vld [vmem:[#allocation4 + $0xb8] sm:$0xff] }
 0x30b   : > { %5551 = vmatpush.msrb.mxu2 %v5365_v53  ;;  %v5467_v53 = vld [vmem:[#allocation4 + $0x690] sm:$0xff] }
 0x30d   : > { %5552 = vmatpush.msrb.mxu2 %v5363_v26  ;;  %v5431_v26 = vld [vmem:[#allocation4 + $0x570] sm:$0xff] }
 0x30f   : > { %5553 = vmatpush.msrb.mxu2 %v5361_v63  ;;  %v5270_v63 = vld [vmem:[#allocation4 + $0x68] sm:$0xff] }
 0x347   : > { %v8679_v14 = vpop.permute.xlu2 %8678 }
 0x348   : > { %v8681_v48 = vunpack.i.h.bf16 %v8679_v14  ;;  %v8680_v43 = vunpack.i.l.bf16 %v8679_v14  ;;  %v5289_v14 = vld [vmem:[#allocation4 + $0x100] sm:$0xff] }
 0x34a   : > { %v5196_v7 = vsel %vm485_vm3, %v8680_v43, %v8681_v48  ;;  %v5445_v43 = vld [vmem:[#allocation4 + $0x5e0] sm:$0xff] }
 0x34b   : > { %v10687_v1 = vmax.f32 %v5168_v24, %v5196_v7  ;;  %v5439_v7 = vld [vmem:[#allocation4 + $0x5b0] sm:$0xff] }
 0x35a   : > { %v5195_v35 = vpop.permute.xlu2 %5194 }
 0x35b   : > { %v10715_v0 = vmax.f32 %v5174_v41, %v5195_v35  ;;  %v5331_v41 = vld [vmem:[#allocation4 + $0x250] sm:$0xff] }
 0x35c   : > { %5532 = vmatpush.msrb.mxu1 %v5331_v41  ;;  %v5264_v41 = vld [vmem:[#allocation4 + $0x38] sm:$0xff] }
 0x35e   : > { %5533 = vmatpush.msrb.mxu1 %v5329_v54  ;;  %v5262_v54 = vld [vmem:[#allocation4 + $0x28] sm:$0xff] }
 0x360   : > { %5534 = vmatpush.msrb.mxu1 %v5327_v5  ;;  %v5385_v5 = vld [vmem:[#allocation4 + $0x400] sm:$0xff] }
 0x362   : > { %5535 = vmatpush.msrb.mxu1 %v5325_v8 }
 0x364   : > { %5536 = vmatpush.msrb.mxu1 %v5323_v38 }
 0x368   : > { %v10671_v6 = vpop.permute.xlu1 %8688 }
 0x369   : > { %v8691_v61 = vunpack.i.h.bf16 %v10671_v6  ;;  %v8690_v9 = vunpack.i.l.bf16 %v10671_v6  ;;  %v5286_v6 = vld [vmem:[#allocation4 + $0xe8] sm:$0xff] }
 0x36b   : > { %v5200_v62 = vsel %vm485_vm3, %v8690_v9, %v8691_v61  ;;  %v5201_v60 = vsel %vm485_vm3, %v8691_v61, %v5195_v35  ;;  %v5443_v61 = vld [vmem:[#allocation4 + $0x5d0] sm:$0xff]  ;;  %v5268_v35 = vld [vmem:[#allocation4 + $0x58] sm:$0xff] }
 0x36c   : > { %v10681_v30 = vmax.f32 %v5172_v51, %v5200_v62  ;;  %v5267_v51 = vld [vmem:[#allocation4 + $0x50] sm:$0xff]  ;;  %v10719_v39 = vmax.f32 %v5173_v40, %v5201_v60  ;;  %v5257_v40 = vld [vmem:[#allocation4] sm:$0xff] }
 0x36d   : > { %v8684_v32 = vpop.permute.xlu0 %8683  ;;  %5492 = vmatpush.msrb.mxu3 %v5267_v51  ;;  %v5321_v62 = vld [vmem:[#allocation4 + $0x200] sm:$0xff]  ;;  %v5276_v51 = vld [vmem:[#allocation4 + $0x98] sm:$0xff] }
 0x36e   : > { %v8686_v33 = vunpack.i.h.bf16 %v8684_v32  ;;  %v8685_v12 = vunpack.i.l.bf16 %v8684_v32  ;;  %5231 = vrot.lane.b32.xlu2 %v10681_v30, %s8864_s27  ;;  %5537 = vmatpush.msrb.mxu1 %v5321_v62  ;;  %v5405_v32 = vld [vmem:[#allocation4 + $0x4a0] sm:$0xff] }
 0x36f   : > { %5493 = vmatpush.msrb.mxu3 %v5265_v19  ;;  %v5463_v19 = vld [vmem:[#allocation4 + $0x670] sm:$0xff]  ;;  %v5393_v60 = vld [vmem:[#allocation4 + $0x440] sm:$0xff] }
 0x370   : > { %v5197_v10 = vsel %vm485_vm3, %v8681_v48, %v8685_v12  ;;  %v5198_v11 = vsel %vm485_vm3, %v8685_v12, %v8686_v33  ;;  %v5199_v27 = vsel %vm485_vm3, %v8686_v33, %v8690_v9  ;;  %v5413_v48 = vld [vmem:[#allocation4 + $0x4e0] sm:$0xff]  ;;  %v5284_v9 = vld [vmem:[#allocation4 + $0xd8] sm:$0xff]  ;;  %v5278_v33 = vld [vmem:[#allocation4 + $0xa8] sm:$0xff]  ;;  %8430 = vmatpush.msk.msra.mxu1 %vm497_vm1, %v5471_v36 }
 0x371   : > { %v10694_v55 = vmax.f32 %v5169_v13, %v5197_v10  ;;  %v10698_v42 = vmax.f32 %v5170_v34, %v5198_v11  ;;  %v10702_v24 = vmax.f32 %v5171_v56, %v5199_v27  ;;  %v5297_v13 = vld [vmem:[#allocation4 + $0x140] sm:$0xff]  ;;  %v5295_v34 = vld [vmem:[#allocation4 + $0x130] sm:$0xff]  ;;  %5494 = vmatpush.msrb.mxu3 %v5263_v46  ;;  %v5274_v27 = vld [vmem:[#allocation4 + $0x88] sm:$0xff] }
 0x372   : > { %v5359_v56 = vld [vmem:[#allocation4 + $0x330] sm:$0xff]  ;;  %5513 = vmatpush.msra.mxu0 %v5297_v13  ;;  %5607 = vmatpush.msra.mxu1 %v5469_v3  ;;  %v5433_v10 = vld [vmem:[#allocation4 + $0x580] sm:$0xff]  ;;  %v5320_v3 = vld [vmem:[#allocation4 + $0x1f8] sm:$0xff] }
 0x373   : > { %v8697_v37 = vpack.i.bf16 %v10702_v24, %v10698_v42  ;;  %v8692_v47 = vpack.i.bf16 %v10694_v55, %v10687_v1  ;;  %5554 = vmatpush.msrb.mxu2 %v5359_v56  ;;  %5495 = vmatpush.msrb.mxu3 %v5261_v15  ;;  %v5403_v12 = vld [vmem:[#allocation4 + $0x490] sm:$0xff]  ;;  %v5465_v11 = vld [vmem:[#allocation4 + $0x680] sm:$0xff] }
 0x374   : > { %5514 = vmatpush.msra.mxu0 %v5295_v34  ;;  %5608 = vmatpush.msra.mxu1 %v5467_v53  ;;  %v5461_v13 = vld [vmem:[#allocation4 + $0x660] sm:$0xff]  ;;  %v5395_v46 = vld [vmem:[#allocation4 + $0x450] sm:$0xff]  ;;  %v5350_v53 = vld [vmem:[#allocation4 + $0x2e8] sm:$0xff] }
 0x375   : > { %8698 = vrot.lane.b32.xlu1 %v8697_v37, %s8864_s27  ;;  %8693 = vrot.lane.b32.xlu0 %v8692_v47, %s8864_s27  ;;  %v5397_v37 = vld [vmem:[#allocation4 + $0x460] sm:$0xff]  ;;  %v5427_v34 = vld [vmem:[#allocation4 + $0x550] sm:$0xff] }
 0x376   : > { %5515 = vmatpush.msra.mxu0 %v5293_v20  ;;  %5555 = vmatpush.msrb.mxu2 %v5357_v21  ;;  %v5429_v47 = vld [vmem:[#allocation4 + $0x560] sm:$0xff]  ;;  %v5459_v56 = vld [vmem:[#allocation4 + $0x650] sm:$0xff] }
 0x377   : > { %5496 = vmatpush.msrb.mxu3 %v5259_v18  ;;  %5609 = vmatpush.msra.mxu1 %v5465_v11  ;;  %v5425_v15 = vld [vmem:[#allocation4 + $0x540] sm:$0xff]  ;;  %v5391_v21 = vld [vmem:[#allocation4 + $0x430] sm:$0xff]  ;;  %v5380_v11 = vld [vmem:[#allocation4 + $0x3d8] sm:$0xff] }
 0x378   : > { %5516 = vmatpush.msra.mxu0 %v5291_v2  ;;  %5556 = vmatpush.msrb.mxu2 %v5355_v59  ;;  %v5457_v20 = vld [vmem:[#allocation4 + $0x640] sm:$0xff]  ;;  %v5423_v18 = vld [vmem:[#allocation4 + $0x530] sm:$0xff] }
 0x379   : > { %5497 = vmatpush.msrb.mxu3 %v5257_v40  ;;  %5610 = vmatpush.msra.mxu1 %v5463_v19  ;;  %v5455_v2 = vld [vmem:[#allocation4 + $0x630] sm:$0xff]  ;;  %v5389_v59 = vld [vmem:[#allocation4 + $0x420] sm:$0xff]  ;;  %v5314_v19 = vld [vmem:[#allocation4 + $0x1c8] sm:$0xff] }
 0x37a   : > { %5517 = vmatpush.msra.mxu0 %v5289_v14  ;;  %5557 = vmatpush.msrb.mxu2 %v5353_v17  ;;  %v5421_v40 = vld [vmem:[#allocation4 + $0x520] sm:$0xff]  ;;  %v5387_v17 = vld [vmem:[#allocation4 + $0x410] sm:$0xff] }
 0x37b   : > { %5562 = vmatpush.msra.mxu3 %v5415_v58  ;;  %5611 = vmatpush.msra.mxu1 %v5461_v13  ;;  %v5453_v14 = vld [vmem:[#allocation4 + $0x620] sm:$0xff]  ;;  %v5419_v58 = vld [vmem:[#allocation4 + $0x510] sm:$0xff] }
 0x37c   : > { %5582 = vmatpush.msrb.mxu0 %v5447_v25  ;;  %5622 = vmatpush.msra.mxu2 %v5288_v23  ;;  %v5451_v25 = vld [vmem:[#allocation4 + $0x610] sm:$0xff]  ;;  %v5260_v23 = vld [vmem:[#allocation4 + $0x18] sm:$0xff] }
 0x37d   : > { %5233 = vrot.lane.b32.xlu1 %v10719_v39, %s8864_s27  ;;  %5235 = vrot.lane.b32.xlu0 %v10715_v0, %s8864_s27 }
 0x37e   : > { %5563 = vmatpush.msra.mxu3 %v5413_v48  ;;  %5583 = vmatpush.msrb.mxu0 %v5445_v43  ;;  %v5417_v48 = vld [vmem:[#allocation4 + $0x500] sm:$0xff] }
 0x37f   : > { %5623 = vmatpush.msra.mxu2 %v5286_v6  ;;  %5612 = vmatpush.msra.mxu1 %v5459_v56  ;;  %v5449_v43 = vld [vmem:[#allocation4 + $0x600] sm:$0xff]  ;;  %v5258_v6 = vld [vmem:[#allocation4 + $0x8] sm:$0xff]  ;;  %v5344_v56 = vld [vmem:[#allocation4 + $0x2b8] sm:$0xff] }
 0x380   : > { %5564 = vmatpush.msra.mxu3 %v5411_v16  ;;  %5584 = vmatpush.msrb.mxu0 %v5443_v61 }
 0x381   : > { %5624 = vmatpush.msra.mxu2 %v5284_v9  ;;  %5613 = vmatpush.msra.mxu1 %v5457_v20  ;;  %v5308_v20 = vld [vmem:[#allocation4 + $0x198] sm:$0xff] }
 0x382   : > { %5565 = vmatpush.msra.mxu3 %v5409_v45  ;;  %5585 = vmatpush.msrb.mxu0 %v5441_v44 }
 0x383   : > { %5625 = vmatpush.msra.mxu2 %v5282_v50  ;;  %5614 = vmatpush.msra.mxu1 %v5455_v2  ;;  %v5306_v2 = vld [vmem:[#allocation4 + $0x188] sm:$0xff] }
 0x384   : > { %5566 = vmatpush.msra.mxu3 %v5407_v22  ;;  %5586 = vmatpush.msrb.mxu0 %v5439_v7 }
 0x385   : > { %5626 = vmatpush.msra.mxu2 %v5280_v31  ;;  %5615 = vmatpush.msra.mxu1 %v5453_v14  ;;  %v5304_v14 = vld [vmem:[#allocation4 + $0x178] sm:$0xff] }
 0x386   : > { %5567 = vmatpush.msra.mxu3 %v5405_v32  ;;  %5587 = vmatpush.msrb.mxu0 %v5437_v57 }
 0x387   : > { %5627 = vmatpush.msra.mxu2 %v5278_v33  ;;  %5616 = vmatpush.msra.mxu1 %v5451_v25  ;;  %v5352_v33 = vld [vmem:[#allocation4 + $0x2f8] sm:$0xff]  ;;  %v5302_v25 = vld [vmem:[#allocation4 + $0x168] sm:$0xff] }
 0x388   : > { %5568 = vmatpush.msra.mxu3 %v5403_v12  ;;  %5588 = vmatpush.msrb.mxu0 %v5435_v29  ;;  %v5384_v12 = vld [vmem:[#allocation4 + $0x3f8] sm:$0xff] }
 0x389   : > { %5628 = vmatpush.msra.mxu2 %v5276_v51  ;;  %5617 = vmatpush.msra.mxu1 %v5449_v43  ;;  %v5416_v29 = vld [vmem:[#allocation4 + $0x4f8] sm:$0xff] }
 0x38a   : > { %5569 = vmatpush.msra.mxu3 %v5401_v28  ;;  %5589 = vmatpush.msrb.mxu0 %v5433_v10  ;;  %v5382_v28 = vld [vmem:[#allocation4 + $0x3e8] sm:$0xff]  ;;  %v5348_v10 = vld [vmem:[#allocation4 + $0x2d8] sm:$0xff] }
 0x38b   : > { %5629 = vmatpush.msra.mxu2 %v5274_v27  ;;  %v5412_v27 = vld [vmem:[#allocation4 + $0x4d8] sm:$0xff] }
 0x38c   : > { %5570 = vmatpush.msra.mxu3 %v5399_v52  ;;  %5590 = vmatpush.msrb.mxu0 %v5431_v26  ;;  %v5300_v43 = vld [vmem:[#allocation4 + $0x158] sm:$0xff] }
 0x38d   : > { %5630 = vmatpush.msra.mxu2 %v5272_v49  ;;  %v5346_v49 = vld [vmem:[#allocation4 + $0x2c8] sm:$0xff] }
 0x38e   : > { %5571 = vmatpush.msra.mxu3 %v5397_v37  ;;  %5591 = vmatpush.msrb.mxu0 %v5429_v47  ;;  %v5378_v37 = vld [vmem:[#allocation4 + $0x3c8] sm:$0xff] }
 0x38f   : > { %5631 = vmatpush.msra.mxu2 %v5270_v63  ;;  %v5410_v47 = vld [vmem:[#allocation4 + $0x4c8] sm:$0xff] }
 0x390   : > { %5572 = vmatpush.msra.mxu3 %v5395_v46  ;;  %5592 = vmatpush.msrb.mxu0 %v5427_v34  ;;  %v5312_v34 = vld [vmem:[#allocation4 + $0x1b8] sm:$0xff] }
 0x391   : > { %5632 = vmatpush.msra.mxu2 %v5268_v35  ;;  %v5376_v35 = vld [vmem:[#allocation4 + $0x3b8] sm:$0xff] }
 0x392   : > { %5573 = vmatpush.msra.mxu3 %v5393_v60  ;;  %5593 = vmatpush.msrb.mxu0 %v5425_v15  ;;  %v5408_v60 = vld [vmem:[#allocation4 + $0x4b8] sm:$0xff]  ;;  %v5406_v15 = vld [vmem:[#allocation4 + $0x4a8] sm:$0xff] }
 0x393   : > { %5633 = vmatpush.msra.mxu2 %v5266_v4  ;;  %v5340_v4 = vld [vmem:[#allocation4 + $0x298] sm:$0xff] }
 0x394   : > { %5574 = vmatpush.msra.mxu3 %v5391_v21  ;;  %5594 = vmatpush.msrb.mxu0 %v5423_v18  ;;  %v5372_v21 = vld [vmem:[#allocation4 + $0x398] sm:$0xff] }
 0x395   : > { %5634 = vmatpush.msra.mxu2 %v5264_v41  ;;  %v5404_v18 = vld [vmem:[#allocation4 + $0x498] sm:$0xff]  ;;  %v5338_v41 = vld [vmem:[#allocation4 + $0x288] sm:$0xff] }
 0x396   : > { %5575 = vmatpush.msra.mxu3 %v5389_v59  ;;  %5595 = vmatpush.msrb.mxu0 %v5421_v40  ;;  %v5370_v59 = vld [vmem:[#allocation4 + $0x388] sm:$0xff] }
 0x397   : > { %5635 = vmatpush.msra.mxu2 %v5262_v54  ;;  %v5402_v40 = vld [vmem:[#allocation4 + $0x488] sm:$0xff]  ;;  %v5336_v54 = vld [vmem:[#allocation4 + $0x278] sm:$0xff] }
 0x398   : > { %5576 = vmatpush.msra.mxu3 %v5387_v17  ;;  %5596 = vmatpush.msrb.mxu0 %v5419_v58  ;;  %v5368_v17 = vld [vmem:[#allocation4 + $0x378] sm:$0xff] }
 0x399   : > { %5636 = vmatpush.msra.mxu2 %v5260_v23  ;;  %v5400_v58 = vld [vmem:[#allocation4 + $0x478] sm:$0xff]  ;;  %v5334_v23 = vld [vmem:[#allocation4 + $0x268] sm:$0xff] }
 0x39a   : > { %5577 = vmatpush.msra.mxu3 %v5385_v5  ;;  %5597 = vmatpush.msrb.mxu0 %v5417_v48  ;;  %v5366_v5 = vld [vmem:[#allocation4 + $0x368] sm:$0xff] }
 0x39b   : > { %5637 = vmatpush.msra.mxu2 %v5258_v6  ;;  %v5398_v48 = vld [vmem:[#allocation4 + $0x468] sm:$0xff]  ;;  %v5332_v6 = vld [vmem:[#allocation4 + $0x258] sm:$0xff] }
 0x3c8   : > { %v5232_v44 = vpop.permute.xlu2 %5231 }
 0x3e7   : > { %v8699_v8 = vpop.permute.xlu1 %8698  ;;  %v8694_v16 = vpop.permute.xlu0 %8693 }
 0x3e8   : > { %v8701_v61 = vunpack.i.h.bf16 %v8699_v8  ;;  %v8700_v9 = vunpack.i.l.bf16 %v8699_v8  ;;  %v8696_v38 = vunpack.i.h.bf16 %v8694_v16  ;;  %v8695_v45 = vunpack.i.l.bf16 %v8694_v16  ;;  %v5364_v8 = vld [vmem:[#allocation4 + $0x358] sm:$0xff] }
 0x3e9   : > { %v5396_v16 = vld [vmem:[#allocation4 + $0x458] sm:$0xff] }
 0x3ea   : > { %v5239_v50 = vsel %vm1397_vm7, %v8700_v9, %v8701_v61  ;;  %v5240_v62 = vsel %vm1397_vm7, %v8701_v61, %v5232_v44  ;;  %v5238_v22 = vsel %vm1397_vm7, %v8696_v38, %v8700_v9  ;;  %v5237_v7 = vsel %vm1397_vm7, %v8695_v45, %v8696_v38  ;;  %v5298_v61 = vld [vmem:[#allocation4 + $0x148] sm:$0xff] }
 0x3eb   : > { %v10731_v36 = vmax.f32 %v10698_v42, %v5239_v50  ;;  %v10734_v31 = vmax.f32 %v10702_v24, %v5240_v62  ;;  %v10737_v32 = vmax.f32 %v10694_v55, %v5238_v22  ;;  %v5250_v57 = vmax.f32 %v10687_v1, %v5237_v7  ;;  %v5318_v42 = vld [vmem:[#allocation4 + $0x1e8] sm:$0xff]  ;;  %v5316_v1 = vld [vmem:[#allocation4 + $0x1d8] sm:$0xff] }
 0x3ec   : > { %v5414_v55 = vld [vmem:[#allocation4 + $0x4e8] sm:$0xff]  ;;  %v5328_v50 = vld [vmem:[#allocation4 + $0x238] sm:$0xff] }
 0x3ed   : > { %5498 = vmatmul.f32.vlgmr.msrb.gmra.mxu3 %v5250_v57  ;;  %5518 = vmatmul.f32.vlgmr.msra.gmra.mxu0 %v10737_v32  ;;  %v5330_v9 = vld [vmem:[#allocation4 + $0x248] sm:$0xff]  ;;  %v5360_v62 = vld [vmem:[#allocation4 + $0x338] sm:$0xff] }
 0x3ee   : > { %5538 = vmatmul.f32.vlgmr.msrb.gmra.mxu1 %v10731_v36  ;;  %5558 = vmatmul.f32.vlgmr.msrb.gmra.mxu2 %v10734_v31  ;;  %v5362_v38 = vld [vmem:[#allocation4 + $0x348] sm:$0xff]  ;;  %v5392_v22 = vld [vmem:[#allocation4 + $0x438] sm:$0xff] }
 0x3ef   : > { %5642 = vmatpush.msrb.mxu1 %v5320_v3  ;;  %5662 = vmatpush.msrb.mxu3 %v5352_v33  ;;  %v5234_v24 = vpop.permute.xlu1 %5233  ;;  %v5236_v51 = vpop.permute.xlu0 %5235  ;;  %v5394_v45 = vld [vmem:[#allocation4 + $0x448] sm:$0xff] }
 0x3f0   : > { %5682 = vmatpush.msra.mxu0 %v5384_v12  ;;  %5702 = vmatpush.msrb.mxu2 %v5416_v29  ;;  %v5241_v52 = vsel %vm1397_vm7, %v5232_v44, %v5234_v24  ;;  %v5242_v26 = vsel %vm1397_vm7, %v5234_v24, %v5236_v51  ;;  %v10752_v46 = vmax.f32 %v10715_v0, %v5236_v51  ;;  %v5374_v0 = vld [vmem:[#allocation4 + $0x3a8] sm:$0xff]  ;;  %v5296_v44 = vld [vmem:[#allocation4 + $0x138] sm:$0xff] }
 0x3f1   : > { %5643 = vmatpush.msrb.mxu1 %v5318_v42  ;;  %5663 = vmatpush.msrb.mxu3 %v5350_v53  ;;  %v10746_v13 = vmax.f32 %v10681_v30, %v5241_v52  ;;  %v10749_v63 = vmax.f32 %v10719_v39, %v5242_v26  ;;  %v5310_v30 = vld [vmem:[#allocation4 + $0x1a8] sm:$0xff]  ;;  %v5292_v12 = vld [vmem:[#allocation4 + $0x118] sm:$0xff] }
 0x3f2   : > { %5703 = vmatpush.msrb.mxu2 %v5414_v55  ;;  %5683 = vmatpush.msra.mxu0 %v5382_v28  ;;  %v5342_v39 = vld [vmem:[#allocation4 + $0x2a8] sm:$0xff]  ;;  %v5324_v29 = vld [vmem:[#allocation4 + $0x218] sm:$0xff] }
 0x3f3   : > { %5644 = vmatpush.msrb.mxu1 %v5316_v1  ;;  %5664 = vmatpush.msrb.mxu3 %v5348_v10  ;;  %v5294_v7 = vld [vmem:[#allocation4 + $0x128] sm:$0xff]  ;;  %v5356_v42 = vld [vmem:[#allocation4 + $0x318] sm:$0xff] }
 0x3f4   : > { %5684 = vmatpush.msra.mxu0 %v5380_v11  ;;  %5704 = vmatpush.msrb.mxu2 %v5412_v27  ;;  %v5358_v3 = vld [vmem:[#allocation4 + $0x328] sm:$0xff]  ;;  %v5388_v53 = vld [vmem:[#allocation4 + $0x418] sm:$0xff] }
 0x3f5   : > { %5645 = vmatpush.msrb.mxu1 %v5314_v19  ;;  %5665 = vmatpush.msrb.mxu3 %v5346_v49  ;;  %v5390_v33 = vld [vmem:[#allocation4 + $0x428] sm:$0xff]  ;;  %v5448_v1 = vld [vmem:[#allocation4 + $0x5f8] sm:$0xff] }
 0x3f6   : > { %5685 = vmatpush.msra.mxu0 %v5378_v37  ;;  %5705 = vmatpush.msrb.mxu2 %v5410_v47  ;;  %v5290_v24 = vld [vmem:[#allocation4 + $0x108] sm:$0xff]  ;;  %v5472_v10 = vld [vmem:[#allocation4 + $0x6b8] sm:$0x7f] }
 0x3f7   : > { %5578 = vmatmul.f32.vlgmr.msra.gmra.mxu3 %v10746_v13  ;;  %5598 = vmatmul.f32.vlgmr.msrb.gmra.mxu0 %v10749_v63  ;;  %v5322_v55 = vld [vmem:[#allocation4 + $0x208] sm:$0xff]  ;;  %v5444_v52 = vld [vmem:[#allocation4 + $0x5d8] sm:$0xff] }
 0x3f8   : > { %8431 = vmatmul.msk.f32.vlgmr.msra.gmra.mxu1 %vm1587_vm8, %v10752_v46  ;;  %5638 = vmatmul.f32.vlgmr.msra.gmra.mxu2 %v5250_v57  ;;  %v5326_v57 = vld [vmem:[#allocation4 + $0x228] sm:$0xff]  ;;  %v5468_v26 = vld [vmem:[#allocation4 + $0x698] sm:$0xff] }
 0x3f9   : > { %5646 = vmatpush.msrb.mxu1 %v5312_v34  ;;  %5666 = vmatpush.msrb.mxu3 %v5344_v56  ;;  %v5354_v51 = vld [vmem:[#allocation4 + $0x308] sm:$0xff]  ;;  %v5464_v37 = vld [vmem:[#allocation4 + $0x678] sm:$0xff] }
 0x3fa   : > { %5686 = vmatpush.msra.mxu0 %v5376_v35  ;;  %5706 = vmatpush.msrb.mxu2 %v5408_v60  ;;  %v5386_v28 = vld [vmem:[#allocation4 + $0x408] sm:$0xff]  ;;  %v5436_v47 = vld [vmem:[#allocation4 + $0x598] sm:$0xff] }
 0x3fb   : > { %5647 = vmatpush.msrb.mxu1 %v5310_v30  ;;  %5667 = vmatpush.msrb.mxu3 %v5342_v39  ;;  %v5446_v11 = vld [vmem:[#allocation4 + $0x5e8] sm:$0xff]  ;;  %v5432_v35 = vld [vmem:[#allocation4 + $0x578] sm:$0xff] }
 0x3fc   : > { %5687 = vmatpush.msra.mxu0 %v5374_v0  ;;  %5707 = vmatpush.msrb.mxu2 %v5406_v15  ;;  %v5470_v27 = vld [vmem:[#allocation4 + $0x6a8] sm:$0xff]  ;;  %v5456_v60 = vld [vmem:[#allocation4 + $0x638] sm:$0xff] }
 0x3fd   : > { %5648 = vmatpush.msrb.mxu1 %v5308_v20  ;;  %5668 = vmatpush.msrb.mxu3 %v5340_v4  ;;  %v5442_v19 = vld [vmem:[#allocation4 + $0x5c8] sm:$0xff]  ;;  %v5428_v0 = vld [vmem:[#allocation4 + $0x558] sm:$0xff] }
 0x3fe   : > { %5688 = vmatpush.msra.mxu0 %v5372_v21  ;;  %5708 = vmatpush.msrb.mxu2 %v5404_v18  ;;  %v5466_v49 = vld [vmem:[#allocation4 + $0x688] sm:$0xff]  ;;  %v5452_v15 = vld [vmem:[#allocation4 + $0x618] sm:$0xff] }
 0x3ff   : > { %5649 = vmatpush.msrb.mxu1 %v5306_v2  ;;  %5669 = vmatpush.msrb.mxu3 %v5338_v41  ;;  %v5434_v34 = vld [vmem:[#allocation4 + $0x588] sm:$0xff]  ;;  %v5424_v21 = vld [vmem:[#allocation4 + $0x538] sm:$0xff] }
 0x400   : > { %5689 = vmatpush.msra.mxu0 %v5370_v59  ;;  %5709 = vmatpush.msrb.mxu2 %v5402_v40  ;;  %v5458_v56 = vld [vmem:[#allocation4 + $0x648] sm:$0xff]  ;;  %v5420_v2 = vld [vmem:[#allocation4 + $0x518] sm:$0xff]  ;;  %v8880_v59 = vmov 0.0  }
 0x401   : > { %5650 = vmatpush.msrb.mxu1 %v5304_v14  ;;  %5670 = vmatpush.msrb.mxu3 %v5336_v54  ;;  %v5430_v30 = vld [vmem:[#allocation4 + $0x568] sm:$0xff]  ;;  %5763 = vst [vmem:[#allocation2 + $0x8] sm:$0xff] %v8880_v59  ;;  %v8462_v59 = vld [vmem:[%s11501_s4 + $0x50] sm:$0xff] }
 0x402   : > { %5690 = vmatpush.msra.mxu0 %v5368_v17  ;;  %5710 = vmatpush.msrb.mxu2 %v5400_v58  ;;  %v5454_v39 = vld [vmem:[#allocation4 + $0x628] sm:$0xff] }
 0x403   : > { %5651 = vmatpush.msrb.mxu1 %v5302_v25  ;;  %5671 = vmatpush.msrb.mxu3 %v5334_v23  ;;  %v5426_v20 = vld [vmem:[#allocation4 + $0x548] sm:$0xff] }
 0x404   : > { %5691 = vmatpush.msra.mxu0 %v5366_v5  ;;  %5711 = vmatpush.msrb.mxu2 %v5398_v48  ;;  %v5450_v4 = vld [vmem:[#allocation4 + $0x608] sm:$0xff] }
 0x405   : > { %5652 = vmatpush.msrb.mxu1 %v5300_v43  ;;  %5672 = vmatpush.msrb.mxu3 %v5332_v6  ;;  %v5422_v18 = vld [vmem:[#allocation4 + $0x528] sm:$0xff] }
 0x406   : > { %5692 = vmatpush.msra.mxu0 %v5364_v8  ;;  %5712 = vmatpush.msrb.mxu2 %v5396_v16  ;;  %v5418_v41 = vld [vmem:[#allocation4 + $0x508] sm:$0xff] }
 0x407   : > { %5653 = vmatpush.msrb.mxu1 %v5298_v61  ;;  %5673 = vmatpush.msrb.mxu3 %v5330_v9 }
 0x408   : > { %5693 = vmatpush.msra.mxu0 %v5362_v38  ;;  %5713 = vmatpush.msrb.mxu2 %v5394_v45 }
 0x409   : > { %5654 = vmatpush.msrb.mxu1 %v5296_v44  ;;  %5674 = vmatpush.msrb.mxu3 %v5328_v50 }
 0x40a   : > { %5694 = vmatpush.msra.mxu0 %v5360_v62  ;;  %5714 = vmatpush.msrb.mxu2 %v5392_v22 }
 0x40b   : > { %5655 = vmatpush.msrb.mxu1 %v5294_v7  ;;  %5675 = vmatpush.msrb.mxu3 %v5326_v57 }
 0x40c   : > { %5695 = vmatpush.msra.mxu0 %v5358_v3  ;;  %5715 = vmatpush.msrb.mxu2 %v5390_v33 }
 0x40d   : > { %5656 = vmatpush.msrb.mxu1 %v5292_v12  ;;  %5676 = vmatpush.msrb.mxu3 %v5324_v29  ;;  %v8434_v29 = vld [vmem:[%s11501_s4 + $0x10] sm:$0xff] }
 0x40e   : > { %5696 = vmatpush.msra.mxu0 %v5356_v42  ;;  %5716 = vmatpush.msrb.mxu2 %v5388_v53 }
 0x40f   : > { %5657 = vmatpush.msrb.mxu1 %v5290_v24  ;;  %5677 = vmatpush.msrb.mxu3 %v5322_v55  ;;  %v8435_v55 = vld [vmem:[%s11501_s4 + $0x18] sm:$0xff] }
 0x410   : > { %5697 = vmatpush.msra.mxu0 %v5354_v51  ;;  %5717 = vmatpush.msrb.mxu2 %v5386_v28  ;;  %v5769_v28 = vld [vmem:[%s11501_s4] sm:$0xff] }
 0x411   : > { %5658 = vmatmul.f32.vlgmr.msrb.gmra.mxu1 %v10737_v32  ;;  %5678 = vmatmul.f32.vlgmr.msrb.gmra.mxu3 %v10731_v36  ;;  %v5440_v32 = vld [vmem:[#allocation4 + $0x5b8] sm:$0xff]  ;;  %v5438_v36 = vld [vmem:[#allocation4 + $0x5a8] sm:$0xff] }
 0x412   : > { %5698 = vmatmul.f32.vlgmr.msra.gmra.mxu0 %v10734_v31  ;;  %5718 = vmatmul.f32.vlgmr.msrb.gmra.mxu2 %v10746_v13  ;;  %v5462_v31 = vld [vmem:[#allocation4 + $0x668] sm:$0xff]  ;;  %v5460_v13 = vld [vmem:[#allocation4 + $0x658] sm:$0xff] }
 0x413   : > { %5722 = vmatpush.msra.mxu1 %v5448_v1  ;;  %8432 = vmatpush.msk.msra.mxu3 %vm497_vm1, %v5472_v10  ;;  %vm5765_vm1 = vcmask 556032   ;;  %v5770_v10 = vld [vmem:[%s11501_s4 + $0x8] sm:$0xff] }
 0x415   : > { %5723 = vmatpush.msra.mxu1 %v5446_v11  ;;  %5747 = vmatpush.msra.mxu3 %v5470_v27 }
 0x417   : > { %5724 = vmatpush.msra.mxu1 %v5444_v52  ;;  %5748 = vmatpush.msra.mxu3 %v5468_v26 }
 0x419   : > { %5725 = vmatpush.msra.mxu1 %v5442_v19  ;;  %5749 = vmatpush.msra.mxu3 %v5466_v49 }
 0x41b   : > { %5726 = vmatpush.msra.mxu1 %v5440_v32  ;;  %5750 = vmatpush.msra.mxu3 %v5464_v37  ;;  %v8444_v32 = vld [vmem:[%s11501_s4 + $0x20] sm:$0xff] }
 0x41d   : > { %5727 = vmatpush.msra.mxu1 %v5438_v36  ;;  %5751 = vmatpush.msra.mxu3 %v5462_v31  ;;  %v8450_v31 = vld [vmem:[%s11501_s4 + $0x30] sm:$0xff] }
 0x41f   : > { %5728 = vmatpush.msra.mxu1 %v5436_v47  ;;  %5752 = vmatpush.msra.mxu3 %v5460_v13 }
 0x421   : > { %5729 = vmatpush.msra.mxu1 %v5434_v34  ;;  %5753 = vmatpush.msra.mxu3 %v5458_v56 }
 0x423   : > { %5730 = vmatpush.msra.mxu1 %v5432_v35  ;;  %5754 = vmatpush.msra.mxu3 %v5456_v60 }
 0x425   : > { %5731 = vmatpush.msra.mxu1 %v5430_v30  ;;  %5755 = vmatpush.msra.mxu3 %v5454_v39  ;;  %v8445_v30 = vld [vmem:[%s11501_s4 + $0x28] sm:$0xff] }
 0x427   : > { %5732 = vmatpush.msra.mxu1 %v5428_v0  ;;  %5756 = vmatpush.msra.mxu3 %v5452_v15  ;;  %v8451_v0 = vld [vmem:[%s11501_s4 + $0x38] sm:$0xff] }
 0x429   : > { %5733 = vmatpush.msra.mxu1 %v5426_v20  ;;  %5757 = vmatpush.msra.mxu3 %v5450_v4 }
 0x42a   : > { %8433 = vmatmul.msk.f32.vlgmr.msra.gmra.mxu3 %vm1587_vm8, %v10752_v46  ;;  %vm6160_vm8 = vcmask 924672  }
 0x42b   : > { %5734 = vmatpush.msra.mxu1 %v5424_v21 }
 0x42d   : > { %5735 = vmatpush.msra.mxu1 %v5422_v18 }
 0x42f   : > { %5736 = vmatpush.msra.mxu1 %v5420_v2  ;;  %v8456_v2 = vld [vmem:[%s11501_s4 + $0x40] sm:$0xff] }
 0x431   : > { %5737 = vmatpush.msra.mxu1 %v5418_v41 }
 0x432   : > { %5738 = vmatmul.f32.vlgmr.msra.gmra.mxu1 %v10749_v63 }
 0x46a   : > { %v5519_v40 = vpop.f32.mrf.mxu0 }
 0x46b   : > { %v5539_v17 = vpop.f32.mrf.mxu1 }
 0x470   : > { %v5499_v14 = vpop.f32.mrf.mxu3 }
 0x471   : > { %v5520_v54 = vadd.f32 %v5519_v40, %v5499_v14  ;;  %v5559_v25 = vpop.f32.mrf.mxu2 }
 0x473   : > { %v5540_v58 = vadd.f32 %v5539_v17, %v5520_v54  ;;  %v8457_v17 = vld [vmem:[%s11501_s4 + $0x48] sm:$0xff] }
 0x474   : > { %v5599_v48 = vpop.f32.mrf.mxu0 }
 0x475   : > { %v5560_v23 = vadd.f32 %v5559_v25, %v5540_v58  ;;  %v5619_v6 = vpop.f32.mrf.mxu1  ;;  %v8463_v58 = vld [vmem:[%s11501_s4 + $0x58] sm:$0xff] }
 0x47a   : > { %v5579_v5 = vpop.f32.mrf.mxu3 }
 0x47b   : > { %v5580_v46 = vadd.f32 %v5579_v5, %v5560_v23  ;;  %v5639_v16 = vpop.f32.mrf.mxu2 }
 0x47d   : > { %v5600_v43 = vadd.f32 %v5599_v48, %v5580_v46 }
 0x47f   : > { %v10766_v8 = vadd.f32 %v5619_v6, %v5600_v43  ;;  %v8468_v43 = vld [vmem:[%s11501_s4 + $0x60] sm:$0xff] }
 0x481   : > { %5776 = vrot.lane.b32.xlu0 %v10766_v8, %s8860_s22 }
 0x48e   : > { %v5659_v63 = vpop.f32.mrf.mxu1 }
 0x48f   : > { %v5660_v9 = vadd.f32 %v5659_v63, %v5639_v16  ;;  %v5699_v45 = vpop.f32.mrf.mxu0 }
 0x494   : > { %v5679_v61 = vpop.f32.mrf.mxu3 }
 0x495   : > { %v5680_v38 = vadd.f32 %v5679_v61, %v5660_v9  ;;  %v5719_v50 = vpop.f32.mrf.mxu2  ;;  %v8469_v9 = vld [vmem:[%s11501_s4 + $0x68] sm:$0xff] }
 0x497   : > { %v5700_v44 = vadd.f32 %v5699_v45, %v5680_v38  ;;  %v8475_v38 = vld [vmem:[%s11501_s4 + $0x78] sm:$0xff] }
 0x499   : > { %v5720_v62 = vadd.f32 %v5719_v50, %v5700_v44 }
 0x4ad   : > { %v5759_v57 = vpop.f32.mrf.mxu3 }
 0x4af   : > { %v5739_v22 = vpop.f32.mrf.mxu1 }
 0x4b0   : > { %v5740_v7 = vadd.f32 %v5739_v22, %v5720_v62  ;;  %v8480_v62 = vld [vmem:[%s11501_s4 + $0x80] sm:$0xff] }
 0x4b2   : > { %v5760_v3 = vadd.f32 %v5759_v57, %v5740_v7  ;;  %v8486_v7 = vld [vmem:[%s11501_s4 + $0x90] sm:$0xff] }
 0x4b4   : > { %5766 = vst.msk [vmem:[#allocation2 + $0x8] sm:$0xff] %vm5765_vm1, %v5760_v3 }
 0x4bb   : > { %v10771_v33 = vld [vmem:[#allocation2 + $0x8] sm:$0xff] }
 0x4bc   : > { %5778 = vrot.lane.b32.xlu2 %v10771_v33, %s8860_s22  ;;  %v8702_v12 = vpack.i.bf16 %v10771_v33, %v10766_v8 }
 0x4be   : > { %8703 = vrot.lane.b32.xlu1 %v8702_v12, %s8861_s23  ;;  %8708 = vrot.lane.b32.xlu0 %v8702_v12, %s8863_s26  ;;  %s8884_s23 = smov 112   ;;  %s8885_s26 = smov 100  }
 0x4c4   : > { %5959 = vrot.lane.b32.xlu2 %v10771_v33, %s8862_s24 }
 0x4c6   : > { %5957 = vrot.lane.b32.xlu1 %v10766_v8, %s8862_s24  ;;  %8713 = vrot.lane.b32.xlu0 %v8702_v12, %s8881_s19  ;;  %s8892_s19 = smov 83  }
 0x4cc   : > { %6091 = vrot.lane.b32.xlu2 %v10771_v33, %s8882_s20 }
 0x4ce   : > { %6089 = vrot.lane.b32.xlu1 %v10766_v8, %s8882_s20  ;;  %8718 = vrot.lane.b32.xlu0 %v8702_v12, %s8883_s28  ;;  %s8893_s28 = smov 84  }
 0x4d4   : > { %6225 = vrot.lane.b32.xlu2 %v10771_v33, %s8884_s23 }
 0x4d6   : > { %6223 = vrot.lane.b32.xlu1 %v10766_v8, %s8884_s23  ;;  %8723 = vrot.lane.b32.xlu0 %v8702_v12, %s8885_s26  ;;  %s8895_s23 = smov 82  }
 0x4dc   : > { %6359 = vrot.lane.b32.xlu2 %v10771_v33, %s8886_s30 }
 0x4de   : > { %6357 = vrot.lane.b32.xlu1 %v10766_v8, %s8886_s30  ;;  %8728 = vrot.lane.b32.xlu0 %v8702_v12, %s8887_s14  ;;  %s8896_s30 = smov 70   ;;  %s8897_s14 = smov 71  }
 0x4e4   : > { %6493 = vrot.lane.b32.xlu2 %v10771_v33, %s8888_s15 }
 0x4e6   : > { %6491 = vrot.lane.b32.xlu1 %v10766_v8, %s8888_s15  ;;  %8733 = vrot.lane.b32.xlu0 %v8702_v12, %s8864_s27  ;;  %s8894_s27 = smov 72   ;;  %s8898_s15 = smov 68  }
 0x4ec   : > { %6627 = vrot.lane.b32.xlu2 %v10771_v33, %s11513_s16 }
 0x4ee   : > { %6625 = vrot.lane.b32.xlu1 %v10766_v8, %s11513_s16  ;;  %8738 = vrot.lane.b32.xlu0 %v8702_v12, %s8890_s21  ;;  %s11512_s21 = smov 69   ;;  %s11692_s16 = smov 94  }
 0x4f3   : > { %v5777_v42 = vpop.permute.xlu0 %5776 }
 0x4f4   : > { %6760 = vrot.lane.b32.xlu2 %v10771_v33, %s8891_s18 }
 0x4f6   : > { %6758 = vrot.lane.b32.xlu1 %v10766_v8, %s8891_s18  ;;  %8743 = vrot.lane.b32.xlu0 %v8702_v12, %s8892_s19  ;;  %s8900_s18 = smov 25   ;;  %s8902_s19 = smov 75  }
 0x4fc   : > { %6894 = vrot.lane.b32.xlu2 %v10771_v33, %s8893_s28 }
 0x4fe   : > { %6892 = vrot.lane.b32.xlu1 %v10766_v8, %s8893_s28  ;;  %8748 = vrot.lane.b32.xlu0 %v8702_v12, %s8894_s27  ;;  %s8903_s28 = smov 47  }
 0x504   : > { %7028 = vrot.lane.b32.xlu2 %v10771_v33, %s8895_s23 }
 0x506   : > { %7026 = vrot.lane.b32.xlu1 %v10766_v8, %s8895_s23  ;;  %8753 = vrot.lane.b32.xlu0 %v8702_v12, %s8896_s30  ;;  %s8905_s23 = smov 122   ;;  %s8907_s30 = smov 44  }
 0x50c   : > { %7162 = vrot.lane.b32.xlu2 %v10771_v33, %s8897_s14 }
 0x50e   : > { %7160 = vrot.lane.b32.xlu1 %v10766_v8, %s8897_s14  ;;  %8758 = vrot.lane.b32.xlu0 %v8702_v12, %s8898_s15 }
 0x514   : > { %7296 = vrot.lane.b32.xlu2 %v10771_v33, %s11512_s21 }
 0x516   : > { %v5779_v53 = vpop.permute.xlu2 %5778  ;;  %7294 = vrot.lane.b32.xlu1 %v10766_v8, %s11512_s21 }
 0x517   : > { %v5780_v24 = vsel %vm485_vm3, %v5777_v42, %v5779_v53  ;;  %5828 = vmatpush.msra.mxu2 %v5779_v53 }
 0x518   : > { %5805 = vmatpush.msrb.mxu0 %v5780_v24  ;;  %8438 = vmatmul.msk.f32.vlgmr.msra.gmra.mxu2 %vm5783_vm2, %v8434_v29 }
 0x519   : > { %5880 = vmatpush.msrb.mxu2 %v10771_v33  ;;  %8436 = vmatmul.msk.f32.vlgmr.msrb.gmra.mxu0 %vm5783_vm2, %v8434_v29  ;;  %v8481_v33 = vld [vmem:[%s11501_s4 + $0x88] sm:$0xff]  ;;  %v8487_v29 = vld [vmem:[%s11501_s4 + $0x98] sm:$0xff] }
 0x51a   : > { %5857 = vmatpush.msra.mxu0 %v10766_v8  ;;  %v8474_v8 = vld [vmem:[%s11501_s4 + $0x70] sm:$0xff] }
 0x51e   : > { %v5960_v51 = vpop.permute.xlu2 %5959 }
 0x51f   : > { %6008 = vmatpush.msra.mxu2 %v5960_v51 }
 0x520   : > { %8439 = vmatmul.msk.f32.gmra.mxu2 %vm5783_vm2, %v8435_v55 }
 0x521   : > { %8437 = vmatmul.msk.f32.gmra.mxu0 %vm5783_vm2, %v8435_v55  ;;  %v8492_v55 = vld [vmem:[%s11501_s4 + $0xa0] sm:$0xff] }
 0x526   : > { %v6092_v1 = vpop.permute.xlu2 %6091 }
 0x528   : > { %8442 = vmatmul.msk.f32.vlgmr.msrb.gmra.mxu2 %vm5783_vm2, %v5769_v28 }
 0x529   : > { %6141 = vmatpush.msrb.mxu2 %v6092_v1  ;;  %8440 = vmatmul.msk.f32.vlgmr.msra.gmra.mxu0 %vm5783_vm2, %v5769_v28  ;;  %v8498_v28 = vld [vmem:[%s11501_s4 + $0xb0] sm:$0xff] }
 0x52e   : > { %v6226_v47 = vpop.permute.xlu2 %6225 }
 0x530   : > { %8443 = vmatmul.msk.f32.gmra.mxu2 %vm5783_vm2, %v5770_v10  ;;  %v8704_v11 = vpop.permute.xlu1 %8703  ;;  %v8709_v27 = vpop.permute.xlu0 %8708 }
 0x531   : > { %v8706_v52 = vunpack.i.h.bf16 %v8704_v11  ;;  %v8705_v26 = vunpack.i.l.bf16 %v8704_v11  ;;  %v8711_v19 = vunpack.i.h.bf16 %v8709_v27  ;;  %v8710_v49 = vunpack.i.l.bf16 %v8709_v27  ;;  %8441 = vmatmul.msk.f32.gmra.mxu0 %vm5783_vm2, %v5770_v10  ;;  %v8493_v11 = vld [vmem:[%s11501_s4 + $0xa8] sm:$0xff] }
 0x533   : > { %5942 = vmatpush.msrb.mxu1 %v8706_v52  ;;  %v5895_v37 = vsel %vm827_vm4, %v8705_v26, %v8706_v52  ;;  %v6027_v36 = vsel %vm1207_vm6, %v8710_v49, %v8711_v19  ;;  %vm6093_vm4 = vcmask 932864   ;;  %vm6294_vm6 = vcmask 908288   ;;  %v8499_v52 = vld [vmem:[%s11501_s4 + $0xb8] sm:$0xff] }
 0x534   : > { %5919 = vmatpush.msrb.mxu3 %v5895_v37  ;;  %8448 = vmatmul.msk.f32.vlgmr.msrb.gmra.mxu1 %vm5783_vm2, %v8444_v32 }
 0x535   : > { %6074 = vmatpush.msra.mxu1 %v8711_v19  ;;  %8446 = vmatmul.msk.f32.vlgmr.msrb.gmra.mxu3 %vm5783_vm2, %v8444_v32  ;;  %v8504_v32 = vld [vmem:[%s11501_s4 + $0xc0] sm:$0xff] }
 0x536   : > { %6051 = vmatpush.msra.mxu3 %v6027_v36  ;;  %v6360_v40 = vpop.permute.xlu2 %6359  ;;  %v8510_v36 = vld [vmem:[%s11501_s4 + $0xd0] sm:$0xff] }
 0x538   : > { %8454 = vmatmul.msk.f32.vlgmr.msra.gmra.mxu2 %vm5783_vm2, %v8450_v31  ;;  %v5958_v13 = vpop.permute.xlu1 %5957  ;;  %v8714_v34 = vpop.permute.xlu0 %8713 }
 0x539   : > { %6275 = vmatpush.msra.mxu2 %v6226_v47  ;;  %v5961_v56 = vsel %vm1017_vm5, %v5958_v13, %v5960_v51  ;;  %v8716_v35 = vunpack.i.h.bf16 %v8714_v34  ;;  %v8715_v60 = vunpack.i.l.bf16 %v8714_v34  ;;  %v8505_v13 = vld [vmem:[%s11501_s4 + $0xc8] sm:$0xff] }
 0x53a   : > { %5985 = vmatpush.msrb.mxu0 %v5961_v56  ;;  %v8511_v56 = vld [vmem:[%s11501_s4 + $0xd8] sm:$0xff] }
 0x53b   : > { %8452 = vmatmul.msk.f32.vlgmr.msrb.gmra.mxu0 %vm5783_vm2, %v8450_v31  ;;  %6208 = vmatpush.msrb.mxu1 %v8716_v35  ;;  %v6161_v39 = vsel %vm6160_vm8, %v8715_v60, %v8716_v35  ;;  %vm6963_vm8 = vcmask 678912  }
 0x53c   : > { %8449 = vmatmul.msk.f32.gmra.mxu1 %vm5783_vm2, %v8445_v30  ;;  %6185 = vmatpush.msrb.mxu3 %v6161_v39  ;;  %v8516_v39 = vld [vmem:[%s11501_s4 + $0xe0] sm:$0xff] }
 0x53d   : > { %8447 = vmatmul.msk.f32.gmra.mxu3 %vm5783_vm2, %v8445_v30 }
 0x53e   : > { %v6494_v63 = vpop.permute.xlu2 %6493 }
 0x540   : > { %8455 = vmatmul.msk.f32.gmra.mxu2 %vm5783_vm2, %v8451_v0  ;;  %v6090_v15 = vpop.permute.xlu1 %6089  ;;  %v8719_v20 = vpop.permute.xlu0 %8718 }
 0x541   : > { %v6094_v4 = vsel %vm6093_vm4, %v6090_v15, %v6092_v1  ;;  %v8721_v21 = vunpack.i.h.bf16 %v8719_v20  ;;  %v8720_v18 = vunpack.i.l.bf16 %v8719_v20  ;;  %v8522_v15 = vld [vmem:[%s11501_s4 + $0xf0] sm:$0xff] }
 0x542   : > { %6118 = vmatpush.msra.mxu0 %v6094_v4 }
 0x543   : > { %8453 = vmatmul.msk.f32.gmra.mxu0 %vm5783_vm2, %v8451_v0  ;;  %v6295_v41 = vsel %vm6294_vm6, %v8720_v18, %v8721_v21  ;;  %vm7030_vm6 = vcmask 670720   ;;  %v8517_v18 = vld [vmem:[%s11501_s4 + $0xe8] sm:$0xff] }
 0x544   : > { %8460 = vmatmul.msk.f32.vlgmr.msra.gmra.mxu1 %vm5783_vm2, %v8456_v2 }
 0x545   : > { %6342 = vmatpush.msra.mxu1 %v8721_v21  ;;  %8458 = vmatmul.msk.f32.vlgmr.msra.gmra.mxu3 %vm5783_vm2, %v8456_v2 }
 0x546   : > { %6319 = vmatpush.msra.mxu3 %v6295_v41  ;;  %v6628_v57 = vpop.permute.xlu2 %6627 }
 0x548   : > { %8466 = vmatmul.msk.f32.vlgmr.msrb.gmra.mxu2 %vm5783_vm2, %v8462_v59  ;;  %v6224_v14 = vpop.permute.xlu1 %6223  ;;  %v8724_v25 = vpop.permute.xlu0 %8723 }
 0x549   : > { %6409 = vmatpush.msrb.mxu2 %v6360_v40  ;;  %v6228_v54 = vsel %vm6227_vm14, %v6224_v14, %v6226_v47  ;;  %v8726_v5 = vunpack.i.h.bf16 %v8724_v25  ;;  %v8725_v46 = vunpack.i.l.bf16 %v8724_v25  ;;  %vm7097_vm14 = vcmask 588800  }
 0x54a   : > { %6252 = vmatpush.msrb.mxu0 %v6228_v54 }
 0x54b   : > { %8464 = vmatmul.msk.f32.vlgmr.msra.gmra.mxu0 %vm5783_vm2, %v8462_v59  ;;  %v6429_v6 = vsel %vm6428_vm0, %v8725_v46, %v8726_v5  ;;  %v8523_v59 = vld [vmem:[%s11501_s4 + $0xf8] sm:$0xff]  ;;  %vm7231_vm0 = vcmask 572416  }
 0x54c   : > { %8461 = vmatmul.msk.f32.gmra.mxu1 %vm5783_vm2, %v8457_v17 }
 0x54d   : > { %8459 = vmatmul.msk.f32.gmra.mxu3 %vm5783_vm2, %v8457_v17 }
 0x54e   : > { %v6761_v1 = vpop.permute.xlu2 %6760 }
 0x550   : > { %8467 = vmatmul.msk.f32.gmra.mxu2 %vm5783_vm2, %v8463_v58  ;;  %v6358_v23 = vpop.permute.xlu1 %6357  ;;  %v8729_v45 = vpop.permute.xlu0 %8728 }
 0x551   : > { %v6362_v48 = vsel %vm6361_vm15, %v6358_v23, %v6360_v40  ;;  %v8731_v44 = vunpack.i.h.bf16 %v8729_v45  ;;  %v8730_v50 = vunpack.i.l.bf16 %v8729_v45  ;;  %vm7164_vm15 = vcmask 580608  }
 0x552   : > { %6386 = vmatpush.msra.mxu0 %v6362_v48 }
 0x553   : > { %8465 = vmatmul.msk.f32.gmra.mxu0 %vm5783_vm2, %v8463_v58  ;;  %v6563_v22 = vsel %vm6562_vm10, %v8730_v50, %v8731_v44  ;;  %v8528_v58 = vld [vmem:[%s11501_s4 + $0x100] sm:$0xff] }
 0x554   : > { %8472 = vmatmul.msk.f32.vlgmr.msrb.gmra.mxu1 %vm5783_vm2, %v8468_v43  ;;  %v8540_v50 = vld [vmem:[%s11501_s4 + $0x120] sm:$0xff] }
 0x555   : > { %6476 = vmatpush.msrb.mxu1 %v8726_v5  ;;  %8470 = vmatmul.msk.f32.vlgmr.msrb.gmra.mxu3 %vm5783_vm2, %v8468_v43  ;;  %v8534_v5 = vld [vmem:[%s11501_s4 + $0x110] sm:$0xff] }
 0x556   : > { %6453 = vmatpush.msrb.mxu3 %v6429_v6  ;;  %v6895_v31 = vpop.permute.xlu2 %6894  ;;  %v8529_v6 = vld [vmem:[%s11501_s4 + $0x108] sm:$0xff] }
 0x558   : > { %8478 = vmatmul.msk.f32.vlgmr.msra.gmra.mxu2 %vm5783_vm2, %v8474_v8  ;;  %v6492_v16 = vpop.permute.xlu1 %6491  ;;  %v8734_v42 = vpop.permute.xlu0 %8733 }
 0x559   : > { %6543 = vmatpush.msra.mxu2 %v6494_v63  ;;  %v6496_v61 = vsel %vm6495_vm9, %v6492_v16, %v6494_v63  ;;  %v8736_v53 = vunpack.i.h.bf16 %v8734_v42  ;;  %v8735_v24 = vunpack.i.l.bf16 %v8734_v42  ;;  %v8535_v16 = vld [vmem:[%s11501_s4 + $0x118] sm:$0xff]  ;;  %vm7298_vm9 = vcmask 564224  }
 0x55b   : > { %8476 = vmatmul.msk.f32.vlgmr.msrb.gmra.mxu0 %vm5783_vm2, %v8474_v8  ;;  %v6696_v51 = vsel %vm1397_vm7, %v8735_v24, %v8736_v53  ;;  %vm6829_vm7 = vcmask 695296   ;;  %v8541_v24 = vld [vmem:[%s11501_s4 + $0x128] sm:$0xff] }
 0x55c   : > { %6520 = vmatpush.msrb.mxu0 %v6496_v61  ;;  %8473 = vmatmul.msk.f32.gmra.mxu1 %vm5783_vm2, %v8469_v9 }
 0x55d   : > { %8471 = vmatmul.msk.f32.gmra.mxu3 %vm5783_vm2, %v8469_v9 }
 0x55e   : > { %v7029_v4 = vpop.permute.xlu2 %7028 }
 0x560   : > { %8479 = vmatmul.msk.f32.gmra.mxu2 %vm5783_vm2, %v8475_v38  ;;  %v6626_v3 = vpop.permute.xlu1 %6625  ;;  %v8739_v26 = vpop.permute.xlu0 %8738 }
 0x561   : > { %v6630_v12 = vsel %vm6629_vm11, %v6626_v3, %v6628_v57  ;;  %v8741_v19 = vunpack.i.h.bf16 %v8739_v26  ;;  %v8740_v49 = vunpack.i.l.bf16 %v8739_v26 }
 0x563   : > { %8477 = vmatmul.msk.f32.gmra.mxu0 %vm5783_vm2, %v8475_v38  ;;  %v6830_v37 = vsel %vm6829_vm7, %v8740_v49, %v8741_v19 }
 0x564   : > { %8484 = vmatmul.msk.f32.vlgmr.msra.gmra.mxu1 %vm5783_vm2, %v8480_v62 }
 0x565   : > { %6610 = vmatpush.msra.mxu1 %v8731_v44  ;;  %8482 = vmatmul.msk.f32.vlgmr.msra.gmra.mxu3 %vm5783_vm2, %v8480_v62 }
 0x566   : > { %6587 = vmatpush.msra.mxu3 %v6563_v22  ;;  %v7163_v48 = vpop.permute.xlu2 %7162 }
 0x568   : > { %8490 = vmatmul.msk.f32.vlgmr.msrb.gmra.mxu2 %vm5783_vm2, %v8486_v7  ;;  %v6759_v10 = vpop.permute.xlu1 %6758  ;;  %v8744_v35 = vpop.permute.xlu0 %8743 }
 0x569   : > { %6677 = vmatpush.msrb.mxu2 %v6628_v57  ;;  %v6763_v27 = vsel %vm6762_vm12, %v6759_v10, %v6761_v1  ;;  %v8746_v60 = vunpack.i.h.bf16 %v8744_v35  ;;  %v8745_v30 = vunpack.i.l.bf16 %v8744_v35 }
 0x56b   : > { %8488 = vmatmul.msk.f32.vlgmr.msra.gmra.mxu0 %vm5783_vm2, %v8486_v7  ;;  %v6964_v0 = vsel %vm6963_vm8, %v8745_v30, %v8746_v60  ;;  %v8546_v7 = vld [vmem:[%s11501_s4 + $0x130] sm:$0xff] }
 0x56c   : > { %6654 = vmatpush.msra.mxu0 %v6630_v12  ;;  %8485 = vmatmul.msk.f32.gmra.mxu1 %vm5783_vm2, %v8481_v33 }
 0x56d   : > { %8483 = vmatmul.msk.f32.gmra.mxu3 %vm5783_vm2, %v8481_v33 }
 0x56e   : > { %v7297_v57 = vpop.permute.xlu2 %7296 }
 0x570   : > { %8491 = vmatmul.msk.f32.gmra.mxu2 %vm5783_vm2, %v8487_v29  ;;  %v6893_v47 = vpop.permute.xlu1 %6892  ;;  %v8749_v40 = vpop.permute.xlu0 %8748 }
 0x571   : > { %v6897_v34 = vsel %vm6896_vm13, %v6893_v47, %v6895_v31  ;;  %v8751_v54 = vunpack.i.h.bf16 %v8749_v40  ;;  %v8750_v17 = vunpack.i.l.bf16 %v8749_v40  ;;  %v8552_v47 = vld [vmem:[%s11501_s4 + $0x140] sm:$0xff] }
 0x573   : > { %8489 = vmatmul.msk.f32.gmra.mxu0 %vm5783_vm2, %v8487_v29  ;;  %v7098_v23 = vsel %vm7097_vm14, %v8750_v17, %v8751_v54 }
 0x574   : > { %8496 = vmatmul.msk.f32.vlgmr.msrb.gmra.mxu1 %vm5783_vm2, %v8492_v55 }
 0x575   : > { %6743 = vmatpush.msrb.mxu1 %v8736_v53  ;;  %8494 = vmatmul.msk.f32.vlgmr.msrb.gmra.mxu3 %vm5783_vm2, %v8492_v55 }
 0x576   : > { %6720 = vmatpush.msrb.mxu3 %v6696_v51 }
 0x578   : > { %8502 = vmatmul.msk.f32.vlgmr.msra.gmra.mxu2 %vm5783_vm2, %v8498_v28  ;;  %v7027_v21 = vpop.permute.xlu1 %7026  ;;  %v8754_v61 = vpop.permute.xlu0 %8753 }
 0x579   : > { %6810 = vmatpush.msra.mxu2 %v6761_v1  ;;  %v7031_v2 = vsel %vm7030_vm6, %v7027_v21, %v7029_v4  ;;  %v8756_v38 = vunpack.i.h.bf16 %v8754_v61  ;;  %v8755_v45 = vunpack.i.l.bf16 %v8754_v61 }
 0x57b   : > { %8500 = vmatmul.msk.f32.vlgmr.msrb.gmra.mxu0 %vm5783_vm2, %v8498_v28  ;;  %v7232_v22 = vsel %vm7231_vm0, %v8755_v45, %v8756_v38 }
 0x57c   : > { %6787 = vmatpush.msrb.mxu0 %v6763_v27  ;;  %8497 = vmatmul.msk.f32.gmra.mxu1 %vm5783_vm2, %v8493_v11 }
 0x57d   : > { %8495 = vmatmul.msk.f32.gmra.mxu3 %vm5783_vm2, %v8493_v11  ;;  %v8547_v11 = vld [vmem:[%s11501_s4 + $0x138] sm:$0xff] }
 0x580   : > { %8503 = vmatmul.msk.f32.gmra.mxu2 %vm5783_vm2, %v8499_v52  ;;  %v7161_v43 = vpop.permute.xlu1 %7160  ;;  %v8759_v27 = vpop.permute.xlu0 %8758 }
 0x581   : > { %v7165_v8 = vsel %vm7164_vm15, %v7161_v43, %v7163_v48  ;;  %v8761_v49 = vunpack.i.h.bf16 %v8759_v27 }
 0x583   : > { %8501 = vmatmul.msk.f32.gmra.mxu0 %vm5783_vm2, %v8499_v52 }
 0x584   : > { %8508 = vmatmul.msk.f32.vlgmr.msra.gmra.mxu1 %vm5783_vm2, %v8504_v32 }
 0x585   : > { %6877 = vmatpush.msra.mxu1 %v8741_v19  ;;  %8506 = vmatmul.msk.f32.vlgmr.msra.gmra.mxu3 %vm5783_vm2, %v8504_v32  ;;  %v8760_v32 = vunpack.i.l.bf16 %v8759_v27 }
 0x586   : > { %6854 = vmatpush.msra.mxu3 %v6830_v37 }
 0x587   : > { %v7365_v30 = vsel %vm5765_vm1, %v8760_v32, %v8761_v49  ;;  %v7425_v32 = vld [vmem:[%s11502_s5 + $0x8] sm:$0xff]  ;;  %vm7506_vm1 = vcmask 1044480  }
 0x588   : > { %8514 = vmatmul.msk.f32.vlgmr.msrb.gmra.mxu2 %vm5783_vm2, %v8510_v36  ;;  %v7295_v3 = vpop.permute.xlu1 %7294 }
 0x589   : > { %6944 = vmatpush.msrb.mxu2 %v6895_v31  ;;  %v7299_v28 = vsel %vm7298_vm9, %v7295_v3, %v7297_v57 }
 0x58b   : > { %8512 = vmatmul.msk.f32.vlgmr.msra.gmra.mxu0 %vm5783_vm2, %v8510_v36 }
 0x58c   : > { %6921 = vmatpush.msra.mxu0 %v6897_v34  ;;  %8509 = vmatmul.msk.f32.gmra.mxu1 %vm5783_vm2, %v8505_v13 }
 0x58d   : > { %8507 = vmatmul.msk.f32.gmra.mxu3 %vm5783_vm2, %v8505_v13 }
 0x590   : > { %8515 = vmatmul.msk.f32.gmra.mxu2 %vm5783_vm2, %v8511_v56 }
 0x593   : > { %8513 = vmatmul.msk.f32.gmra.mxu0 %vm5783_vm2, %v8511_v56 }
 0x594   : > { %8520 = vmatmul.msk.f32.vlgmr.msrb.gmra.mxu1 %vm5783_vm2, %v8516_v39 }
 0x595   : > { %7011 = vmatpush.msrb.mxu1 %v8746_v60  ;;  %8518 = vmatmul.msk.f32.vlgmr.msrb.gmra.mxu3 %vm5783_vm2, %v8516_v39  ;;  %v8558_v39 = vld [vmem:[%s11501_s4 + $0x150] sm:$0xff] }
 0x596   : > { %6988 = vmatpush.msrb.mxu3 %v6964_v0  ;;  %v10969_v20 = vpop.f32.mrf.mxu0 }
 0x598   : > { %8526 = vmatmul.msk.f32.vlgmr.msra.gmra.mxu2 %vm5783_vm2, %v8522_v15 }
 0x599   : > { %7078 = vmatpush.msra.mxu2 %v7029_v4 }
 0x59b   : > { %v5830_v41 = vpop.f32.mrf.mxu2  ;;  %8524 = vmatmul.msk.f32.vlgmr.msrb.gmra.mxu0 %vm5783_vm2, %v8522_v15 }
 0x59c   : > { %7055 = vmatpush.msrb.mxu0 %v7031_v2  ;;  %8521 = vmatmul.msk.f32.gmra.mxu1 %vm5783_vm2, %v8517_v18 }
 0x59d   : > { %8519 = vmatmul.msk.f32.gmra.mxu3 %vm5783_vm2, %v8517_v18  ;;  %v8553_v18 = vld [vmem:[%s11501_s4 + $0x148] sm:$0xff] }
 0x59e   : > { %v10981_v14 = vpop.f32.mrf.mxu0 }
 0x5a0   : > { %8527 = vmatmul.msk.f32.gmra.mxu2 %vm5783_vm2, %v8523_v59 }
 0x5a3   : > { %v5833_v25 = vpop.f32.mrf.mxu2  ;;  %8525 = vmatmul.msk.f32.gmra.mxu0 %vm5783_vm2, %v8523_v59 }
 0x5a4   : > { %8532 = vmatmul.msk.f32.vlgmr.msra.gmra.mxu1 %vm5783_vm2, %v8528_v58 }
 0x5a5   : > { %7145 = vmatpush.msra.mxu1 %v8751_v54  ;;  %8530 = vmatmul.msk.f32.vlgmr.msra.gmra.mxu3 %vm5783_vm2, %v8528_v58 }
 0x5a6   : > { %7122 = vmatpush.msra.mxu3 %v7098_v23  ;;  %v5859_v46 = vpop.f32.mrf.mxu0  ;;  %v8564_v23 = vld [vmem:[%s11501_s4 + $0x160] sm:$0xff] }
 0x5a7   : > { %v5860_v37 = vadd.f32 %v5859_v46, %v10969_v20 }
 0x5a8   : > { %8538 = vmatmul.msk.f32.vlgmr.msrb.gmra.mxu2 %vm5783_vm2, %v8534_v5 }
 0x5a9   : > { %7212 = vmatpush.msrb.mxu2 %v7163_v48 }
 0x5ab   : > { %v5882_v63 = vpop.f32.mrf.mxu2  ;;  %8536 = vmatmul.msk.f32.vlgmr.msra.gmra.mxu0 %vm5783_vm2, %v8534_v5 }
 0x5ac   : > { %7189 = vmatpush.msra.mxu0 %v7165_v8  ;;  %8533 = vmatmul.msk.f32.gmra.mxu1 %vm5783_vm2, %v8529_v6  ;;  %v5883_v33 = vadd.f32 %v5882_v63, %v5830_v41 }
 0x5ad   : > { %8531 = vmatmul.msk.f32.gmra.mxu3 %vm5783_vm2, %v8529_v6  ;;  %v8570_v6 = vld [vmem:[%s11501_s4 + $0x170] sm:$0xff] }
 0x5ae   : > { %v5862_v9 = vpop.f32.mrf.mxu0 }
 0x5af   : > { %v5863_v52 = vadd.f32 %v5862_v9, %v10981_v14  ;;  %v8559_v14 = vld [vmem:[%s11501_s4 + $0x158] sm:$0xff]  ;;  %v8565_v9 = vld [vmem:[%s11501_s4 + $0x168] sm:$0xff] }
 0x5b0   : > { %8539 = vmatmul.msk.f32.gmra.mxu2 %vm5783_vm2, %v8535_v16 }
 0x5b1   : > { %v5944_v44 = vpop.f32.mrf.mxu1 }
 0x5b2   : > { %v5951_v55 = vadd.f32 %v5944_v44, %v5883_v33  ;;  %v8576_v33 = vld [vmem:[%s11501_s4 + $0x180] sm:$0xff] }
 0x5b3   : > { %v5885_v62 = vpop.f32.mrf.mxu2  ;;  %8537 = vmatmul.msk.f32.gmra.mxu0 %vm5783_vm2, %v8535_v16 }
 0x5b4   : > { %8544 = vmatmul.msk.f32.vlgmr.msrb.gmra.mxu1 %vm5783_vm2, %v8540_v50  ;;  %v5886_v12 = vadd.f32 %v5885_v62, %v5833_v25  ;;  %v8571_v62 = vld [vmem:[%s11501_s4 + $0x178] sm:$0xff] }
 0x5b5   : > { %7279 = vmatpush.msrb.mxu1 %v8756_v38  ;;  %8542 = vmatmul.msk.f32.vlgmr.msrb.gmra.mxu3 %vm5783_vm2, %v8540_v50 }
 0x5b6   : > { %7256 = vmatpush.msrb.mxu3 %v7232_v22 }
 0x5b8   : > { %v5921_v29 = vpop.f32.mrf.mxu3  ;;  %8550 = vmatmul.msk.f32.vlgmr.msra.gmra.mxu2 %vm5783_vm2, %v8546_v7  ;;  %v5987_v42 = vpop.f32.mrf.mxu0 }
 0x5b9   : > { %7346 = vmatpush.msra.mxu2 %v7297_v57  ;;  %v5947_v53 = vpop.f32.mrf.mxu1  ;;  %v5950_v34 = vadd.f32 %v5921_v29, %v5860_v37 }
 0x5ba   : > { %v5953_v51 = vadd.f32 %v5947_v53, %v5886_v12 }
 0x5bb   : > { %v6010_v1 = vpop.f32.mrf.mxu2  ;;  %8548 = vmatmul.msk.f32.vlgmr.msrb.gmra.mxu0 %vm5783_vm2, %v8546_v7  ;;  %v6016_v0 = vadd.f32 %v5987_v42, %v5950_v34 }
 0x5bc   : > { %v6017_v10 = vadd.f32 %v6010_v1, %v5951_v55  ;;  %7323 = vmatpush.msrb.mxu0 %v7299_v28  ;;  %8545 = vmatmul.msk.f32.gmra.mxu1 %vm5783_vm2, %v8541_v24 }
 0x5bd   : > { %8543 = vmatmul.msk.f32.gmra.mxu3 %vm5783_vm2, %v8541_v24 }
 0x5c0   : > { %v5924_v26 = vpop.f32.mrf.mxu3  ;;  %8551 = vmatmul.msk.f32.gmra.mxu2 %vm5783_vm2, %v8547_v11  ;;  %v5990_v19 = vpop.f32.mrf.mxu0 }
 0x5c1   : > { %v5952_v36 = vadd.f32 %v5924_v26, %v5863_v52  ;;  %v6076_v31 = vpop.f32.mrf.mxu1 }
 0x5c2   : > { %v6083_v13 = vadd.f32 %v6076_v31, %v6017_v10  ;;  %v8577_v10 = vld [vmem:[%s11501_s4 + $0x188] sm:$0xff] }
 0x5c3   : > { %v6018_v56 = vadd.f32 %v5990_v19, %v5952_v36  ;;  %v6013_v35 = vpop.f32.mrf.mxu2  ;;  %8549 = vmatmul.msk.f32.gmra.mxu0 %vm5783_vm2, %v8547_v11 }
 0x5c4   : > { %v6019_v60 = vadd.f32 %v6013_v35, %v5953_v51  ;;  %8556 = vmatmul.msk.f32.vlgmr.msra.gmra.mxu1 %vm5783_vm2, %v8552_v47  ;;  %v7424_v51 = vld [vmem:[%s11502_s5] sm:$0xff] }
 0x5c5   : > { %7412 = vmatpush.msra.mxu1 %v8761_v49  ;;  %8554 = vmatmul.msk.f32.vlgmr.msra.gmra.mxu3 %vm5783_vm2, %v8552_v47 }
 0x5c6   : > { %7389 = vmatpush.msra.mxu3 %v7365_v30  ;;  %7428 = vperm.xlu2 %8762, %v7424_v51  }
 0x5c8   : > { %v6053_v15 = vpop.f32.mrf.mxu3  ;;  %8562 = vmatmul.msk.f32.vlgmr.msrb.gmra.mxu2 %vm5783_vm2, %v8558_v39  ;;  %v6120_v20 = vpop.f32.mrf.mxu0 }
 0x5c9   : > { %v6082_v4 = vadd.f32 %v6053_v15, %v6016_v0  ;;  %v6079_v21 = vpop.f32.mrf.mxu1 }
 0x5ca   : > { %v6085_v2 = vadd.f32 %v6079_v21, %v6019_v60 }
 0x5cb   : > { %v6149_v41 = vadd.f32 %v6120_v20, %v6082_v4  ;;  %v6143_v59 = vpop.f32.mrf.mxu2  ;;  %8560 = vmatmul.msk.f32.vlgmr.msra.gmra.mxu0 %vm5783_vm2, %v8558_v39 }
 0x5cc   : > { %v6150_v40 = vadd.f32 %v6143_v59, %v6083_v13  ;;  %8557 = vmatmul.msk.f32.gmra.mxu1 %vm5783_vm2, %v8553_v18 }
 0x5cd   : > { %8555 = vmatmul.msk.f32.gmra.mxu3 %vm5783_vm2, %v8553_v18 }
 0x5ce   : > { %7433 = vperm.xlu2 %8762, %v7425_v32  }
 0x5d0   : > { %v6056_v54 = vpop.f32.mrf.mxu3  ;;  %8563 = vmatmul.msk.f32.gmra.mxu2 %vm5783_vm2, %v8559_v14  ;;  %v6123_v17 = vpop.f32.mrf.mxu0 }
 0x5d1   : > { %v6084_v58 = vadd.f32 %v6056_v54, %v6018_v56  ;;  %v6210_v25 = vpop.f32.mrf.mxu1 }
 0x5d2   : > { %v6217_v5 = vadd.f32 %v6210_v25, %v6150_v40 }
 0x5d3   : > { %v6151_v46 = vadd.f32 %v6123_v17, %v6084_v58  ;;  %v6146_v48 = vpop.f32.mrf.mxu2  ;;  %8561 = vmatmul.msk.f32.gmra.mxu0 %vm5783_vm2, %v8559_v14 }
 0x5d4   : > { %v6152_v43 = vadd.f32 %v6146_v48, %v6085_v2  ;;  %8568 = vmatmul.msk.f32.vlgmr.msrb.gmra.mxu1 %vm5783_vm2, %v8564_v23 }
 0x5d5   : > { %8566 = vmatmul.msk.f32.vlgmr.msrb.gmra.mxu3 %vm5783_vm2, %v8564_v23 }
 0x5d8   : > { %v6187_v8 = vpop.f32.mrf.mxu3  ;;  %8574 = vmatmul.msk.f32.vlgmr.msra.gmra.mxu2 %vm5783_vm2, %v8570_v6  ;;  %v6254_v63 = vpop.f32.mrf.mxu0 }
 0x5d9   : > { %v6216_v16 = vadd.f32 %v6187_v8, %v6149_v41  ;;  %v6213_v61 = vpop.f32.mrf.mxu1 }
 0x5da   : > { %v6219_v38 = vadd.f32 %v6213_v61, %v6152_v43 }
 0x5db   : > { %v6283_v45 = vadd.f32 %v6254_v63, %v6216_v16  ;;  %v6277_v44 = vpop.f32.mrf.mxu2  ;;  %8572 = vmatmul.msk.f32.vlgmr.msrb.gmra.mxu0 %vm5783_vm2, %v8570_v6 }
 0x5dc   : > { %v6284_v50 = vadd.f32 %v6277_v44, %v6217_v5  ;;  %8569 = vmatmul.msk.f32.gmra.mxu1 %vm5783_vm2, %v8565_v9 }
 0x5dd   : > { %8567 = vmatmul.msk.f32.gmra.mxu3 %vm5783_vm2, %v8565_v9 }
 0x5e0   : > { %v6190_v22 = vpop.f32.mrf.mxu3  ;;  %8575 = vmatmul.msk.f32.gmra.mxu2 %vm5783_vm2, %v8571_v62  ;;  %v6257_v7 = vpop.f32.mrf.mxu0 }
 0x5e1   : > { %v6218_v57 = vadd.f32 %v6190_v22, %v6151_v46  ;;  %v6344_v3 = vpop.f32.mrf.mxu1 }
 0x5e2   : > { %v6351_v12 = vadd.f32 %v6344_v3, %v6284_v50 }
 0x5e3   : > { %v6285_v29 = vadd.f32 %v6257_v7, %v6218_v57  ;;  %v6280_v42 = vpop.f32.mrf.mxu2  ;;  %8573 = vmatmul.msk.f32.gmra.mxu0 %vm5783_vm2, %v8571_v62 }
 0x5e4   : > { %v6286_v53 = vadd.f32 %v6280_v42, %v6219_v38  ;;  %8580 = vmatmul.msk.f32.vlgmr.msra.gmra.mxu1 %vm5783_vm2, %v8576_v33 }
 0x5e5   : > { %8578 = vmatmul.msk.f32.vlgmr.msra.gmra.mxu3 %vm5783_vm2, %v8576_v33 }
 0x5e8   : > { %v6321_v24 = vpop.f32.mrf.mxu3  ;;  %v6388_v55 = vpop.f32.mrf.mxu0 }
 0x5e9   : > { %v6350_v28 = vadd.f32 %v6321_v24, %v6283_v45  ;;  %v6347_v1 = vpop.f32.mrf.mxu1 }
 0x5ea   : > { %v6353_v11 = vadd.f32 %v6347_v1, %v6286_v53 }
 0x5eb   : > { %v6417_v27 = vadd.f32 %v6388_v55, %v6350_v28  ;;  %v6411_v52 = vpop.f32.mrf.mxu2 }
 0x5ec   : > { %v6418_v26 = vadd.f32 %v6411_v52, %v6351_v12  ;;  %8581 = vmatmul.msk.f32.gmra.mxu1 %vm5783_vm2, %v8577_v10 }
 0x5ed   : > { %8579 = vmatmul.msk.f32.gmra.mxu3 %vm5783_vm2, %v8577_v10 }
 0x5f0   : > { %v6324_v19 = vpop.f32.mrf.mxu3  ;;  %v6391_v49 = vpop.f32.mrf.mxu0 }
 0x5f1   : > { %v6352_v37 = vadd.f32 %v6324_v19, %v6285_v29  ;;  %v6478_v36 = vpop.f32.mrf.mxu1 }
 0x5f2   : > { %v6485_v31 = vadd.f32 %v6478_v36, %v6418_v26 }
 0x5f3   : > { %v6419_v47 = vadd.f32 %v6391_v49, %v6352_v37  ;;  %v6414_v13 = vpop.f32.mrf.mxu2 }
 0x5f4   : > { %v6420_v34 = vadd.f32 %v6414_v13, %v6353_v11 }
 0x5f8   : > { %v6455_v56 = vpop.f32.mrf.mxu3  ;;  %v6522_v35 = vpop.f32.mrf.mxu0 }
 0x5f9   : > { %v6484_v60 = vadd.f32 %v6455_v56, %v6417_v27  ;;  %v6481_v30 = vpop.f32.mrf.mxu1 }
 0x5fa   : > { %v6487_v39 = vadd.f32 %v6481_v30, %v6420_v34 }
 0x5fb   : > { %v6551_v0 = vadd.f32 %v6522_v35, %v6484_v60  ;;  %v6545_v15 = vpop.f32.mrf.mxu2 }
 0x5fc   : > { %v6552_v20 = vadd.f32 %v6545_v15, %v6485_v31 }
 0x600   : > { %v6458_v4 = vpop.f32.mrf.mxu3  ;;  %v6525_v21 = vpop.f32.mrf.mxu0 }
 0x601   : > { %v6486_v18 = vadd.f32 %v6458_v4, %v6419_v47  ;;  %v6612_v2 = vpop.f32.mrf.mxu1 }
 0x602   : > { %v6619_v41 = vadd.f32 %v6612_v2, %v6552_v20 }
 0x603   : > { %v6553_v59 = vadd.f32 %v6525_v21, %v6486_v18  ;;  %v6548_v40 = vpop.f32.mrf.mxu2 }
 0x604   : > { %v6554_v14 = vadd.f32 %v6548_v40, %v6487_v39 }
 0x608   : > { %v6589_v54 = vpop.f32.mrf.mxu3  ;;  %v6656_v17 = vpop.f32.mrf.mxu0 }
 0x609   : > { %v6618_v58 = vadd.f32 %v6589_v54, %v6551_v0  ;;  %v6615_v25 = vpop.f32.mrf.mxu1 }
 0x60a   : > { %v6621_v23 = vadd.f32 %v6615_v25, %v6554_v14 }
 0x60b   : > { %v6679_v5 = vpop.f32.mrf.mxu2  ;;  %v6685_v36 = vadd.f32 %v6656_v17, %v6618_v58 }
 0x60c   : > { %v6686_v56 = vadd.f32 %v6679_v5, %v6619_v41 }
 0x610   : > { %v6592_v46 = vpop.f32.mrf.mxu3  ;;  %v6659_v48 = vpop.f32.mrf.mxu0 }
 0x611   : > { %v6620_v43 = vadd.f32 %v6592_v46, %v6553_v59  ;;  %v6745_v6 = vpop.f32.mrf.mxu1 }
 0x612   : > { %v6752_v35 = vadd.f32 %v6745_v6, %v6686_v56  ;;  %v7493_v56 = vld [vmem:[%s11503_s6 + $0x48] sm:$0xff] }
 0x613   : > { %v6682_v8 = vpop.f32.mrf.mxu2  ;;  %v6687_v15 = vadd.f32 %v6659_v48, %v6620_v43 }
 0x614   : > { %v6688_v63 = vadd.f32 %v6682_v8, %v6621_v23 }
 0x618   : > { %v6722_v16 = vpop.f32.mrf.mxu3  ;;  %v6789_v61 = vpop.f32.mrf.mxu0 }
 0x619   : > { %v6748_v9 = vpop.f32.mrf.mxu1  ;;  %v6751_v13 = vadd.f32 %v6722_v16, %v6685_v36  ;;  %v7498_v36 = vld [vmem:[%s11503_s6 + $0x70] sm:$0xff] }
 0x61a   : > { %v6754_v38 = vadd.f32 %v6748_v9, %v6688_v63 }
 0x61b   : > { %v6812_v45 = vpop.f32.mrf.mxu2  ;;  %v6818_v30 = vadd.f32 %v6789_v61, %v6751_v13  ;;  %v7495_v13 = vld [vmem:[%s11503_s6 + $0x58] sm:$0xff] }
 0x61c   : > { %v6819_v39 = vadd.f32 %v6812_v45, %v6752_v35  ;;  %v7492_v35 = vld [vmem:[%s11503_s6 + $0x40] sm:$0xff] }
 0x620   : > { %v6725_v44 = vpop.f32.mrf.mxu3  ;;  %v6792_v50 = vpop.f32.mrf.mxu0 }
 0x621   : > { %v6879_v62 = vpop.f32.mrf.mxu1  ;;  %v6753_v18 = vadd.f32 %v6725_v44, %v6687_v15 }
 0x622   : > { %v6886_v21 = vadd.f32 %v6879_v62, %v6819_v39  ;;  %v7491_v39 = vld [vmem:[%s11503_s6 + $0x38] sm:$0xff] }
 0x623   : > { %v6815_v22 = vpop.f32.mrf.mxu2  ;;  %v6820_v17 = vadd.f32 %v6792_v50, %v6753_v18 }
 0x624   : > { %v6821_v7 = vadd.f32 %v6815_v22, %v6754_v38  ;;  %v7429_v22 = vpop.permute.xlu2 %7428 }
 0x628   : > { %v6856_v57 = vpop.f32.mrf.mxu3  ;;  %v6923_v3 = vpop.f32.mrf.mxu0 }
 0x629   : > { %v6882_v33 = vpop.f32.mrf.mxu1  ;;  %v6885_v20 = vadd.f32 %v6856_v57, %v6818_v30 }
 0x62a   : > { %v6888_v12 = vadd.f32 %v6882_v33, %v6821_v7 }
 0x62b   : > { %v6946_v29 = vpop.f32.mrf.mxu2  ;;  %v6952_v14 = vadd.f32 %v6923_v3, %v6885_v20 }
 0x62c   : > { %v6953_v59 = vadd.f32 %v6946_v29, %v6886_v21 }
 0x630   : > { %v6859_v42 = vpop.f32.mrf.mxu3  ;;  %v6926_v53 = vpop.f32.mrf.mxu0 }
 0x631   : > { %v7013_v24 = vpop.f32.mrf.mxu1  ;;  %v6887_v5 = vadd.f32 %v6859_v42, %v6820_v17  ;;  %v7488_v17 = vld [vmem:[%s11503_s6 + $0x20] sm:$0xff] }
 0x632   : > { %v7020_v54 = vadd.f32 %v7013_v24, %v6953_v59 }
 0x633   : > { %v6949_v55 = vpop.f32.mrf.mxu2  ;;  %v6954_v63 = vadd.f32 %v6926_v53, %v6887_v5 }
 0x634   : > { %v6955_v51 = vadd.f32 %v6949_v55, %v6888_v12 }
 0x638   : > { %v6990_v28 = vpop.f32.mrf.mxu3  ;;  %v7057_v11 = vpop.f32.mrf.mxu0 }
 0x639   : > { %v7016_v1 = vpop.f32.mrf.mxu1  ;;  %v7019_v58 = vadd.f32 %v6990_v28, %v6952_v14 }
 0x63a   : > { %v7022_v10 = vadd.f32 %v7016_v1, %v6955_v51 }
 0x63b   : > { %v7080_v27 = vpop.f32.mrf.mxu2  ;;  %v7086_v48 = vadd.f32 %v7057_v11, %v7019_v58  ;;  %v7487_v58 = vld [vmem:[%s11503_s6 + $0x18] sm:$0xff] }
 0x63c   : > { %v7087_v25 = vadd.f32 %v7080_v27, %v7020_v54  ;;  %v7489_v54 = vld [vmem:[%s11503_s6 + $0x28] sm:$0xff] }
 0x640   : > { %v6993_v52 = vpop.f32.mrf.mxu3  ;;  %v7060_v49 = vpop.f32.mrf.mxu0 }
 0x641   : > { %v7147_v26 = vpop.f32.mrf.mxu1  ;;  %v7021_v38 = vadd.f32 %v6993_v52, %v6954_v63 }
 0x642   : > { %v7154_v6 = vadd.f32 %v7147_v26, %v7087_v25  ;;  %v7486_v25 = vld [vmem:[%s11503_s6 + $0x10] sm:$0xff] }
 0x643   : > { %v7083_v19 = vpop.f32.mrf.mxu2  ;;  %v7088_v3 = vadd.f32 %v7060_v49, %v7021_v38 }
 0x644   : > { %v7089_v32 = vadd.f32 %v7083_v19, %v7022_v10  ;;  %v7434_v19 = vpop.permute.xlu2 %7433 }
 0x648   : > { %v7124_v37 = vpop.f32.mrf.mxu3  ;;  %v7191_v60 = vpop.f32.mrf.mxu0 }
 0x649   : > { %v7150_v31 = vpop.f32.mrf.mxu1  ;;  %v7153_v16 = vadd.f32 %v7124_v37, %v7086_v48  ;;  %v7499_v37 = vld [vmem:[%s11503_s6 + $0x78] sm:$0x1f] }
 0x64a   : > { %v7156_v47 = vadd.f32 %v7150_v31, %v7089_v32  ;;  %8582 = vmatpush.msk.msra.mxu0 %vm7506_vm1, %v7499_v37  ;;  %v7497_v31 = vld [vmem:[%s11503_s6 + $0x68] sm:$0xff] }
 0x64b   : > { %v7214_v34 = vpop.f32.mrf.mxu2  ;;  %v7220_v62 = vadd.f32 %v7191_v60, %v7153_v16 }
 0x64c   : > { %v7221_v43 = vadd.f32 %v7214_v34, %v7154_v6  ;;  %7511 = vmatpush.msra.mxu0 %v7498_v36  ;;  %v7494_v34 = vld [vmem:[%s11503_s6 + $0x50] sm:$0xff] }
 0x64e   : > { %7512 = vmatpush.msra.mxu0 %v7497_v31 }
 0x650   : > { %v7127_v0 = vpop.f32.mrf.mxu3  ;;  %v7194_v23 = vpop.f32.mrf.mxu0 }
 0x651   : > { %v7281_v4 = vpop.f32.mrf.mxu1  ;;  %v7155_v29 = vadd.f32 %v7127_v0, %v7088_v3  ;;  %v7490_v0 = vld [vmem:[%s11503_s6 + $0x30] sm:$0xff] }
 0x652   : > { %v7288_v9 = vadd.f32 %v7281_v4, %v7221_v43 }
 0x653   : > { %v7217_v2 = vpop.f32.mrf.mxu2  ;;  %v7222_v55 = vadd.f32 %v7194_v23, %v7155_v29  ;;  %v7485_v23 = vld [vmem:[%s11503_s6 + $0x8] sm:$0xff] }
 0x654   : > { %v7223_v40 = vadd.f32 %v7217_v2, %v7156_v47  ;;  %v7496_v47 = vld [vmem:[%s11503_s6 + $0x60] sm:$0xff] }
 0x655   : > { %7513 = vmatpush.msra.mxu0 %v7496_v47  ;;  %v7711_v47 = vld [vmem:[%s11504_s7 + $0x78] sm:$0xff] }
 0x656   : > { %7758 = vmatpush.msrb.mxu2 %v7711_v47  ;;  %v7728_v47 = vld [vmem:[%s11504_s7 + $0x100] sm:$0xff] }
 0x657   : > { %7514 = vmatpush.msra.mxu0 %v7495_v13  ;;  %v7727_v13 = vld [vmem:[%s11504_s7 + $0xf8] sm:$0xff] }
 0x658   : > { %v7258_v41 = vpop.f32.mrf.mxu3  ;;  %v7325_v7 = vpop.f32.mrf.mxu0  ;;  %7778 = vmatpush.msrb.mxu3 %v7727_v13  ;;  %v7745_v13 = vld [vmem:[%s11504_s7 + $0x188] sm:$0xff] }
 0x659   : > { %v7284_v46 = vpop.f32.mrf.mxu1  ;;  %v7287_v33 = vadd.f32 %v7258_v41, %v7220_v62  ;;  %7515 = vmatpush.msra.mxu0 %v7494_v34  ;;  %v7484_v41 = vld [vmem:[%s11503_s6] sm:$0xff]  ;;  %v7743_v34 = vld [vmem:[%s11504_s7 + $0x178] sm:$0xff] }
 0x65a   : > { %v11084_v8 = vadd.f32 %v7284_v46, %v7223_v40  ;;  %7798 = vmatpush.msrb.mxu1 %v7743_v34  ;;  %v7744_v34 = vld [vmem:[%s11504_s7 + $0x180] sm:$0xff] }
 0x65b   : > { %v7348_v61 = vpop.f32.mrf.mxu2  ;;  %v7354_v24 = vadd.f32 %v7325_v7, %v7287_v33  ;;  %7516 = vmatpush.msra.mxu0 %v7493_v56 }
 0x65c   : > { %v7355_v45 = vadd.f32 %v7348_v61, %v7288_v9  ;;  %v7533_v9 = vlaneseq }
 0x65d   : > { %7517 = vmatpush.msra.mxu0 %v7492_v35  ;;  %v7710_v35 = vld [vmem:[%s11504_s7 + $0x70] sm:$0xff] }
 0x65e   : > { %vm7535_vm2 = vcmp.lt.s32.totalorder %v7533_v9, 25  ;;  %vm7555_vm11 = vcmp.ge.s32.totalorder %v7533_v9, 50  ;;  %vm7556_vm12 = vcmp.lt.s32.totalorder %v7533_v9, 75  ;;  %vm7565_vm8 = vcmp.ge.s32.totalorder %v7533_v9, 75  ;;  %7759 = vmatpush.msrb.mxu2 %v7710_v35 }
 0x65f   : > { %7518 = vmatpush.msra.mxu0 %v7491_v39  ;;  %vm7557_vm7 = vmand %vm7555_vm11, %vm7556_vm12  ;;  %vm7566_vm6 = vcmp.lt.s32.totalorder %v7533_v9, 100  ;;  %vm7575_vm15 = vcmp.ge.s32.totalorder %v7533_v9, 100  ;;  %vm7576_vm0 = vcmp.lt.s32.totalorder %v7533_v9, 125  ;;  %vm7587_vm1 = vcmp.ge.s32.totalorder %v7533_v9, 125  ;;  %v7709_v39 = vld [vmem:[%s11504_s7 + $0x68] sm:$0xff] }
 0x660   : > { %v7261_v44 = vpop.f32.mrf.mxu3  ;;  %v7328_v10 = vpop.f32.mrf.mxu0  ;;  %vm7567_vm14 = vmand %vm7565_vm8, %vm7566_vm6  ;;  %vm7607_vm11 = vcmp.ge.s32.totalorder %v7533_v9, 47  ;;  %vm7608_vm12 = vcmp.lt.s32.totalorder %v7533_v9, 72  ;;  %vm7616_vm8 = vcmp.lt.s32.totalorder %v7533_v9, 97  ;;  %7760 = vmatpush.msrb.mxu2 %v7709_v39  ;;  %v7851_v39 = vld [vmem:[%s11506_s9 + $0x60] sm:$0xff] }
 0x661   : > { %v7414_v50 = vpop.f32.mrf.mxu1  ;;  %v7289_v28 = vadd.f32 %v7261_v44, %v7222_v55  ;;  %7519 = vmatpush.msra.mxu0 %v7490_v0  ;;  %vm7577_vm9 = vmand %vm7575_vm15, %vm7576_vm0  ;;  %vm7626_vm0 = vcmp.lt.s32.totalorder %v7533_v9, 122  ;;  %v7725_v0 = vld [vmem:[%s11504_s7 + $0xe8] sm:$0xff] }
 0x662   : > { %v7421_v57 = vadd.f32 %v7414_v50, %v7355_v45 }
 0x663   : > { %v7356_v27 = vadd.f32 %v7328_v10, %v7289_v28  ;;  %v7351_v15 = vpop.f32.mrf.mxu2  ;;  %7520 = vmatpush.msra.mxu0 %v7489_v54  ;;  %v7706_v54 = vld [vmem:[%s11504_s7 + $0x50] sm:$0xff] }
 0x664   : > { %v7437_v12 = vadd.f32 %v7429_v22, %v7421_v57  ;;  %v7357_v4 = vadd.f32 %v7351_v15, %v11084_v8  ;;  %v7741_v15 = vld [vmem:[%s11504_s7 + $0x168] sm:$0xff] }
 0x665   : > { %7521 = vmatpush.msra.mxu0 %v7488_v17  ;;  %v7722_v17 = vld [vmem:[%s11504_s7 + $0xd0] sm:$0xff] }
 0x666   : > { %v7441_v42 = vmax.f32 %v7437_v12, 0.0 }
 0x667   : > { %7522 = vmatpush.msra.mxu0 %v7487_v58 }
 0x668   : > { %7450 = vrot.lane.b32.xlu1 %v7441_v42, %s8860_s22  ;;  %v7391_v53 = vpop.f32.mrf.mxu3 }
 0x669   : > { %v7420_v51 = vadd.f32 %v7391_v53, %v7354_v24  ;;  %v7417_v20 = vpop.f32.mrf.mxu1  ;;  %7523 = vmatpush.msra.mxu0 %v7486_v25  ;;  %v7738_v25 = vld [vmem:[%s11504_s7 + $0x150] sm:$0xff] }
 0x66a   : > { %v7423_v2 = vadd.f32 %v7417_v20, %v7357_v4  ;;  %v7708_v20 = vld [vmem:[%s11504_s7 + $0x60] sm:$0xff] }
 0x66b   : > { %v7436_v1 = vadd.f32 %v7429_v22, %v7420_v51  ;;  %7524 = vmatpush.msra.mxu0 %v7485_v23  ;;  %v7724_v4 = vld [vmem:[%s11504_s7 + $0xe0] sm:$0xff]  ;;  %7761 = vmatpush.msrb.mxu2 %v7708_v20 }
 0x66c   : > { %v7439_v40 = vadd.f32 %v7434_v19, %v7423_v2  ;;  %v7723_v2 = vld [vmem:[%s11504_s7 + $0xd8] sm:$0xff] }
 0x66d   : > { %v7440_v11 = vmax.f32 %v7436_v1, 0.0  ;;  %7525 = vmatpush.msra.mxu0 %v7484_v41  ;;  %v7705_v41 = vld [vmem:[%s11504_s7 + $0x48] sm:$0xff] }
 0x66e   : > { %v7443_v14 = vmax.f32 %v7439_v40, 0.0 }
 0x66f   : > { %7448 = vrot.lane.b32.xlu0 %v7440_v11, %s8860_s22 }
 0x670   : > { %v7394_v52 = vpop.f32.mrf.mxu3 }
 0x671   : > { %v7422_v26 = vadd.f32 %v7394_v52, %v7356_v27 }
 0x673   : > { %v7438_v49 = vadd.f32 %v7434_v19, %v7422_v26 }
 0x675   : > { %v7442_v32 = vmax.f32 %v7438_v49, 0.0 }
 0x677   : > { %7452 = vrot.lane.b32.xlu2 %v7442_v32, %s8860_s22 }
 0x6d1   : > { %v7453_v48 = vpop.permute.xlu2 %7452 }
 0x6da   : > { %v7451_v60 = vpop.permute.xlu1 %7450 }
 0x6db   : > { %v7463_v30 = vmax.f32 %v7441_v42, %v7451_v60 }
 0x6dd   : > { %7472 = vrot.lane.b32.xlu1 %v7463_v30, %s8882_s20  ;;  %v7742_v30 = vld [vmem:[%s11504_s7 + $0x170] sm:$0xff] }
 0x6de   : > { %7799 = vmatpush.msrb.mxu1 %v7742_v30  ;;  %v7852_v30 = vld [vmem:[%s11506_s9 + $0x68] sm:$0xff] }
 0x6e0   : > { %7800 = vmatpush.msrb.mxu1 %v7741_v15  ;;  %v7849_v15 = vld [vmem:[%s11506_s9 + $0x50] sm:$0xff] }
 0x6e1   : > { %v7449_v21 = vpop.permute.xlu0 %7448 }
 0x6e2   : > { %v7456_v18 = vsel %vm485_vm3, %v7449_v21, %v7451_v60  ;;  %v7726_v60 = vld [vmem:[%s11504_s7 + $0xf0] sm:$0xff]  ;;  %v7740_v21 = vld [vmem:[%s11504_s7 + $0x160] sm:$0xff] }
 0x6e3   : > { %v7462_v59 = vmax.f32 %v7440_v11, %v7456_v18  ;;  %7779 = vmatpush.msrb.mxu3 %v7726_v60  ;;  %v7707_v18 = vld [vmem:[%s11504_s7 + $0x58] sm:$0xff]  ;;  %7801 = vmatpush.msrb.mxu1 %v7740_v21  ;;  %v7853_v60 = vld [vmem:[%s11506_s9 + $0x70] sm:$0xff] }
 0x6e4   : > { %7762 = vmatpush.msrb.mxu2 %v7707_v18  ;;  %7860 = vmatpush.msrb.mxu0 %v7853_v60 }
 0x6e5   : > { %7470 = vrot.lane.b32.xlu0 %v7462_v59, %s8882_s20  ;;  %7780 = vmatpush.msrb.mxu3 %v7725_v0  ;;  %v7850_v0 = vld [vmem:[%s11506_s9 + $0x58] sm:$0xff] }
 0x6e6   : > { %7763 = vmatpush.msrb.mxu2 %v7706_v54  ;;  %7861 = vmatpush.msrb.mxu0 %v7852_v30  ;;  %v7847_v54 = vld [vmem:[%s11506_s9 + $0x40] sm:$0xff] }
 0x6e7   : > { %7781 = vmatpush.msrb.mxu3 %v7724_v4 }
 0x6e8   : > { %7764 = vmatpush.msrb.mxu2 %v7705_v41  ;;  %7862 = vmatpush.msrb.mxu0 %v7851_v39  ;;  %v7842_v41 = vld [vmem:[%s11506_s9 + $0x18] sm:$0xff] }
 0x6e9   : > { %7782 = vmatpush.msrb.mxu3 %v7723_v2 }
 0x6ea   : > { %7863 = vmatpush.msrb.mxu0 %v7850_v0 }
 0x6eb   : > { %7783 = vmatpush.msrb.mxu3 %v7722_v17  ;;  %v7846_v17 = vld [vmem:[%s11506_s9 + $0x38] sm:$0xff] }
 0x6ec   : > { %7864 = vmatpush.msrb.mxu0 %v7849_v15 }
 0x6ed   : > { %7454 = vrot.lane.b32.xlu0 %v7443_v14, %s8860_s22  ;;  %s8908_s22 = smov 119  }
 0x74f   : > { %v7473_v5 = vpop.permute.xlu1 %7472 }
 0x757   : > { %v7471_v46 = vpop.permute.xlu0 %7470 }
 0x758   : > { %v7478_v6 = vsel %vm6093_vm4, %v7471_v46, %v7473_v5  ;;  %v7721_v5 = vld [vmem:[%s11504_s7 + $0xc8] sm:$0xff] }
 0x759   : > { %v7482_v8 = vmax.f32 %v7462_v59, %v7478_v6  ;;  %v7737_v46 = vld [vmem:[%s11504_s7 + $0x148] sm:$0xff]  ;;  %7784 = vmatpush.msrb.mxu3 %v7721_v5  ;;  %v7841_v5 = vld [vmem:[%s11506_s9 + $0x10] sm:$0xff] }
 0x75b   : > { %8583 = vmatmul.msk.f32.vlgmr.msra.gmra.mxu0 %vm1017_vm5, %v7482_v8  ;;  %v7890_v8 = vld [vmem:[%s11508_s11 + $0x50] sm:$0xf] }
 0x75f   : > { %v7455_v43 = vpop.permute.xlu0 %7454 }
 0x760   : > { %v7457_v63 = vsel %vm485_vm3, %v7453_v48, %v7455_v43  ;;  %v7465_v16 = vmax.f32 %v7443_v14, %v7455_v43  ;;  %vm7545_vm3 = vcmp.ge.s32.totalorder %v7533_v9, 25  ;;  %v7739_v14 = vld [vmem:[%s11504_s7 + $0x158] sm:$0xff]  ;;  %v7704_v43 = vld [vmem:[%s11504_s7 + $0x40] sm:$0xff]  ;;  %v7889_v48 = vld [vmem:[%s11508_s11 + $0x48] sm:$0xff] }
 0x761   : > { %v7464_v61 = vmax.f32 %v7442_v32, %v7457_v63  ;;  %7802 = vmatpush.msrb.mxu1 %v7739_v14  ;;  %v7720_v63 = vld [vmem:[%s11504_s7 + $0xc0] sm:$0xff]  ;;  %7765 = vmatpush.msrb.mxu2 %v7704_v43 }
 0x762   : > { %7476 = vrot.lane.b32.xlu2 %v7465_v16, %s8882_s20  ;;  %7785 = vmatpush.msrb.mxu3 %v7720_v63  ;;  %v7888_v43 = vld [vmem:[%s11508_s11 + $0x40] sm:$0xff]  ;;  %v7887_v63 = vld [vmem:[%s11508_s11 + $0x38] sm:$0xff]  ;;  %v7886_v16 = vld [vmem:[%s11508_s11 + $0x30] sm:$0xff] }
 0x763   : > { %7474 = vrot.lane.b32.xlu1 %v7464_v61, %s8882_s20  ;;  %s8901_s20 = smov 50   ;;  %7803 = vmatpush.msrb.mxu1 %v7738_v25  ;;  %v7844_v25 = vld [vmem:[%s11506_s9 + $0x28] sm:$0xff] }
 0x765   : > { %7804 = vmatpush.msrb.mxu1 %v7737_v46  ;;  %v7840_v46 = vld [vmem:[%s11506_s9 + $0x8] sm:$0xff] }
 0x7bc   : > { %v7477_v38 = vpop.permute.xlu2 %7476 }
 0x7d5   : > { %v7475_v45 = vpop.permute.xlu1 %7474 }
 0x7d6   : > { %v7479_v44 = vsel %vm6093_vm4, %v7475_v45, %v7477_v38  ;;  %vm7546_vm4 = vcmp.lt.s32.totalorder %v7533_v9, 50  ;;  %v7736_v38 = vld [vmem:[%s11504_s7 + $0x140] sm:$0xff]  ;;  %v7703_v45 = vld [vmem:[%s11504_s7 + $0x38] sm:$0xff] }
 0x7d7   : > { %v7483_v62 = vmax.f32 %v7464_v61, %v7479_v44  ;;  %vm7547_vm10 = vmand %vm7545_vm3, %vm7546_vm4  ;;  %vm7597_vm4 = vcmp.ge.s32.totalorder %v7533_v9, 22  ;;  %v7719_v44 = vld [vmem:[%s11504_s7 + $0xb8] sm:$0xff]  ;;  %7805 = vmatpush.msrb.mxu1 %v7736_v38  ;;  %7766 = vmatpush.msrb.mxu2 %v7703_v45  ;;  %v7885_v61 = vld [vmem:[%s11508_s11 + $0x28] sm:$0xff] }
 0x7d8   : > { %v7527_v50 = vpop.f32.mrf.mxu0  ;;  %7786 = vmatpush.msrb.mxu3 %v7719_v44  ;;  %v7884_v38 = vld [vmem:[%s11508_s11 + $0x20] sm:$0xff]  ;;  %v7883_v45 = vld [vmem:[%s11508_s11 + $0x18] sm:$0xff] }
 0x7d9   : > { %7539 = vst [vmem:[#allocation1] sm:$0xff] %v7527_v50  ;;  %8584 = vmatmul.msk.f32.gmra.mxu0 %vm1017_vm5, %v7483_v62  ;;  %v7735_v62 = vld [vmem:[%s11504_s7 + $0x138] sm:$0xff]  ;;  %v7746_v44 = vld [vmem:[%s11505_s8] sm:$0x1] }
 0x7da   : > { %7537 = vst.msk [vmem:[#allocation3] sm:$0x1] %vm7535_vm2, %v7527_v50  ;;  %vm7588_vm2 = vcmp.lt.s32.totalorder %v7533_v9, 150  ;;  %7806 = vmatpush.msrb.mxu1 %v7735_v62 }
 0x7db   : > { %vm7589_vm3 = vmand %vm7587_vm1, %vm7588_vm2  ;;  %vm11218_vm1 = vcmp.ge.s32.totalorder %v7533_v9, 122  ;;  %vm11223_vm2 = vcmp.lt.s32.totalorder %v7533_v9, 147 }
 0x7e0   : > { %v7541_v22 = vld [vmem:[#allocation1 + $0x1] ss:$9 sm:$0xff] }
 0x7e1   : > { %7549 = vst [vmem:[#allocation1] sm:$0xff] %v7527_v50  ;;  %7542 = vrot.lane.b32.xlu0 %v7541_v22, %s8900_s18 }
 0x7e8   : > { %v7551_v7 = vld [vmem:[#allocation1 + $0x2] ss:$9 sm:$0xff] }
 0x7e9   : > { %7559 = vst [vmem:[#allocation1] sm:$0xff] %v7527_v50  ;;  %7552 = vrot.lane.b32.xlu1 %v7551_v7, %s8901_s20  ;;  %v7702_v7 = vld [vmem:[%s11504_s7 + $0x30] sm:$0xff] }
 0x7ea   : > { %7767 = vmatpush.msrb.mxu2 %v7702_v7 }
 0x7f0   : > { %v7561_v57 = vld [vmem:[#allocation1 + $0x3] ss:$9 sm:$0xff] }
 0x7f1   : > { %7569 = vst [vmem:[#allocation1] sm:$0xff] %v7527_v50  ;;  %7562 = vrot.lane.b32.xlu0 %v7561_v57, %s8902_s19  ;;  %v7718_v57 = vld [vmem:[%s11504_s7 + $0xb0] sm:$0xff] }
 0x7f2   : > { %7787 = vmatpush.msrb.mxu3 %v7718_v57 }
 0x7f8   : > { %v7571_v3 = vld [vmem:[#allocation1 + $0x4] ss:$9 sm:$0xff] }
 0x7f9   : > { %7579 = vst [vmem:[#allocation1] sm:$0xff] %v7527_v50  ;;  %7572 = vrot.lane.b32.xlu1 %v7571_v3, %s8885_s26  ;;  %s11690_s26 = smov 97   ;;  %v7734_v3 = vld [vmem:[%s11504_s7 + $0x130] sm:$0xff] }
 0x7fa   : > { %7807 = vmatpush.msrb.mxu1 %v7734_v3 }
 0x800   : > { %v7581_v33 = vld [vmem:[#allocation1 + $0x5] ss:$9 sm:$0xff] }
 0x801   : > { %7591 = vst [vmem:[#allocation1] sm:$0xff] %v7527_v50 }
 0x808   : > { %v7593_v12 = vld [vmem:[#allocation1 + $0x6] ss:$9 sm:$0xff] }
 0x809   : > { %7601 = vst [vmem:[#allocation1] sm:$0xff] %v7527_v50 }
 0x810   : > { %v7603_v29 = vld [vmem:[#allocation1 + $0x7] ss:$9 sm:$0xff] }
 0x811   : > { %7604 = vrot.lane.b32.xlu0 %v7603_v29, %s8903_s28  ;;  %v7733_v29 = vld [vmem:[%s11504_s7 + $0x128] sm:$0xff] }
 0x812   : > { %7808 = vmatpush.msrb.mxu1 %v7733_v29 }
 0x853   : > { %v7543_v42 = vpop.permute.xlu0 %7542 }
 0x854   : > { %7548 = vst.msk [vmem:[#allocation3] sm:$0x1] %vm7547_vm10, %v7543_v42  ;;  %vm7598_vm10 = vcmp.lt.s32.totalorder %v7533_v9, 47  ;;  %v7700_v42 = vld [vmem:[%s11504_s7 + $0x20] sm:$0xff] }
 0x855   : > { %vm7599_vm6 = vmand %vm7597_vm4, %vm7598_vm10  ;;  %vm11253_vm10 = vcmp.ge.s32.totalorder %v7533_v9, 19 }
 0x856   : > { %v7530_v24 = vpop.f32.mrf.mxu0  ;;  %vm7640_vm4 = vmand %vm11218_vm1, %vm11223_vm2  ;;  %vm7691_vm2 = vcmp.ge.s32.totalorder %v7533_v9, 119 }
 0x857   : > { %7619 = vst [vmem:[#allocation1] sm:$0xff] %v7530_v24  ;;  %7612 = vrot.lane.b32.xlu2 %v7530_v24, %s8894_s27  ;;  %s8904_s27 = smov 22  }
 0x85b   : > { %v7553_v53 = vpop.permute.xlu1 %7552 }
 0x85c   : > { %7558 = vst.msk [vmem:[#allocation3] sm:$0x1] %vm7557_vm7, %v7553_v53  ;;  %vm7615_vm7 = vcmp.ge.s32.totalorder %v7533_v9, 72  ;;  %v7732_v53 = vld [vmem:[%s11504_s7 + $0x120] sm:$0xff] }
 0x85d   : > { %vm7617_vm15 = vmand %vm7615_vm7, %vm7616_vm8  ;;  %vm11274_vm7 = vcmp.lt.s32.totalorder %v7533_v9, 69  ;;  %7809 = vmatpush.msrb.mxu1 %v7732_v53  ;;  %v7880_v53 = vld [vmem:[%s11508_s11] sm:$0xff] }
 0x85e   : > { %v7621_v55 = vld [vmem:[#allocation1 + $0x1] ss:$9 sm:$0xff] }
 0x85f   : > { %7582 = vrot.lane.b32.xlu2 %v7581_v33, %s8862_s24  ;;  %7622 = vrot.lane.b32.xlu0 %v7621_v55, %s11690_s26  ;;  %7629 = vst [vmem:[#allocation1] sm:$0xff] %v7530_v24  ;;  %s8906_s24 = smov 19   ;;  %v7701_v33 = vld [vmem:[%s11504_s7 + $0x28] sm:$0xff]  ;;  %v7699_v55 = vld [vmem:[%s11504_s7 + $0x18] sm:$0xff] }
 0x860   : > { %7768 = vmatpush.msrb.mxu2 %v7701_v33 }
 0x862   : > { %7769 = vmatpush.msrb.mxu2 %v7700_v42  ;;  %v7882_v42 = vld [vmem:[%s11508_s11 + $0x10] sm:$0xff] }
 0x863   : > { %v7563_v51 = vpop.permute.xlu0 %7562 }
 0x864   : > { %7568 = vst.msk [vmem:[#allocation3] sm:$0x1] %vm7567_vm14, %v7563_v51  ;;  %vm7609_vm14 = vmand %vm7607_vm11, %vm7608_vm12  ;;  %vm11258_vm11 = vcmp.lt.s32.totalorder %v7533_v9, 44  ;;  %vm11269_vm12 = vcmp.ge.s32.totalorder %v7533_v9, 44  ;;  %v7715_v51 = vld [vmem:[%s11504_s7 + $0x98] sm:$0xff]  ;;  %7770 = vmatpush.msrb.mxu2 %v7699_v55 }
 0x865   : > { %vm7650_vm8 = vmand %vm11253_vm10, %vm11258_vm11  ;;  %vm7755_vm11 = vcmask 130048   ;;  %v7854_v55 = vld [vmem:[%s11507_s10] sm:$0x1] }
 0x866   : > { %v7631_v28 = vld [vmem:[#allocation1 + $0x2] ss:$9 sm:$0xff] }
 0x867   : > { %7594 = vrot.lane.b32.xlu2 %v7593_v12, %s8904_s27  ;;  %7632 = vrot.lane.b32.xlu1 %v7631_v28, %s8905_s23  ;;  %7642 = vst [vmem:[#allocation1] sm:$0xff] %v7530_v24  ;;  %v7717_v12 = vld [vmem:[%s11504_s7 + $0xa8] sm:$0xff]  ;;  %v7731_v28 = vld [vmem:[%s11504_s7 + $0x118] sm:$0xff] }
 0x868   : > { %7788 = vmatpush.msrb.mxu3 %v7717_v12  ;;  %7810 = vmatpush.msrb.mxu1 %v7731_v28 }
 0x86b   : > { %v7573_v1 = vpop.permute.xlu1 %7572 }
 0x86c   : > { %7578 = vst.msk [vmem:[#allocation3] sm:$0x1] %vm7577_vm9, %v7573_v1  ;;  %v7698_v1 = vld [vmem:[%s11504_s7 + $0x10] sm:$0xff] }
 0x86d   : > { %7771 = vmatpush.msrb.mxu2 %v7698_v1 }
 0x86e   : > { %v7644_v10 = vld [vmem:[#allocation1 + $0x3] ss:$9 sm:$0xff] }
 0x86f   : > { %7645 = vrot.lane.b32.xlu1 %v7644_v10, %s8906_s24  ;;  %7652 = vst [vmem:[#allocation1] sm:$0xff] %v7530_v24  ;;  %v7714_v10 = vld [vmem:[%s11504_s7 + $0x90] sm:$0xff] }
 0x876   : > { %v7654_v11 = vld [vmem:[#allocation1 + $0x4] ss:$9 sm:$0xff] }
 0x877   : > { %7655 = vrot.lane.b32.xlu2 %v7654_v11, %s8907_s30  ;;  %7662 = vst [vmem:[#allocation1] sm:$0xff] %v7530_v24  ;;  %v7730_v11 = vld [vmem:[%s11504_s7 + $0x110] sm:$0xff] }
 0x878   : > { %7811 = vmatpush.msrb.mxu1 %v7730_v11 }
 0x87e   : > { %v7664_v27 = vld [vmem:[#allocation1 + $0x5] ss:$9 sm:$0xff] }
 0x87f   : > { %7665 = vrot.lane.b32.xlu1 %v7664_v27, %s11691_s17  ;;  %7672 = vst [vmem:[#allocation1] sm:$0xff] %v7530_v24  ;;  %v7697_v27 = vld [vmem:[%s11504_s7 + $0x8] sm:$0xff] }
 0x880   : > { %7772 = vmatpush.msrb.mxu2 %v7697_v27  ;;  %v7919_v27 = vld [vmem:[#allocation7] sm:$0x1] }
 0x883   : > { %v7605_v31 = vpop.permute.xlu0 %7604 }
 0x886   : > { %v7674_v52 = vld [vmem:[#allocation1 + $0x6] ss:$9 sm:$0xff] }
 0x887   : > { %7675 = vrot.lane.b32.xlu2 %v7674_v52, %s11692_s16  ;;  %7682 = vst [vmem:[#allocation1] sm:$0xff] %v7530_v24  ;;  %v7716_v24 = vld [vmem:[%s11504_s7 + $0xa0] sm:$0xff]  ;;  %v7713_v52 = vld [vmem:[%s11504_s7 + $0x88] sm:$0xff] }
 0x888   : > { %7789 = vmatpush.msrb.mxu3 %v7716_v24  ;;  %v7881_v24 = vld [vmem:[%s11508_s11 + $0x8] sm:$0xff] }
 0x88a   : > { %7790 = vmatpush.msrb.mxu3 %v7715_v51 }
 0x88c   : > { %7791 = vmatpush.msrb.mxu3 %v7714_v10  ;;  %v7891_v10 = vld [vmem:[%s11509_s12] sm:$0x1] }
 0x88e   : > { %v7684_v26 = vld [vmem:[#allocation1 + $0x7] ss:$9 sm:$0xff]  ;;  %7792 = vmatpush.msrb.mxu3 %v7713_v52 }
 0x88f   : > { %7685 = vrot.lane.b32.xlu0 %v7684_v26, %s8908_s22  ;;  %v7729_v26 = vld [vmem:[%s11504_s7 + $0x108] sm:$0xff] }
 0x890   : > { %7812 = vmatpush.msrb.mxu1 %v7729_v26 }
 0x892   : > { %7813 = vmatpush.msrb.mxu1 %v7728_v47 }
 0x8b1   : > { %v7613_v19 = vpop.permute.xlu2 %7612 }
 0x8b9   : > { %v7583_v49 = vpop.permute.xlu2 %7582 }
 0x8ba   : > { %v7584_v32 = vrot.slane %v7583_v49, 7 }
 0x8bc   : > { %v7585_v37 = vsel %vm1017_vm5, %v7584_v32, %v7583_v49  ;;  %vm7625_vm5 = vcmp.ge.s32.totalorder %v7533_v9, 97  ;;  %v7696_v32 = vld [vmem:[%s11504_s7] sm:$0xff] }
 0x8bd   : > { %7590 = vst.msk [vmem:[#allocation3] sm:$0x3] %vm7589_vm3, %v7585_v37  ;;  %vm7627_vm9 = vmand %vm7625_vm5, %vm7626_vm0  ;;  %vm7635_vm3 = vcmask 998400   ;;  %v7712_v37 = vld [vmem:[%s11504_s7 + $0x80] sm:$0xff]  ;;  %vm11369_vm5 = vcmp.ge.s32.totalorder %v7533_v9, 94  ;;  %vm11374_vm0 = vcmp.lt.s32.totalorder %v7533_v9, 119  ;;  %7773 = vmatpush.msrb.mxu2 %v7696_v32 }
 0x8be   : > { %7793 = vmatpush.msrb.mxu3 %v7712_v37  ;;  %vm7680_vm1 = vmand %vm11369_vm5, %vm11374_vm0 }
 0x8bf   : > { %7832 = vmatpush.msra.mxu2 %v7745_v13 }
 0x8c1   : > { %v7595_v36 = vpop.permute.xlu2 %7594  ;;  %7833 = vmatpush.msra.mxu2 %v7744_v34 }
 0x8c2   : > { %7600 = vst.msk [vmem:[#allocation3 + $0x1] sm:$0x1] %vm7599_vm6, %v7595_v36  ;;  %vm7660_vm6 = vmand %vm11269_vm12, %vm11274_vm7  ;;  %vm7895_vm12 = vcmask 1043456   ;;  %vm7855_vm7 = vcmask 982016  }
 0x8c3   : > { %7610 = vst.msk [vmem:[#allocation3 + $0x1] sm:$0x1] %vm7609_vm14, %v7605_v31  ;;  %vm11353_vm14 = vcmp.ge.s32.totalorder %v7533_v9, 69  ;;  %8587 = vmatpush.msk.msra.mxu3 %vm7895_vm12, %v7890_v8 }
 0x8c4   : > { %7618 = vst.msk [vmem:[#allocation3 + $0x1] sm:$0x1] %vm7617_vm15, %v7613_v19  ;;  %vm11358_vm15 = vcmp.lt.s32.totalorder %v7533_v9, 94 }
 0x8c5   : > { %7905 = vmatpush.msra.mxu3 %v7889_v48 }
 0x8c7   : > { %7906 = vmatpush.msra.mxu3 %v7888_v43 }
 0x8c9   : > { %7907 = vmatpush.msra.mxu3 %v7887_v63 }
 0x8cb   : > { %7908 = vmatpush.msra.mxu3 %v7886_v16 }
 0x8cd   : > { %7909 = vmatpush.msra.mxu3 %v7885_v61 }
 0x8cf   : > { %7910 = vmatpush.msra.mxu3 %v7884_v38 }
 0x8d1   : > { %v7623_v56 = vpop.permute.xlu0 %7622  ;;  %v7656_v22 = vpop.permute.xlu2 %7655  ;;  %7911 = vmatpush.msra.mxu3 %v7883_v45 }
 0x8d2   : > { %7628 = vst.msk [vmem:[#allocation3 + $0x1] sm:$0x1] %vm7627_vm9, %v7623_v56  ;;  %vm7670_vm9 = vmand %vm11353_vm14, %vm11358_vm15 }
 0x8d3   : > { %7912 = vmatpush.msra.mxu3 %v7882_v42 }
 0x8d5   : > { %7913 = vmatpush.msra.mxu3 %v7881_v24 }
 0x8d7   : > { %7914 = vmatpush.msra.mxu3 %v7880_v53 }
 0x8d9   : > { %v7633_v58 = vpop.permute.xlu1 %7632 }
 0x8da   : > { %v7634_v23 = vrot.slane %v7633_v58, 7 }
 0x8dc   : > { %v7636_v6 = vsel %vm7635_vm3, %v7634_v23, %v7633_v58  ;;  %vm7692_vm3 = vcmp.lt.s32.totalorder %v7533_v9, 144  ;;  %v7848_v9 = vld [vmem:[%s11506_s9 + $0x48] sm:$0xff]  ;;  %v7845_v58 = vld [vmem:[%s11506_s9 + $0x30] sm:$0xff]  ;;  %v7843_v23 = vld [vmem:[%s11506_s9 + $0x20] sm:$0xff] }
 0x8dd   : > { %7641 = vst.msk [vmem:[#allocation3 + $0x1] sm:$0x3] %vm7640_vm4, %v7636_v6  ;;  %vm7688_vm4 = vcmask 973824   ;;  %vm7693_vm10 = vmand %vm7691_vm2, %vm7692_vm3  ;;  %7865 = vmatpush.msrb.mxu0 %v7848_v9  ;;  %v7839_v6 = vld [vmem:[%s11506_s9] sm:$0xff] }
 0x8df   : > { %7866 = vmatpush.msrb.mxu0 %v7847_v54 }
 0x8e1   : > { %v7646_v50 = vpop.permute.xlu1 %7645  ;;  %v7676_v35 = vpop.permute.xlu2 %7675  ;;  %7867 = vmatpush.msrb.mxu0 %v7846_v17 }
 0x8e2   : > { %7651 = vst.msk [vmem:[#allocation3 + $0x2] sm:$0x1] %vm7650_vm8, %v7646_v50  ;;  %vm7921_vm8 = vcmask 122880  }
 0x8e3   : > { %7661 = vst.msk [vmem:[#allocation3 + $0x2] sm:$0x1] %vm7660_vm6, %v7656_v22  ;;  %7868 = vmatpush.msrb.mxu0 %v7845_v58 }
 0x8e5   : > { %7869 = vmatpush.msrb.mxu0 %v7844_v25 }
 0x8e7   : > { %7870 = vmatpush.msrb.mxu0 %v7843_v23 }
 0x8e9   : > { %7871 = vmatpush.msrb.mxu0 %v7842_v41 }
 0x8eb   : > { %7872 = vmatpush.msrb.mxu0 %v7841_v5 }
 0x8ed   : > { %7873 = vmatpush.msrb.mxu0 %v7840_v46 }
 0x8ef   : > { %7874 = vmatpush.msrb.mxu0 %v7839_v6 }
 0x8f1   : > { %v7666_v56 = vpop.permute.xlu1 %7665 }
 0x8f2   : > { %7671 = vst.msk [vmem:[#allocation3 + $0x2] sm:$0x1] %vm7670_vm9, %v7666_v56 }
 0x8f3   : > { %7681 = vst.msk [vmem:[#allocation3 + $0x2] sm:$0x1] %vm7680_vm1, %v7676_v35 }
 0x901   : > { %v7686_v20 = vpop.permute.xlu0 %7685 }
 0x902   : > { %v7687_v4 = vrot.slane %v7686_v20, 7 }
 0x904   : > { %v7689_v21 = vsel %vm7688_vm4, %v7687_v4, %v7686_v20 }
 0x905   : > { %7694 = vst.msk [vmem:[#allocation3 + $0x2] sm:$0x3] %vm7693_vm10, %v7689_v21 }
 0x90c   : > { %v7695_v18 = vld [vmem:[#allocation3] sm:$0xf] }
 0x90d   : > { %v7748_v2 = vperm.slane %v7695_v18, 0  ;;  %v7749_v59 = vperm.slane %v7695_v18, 1  ;;  %v7750_v40 = vperm.slane %v7695_v18, 2  ;;  %v7751_v14 = vperm.slane %v7695_v18, 3 }
 0x90f   : > { %7774 = vmatmul.f32.vlgmr.msrb.gmra.mxu2 %v7748_v2  ;;  %7794 = vmatmul.f32.vlgmr.msrb.gmra.mxu3 %v7749_v59 }
 0x910   : > { %7814 = vmatmul.f32.vlgmr.msrb.gmra.mxu1 %v7750_v40 }
 0x917   : > { %8585 = vmatmul.msk.f32.vlgmr.msra.gmra.mxu2 %vm7755_vm11, %v7751_v14 }
 0x98d   : > { %v7815_v57 = vpop.f32.mrf.mxu1 }
 0x992   : > { %v7775_v62 = vpop.f32.mrf.mxu2  ;;  %v7795_v22 = vpop.f32.mrf.mxu3 }
 0x993   : > { %v7776_v50 = vadd.f32 %v7775_v62, %v7746_v44 }
 0x995   : > { %v7796_v7 = vadd.f32 %v7795_v22, %v7776_v50 }
 0x997   : > { %v7816_v3 = vadd.f32 %v7815_v57, %v7796_v7 }
 0x99a   : > { %v7835_v33 = vpop.f32.mrf.mxu2 }
 0x99b   : > { %v7836_v12 = vadd.f32 %v7835_v33, %v7816_v3 }
 0x99d   : > { %v7838_v29 = vmax.f32 %v7836_v12, 0.0 }
 0x99f   : > { %8586 = vmatmul.msk.f32.vlgmr.msrb.gmra.mxu0 %vm7855_vm7, %v7838_v29 }
 0xa1c   : > { %v7876_v51 = vpop.f32.mrf.mxu0 }
 0xa1d   : > { %v7877_v28 = vadd.f32 %v7876_v51, %v7854_v55 }
 0xa1f   : > { %v7879_v1 = vmax.f32 %v7877_v28, 0.0 }
 0xa21   : > { %8588 = vmatmul.msk.f32.vlgmr.msra.gmra.mxu3 %vm6896_vm13, %v7879_v1 }
 0xaa4   : > { %v7916_v11 = vpop.f32.mrf.mxu3 }
 0xaa5   : > { %v7917_v52 = vadd.f32 %v7916_v11, %v7891_v10  ;;  %7926 = sbr.rel (%p8589_p8) target bundleno = 3032 (0xbd8), region = 84 }
 0xaa7   : > { %v7920_v26 = vadd.f32 %v7919_v27, %v7917_v52 }
 0xaa9   : > { %7922 = vst.msk [vmem:[#allocation7] sm:$0x1] %vm7921_vm8, %v7920_v26 }
 0xaaa   : > { %v8909_v19 = vmov 2.0   ;;  %v8910_v35 = vmov 16.0   ;;  %v8911_v40 = vmov 15.0  }
 0xaab   : > { %8772 = vrcp.f32 %v8909_v19 }
 0xaac   : > { %8774 = vrcp.f32 %v8910_v35 }
 0xaad   : > { %8776 = vrcp.f32 %v8911_v40 }
 0xab0   : > { %v7927_v31 = vld [vmem:[#allocation7] sm:$0x1] }
 0xab1   : > { %v8773_v49 = vpop.eup %8772 }
 0xab2   : > { %v7929_v32 = vmul.f32 2.0, %v8773_v49  ;;  %vm7933_vm13 = vweird.f32 %v8773_v49  ;;  %v8775_v60 = vpop.eup %8774 }
 0xab3   : > { %v7940_v30 = vmul.f32 16.0, %v8775_v60  ;;  %vm7944_vm6 = vweird.f32 %v8775_v60  ;;  %v8777_v14 = vpop.eup %8776 }
 0xab4   : > { %v7930_v37 = vsub.f32 1.0, %v7929_v32  ;;  %v7953_v9 = vmul.f32 15.0, %v8777_v14  ;;  %vm7957_vm14 = vweird.f32 %v8777_v14 }
 0xab5   : > { %v7941_v39 = vsub.f32 1.0, %v7940_v30 }
 0xab6   : > { %v7931_v36 = vmul.f32 %v8773_v49, %v7930_v37  ;;  %v7954_v54 = vsub.f32 1.0, %v7953_v9 }
 0xab7   : > { %v7942_v0 = vmul.f32 %v8775_v60, %v7941_v39 }
 0xab8   : > { %v7932_v47 = vadd.f32 %v8773_v49, %v7931_v36  ;;  %v7955_v17 = vmul.f32 %v8777_v14, %v7954_v54 }
 0xab9   : > { %v7943_v15 = vadd.f32 %v8775_v60, %v7942_v0 }
 0xaba   : > { %v7934_v13 = vsel %vm7933_vm13, %v8773_v49, %v7932_v47  ;;  %v7956_v58 = vadd.f32 %v8777_v14, %v7955_v17 }
 0xabb   : > { %v7935_v34 = vmul.f32 %v7934_v13, %v7927_v31  ;;  %v7945_v20 = vsel %vm7944_vm6, %v8775_v60, %v7943_v15 }
 0xabc   : > { %v7958_v25 = vsel %vm7957_vm14, %v8777_v14, %v7956_v58 }
 0xabd   : > { %v7936_v56 = vsel %vm7921_vm8, %v7935_v34, 0.0 }
 0xabe   : > { %7937 = vadd.xlane.f32.xlu0 %v7936_v56 }
 0xb31   : > { %v7938_v4 = vpop.xlane.xlu0 %7937 }
 0xb32   : > { %v7946_v21 = vmul.f32 %v7945_v20, %v7938_v4 }
 0xb34   : > { %v7947_v18 = vsub.f32 %v7935_v34, %v7946_v21 }
 0xb36   : > { %v7948_v2 = vmul.f32 %v7947_v18, %v7947_v18 }
 0xb38   : > { %v7949_v59 = vsel %vm7921_vm8, %v7948_v2, 0.0 }
 0xb39   : > { %7950 = vadd.xlane.f32.xlu0 %v7949_v59 }
 0xbac   : > { %v7951_v23 = vpop.xlane.xlu0 %7950 }
 0xbad   : > { %v7959_v41 = vmul.f32 %v7958_v25, %v7951_v23 }
 0xbaf   : > { %8778 = vrsqrt.f32 %v7959_v41  ;;  %vm7967_vm15 = vcmp.eq.f32.partialorder %v7959_v41, inf  ;;  %v7970_v16 = vand.u32 2147483648, %v7959_v41  ;;  %vm7969_vm5 = vcmp.eq.f32.partialorder %v7959_v41, 0.0 }
 0xbb5   : > { %v8779_v5 = vpop.eup %8778 }
 0xbb6   : > { %v7961_v46 = vmul.f32 %v8779_v5, %v7959_v41 }
 0xbb8   : > { %v7962_v6 = vmul.f32 %v8779_v5, %v7961_v46 }
 0xbba   : > { %v7963_v8 = vmul.f32 0.5, %v7962_v6 }
 0xbbc   : > { %v7964_v48 = vsub.f32 1.5, %v7963_v8 }
 0xbbe   : > { %v7965_v43 = vmul.f32 %v8779_v5, %v7964_v48 }
 0xbc0   : > { %v7966_v63 = vmul.f32 %v7965_v43, %v7959_v41 }
 0xbc2   : > { %v7968_v61 = vsel %vm7967_vm15, %v7959_v41, %v7966_v63 }
 0xbc3   : > { %v7971_v38 = vsel %vm7969_vm5, %v7970_v16, %v7968_v61 }
 0xbc4   : > { %8780 = vrcp.f32 %v7971_v38  ;;  %v7983_v50 = vand.u32 2147483648, %v7971_v38  ;;  %v7981_v7 = vand.u32 2147483647, %v7971_v38  ;;  %vm7977_vm9 = vweird.f32 %v7971_v38 }
 0xbc6   : > { %v7984_v3 = vor.u32 1.1754944e-38, %v7983_v50  ;;  %vm7982_vm2 = vcmp.eq.f32.partialorder %v7981_v7, 8.507059e+37 }
 0xbca   : > { %v8781_v45 = vpop.eup %8780 }
 0xbcb   : > { %v7973_v44 = vmul.f32 %v8781_v45, %v7971_v38  ;;  %vm7978_vm0 = vweird.f32 %v8781_v45 }
 0xbcc   : > { %vm7979_vm1 = vmor %vm7977_vm9, %vm7978_vm0 }
 0xbcd   : > { %v7974_v62 = vsub.f32 1.0, %v7973_v44 }
 0xbcf   : > { %v7975_v22 = vmul.f32 %v8781_v45, %v7974_v62 }
 0xbd1   : > { %v7976_v57 = vadd.f32 %v8781_v45, %v7975_v22 }
 0xbd3   : > { %v7980_v33 = vsel %vm7979_vm1, %v8781_v45, %v7976_v57 }
 0xbd4   : > { %v7985_v12 = vsel %vm7982_vm2, %v7984_v3, %v7980_v33 }
 0xbd5   : > { %v7986_v29 = vmul.f32 %v7985_v12, %v7947_v18 }
 0xbd7   : > { %7987 = vst.msk [vmem:[#allocation7] sm:$0x1] %vm7921_vm8, %v7986_v29 }
 0xbd8 PF: > { %p8609_p9 = scmp.eq.s32.totalorder %s8992_s29, 1  ;;  %s8912_s27 = smov [#allocation7]  }
 0xbd9   : > { %s7994_s23 = sshll.u32 %s8912_s27, 4  ;;  %s7996_s17 = sshll.u32 %s11510_s13, 4  ;;  %s7995_s23 = int_to_ptr.vmem [resolvable:$true] %s7994_s23  ;;  %s7997_s17 = int_to_ptr.hbm [resolvable:$true] %s7996_s17 }
 0xbda   : > { %8600 = dma.vmem_to_hbm [thread:$0]  (%p8609_p9), %s7995_s23, 16, %s7997_s17, [#allocation6]  }
 0xbdb   : > { %8849 = dma.done.wait (%p8609_p9), [#allocation6], 16  }
 0xbdc   : > { %8851 = vsyncadd (%p8609_p9), [#allocation6], 4294967280 }
 0xbdd PF: > { %s25_s25 = sadd.s32 1, %s8854_s25  }
 0xbde   : > { %p22_p10 = scmp.ge.s32.totalorder %s25_s25, 4  }
 0xbe0   :  { %24 = sbr.rel (!%p22_p10) target bundleno = 2 (0x2), region = 174 }
 0xbe5   :  { %8010 = vsyncpa [#allocation5], 1 }
 0xbe6   :  { %8012 = vsyncpa [#allocation5 + $0x1], 1 }
 0xbe7   :  { %8013 = vsyncpa [#allocation6], 1 }
 0xbe8   :  { %8015 = vsyncpa [#allocation6 + $0x1], 1 }

</bundles_post_ra>
